<compile_context>
chip_gen: v5e
topology: v5e:2x2
jax: 0.10.0
libtpu: 0.0.40
codegen_flags: <defaults>
</compile_context>

<pallas_src>
import jax
import jax.numpy as jnp
from jax import lax
from jax.experimental import pallas as pl
from jax.experimental.pallas import tpu as pltpu


# ----------------------------------------------------------------------------
# Pallas kernel
# ----------------------------------------------------------------------------
def lstm_classifier_kernel(
    x_ref,        # (T, bb, D)   catted embeddings, time-major
    len_ref,      # (bb, 1)      int32 sequence lengths (sublane-major batch)
    valid_ref,    # (1, T, bb)   f32 validity mask t < len (lane-major batch)
    wih0_ref,     # (D, 8H)      fused gate-interleaved input weights, layer 0
    b0_ref,       # (1, 8H)      fused bias, layer 0
    whh0_ref,     # (2H, 8H)     block-diag fused recurrent weights, layer 0
    wih1_ref,     # (2H, 8H)     fused input weights, layer 1
    b1_ref,       # (1, 8H)      fused bias, layer 1
    whh1_ref,     # (2H, 8H)     block-diag fused recurrent weights, layer 1
    fcw_ref,      # (1, 2H)      final Linear weight row (O == 1)
    fcb_ref,      # (1, 1)       final Linear bias
    out_ref,      # (1, T, bb)   sigmoid(fc(...)), lane-major batch
    pnat_ref,     # (T, bb, 8H)  scratch: natural-order projections
    p_ref,        # (T, bb, 8H)  scratch: direction-aligned projections
    ynat_ref,     # (T, bb, 2H)  scratch: natural-step-order layer outputs
):
    T, bb, D = x_ref.shape
    G = p_ref.shape[-1]                 # 8H (both directions, 4 gates each)
    H2 = ynat_ref.shape[-1]             # 2H
    H = H2 // 2

    # Lane-position constants (fwd lanes are the first H of every 2H chunk).
    lane_h2 = lax.broadcasted_iota(jnp.int32, (1, H2), 1)
    is_fwd_h2 = lane_h2 < H                                   # (1, 2H) bool
    lane_g = lax.broadcasted_iota(jnp.int32, (1, G), 1)
    is_fwd_g = (lane_g % H2) < H                              # (1, 8H) bool

    len_col = len_ref[...]                                    # (bb, 1) int32

    def project_and_align(x2d, w_ref, b_ref):
        """Whole-sequence input projection (one MXU matmul) + per-direction
        time alignment: p_ref[i] holds x[i]-proj on fwd lanes and x[T-1-i]-proj
        on bwd lanes.  Off the serial recurrence path."""
        p = jnp.dot(x2d, w_ref[...],
                    preferred_element_type=jnp.float32) + b_ref[...]
        pnat_ref[...] = p.reshape(T, bb, G)
        for t in range(T):
            p_ref[t] = jnp.where(is_fwd_g, pnat_ref[t], pnat_ref[T - 1 - t])

    def run_fused_layer(whh_ref):
        """One bidirectional layer: fwd step t=i and bwd step t=T-1-i share a
        single (bb,2H)x(2H,8H) MXU push per iteration (block-diagonal W_hh).
        h/c are loop-carried values; one full-lane store per step."""
        h = jnp.zeros((bb, H2), jnp.float32)
        c = jnp.zeros((bb, H2), jnp.float32)
        # T is static & small: full unroll gives the scheduler cross-iteration
        # visibility.  (Use lax.fori_loop(..., unroll=True) for large T.)
        for i in range(T):
            rev = T - 1 - i
            gates = p_ref[i] + jnp.dot(h, whh_ref[...],
                                       preferred_element_type=jnp.float32)
            # Interleaved gate layout [i_f i_b | f_f f_b | g_f g_b | o_f o_b]:
            # every slice is a lane-aligned full-2H chunk.
            i_g = jax.nn.sigmoid(gates[:, 0 * H2:1 * H2])
            f_g = jax.nn.sigmoid(gates[:, 1 * H2:2 * H2])
            g_g = jnp.tanh(gates[:, 2 * H2:3 * H2])
            o_g = jax.nn.sigmoid(gates[:, 3 * H2:4 * H2])
            c_new = f_g * c + i_g * g_g
            h_new = o_g * jnp.tanh(c_new)
            # pack_padded_sequence semantics: steps past lengths[b] never
            # update the state (fwd carries prev state; bwd stays at its zero
            # init until the sequence's own last valid element).
            thresh = jnp.where(is_fwd_h2, jnp.int32(i), jnp.int32(rev))
            m = len_col > thresh                              # (bb, 2H) bool
            h = jnp.where(m, h_new, h)
            c = jnp.where(m, c_new, c)
            # Full 128-lane unmasked store in natural step order; the bwd-half
            # time un-reverse happens once after the loop.
            ynat_ref[i] = h

    def read_aligned():
        """Time-align the staged outputs: y[t] = [fwd(t) | bwd(t)]."""
        return jnp.stack(
            [jnp.where(is_fwd_h2, ynat_ref[t], ynat_ref[T - 1 - t])
             for t in range(T)], axis=0)                      # (T, bb, 2H)

    # ---- layer 0 -------------------------------------------------------------
    project_and_align(x_ref[...].reshape(T * bb, D), wih0_ref, b0_ref)
    run_fused_layer(whh0_ref)

    # ---- layer 1 (inter-layer dropout is the eval-mode no-op) ----------------
    y0 = read_aligned()
    project_and_align(y0.reshape(T * bb, H2), wih1_ref, b1_ref)
    run_fused_layer(whh1_ref)

    # ---- pad_packed_sequence(padding_value=12) + Linear(2H->1) + sigmoid -----
    y1 = read_aligned()                                       # (T, bb, 2H)
    fcw = fcw_ref[...]                                        # (1, 2H)
    # O == 1: VPU multiply + lane reduction instead of an N=1 MXU matmul.
    live = jnp.sum(y1 * fcw.reshape(1, 1, H2), axis=-1) + fcb_ref[...]  # (T, bb)
    # Padded positions produce the constant fc(12 * ones) before sigmoid.
    pad = 12.0 * jnp.sum(fcw, axis=-1, keepdims=True) + fcb_ref[...]    # (1, 1)
    logits = jnp.where(valid_ref[0] > 0.0, live, pad)
    out_ref[0] = jax.nn.sigmoid(logits)


# ----------------------------------------------------------------------------
# Parameter construction (PyTorch layout) + fusion into kernel layout
# ----------------------------------------------------------------------------
def init_raw_params(key, input_size, hidden_size, output_size, vocab_size, emb_dim):
    """PyTorch-layout parameters (nn.LSTM / nn.Linear shapes + uniform init)."""
    H = hidden_size
    keys = iter(jax.random.split(key, 32))
    s = 1.0 / float(H) ** 0.5

    def u(shape):
        return jax.random.uniform(next(keys), shape, jnp.float32, -s, s)

    raw = {"hidden_size": H, "input_size": input_size, "output_size": output_size}
    raw["emb_table"] = 0.02 * jax.random.normal(
        next(keys), (vocab_size, emb_dim), jnp.float32)

    for layer, in_dim in ((0, input_size), (1, 2 * H)):
        for d in ("f", "b"):
            raw[f"w_ih{layer}{d}"] = u((4 * H, in_dim))   # gate rows [i, f, g, o]
            raw[f"w_hh{layer}{d}"] = u((4 * H, H))
            raw[f"b_ih{layer}{d}"] = u((4 * H,))
            raw[f"b_hh{layer}{d}"] = u((4 * H,))

    raw["fc_w"] = u((output_size, 2 * H))
    raw["fc_b"] = u((output_size,))
    return raw


def fuse_params(raw):
    """Convert PyTorch-layout weights into the fused, gate-interleaved kernel
    layout: columns [i_f i_b | f_f f_b | g_f g_b | o_f o_b], W_hh block-diag."""
    H = raw["hidden_size"]

    def interleave(wf, wb):
        blocks = []
        for q in range(4):                               # gates i, f, g, o
            blocks.append(wf[..., q * H:(q + 1) * H])
            blocks.append(wb[..., q * H:(q + 1) * H])
        return jnp.concatenate(blocks, axis=-1)

    fused = {}
    for layer in (0, 1):
        wihf = raw[f"w_ih{layer}f"].T                    # (in, 4H)
        wihb = raw[f"w_ih{layer}b"].T
        whhf = raw[f"w_hh{layer}f"].T                    # (H, 4H)
        whhb = raw[f"w_hh{layer}b"].T
        bf = (raw[f"b_ih{layer}f"] + raw[f"b_hh{layer}f"])[None, :]
        bbk = (raw[f"b_ih{layer}b"] + raw[f"b_hh{layer}b"])[None, :]
        fused[f"w_ih{layer}"] = interleave(wihf, wihb)                  # (in, 8H)
        fused[f"b{layer}"] = interleave(bf, bbk)                        # (1, 8H)
        top = interleave(whhf, jnp.zeros_like(whhb))                    # h_fwd rows
        bot = interleave(jnp.zeros_like(whhf), whhb)                    # h_bwd rows
        fused[f"w_hh{layer}"] = jnp.concatenate([top, bot], axis=0)     # (2H, 8H)

    assert raw["output_size"] == 1, "VPU-reduction fc path assumes output_size == 1"
    fused["fc_w"] = raw["fc_w"][0:1, :]                  # (1, 2H)
    fused["fc_b"] = raw["fc_b"].reshape(1, 1)            # (1, 1)
    return fused


# ----------------------------------------------------------------------------
# Glue: "CodeBERTa" replacement + host-side prep + pallas_call
# ----------------------------------------------------------------------------
def build_lstm_input(raw, position_features, origin_ids, modified_ids,
                     edit_seq_ids, pad_token_id):
    # TODO(synk): pretrained CodeBERTa (AutoModel.from_pretrained) has no clean
    # Pallas equivalent; its CLS embedding is replaced by a deterministic
    # embedding-table lookup + attention-masked mean pooling.
    catted_ids = jnp.concatenate([origin_ids, modified_ids, edit_seq_ids], axis=2)
    flat_ids = catted_ids.reshape(-1, catted_ids.shape[-1])            # (B*T, 3L)
    amask = (flat_ids != pad_token_id).astype(jnp.float32)
    tok_emb = raw["emb_table"][flat_ids]                               # (B*T, 3L, E)
    denom = jnp.maximum(amask.sum(axis=1, keepdims=True), 1.0)
    cls_emb = (tok_emb * amask[..., None]).sum(axis=1) / denom         # (B*T, E)
    cls_emb = cls_emb.reshape(catted_ids.shape[0], catted_ids.shape[1], -1)
    return jnp.concatenate([position_features, cls_emb], axis=2).astype(jnp.float32)


def _num_tensorcores():
    """2 only on v7x (2 TCs/chip); v5e/v6e (and unknown) -> 1 (serial grid)."""
    try:
        kind = jax.devices()[0].device_kind.lower()
    except Exception:
        return 1
    return 2 if ("v7" in kind or "7x" in kind) else 1


def _choose_batch_block(B, num_tc, cap=32):
    """bb = full batch on single-TC chips (no serial grid overhead, biggest
    MXU M); split over TCs only when they exist; cap bb for vreg pressure."""
    if B % 8 != 0:
        return B, 1                      # full-dim block; sublanes padded internally
    bb = B
    if num_tc > 1 and B % (8 * num_tc) == 0:
        bb = B // num_tc
    while bb > cap and bb % 16 == 0:
        bb //= 2
    return bb, B // bb


def lstm_classifier_forward(raw, fused, position_features, origin_ids,
                            modified_ids, edit_seq_ids, lengths, pad_token_id,
                            num_tensorcores=None):
    B, T, _ = position_features.shape
    H = raw["hidden_size"]
    H2, G = 2 * H, 8 * H

    catted = build_lstm_input(raw, position_features, origin_ids, modified_ids,
                              edit_seq_ids, pad_token_id)              # (B, T, D)
    D = catted.shape[-1]
    catted_tm = jnp.transpose(catted, (1, 0, 2))                       # (T, B, D)

    if num_tensorcores is None:
        num_tensorcores = _num_tensorcores()
    bb, nblk = _choose_batch_block(B, num_tensorcores)

    lengths_i32 = lengths.astype(jnp.int32)
    lengths_col = lengths_i32.reshape(B, 1)                            # (B, 1)
    mask_bt = (jnp.arange(T)[None, :] < lengths_i32[:, None])          # (B, T)
    valid_lane = mask_bt.astype(jnp.float32).reshape(nblk, bb, T)
    valid_lane = jnp.transpose(valid_lane, (0, 2, 1))                  # (nblk, T, bb)

    out_blocks = pl.pallas_call(
        lstm_classifier_kernel,
        out_shape=jax.ShapeDtypeStruct((nblk, T, bb), jnp.float32),
        grid_spec=pltpu.PrefetchScalarGridSpec(
            num_scalar_prefetch=0,
            grid=(nblk,),
            in_specs=[
                pl.BlockSpec((T, bb, D), lambda b: (0, b, 0)),   # catted (time-major)
                pl.BlockSpec((bb, 1), lambda b: (b, 0)),         # lengths column
                pl.BlockSpec((1, T, bb), lambda b: (b, 0, 0)),   # valid mask
                pl.BlockSpec((D, G), lambda b: (0, 0)),          # w_ih0
                pl.BlockSpec((1, G), lambda b: (0, 0)),          # b0
                pl.BlockSpec((H2, G), lambda b: (0, 0)),         # w_hh0
                pl.BlockSpec((H2, G), lambda b: (0, 0)),         # w_ih1
                pl.BlockSpec((1, G), lambda b: (0, 0)),          # b1
                pl.BlockSpec((H2, G), lambda b: (0, 0)),         # w_hh1
                pl.BlockSpec((1, H2), lambda b: (0, 0)),         # fc_w
                pl.BlockSpec((1, 1), lambda b: (0, 0)),          # fc_b
            ],
            out_specs=pl.BlockSpec((1, T, bb), lambda b: (b, 0, 0)),
            scratch_shapes=[
                pltpu.VMEM((T, bb, G), jnp.float32),    # pnat (natural projections)
                pltpu.VMEM((T, bb, G), jnp.float32),    # p (aligned projections)
                pltpu.VMEM((T, bb, H2), jnp.float32),   # ynat (staged outputs)
            ],
        ),
        compiler_params=pltpu.CompilerParams(
            dimension_semantics=("parallel",)),         # v7x: split batch over 2 TCs
    )(catted_tm, lengths_col, valid_lane,
      fused["w_ih0"], fused["b0"], fused["w_hh0"],
      fused["w_ih1"], fused["b1"], fused["w_hh1"],
      fused["fc_w"], fused["fc_b"])

    # (nblk, T, bb) -> (B, T, 1), batch-first
    out = jnp.transpose(out_blocks, (0, 2, 1)).reshape(B, T, 1)
    return out


# ----------------------------------------------------------------------------
# Pure-JAX reference (PyTorch-layout weights, straightforward per-gate math)
# ----------------------------------------------------------------------------
def lstm_classifier_reference(raw, position_features, origin_ids, modified_ids,
                              edit_seq_ids, lengths, pad_token_id):
    H = raw["hidden_size"]
    catted = build_lstm_input(raw, position_features, origin_ids, modified_ids,
                              edit_seq_ids, pad_token_id)
    B, T, _ = catted.shape
    mask_bt = (jnp.arange(T)[None, :] < lengths[:, None]).astype(jnp.float32)

    def mm(a, b):
        return jnp.dot(a, b, precision=lax.Precision.HIGHEST)

    def run_dir(inp, wih, whh, bih, bhh, reverse):
        h = jnp.zeros((B, H), jnp.float32)
        c = jnp.zeros((B, H), jnp.float32)
        outs = [None] * T
        order = range(T - 1, -1, -1) if reverse else range(T)
        for t in order:
            gates = mm(inp[:, t], wih.T) + mm(h, whh.T) + bih + bhh
            i = jax.nn.sigmoid(gates[:, 0:H])
            f = jax.nn.sigmoid(gates[:, H:2 * H])
            g = jnp.tanh(gates[:, 2 * H:3 * H])
            o = jax.nn.sigmoid(gates[:, 3 * H:4 * H])
            c_new = f * c + i * g
            h_new = o * jnp.tanh(c_new)
            m = mask_bt[:, t][:, None]
            h = jnp.where(m > 0, h_new, h)
            c = jnp.where(m > 0, c_new, c)
            outs[t] = h
        return jnp.stack(outs, axis=1)                   # (B, T, H)

    def bilayer(inp, layer):
        yf = run_dir(inp, raw[f"w_ih{layer}f"], raw[f"w_hh{layer}f"],
                     raw[f"b_ih{layer}f"], raw[f"b_hh{layer}f"], False)
        yb = run_dir(inp, raw[f"w_ih{layer}b"], raw[f"w_hh{layer}b"],
                     raw[f"b_ih{layer}b"], raw[f"b_hh{layer}b"], True)
        return jnp.concatenate([yf, yb], axis=-1)

    y0 = bilayer(catted, 0)
    y1 = bilayer(y0, 1)
    lstm_out = jnp.where(mask_bt[:, :, None] > 0, y1, 12.0)   # pad_packed(12)
    logits = mm(lstm_out.reshape(B * T, 2 * H), raw["fc_w"].T) + raw["fc_b"]
    return jax.nn.sigmoid(logits).reshape(B, T, -1)


# ----------------------------------------------------------------------------
if __name__ == "__main__":
    B, T, L = 16, 8, 6         # batch, seq length, tokens per id-field
    P = 4                      # position-feature dim
    E = 28                     # stand-in "BERT" CLS embedding dim
    input_size = P + E         # 32
    hidden_size = 64           # 2H = 128 -> lane-aligned fused gate chunks
    output_size = 1
    vocab_size = 50
    pad_token_id = 1

    key = jax.random.PRNGKey(0)
    kp, k1, k2, k3, k4 = jax.random.split(key, 5)
    raw = init_raw_params(kp, input_size, hidden_size, output_size, vocab_size, E)
    fused = fuse_params(raw)

    position_features = jax.random.normal(k1, (B, T, P), jnp.float32)
    origin_ids = jax.random.randint(k2, (B, T, L), 0, vocab_size)
    modified_ids = jax.random.randint(k3, (B, T, L), 0, vocab_size)
    edit_seq_ids = jax.random.randint(k4, (B, T, L), 0, vocab_size)
    # descending lengths (enforce_sorted=True in the PyTorch module)
    lengths = jnp.array([8, 8, 8, 7, 7, 6, 6, 5, 5, 4, 4, 3, 3, 2, 2, 1],
                        dtype=jnp.int32)

    out = lstm_classifier_forward(raw, fused, position_features, origin_ids,
                                  modified_ids, edit_seq_ids, lengths,
                                  pad_token_id)
    out = jax.block_until_ready(out)

    ref = lstm_classifier_reference(raw, position_features, origin_ids,
                                    modified_ids, edit_seq_ids, lengths,
                                    pad_token_id)
    ref = jax.block_until_ready(ref)

    assert out.shape == (B, T, output_size)
    assert bool(jnp.all(jnp.isfinite(out)))
    max_err = float(jnp.max(jnp.abs(out - ref)))
    assert max_err < 2e-3, f"mismatch vs reference: {max_err}"
    print("KERNEL_OK")
</pallas_src>

<mosaic_0001>
module attributes {stable_mosaic.version = 11 : i64} {
  func.func @lstm_classifier_kernel(%arg0: i32, %arg1: memref<8x16x32xf32, #tpu.memory_space<vmem>>, %arg2: memref<16x1xi32, #tpu.memory_space<vmem>>, %arg3: memref<1x8x16xf32, #tpu.memory_space<vmem>>, %arg4: memref<32x512xf32, #tpu.memory_space<vmem>>, %arg5: memref<1x512xf32, #tpu.memory_space<vmem>>, %arg6: memref<128x512xf32, #tpu.memory_space<vmem>>, %arg7: memref<128x512xf32, #tpu.memory_space<vmem>>, %arg8: memref<1x512xf32, #tpu.memory_space<vmem>>, %arg9: memref<128x512xf32, #tpu.memory_space<vmem>>, %arg10: memref<1x128xf32, #tpu.memory_space<vmem>>, %arg11: memref<1x1xf32, #tpu.memory_space<vmem>>, %arg12: memref<1x8x16xf32, #tpu.memory_space<vmem>>, %arg13: memref<8x16x512xf32, #tpu.memory_space<vmem>>, %arg14: memref<8x16x512xf32, #tpu.memory_space<vmem>>, %arg15: memref<8x16x128xf32, #tpu.memory_space<vmem>>) attributes {dimension_semantics = [#tpu.dimension_semantics<parallel>], iteration_bounds = array<i64: 1>, scalar_prefetch = 0 : i64, scratch_operands = 3 : i64, tpu.core_type = #tpu.core_type<tc>, window_params = [{transform_indices = @transform_0, window_bounds = array<i64: 8, 16, 32>}, {transform_indices = @transform_1, window_bounds = array<i64: 16, 1>}, {transform_indices = @transform_2, window_bounds = array<i64: 1, 8, 16>}, {pipeline_mode = #tpu.pipeline_mode<synchronous>, transform_indices = @transform_3, window_bounds = array<i64: 32, 512>}, {pipeline_mode = #tpu.pipeline_mode<synchronous>, transform_indices = @transform_4, window_bounds = array<i64: 1, 512>}, {pipeline_mode = #tpu.pipeline_mode<synchronous>, transform_indices = @transform_5, window_bounds = array<i64: 128, 512>}, {pipeline_mode = #tpu.pipeline_mode<synchronous>, transform_indices = @transform_6, window_bounds = array<i64: 128, 512>}, {pipeline_mode = #tpu.pipeline_mode<synchronous>, transform_indices = @transform_7, window_bounds = array<i64: 1, 512>}, {pipeline_mode = #tpu.pipeline_mode<synchronous>, transform_indices = @transform_8, window_bounds = array<i64: 128, 512>}, {pipeline_mode = #tpu.pipeline_mode<synchronous>, transform_indices = @transform_9, window_bounds = array<i64: 1, 128>}, {pipeline_mode = #tpu.pipeline_mode<synchronous>, transform_indices = @transform_10, window_bounds = array<i64: 1, 1>}, {transform_indices = @transform_11, window_bounds = array<i64: 1, 8, 16>}]} {
    %0 = tpu.iota {dimensions = array<i32: 1>} : vector<1x128xi32>
    %c64_i32 = arith.constant 64 : i32
    %1 = vector.broadcast %c64_i32 : i32 to vector<1x128xi32>
    %2 = arith.cmpi slt, %0, %1 : vector<1x128xi32>
    %3 = tpu.iota {dimensions = array<i32: 1>} : vector<1x512xi32>
    %c128_i32 = arith.constant 128 : i32
    %c0_i32 = arith.constant 0 : i32
    %4 = arith.cmpi eq, %c128_i32, %c0_i32 : i32
    %c1_i32 = arith.constant 1 : i32
    %5 = arith.select %4, %c1_i32, %c128_i32 : i32
    %6 = vector.broadcast %5 : i32 to vector<1x512xi32>
    %7 = arith.remsi %3, %6 : vector<1x512xi32>
    %c0_i32_0 = arith.constant 0 : i32
    %8 = vector.broadcast %c0_i32_0 : i32 to vector<1x512xi32>
    %9 = arith.cmpi ne, %7, %8 : vector<1x512xi32>
    %c0_i32_1 = arith.constant 0 : i32
    %10 = vector.broadcast %c0_i32_1 : i32 to vector<1x512xi32>
    %11 = arith.cmpi slt, %7, %10 : vector<1x512xi32>
    %c0_i32_2 = arith.constant 0 : i32
    %12 = arith.cmpi slt, %5, %c0_i32_2 : i32
    %13 = vector.broadcast %12 : i1 to vector<1x512xi1>
    %14 = vector.broadcast %13 : vector<1x512xi1> to vector<1x512xi1>
    %15 = arith.xori %11, %14 : vector<1x512xi1>
    %16 = arith.andi %15, %9 : vector<1x512xi1>
    %17 = vector.broadcast %5 : i32 to vector<1x512xi32>
    %18 = arith.addi %7, %17 : vector<1x512xi32>
    %19 = arith.select %16, %18, %7 : vector<1x512xi1>, vector<1x512xi32>
    %c64_i32_3 = arith.constant 64 : i32
    %20 = vector.broadcast %c64_i32_3 : i32 to vector<1x512xi32>
    %21 = arith.cmpi slt, %19, %20 : vector<1x512xi32>
    %c0 = arith.constant 0 : index
    %c0_4 = arith.constant 0 : index
    %22 = vector.load %arg2[%c0, %c0_4] : memref<16x1xi32, #tpu.memory_space<vmem>>, vector<16x1xi32>
    %c0_5 = arith.constant 0 : index
    %c0_6 = arith.constant 0 : index
    %c0_7 = arith.constant 0 : index
    %23 = vector.load %arg1[%c0_5, %c0_6, %c0_7] : memref<8x16x32xf32, #tpu.memory_space<vmem>>, vector<8x16x32xf32>
    %24 = vector.shape_cast %23 : vector<8x16x32xf32> to vector<128x32xf32>
    %c0_8 = arith.constant 0 : index
    %c0_9 = arith.constant 0 : index
    %25 = vector.load %arg4[%c0_8, %c0_9] : memref<32x512xf32, #tpu.memory_space<vmem>>, vector<32x512xf32>
    %cst = arith.constant dense<0.000000e+00> : vector<128x512xf32>
    %26 = tpu.matmul %24, %25, %cst {dimension_numbers = #tpu.dot_dimension_numbers<[1], [0], [0], [1], [0, 0, 1, 1], [], []>} : vector<128x32xf32>, vector<32x512xf32>, vector<128x512xf32> -> vector<128x512xf32>
    %c0_10 = arith.constant 0 : index
    %c0_11 = arith.constant 0 : index
    %27 = vector.load %arg5[%c0_10, %c0_11] : memref<1x512xf32, #tpu.memory_space<vmem>>, vector<1x512xf32>
    %28 = vector.broadcast %27 : vector<1x512xf32> to vector<128x512xf32>
    %29 = arith.addf %26, %28 : vector<128x512xf32>
    %30 = vector.shape_cast %29 : vector<128x512xf32> to vector<8x16x512xf32>
    %c0_12 = arith.constant 0 : index
    %c0_13 = arith.constant 0 : index
    %c0_14 = arith.constant 0 : index
    %31 = vector.load %arg13[%c0_12, %c0_13, %c0_14] : memref<8x16x512xf32, #tpu.memory_space<vmem>>, vector<8x16x512xf32>
    tpu.vector_store %arg13[%c0_12, %c0_13, %c0_14], %30 {strides = array<i32>} : memref<8x16x512xf32, #tpu.memory_space<vmem>>, vector<8x16x512xf32>,
    %c0_15 = arith.constant 0 : index
    %c0_16 = arith.constant 0 : index
    %c0_17 = arith.constant 0 : index
    %32 = vector.load %arg13[%c0_15, %c0_16, %c0_17] : memref<8x16x512xf32, #tpu.memory_space<vmem>>, vector<1x16x512xf32>
    %33 = vector.shape_cast %32 : vector<1x16x512xf32> to vector<16x512xf32>
    %c7 = arith.constant 7 : index
    %c0_18 = arith.constant 0 : index
    %c0_19 = arith.constant 0 : index
    %34 = vector.load %arg13[%c7, %c0_18, %c0_19] : memref<8x16x512xf32, #tpu.memory_space<vmem>>, vector<1x16x512xf32>
    %35 = vector.shape_cast %34 : vector<1x16x512xf32> to vector<16x512xf32>
    %36 = vector.shape_cast %21 : vector<1x512xi1> to vector<1x512xi1>
    %37 = vector.broadcast %36 : vector<1x512xi1> to vector<16x512xi1>
    %38 = arith.select %37, %33, %35 : vector<16x512xi1>, vector<16x512xf32>
    %c0_20 = arith.constant 0 : index
    %c0_21 = arith.constant 0 : index
    %c0_22 = arith.constant 0 : index
    %39 = vector.load %arg14[%c0_20, %c0_21, %c0_22] : memref<8x16x512xf32, #tpu.memory_space<vmem>>, vector<1x16x512xf32>
    %40 = vector.shape_cast %39 : vector<1x16x512xf32> to vector<16x512xf32>
    %41 = vector.shape_cast %38 : vector<16x512xf32> to vector<1x16x512xf32>
    tpu.vector_store %arg14[%c0_20, %c0_21, %c0_22], %41 {strides = array<i32>} : memref<8x16x512xf32, #tpu.memory_space<vmem>>, vector<1x16x512xf32>,
    %c1 = arith.constant 1 : index
    %c0_23 = arith.constant 0 : index
    %c0_24 = arith.constant 0 : index
    %42 = vector.load %arg13[%c1, %c0_23, %c0_24] : memref<8x16x512xf32, #tpu.memory_space<vmem>>, vector<1x16x512xf32>
    %43 = vector.shape_cast %42 : vector<1x16x512xf32> to vector<16x512xf32>
    %c6 = arith.constant 6 : index
    %c0_25 = arith.constant 0 : index
    %c0_26 = arith.constant 0 : index
    %44 = vector.load %arg13[%c6, %c0_25, %c0_26] : memref<8x16x512xf32, #tpu.memory_space<vmem>>, vector<1x16x512xf32>
    %45 = vector.shape_cast %44 : vector<1x16x512xf32> to vector<16x512xf32>
    %46 = vector.shape_cast %21 : vector<1x512xi1> to vector<1x512xi1>
    %47 = vector.broadcast %46 : vector<1x512xi1> to vector<16x512xi1>
    %48 = arith.select %47, %43, %45 : vector<16x512xi1>, vector<16x512xf32>
    %c1_27 = arith.constant 1 : index
    %c0_28 = arith.constant 0 : index
    %c0_29 = arith.constant 0 : index
    %49 = vector.load %arg14[%c1_27, %c0_28, %c0_29] : memref<8x16x512xf32, #tpu.memory_space<vmem>>, vector<1x16x512xf32>
    %50 = vector.shape_cast %49 : vector<1x16x512xf32> to vector<16x512xf32>
    %51 = vector.shape_cast %48 : vector<16x512xf32> to vector<1x16x512xf32>
    tpu.vector_store %arg14[%c1_27, %c0_28, %c0_29], %51 {strides = array<i32>} : memref<8x16x512xf32, #tpu.memory_space<vmem>>, vector<1x16x512xf32>,
    %c2 = arith.constant 2 : index
    %c0_30 = arith.constant 0 : index
    %c0_31 = arith.constant 0 : index
    %52 = vector.load %arg13[%c2, %c0_30, %c0_31] : memref<8x16x512xf32, #tpu.memory_space<vmem>>, vector<1x16x512xf32>
    %53 = vector.shape_cast %52 : vector<1x16x512xf32> to vector<16x512xf32>
    %c5 = arith.constant 5 : index
    %c0_32 = arith.constant 0 : index
    %c0_33 = arith.constant 0 : index
    %54 = vector.load %arg13[%c5, %c0_32, %c0_33] : memref<8x16x512xf32, #tpu.memory_space<vmem>>, vector<1x16x512xf32>
    %55 = vector.shape_cast %54 : vector<1x16x512xf32> to vector<16x512xf32>
    %56 = vector.shape_cast %21 : vector<1x512xi1> to vector<1x512xi1>
    %57 = vector.broadcast %56 : vector<1x512xi1> to vector<16x512xi1>
    %58 = arith.select %57, %53, %55 : vector<16x512xi1>, vector<16x512xf32>
    %c2_34 = arith.constant 2 : index
    %c0_35 = arith.constant 0 : index
    %c0_36 = arith.constant 0 : index
    %59 = vector.load %arg14[%c2_34, %c0_35, %c0_36] : memref<8x16x512xf32, #tpu.memory_space<vmem>>, vector<1x16x512xf32>
    %60 = vector.shape_cast %59 : vector<1x16x512xf32> to vector<16x512xf32>
    %61 = vector.shape_cast %58 : vector<16x512xf32> to vector<1x16x512xf32>
    tpu.vector_store %arg14[%c2_34, %c0_35, %c0_36], %61 {strides = array<i32>} : memref<8x16x512xf32, #tpu.memory_space<vmem>>, vector<1x16x512xf32>,
    %c3 = arith.constant 3 : index
    %c0_37 = arith.constant 0 : index
    %c0_38 = arith.constant 0 : index
    %62 = vector.load %arg13[%c3, %c0_37, %c0_38] : memref<8x16x512xf32, #tpu.memory_space<vmem>>, vector<1x16x512xf32>
    %63 = vector.shape_cast %62 : vector<1x16x512xf32> to vector<16x512xf32>
    %c4 = arith.constant 4 : index
    %c0_39 = arith.constant 0 : index
    %c0_40 = arith.constant 0 : index
    %64 = vector.load %arg13[%c4, %c0_39, %c0_40] : memref<8x16x512xf32, #tpu.memory_space<vmem>>, vector<1x16x512xf32>
    %65 = vector.shape_cast %64 : vector<1x16x512xf32> to vector<16x512xf32>
    %66 = vector.shape_cast %21 : vector<1x512xi1> to vector<1x512xi1>
    %67 = vector.broadcast %66 : vector<1x512xi1> to vector<16x512xi1>
    %68 = arith.select %67, %63, %65 : vector<16x512xi1>, vector<16x512xf32>
    %c3_41 = arith.constant 3 : index
    %c0_42 = arith.constant 0 : index
    %c0_43 = arith.constant 0 : index
    %69 = vector.load %arg14[%c3_41, %c0_42, %c0_43] : memref<8x16x512xf32, #tpu.memory_space<vmem>>, vector<1x16x512xf32>
    %70 = vector.shape_cast %69 : vector<1x16x512xf32> to vector<16x512xf32>
    %71 = vector.shape_cast %68 : vector<16x512xf32> to vector<1x16x512xf32>
    tpu.vector_store %arg14[%c3_41, %c0_42, %c0_43], %71 {strides = array<i32>} : memref<8x16x512xf32, #tpu.memory_space<vmem>>, vector<1x16x512xf32>,
    %c4_44 = arith.constant 4 : index
    %c0_45 = arith.constant 0 : index
    %c0_46 = arith.constant 0 : index
    %72 = vector.load %arg13[%c4_44, %c0_45, %c0_46] : memref<8x16x512xf32, #tpu.memory_space<vmem>>, vector<1x16x512xf32>
    %73 = vector.shape_cast %72 : vector<1x16x512xf32> to vector<16x512xf32>
    %c3_47 = arith.constant 3 : index
    %c0_48 = arith.constant 0 : index
    %c0_49 = arith.constant 0 : index
    %74 = vector.load %arg13[%c3_47, %c0_48, %c0_49] : memref<8x16x512xf32, #tpu.memory_space<vmem>>, vector<1x16x512xf32>
    %75 = vector.shape_cast %74 : vector<1x16x512xf32> to vector<16x512xf32>
    %76 = vector.shape_cast %21 : vector<1x512xi1> to vector<1x512xi1>
    %77 = vector.broadcast %76 : vector<1x512xi1> to vector<16x512xi1>
    %78 = arith.select %77, %73, %75 : vector<16x512xi1>, vector<16x512xf32>
    %c4_50 = arith.constant 4 : index
    %c0_51 = arith.constant 0 : index
    %c0_52 = arith.constant 0 : index
    %79 = vector.load %arg14[%c4_50, %c0_51, %c0_52] : memref<8x16x512xf32, #tpu.memory_space<vmem>>, vector<1x16x512xf32>
    %80 = vector.shape_cast %79 : vector<1x16x512xf32> to vector<16x512xf32>
    %81 = vector.shape_cast %78 : vector<16x512xf32> to vector<1x16x512xf32>
    tpu.vector_store %arg14[%c4_50, %c0_51, %c0_52], %81 {strides = array<i32>} : memref<8x16x512xf32, #tpu.memory_space<vmem>>, vector<1x16x512xf32>,
    %c5_53 = arith.constant 5 : index
    %c0_54 = arith.constant 0 : index
    %c0_55 = arith.constant 0 : index
    %82 = vector.load %arg13[%c5_53, %c0_54, %c0_55] : memref<8x16x512xf32, #tpu.memory_space<vmem>>, vector<1x16x512xf32>
    %83 = vector.shape_cast %82 : vector<1x16x512xf32> to vector<16x512xf32>
    %c2_56 = arith.constant 2 : index
    %c0_57 = arith.constant 0 : index
    %c0_58 = arith.constant 0 : index
    %84 = vector.load %arg13[%c2_56, %c0_57, %c0_58] : memref<8x16x512xf32, #tpu.memory_space<vmem>>, vector<1x16x512xf32>
    %85 = vector.shape_cast %84 : vector<1x16x512xf32> to vector<16x512xf32>
    %86 = vector.shape_cast %21 : vector<1x512xi1> to vector<1x512xi1>
    %87 = vector.broadcast %86 : vector<1x512xi1> to vector<16x512xi1>
    %88 = arith.select %87, %83, %85 : vector<16x512xi1>, vector<16x512xf32>
    %c5_59 = arith.constant 5 : index
    %c0_60 = arith.constant 0 : index
    %c0_61 = arith.constant 0 : index
    %89 = vector.load %arg14[%c5_59, %c0_60, %c0_61] : memref<8x16x512xf32, #tpu.memory_space<vmem>>, vector<1x16x512xf32>
    %90 = vector.shape_cast %89 : vector<1x16x512xf32> to vector<16x512xf32>
    %91 = vector.shape_cast %88 : vector<16x512xf32> to vector<1x16x512xf32>
    tpu.vector_store %arg14[%c5_59, %c0_60, %c0_61], %91 {strides = array<i32>} : memref<8x16x512xf32, #tpu.memory_space<vmem>>, vector<1x16x512xf32>,
    %c6_62 = arith.constant 6 : index
    %c0_63 = arith.constant 0 : index
    %c0_64 = arith.constant 0 : index
    %92 = vector.load %arg13[%c6_62, %c0_63, %c0_64] : memref<8x16x512xf32, #tpu.memory_space<vmem>>, vector<1x16x512xf32>
    %93 = vector.shape_cast %92 : vector<1x16x512xf32> to vector<16x512xf32>
    %c1_65 = arith.constant 1 : index
    %c0_66 = arith.constant 0 : index
    %c0_67 = arith.constant 0 : index
    %94 = vector.load %arg13[%c1_65, %c0_66, %c0_67] : memref<8x16x512xf32, #tpu.memory_space<vmem>>, vector<1x16x512xf32>
    %95 = vector.shape_cast %94 : vector<1x16x512xf32> to vector<16x512xf32>
    %96 = vector.shape_cast %21 : vector<1x512xi1> to vector<1x512xi1>
    %97 = vector.broadcast %96 : vector<1x512xi1> to vector<16x512xi1>
    %98 = arith.select %97, %93, %95 : vector<16x512xi1>, vector<16x512xf32>
    %c6_68 = arith.constant 6 : index
    %c0_69 = arith.constant 0 : index
    %c0_70 = arith.constant 0 : index
    %99 = vector.load %arg14[%c6_68, %c0_69, %c0_70] : memref<8x16x512xf32, #tpu.memory_space<vmem>>, vector<1x16x512xf32>
    %100 = vector.shape_cast %99 : vector<1x16x512xf32> to vector<16x512xf32>
    %101 = vector.shape_cast %98 : vector<16x512xf32> to vector<1x16x512xf32>
    tpu.vector_store %arg14[%c6_68, %c0_69, %c0_70], %101 {strides = array<i32>} : memref<8x16x512xf32, #tpu.memory_space<vmem>>, vector<1x16x512xf32>,
    %c7_71 = arith.constant 7 : index
    %c0_72 = arith.constant 0 : index
    %c0_73 = arith.constant 0 : index
    %102 = vector.load %arg13[%c7_71, %c0_72, %c0_73] : memref<8x16x512xf32, #tpu.memory_space<vmem>>, vector<1x16x512xf32>
    %103 = vector.shape_cast %102 : vector<1x16x512xf32> to vector<16x512xf32>
    %c0_74 = arith.constant 0 : index
    %c0_75 = arith.constant 0 : index
    %c0_76 = arith.constant 0 : index
    %104 = vector.load %arg13[%c0_74, %c0_75, %c0_76] : memref<8x16x512xf32, #tpu.memory_space<vmem>>, vector<1x16x512xf32>
    %105 = vector.shape_cast %104 : vector<1x16x512xf32> to vector<16x512xf32>
    %106 = vector.shape_cast %21 : vector<1x512xi1> to vector<1x512xi1>
    %107 = vector.broadcast %106 : vector<1x512xi1> to vector<16x512xi1>
    %108 = arith.select %107, %103, %105 : vector<16x512xi1>, vector<16x512xf32>
    %c7_77 = arith.constant 7 : index
    %c0_78 = arith.constant 0 : index
    %c0_79 = arith.constant 0 : index
    %109 = vector.load %arg14[%c7_77, %c0_78, %c0_79] : memref<8x16x512xf32, #tpu.memory_space<vmem>>, vector<1x16x512xf32>
    %110 = vector.shape_cast %109 : vector<1x16x512xf32> to vector<16x512xf32>
    %111 = vector.shape_cast %108 : vector<16x512xf32> to vector<1x16x512xf32>
    tpu.vector_store %arg14[%c7_77, %c0_78, %c0_79], %111 {strides = array<i32>} : memref<8x16x512xf32, #tpu.memory_space<vmem>>, vector<1x16x512xf32>,
    %cst_80 = arith.constant 0.000000e+00 : f32
    %112 = vector.broadcast %cst_80 : f32 to vector<16x128xf32>
    %cst_81 = arith.constant 0.000000e+00 : f32
    %113 = vector.broadcast %cst_81 : f32 to vector<16x128xf32>
    %c0_82 = arith.constant 0 : index
    %c0_83 = arith.constant 0 : index
    %c0_84 = arith.constant 0 : index
    %114 = vector.load %arg14[%c0_82, %c0_83, %c0_84] : memref<8x16x512xf32, #tpu.memory_space<vmem>>, vector<1x16x512xf32>
    %115 = vector.shape_cast %114 : vector<1x16x512xf32> to vector<16x512xf32>
    %c0_85 = arith.constant 0 : index
    %c0_86 = arith.constant 0 : index
    %116 = vector.load %arg6[%c0_85, %c0_86] : memref<128x512xf32, #tpu.memory_space<vmem>>, vector<128x512xf32>
    %cst_87 = arith.constant dense<0.000000e+00> : vector<16x512xf32>
    %117 = tpu.matmul %112, %116, %cst_87 {dimension_numbers = #tpu.dot_dimension_numbers<[1], [0], [0], [1], [0, 0, 1, 1], [], []>} : vector<16x128xf32>, vector<128x512xf32>, vector<16x512xf32> -> vector<16x512xf32>
    %118 = arith.addf %115, %117 : vector<16x512xf32>
    %119 = vector.extract_strided_slice %118 {offsets = [0, 0], sizes = [16, 128], strides = [1, 1]} : vector<16x512xf32> to vector<16x128xf32>
    %120 = arith.negf %119 : vector<16x128xf32>
    %121 = math.exp %120 : vector<16x128xf32>
    %cst_88 = arith.constant 1.000000e+00 : f32
    %122 = vector.broadcast %cst_88 : f32 to vector<16x128xf32>
    %123 = arith.addf %122, %121 : vector<16x128xf32>
    %124 = arith.divf %122, %123 : vector<16x128xf32>
    %125 = vector.extract_strided_slice %118 {offsets = [0, 128], sizes = [16, 128], strides = [1, 1]} : vector<16x512xf32> to vector<16x128xf32>
    %126 = arith.negf %125 : vector<16x128xf32>
    %127 = math.exp %126 : vector<16x128xf32>
    %cst_89 = arith.constant 1.000000e+00 : f32
    %128 = vector.broadcast %cst_89 : f32 to vector<16x128xf32>
    %129 = arith.addf %128, %127 : vector<16x128xf32>
    %130 = arith.divf %128, %129 : vector<16x128xf32>
    %131 = vector.extract_strided_slice %118 {offsets = [0, 256], sizes = [16, 128], strides = [1, 1]} : vector<16x512xf32> to vector<16x128xf32>
    %132 = math.tanh %131 : vector<16x128xf32>
    %133 = vector.extract_strided_slice %118 {offsets = [0, 384], sizes = [16, 128], strides = [1, 1]} : vector<16x512xf32> to vector<16x128xf32>
    %134 = arith.negf %133 : vector<16x128xf32>
    %135 = math.exp %134 : vector<16x128xf32>
    %cst_90 = arith.constant 1.000000e+00 : f32
    %136 = vector.broadcast %cst_90 : f32 to vector<16x128xf32>
    %137 = arith.addf %136, %135 : vector<16x128xf32>
    %138 = arith.divf %136, %137 : vector<16x128xf32>
    %139 = arith.mulf %130, %113 : vector<16x128xf32>
    %140 = arith.mulf %124, %132 : vector<16x128xf32>
    %141 = arith.addf %139, %140 : vector<16x128xf32>
    %142 = math.tanh %141 : vector<16x128xf32>
    %143 = arith.mulf %138, %142 : vector<16x128xf32>
    %c0_i32_91 = arith.constant 0 : i32
    %c7_i32 = arith.constant 7 : i32
    %144 = vector.broadcast %c0_i32_91 : i32 to vector<1x128xi32>
    %145 = vector.broadcast %c7_i32 : i32 to vector<1x128xi32>
    %146 = arith.select %2, %144, %145 : vector<1x128xi1>, vector<1x128xi32>
    %147 = vector.broadcast %22 : vector<16x1xi32> to vector<16x128xi32>
    %148 = vector.broadcast %146 : vector<1x128xi32> to vector<16x128xi32>
    %149 = arith.cmpi sgt, %147, %148 : vector<16x128xi32>
    %150 = arith.select %149, %143, %112 : vector<16x128xi1>, vector<16x128xf32>
    %151 = arith.select %149, %141, %113 : vector<16x128xi1>, vector<16x128xf32>
    %c0_92 = arith.constant 0 : index
    %c0_93 = arith.constant 0 : index
    %c0_94 = arith.constant 0 : index
    %152 = vector.load %arg15[%c0_92, %c0_93, %c0_94] : memref<8x16x128xf32, #tpu.memory_space<vmem>>, vector<1x16x128xf32>
    %153 = vector.shape_cast %152 : vector<1x16x128xf32> to vector<16x128xf32>
    %154 = vector.shape_cast %150 : vector<16x128xf32> to vector<1x16x128xf32>
    tpu.vector_store %arg15[%c0_92, %c0_93, %c0_94], %154 {strides = array<i32>} : memref<8x16x128xf32, #tpu.memory_space<vmem>>, vector<1x16x128xf32>,
    %c1_95 = arith.constant 1 : index
    %c0_96 = arith.constant 0 : index
    %c0_97 = arith.constant 0 : index
    %155 = vector.load %arg14[%c1_95, %c0_96, %c0_97] : memref<8x16x512xf32, #tpu.memory_space<vmem>>, vector<1x16x512xf32>
    %156 = vector.shape_cast %155 : vector<1x16x512xf32> to vector<16x512xf32>
    %c0_98 = arith.constant 0 : index
    %c0_99 = arith.constant 0 : index
    %157 = vector.load %arg6[%c0_98, %c0_99] : memref<128x512xf32, #tpu.memory_space<vmem>>, vector<128x512xf32>
    %cst_100 = arith.constant dense<0.000000e+00> : vector<16x512xf32>
    %158 = tpu.matmul %150, %157, %cst_100 {dimension_numbers = #tpu.dot_dimension_numbers<[1], [0], [0], [1], [0, 0, 1, 1], [], []>} : vector<16x128xf32>, vector<128x512xf32>, vector<16x512xf32> -> vector<16x512xf32>
    %159 = arith.addf %156, %158 : vector<16x512xf32>
    %160 = vector.extract_strided_slice %159 {offsets = [0, 0], sizes = [16, 128], strides = [1, 1]} : vector<16x512xf32> to vector<16x128xf32>
    %161 = arith.negf %160 : vector<16x128xf32>
    %162 = math.exp %161 : vector<16x128xf32>
    %cst_101 = arith.constant 1.000000e+00 : f32
    %163 = vector.broadcast %cst_101 : f32 to vector<16x128xf32>
    %164 = arith.addf %163, %162 : vector<16x128xf32>
    %165 = arith.divf %163, %164 : vector<16x128xf32>
    %166 = vector.extract_strided_slice %159 {offsets = [0, 128], sizes = [16, 128], strides = [1, 1]} : vector<16x512xf32> to vector<16x128xf32>
    %167 = arith.negf %166 : vector<16x128xf32>
    %168 = math.exp %167 : vector<16x128xf32>
    %cst_102 = arith.constant 1.000000e+00 : f32
    %169 = vector.broadcast %cst_102 : f32 to vector<16x128xf32>
    %170 = arith.addf %169, %168 : vector<16x128xf32>
    %171 = arith.divf %169, %170 : vector<16x128xf32>
    %172 = vector.extract_strided_slice %159 {offsets = [0, 256], sizes = [16, 128], strides = [1, 1]} : vector<16x512xf32> to vector<16x128xf32>
    %173 = math.tanh %172 : vector<16x128xf32>
    %174 = vector.extract_strided_slice %159 {offsets = [0, 384], sizes = [16, 128], strides = [1, 1]} : vector<16x512xf32> to vector<16x128xf32>
    %175 = arith.negf %174 : vector<16x128xf32>
    %176 = math.exp %175 : vector<16x128xf32>
    %cst_103 = arith.constant 1.000000e+00 : f32
    %177 = vector.broadcast %cst_103 : f32 to vector<16x128xf32>
    %178 = arith.addf %177, %176 : vector<16x128xf32>
    %179 = arith.divf %177, %178 : vector<16x128xf32>
    %180 = arith.mulf %171, %151 : vector<16x128xf32>
    %181 = arith.mulf %165, %173 : vector<16x128xf32>
    %182 = arith.addf %180, %181 : vector<16x128xf32>
    %183 = math.tanh %182 : vector<16x128xf32>
    %184 = arith.mulf %179, %183 : vector<16x128xf32>
    %c1_i32_104 = arith.constant 1 : i32
    %c6_i32 = arith.constant 6 : i32
    %185 = vector.broadcast %c1_i32_104 : i32 to vector<1x128xi32>
    %186 = vector.broadcast %c6_i32 : i32 to vector<1x128xi32>
    %187 = arith.select %2, %185, %186 : vector<1x128xi1>, vector<1x128xi32>
    %188 = vector.broadcast %22 : vector<16x1xi32> to vector<16x128xi32>
    %189 = vector.broadcast %187 : vector<1x128xi32> to vector<16x128xi32>
    %190 = arith.cmpi sgt, %188, %189 : vector<16x128xi32>
    %191 = arith.select %190, %184, %150 : vector<16x128xi1>, vector<16x128xf32>
    %192 = arith.select %190, %182, %151 : vector<16x128xi1>, vector<16x128xf32>
    %c1_105 = arith.constant 1 : index
    %c0_106 = arith.constant 0 : index
    %c0_107 = arith.constant 0 : index
    %193 = vector.load %arg15[%c1_105, %c0_106, %c0_107] : memref<8x16x128xf32, #tpu.memory_space<vmem>>, vector<1x16x128xf32>
    %194 = vector.shape_cast %193 : vector<1x16x128xf32> to vector<16x128xf32>
    %195 = vector.shape_cast %191 : vector<16x128xf32> to vector<1x16x128xf32>
    tpu.vector_store %arg15[%c1_105, %c0_106, %c0_107], %195 {strides = array<i32>} : memref<8x16x128xf32, #tpu.memory_space<vmem>>, vector<1x16x128xf32>,
    %c2_108 = arith.constant 2 : index
    %c0_109 = arith.constant 0 : index
    %c0_110 = arith.constant 0 : index
    %196 = vector.load %arg14[%c2_108, %c0_109, %c0_110] : memref<8x16x512xf32, #tpu.memory_space<vmem>>, vector<1x16x512xf32>
    %197 = vector.shape_cast %196 : vector<1x16x512xf32> to vector<16x512xf32>
    %c0_111 = arith.constant 0 : index
    %c0_112 = arith.constant 0 : index
    %198 = vector.load %arg6[%c0_111, %c0_112] : memref<128x512xf32, #tpu.memory_space<vmem>>, vector<128x512xf32>
    %cst_113 = arith.constant dense<0.000000e+00> : vector<16x512xf32>
    %199 = tpu.matmul %191, %198, %cst_113 {dimension_numbers = #tpu.dot_dimension_numbers<[1], [0], [0], [1], [0, 0, 1, 1], [], []>} : vector<16x128xf32>, vector<128x512xf32>, vector<16x512xf32> -> vector<16x512xf32>
    %200 = arith.addf %197, %199 : vector<16x512xf32>
    %201 = vector.extract_strided_slice %200 {offsets = [0, 0], sizes = [16, 128], strides = [1, 1]} : vector<16x512xf32> to vector<16x128xf32>
    %202 = arith.negf %201 : vector<16x128xf32>
    %203 = math.exp %202 : vector<16x128xf32>
    %cst_114 = arith.constant 1.000000e+00 : f32
    %204 = vector.broadcast %cst_114 : f32 to vector<16x128xf32>
    %205 = arith.addf %204, %203 : vector<16x128xf32>
    %206 = arith.divf %204, %205 : vector<16x128xf32>
    %207 = vector.extract_strided_slice %200 {offsets = [0, 128], sizes = [16, 128], strides = [1, 1]} : vector<16x512xf32> to vector<16x128xf32>
    %208 = arith.negf %207 : vector<16x128xf32>
    %209 = math.exp %208 : vector<16x128xf32>
    %cst_115 = arith.constant 1.000000e+00 : f32
    %210 = vector.broadcast %cst_115 : f32 to vector<16x128xf32>
    %211 = arith.addf %210, %209 : vector<16x128xf32>
    %212 = arith.divf %210, %211 : vector<16x128xf32>
    %213 = vector.extract_strided_slice %200 {offsets = [0, 256], sizes = [16, 128], strides = [1, 1]} : vector<16x512xf32> to vector<16x128xf32>
    %214 = math.tanh %213 : vector<16x128xf32>
    %215 = vector.extract_strided_slice %200 {offsets = [0, 384], sizes = [16, 128], strides = [1, 1]} : vector<16x512xf32> to vector<16x128xf32>
    %216 = arith.negf %215 : vector<16x128xf32>
    %217 = math.exp %216 : vector<16x128xf32>
    %cst_116 = arith.constant 1.000000e+00 : f32
    %218 = vector.broadcast %cst_116 : f32 to vector<16x128xf32>
    %219 = arith.addf %218, %217 : vector<16x128xf32>
    %220 = arith.divf %218, %219 : vector<16x128xf32>
    %221 = arith.mulf %212, %192 : vector<16x128xf32>
    %222 = arith.mulf %206, %214 : vector<16x128xf32>
    %223 = arith.addf %221, %222 : vector<16x128xf32>
    %224 = math.tanh %223 : vector<16x128xf32>
    %225 = arith.mulf %220, %224 : vector<16x128xf32>
    %c2_i32 = arith.constant 2 : i32
    %c5_i32 = arith.constant 5 : i32
    %226 = vector.broadcast %c2_i32 : i32 to vector<1x128xi32>
    %227 = vector.broadcast %c5_i32 : i32 to vector<1x128xi32>
    %228 = arith.select %2, %226, %227 : vector<1x128xi1>, vector<1x128xi32>
    %229 = vector.broadcast %22 : vector<16x1xi32> to vector<16x128xi32>
    %230 = vector.broadcast %228 : vector<1x128xi32> to vector<16x128xi32>
    %231 = arith.cmpi sgt, %229, %230 : vector<16x128xi32>
    %232 = arith.select %231, %225, %191 : vector<16x128xi1>, vector<16x128xf32>
    %233 = arith.select %231, %223, %192 : vector<16x128xi1>, vector<16x128xf32>
    %c2_117 = arith.constant 2 : index
    %c0_118 = arith.constant 0 : index
    %c0_119 = arith.constant 0 : index
    %234 = vector.load %arg15[%c2_117, %c0_118, %c0_119] : memref<8x16x128xf32, #tpu.memory_space<vmem>>, vector<1x16x128xf32>
    %235 = vector.shape_cast %234 : vector<1x16x128xf32> to vector<16x128xf32>
    %236 = vector.shape_cast %232 : vector<16x128xf32> to vector<1x16x128xf32>
    tpu.vector_store %arg15[%c2_117, %c0_118, %c0_119], %236 {strides = array<i32>} : memref<8x16x128xf32, #tpu.memory_space<vmem>>, vector<1x16x128xf32>,
    %c3_120 = arith.constant 3 : index
    %c0_121 = arith.constant 0 : index
    %c0_122 = arith.constant 0 : index
    %237 = vector.load %arg14[%c3_120, %c0_121, %c0_122] : memref<8x16x512xf32, #tpu.memory_space<vmem>>, vector<1x16x512xf32>
    %238 = vector.shape_cast %237 : vector<1x16x512xf32> to vector<16x512xf32>
    %c0_123 = arith.constant 0 : index
    %c0_124 = arith.constant 0 : index
    %239 = vector.load %arg6[%c0_123, %c0_124] : memref<128x512xf32, #tpu.memory_space<vmem>>, vector<128x512xf32>
    %cst_125 = arith.constant dense<0.000000e+00> : vector<16x512xf32>
    %240 = tpu.matmul %232, %239, %cst_125 {dimension_numbers = #tpu.dot_dimension_numbers<[1], [0], [0], [1], [0, 0, 1, 1], [], []>} : vector<16x128xf32>, vector<128x512xf32>, vector<16x512xf32> -> vector<16x512xf32>
    %241 = arith.addf %238, %240 : vector<16x512xf32>
    %242 = vector.extract_strided_slice %241 {offsets = [0, 0], sizes = [16, 128], strides = [1, 1]} : vector<16x512xf32> to vector<16x128xf32>
    %243 = arith.negf %242 : vector<16x128xf32>
    %244 = math.exp %243 : vector<16x128xf32>
    %cst_126 = arith.constant 1.000000e+00 : f32
    %245 = vector.broadcast %cst_126 : f32 to vector<16x128xf32>
    %246 = arith.addf %245, %244 : vector<16x128xf32>
    %247 = arith.divf %245, %246 : vector<16x128xf32>
    %248 = vector.extract_strided_slice %241 {offsets = [0, 128], sizes = [16, 128], strides = [1, 1]} : vector<16x512xf32> to vector<16x128xf32>
    %249 = arith.negf %248 : vector<16x128xf32>
    %250 = math.exp %249 : vector<16x128xf32>
    %cst_127 = arith.constant 1.000000e+00 : f32
    %251 = vector.broadcast %cst_127 : f32 to vector<16x128xf32>
    %252 = arith.addf %251, %250 : vector<16x128xf32>
    %253 = arith.divf %251, %252 : vector<16x128xf32>
    %254 = vector.extract_strided_slice %241 {offsets = [0, 256], sizes = [16, 128], strides = [1, 1]} : vector<16x512xf32> to vector<16x128xf32>
    %255 = math.tanh %254 : vector<16x128xf32>
    %256 = vector.extract_strided_slice %241 {offsets = [0, 384], sizes = [16, 128], strides = [1, 1]} : vector<16x512xf32> to vector<16x128xf32>
    %257 = arith.negf %256 : vector<16x128xf32>
    %258 = math.exp %257 : vector<16x128xf32>
    %cst_128 = arith.constant 1.000000e+00 : f32
    %259 = vector.broadcast %cst_128 : f32 to vector<16x128xf32>
    %260 = arith.addf %259, %258 : vector<16x128xf32>
    %261 = arith.divf %259, %260 : vector<16x128xf32>
    %262 = arith.mulf %253, %233 : vector<16x128xf32>
    %263 = arith.mulf %247, %255 : vector<16x128xf32>
    %264 = arith.addf %262, %263 : vector<16x128xf32>
    %265 = math.tanh %264 : vector<16x128xf32>
    %266 = arith.mulf %261, %265 : vector<16x128xf32>
    %c3_i32 = arith.constant 3 : i32
    %c4_i32 = arith.constant 4 : i32
    %267 = vector.broadcast %c3_i32 : i32 to vector<1x128xi32>
    %268 = vector.broadcast %c4_i32 : i32 to vector<1x128xi32>
    %269 = arith.select %2, %267, %268 : vector<1x128xi1>, vector<1x128xi32>
    %270 = vector.broadcast %22 : vector<16x1xi32> to vector<16x128xi32>
    %271 = vector.broadcast %269 : vector<1x128xi32> to vector<16x128xi32>
    %272 = arith.cmpi sgt, %270, %271 : vector<16x128xi32>
    %273 = arith.select %272, %266, %232 : vector<16x128xi1>, vector<16x128xf32>
    %274 = arith.select %272, %264, %233 : vector<16x128xi1>, vector<16x128xf32>
    %c3_129 = arith.constant 3 : index
    %c0_130 = arith.constant 0 : index
    %c0_131 = arith.constant 0 : index
    %275 = vector.load %arg15[%c3_129, %c0_130, %c0_131] : memref<8x16x128xf32, #tpu.memory_space<vmem>>, vector<1x16x128xf32>
    %276 = vector.shape_cast %275 : vector<1x16x128xf32> to vector<16x128xf32>
    %277 = vector.shape_cast %273 : vector<16x128xf32> to vector<1x16x128xf32>
    tpu.vector_store %arg15[%c3_129, %c0_130, %c0_131], %277 {strides = array<i32>} : memref<8x16x128xf32, #tpu.memory_space<vmem>>, vector<1x16x128xf32>,
    %c4_132 = arith.constant 4 : index
    %c0_133 = arith.constant 0 : index
    %c0_134 = arith.constant 0 : index
    %278 = vector.load %arg14[%c4_132, %c0_133, %c0_134] : memref<8x16x512xf32, #tpu.memory_space<vmem>>, vector<1x16x512xf32>
    %279 = vector.shape_cast %278 : vector<1x16x512xf32> to vector<16x512xf32>
    %c0_135 = arith.constant 0 : index
    %c0_136 = arith.constant 0 : index
    %280 = vector.load %arg6[%c0_135, %c0_136] : memref<128x512xf32, #tpu.memory_space<vmem>>, vector<128x512xf32>
    %cst_137 = arith.constant dense<0.000000e+00> : vector<16x512xf32>
    %281 = tpu.matmul %273, %280, %cst_137 {dimension_numbers = #tpu.dot_dimension_numbers<[1], [0], [0], [1], [0, 0, 1, 1], [], []>} : vector<16x128xf32>, vector<128x512xf32>, vector<16x512xf32> -> vector<16x512xf32>
    %282 = arith.addf %279, %281 : vector<16x512xf32>
    %283 = vector.extract_strided_slice %282 {offsets = [0, 0], sizes = [16, 128], strides = [1, 1]} : vector<16x512xf32> to vector<16x128xf32>
    %284 = arith.negf %283 : vector<16x128xf32>
    %285 = math.exp %284 : vector<16x128xf32>
    %cst_138 = arith.constant 1.000000e+00 : f32
    %286 = vector.broadcast %cst_138 : f32 to vector<16x128xf32>
    %287 = arith.addf %286, %285 : vector<16x128xf32>
    %288 = arith.divf %286, %287 : vector<16x128xf32>
    %289 = vector.extract_strided_slice %282 {offsets = [0, 128], sizes = [16, 128], strides = [1, 1]} : vector<16x512xf32> to vector<16x128xf32>
    %290 = arith.negf %289 : vector<16x128xf32>
    %291 = math.exp %290 : vector<16x128xf32>
    %cst_139 = arith.constant 1.000000e+00 : f32
    %292 = vector.broadcast %cst_139 : f32 to vector<16x128xf32>
    %293 = arith.addf %292, %291 : vector<16x128xf32>
    %294 = arith.divf %292, %293 : vector<16x128xf32>
    %295 = vector.extract_strided_slice %282 {offsets = [0, 256], sizes = [16, 128], strides = [1, 1]} : vector<16x512xf32> to vector<16x128xf32>
    %296 = math.tanh %295 : vector<16x128xf32>
    %297 = vector.extract_strided_slice %282 {offsets = [0, 384], sizes = [16, 128], strides = [1, 1]} : vector<16x512xf32> to vector<16x128xf32>
    %298 = arith.negf %297 : vector<16x128xf32>
    %299 = math.exp %298 : vector<16x128xf32>
    %cst_140 = arith.constant 1.000000e+00 : f32
    %300 = vector.broadcast %cst_140 : f32 to vector<16x128xf32>
    %301 = arith.addf %300, %299 : vector<16x128xf32>
    %302 = arith.divf %300, %301 : vector<16x128xf32>
    %303 = arith.mulf %294, %274 : vector<16x128xf32>
    %304 = arith.mulf %288, %296 : vector<16x128xf32>
    %305 = arith.addf %303, %304 : vector<16x128xf32>
    %306 = math.tanh %305 : vector<16x128xf32>
    %307 = arith.mulf %302, %306 : vector<16x128xf32>
    %c4_i32_141 = arith.constant 4 : i32
    %c3_i32_142 = arith.constant 3 : i32
    %308 = vector.broadcast %c4_i32_141 : i32 to vector<1x128xi32>
    %309 = vector.broadcast %c3_i32_142 : i32 to vector<1x128xi32>
    %310 = arith.select %2, %308, %309 : vector<1x128xi1>, vector<1x128xi32>
    %311 = vector.broadcast %22 : vector<16x1xi32> to vector<16x128xi32>
    %312 = vector.broadcast %310 : vector<1x128xi32> to vector<16x128xi32>
    %313 = arith.cmpi sgt, %311, %312 : vector<16x128xi32>
    %314 = arith.select %313, %307, %273 : vector<16x128xi1>, vector<16x128xf32>
    %315 = arith.select %313, %305, %274 : vector<16x128xi1>, vector<16x128xf32>
    %c4_143 = arith.constant 4 : index
    %c0_144 = arith.constant 0 : index
    %c0_145 = arith.constant 0 : index
    %316 = vector.load %arg15[%c4_143, %c0_144, %c0_145] : memref<8x16x128xf32, #tpu.memory_space<vmem>>, vector<1x16x128xf32>
    %317 = vector.shape_cast %316 : vector<1x16x128xf32> to vector<16x128xf32>
    %318 = vector.shape_cast %314 : vector<16x128xf32> to vector<1x16x128xf32>
    tpu.vector_store %arg15[%c4_143, %c0_144, %c0_145], %318 {strides = array<i32>} : memref<8x16x128xf32, #tpu.memory_space<vmem>>, vector<1x16x128xf32>,
    %c5_146 = arith.constant 5 : index
    %c0_147 = arith.constant 0 : index
    %c0_148 = arith.constant 0 : index
    %319 = vector.load %arg14[%c5_146, %c0_147, %c0_148] : memref<8x16x512xf32, #tpu.memory_space<vmem>>, vector<1x16x512xf32>
    %320 = vector.shape_cast %319 : vector<1x16x512xf32> to vector<16x512xf32>
    %c0_149 = arith.constant 0 : index
    %c0_150 = arith.constant 0 : index
    %321 = vector.load %arg6[%c0_149, %c0_150] : memref<128x512xf32, #tpu.memory_space<vmem>>, vector<128x512xf32>
    %cst_151 = arith.constant dense<0.000000e+00> : vector<16x512xf32>
    %322 = tpu.matmul %314, %321, %cst_151 {dimension_numbers = #tpu.dot_dimension_numbers<[1], [0], [0], [1], [0, 0, 1, 1], [], []>} : vector<16x128xf32>, vector<128x512xf32>, vector<16x512xf32> -> vector<16x512xf32>
    %323 = arith.addf %320, %322 : vector<16x512xf32>
    %324 = vector.extract_strided_slice %323 {offsets = [0, 0], sizes = [16, 128], strides = [1, 1]} : vector<16x512xf32> to vector<16x128xf32>
    %325 = arith.negf %324 : vector<16x128xf32>
    %326 = math.exp %325 : vector<16x128xf32>
    %cst_152 = arith.constant 1.000000e+00 : f32
    %327 = vector.broadcast %cst_152 : f32 to vector<16x128xf32>
    %328 = arith.addf %327, %326 : vector<16x128xf32>
    %329 = arith.divf %327, %328 : vector<16x128xf32>
    %330 = vector.extract_strided_slice %323 {offsets = [0, 128], sizes = [16, 128], strides = [1, 1]} : vector<16x512xf32> to vector<16x128xf32>
    %331 = arith.negf %330 : vector<16x128xf32>
    %332 = math.exp %331 : vector<16x128xf32>
    %cst_153 = arith.constant 1.000000e+00 : f32
    %333 = vector.broadcast %cst_153 : f32 to vector<16x128xf32>
    %334 = arith.addf %333, %332 : vector<16x128xf32>
    %335 = arith.divf %333, %334 : vector<16x128xf32>
    %336 = vector.extract_strided_slice %323 {offsets = [0, 256], sizes = [16, 128], strides = [1, 1]} : vector<16x512xf32> to vector<16x128xf32>
    %337 = math.tanh %336 : vector<16x128xf32>
    %338 = vector.extract_strided_slice %323 {offsets = [0, 384], sizes = [16, 128], strides = [1, 1]} : vector<16x512xf32> to vector<16x128xf32>
    %339 = arith.negf %338 : vector<16x128xf32>
    %340 = math.exp %339 : vector<16x128xf32>
    %cst_154 = arith.constant 1.000000e+00 : f32
    %341 = vector.broadcast %cst_154 : f32 to vector<16x128xf32>
    %342 = arith.addf %341, %340 : vector<16x128xf32>
    %343 = arith.divf %341, %342 : vector<16x128xf32>
    %344 = arith.mulf %335, %315 : vector<16x128xf32>
    %345 = arith.mulf %329, %337 : vector<16x128xf32>
    %346 = arith.addf %344, %345 : vector<16x128xf32>
    %347 = math.tanh %346 : vector<16x128xf32>
    %348 = arith.mulf %343, %347 : vector<16x128xf32>
    %c5_i32_155 = arith.constant 5 : i32
    %c2_i32_156 = arith.constant 2 : i32
    %349 = vector.broadcast %c5_i32_155 : i32 to vector<1x128xi32>
    %350 = vector.broadcast %c2_i32_156 : i32 to vector<1x128xi32>
    %351 = arith.select %2, %349, %350 : vector<1x128xi1>, vector<1x128xi32>
    %352 = vector.broadcast %22 : vector<16x1xi32> to vector<16x128xi32>
    %353 = vector.broadcast %351 : vector<1x128xi32> to vector<16x128xi32>
    %354 = arith.cmpi sgt, %352, %353 : vector<16x128xi32>
    %355 = arith.select %354, %348, %314 : vector<16x128xi1>, vector<16x128xf32>
    %356 = arith.select %354, %346, %315 : vector<16x128xi1>, vector<16x128xf32>
    %c5_157 = arith.constant 5 : index
    %c0_158 = arith.constant 0 : index
    %c0_159 = arith.constant 0 : index
    %357 = vector.load %arg15[%c5_157, %c0_158, %c0_159] : memref<8x16x128xf32, #tpu.memory_space<vmem>>, vector<1x16x128xf32>
    %358 = vector.shape_cast %357 : vector<1x16x128xf32> to vector<16x128xf32>
    %359 = vector.shape_cast %355 : vector<16x128xf32> to vector<1x16x128xf32>
    tpu.vector_store %arg15[%c5_157, %c0_158, %c0_159], %359 {strides = array<i32>} : memref<8x16x128xf32, #tpu.memory_space<vmem>>, vector<1x16x128xf32>,
    %c6_160 = arith.constant 6 : index
    %c0_161 = arith.constant 0 : index
    %c0_162 = arith.constant 0 : index
    %360 = vector.load %arg14[%c6_160, %c0_161, %c0_162] : memref<8x16x512xf32, #tpu.memory_space<vmem>>, vector<1x16x512xf32>
    %361 = vector.shape_cast %360 : vector<1x16x512xf32> to vector<16x512xf32>
    %c0_163 = arith.constant 0 : index
    %c0_164 = arith.constant 0 : index
    %362 = vector.load %arg6[%c0_163, %c0_164] : memref<128x512xf32, #tpu.memory_space<vmem>>, vector<128x512xf32>
    %cst_165 = arith.constant dense<0.000000e+00> : vector<16x512xf32>
    %363 = tpu.matmul %355, %362, %cst_165 {dimension_numbers = #tpu.dot_dimension_numbers<[1], [0], [0], [1], [0, 0, 1, 1], [], []>} : vector<16x128xf32>, vector<128x512xf32>, vector<16x512xf32> -> vector<16x512xf32>
    %364 = arith.addf %361, %363 : vector<16x512xf32>
    %365 = vector.extract_strided_slice %364 {offsets = [0, 0], sizes = [16, 128], strides = [1, 1]} : vector<16x512xf32> to vector<16x128xf32>
    %366 = arith.negf %365 : vector<16x128xf32>
    %367 = math.exp %366 : vector<16x128xf32>
    %cst_166 = arith.constant 1.000000e+00 : f32
    %368 = vector.broadcast %cst_166 : f32 to vector<16x128xf32>
    %369 = arith.addf %368, %367 : vector<16x128xf32>
    %370 = arith.divf %368, %369 : vector<16x128xf32>
    %371 = vector.extract_strided_slice %364 {offsets = [0, 128], sizes = [16, 128], strides = [1, 1]} : vector<16x512xf32> to vector<16x128xf32>
    %372 = arith.negf %371 : vector<16x128xf32>
    %373 = math.exp %372 : vector<16x128xf32>
    %cst_167 = arith.constant 1.000000e+00 : f32
    %374 = vector.broadcast %cst_167 : f32 to vector<16x128xf32>
    %375 = arith.addf %374, %373 : vector<16x128xf32>
    %376 = arith.divf %374, %375 : vector<16x128xf32>
    %377 = vector.extract_strided_slice %364 {offsets = [0, 256], sizes = [16, 128], strides = [1, 1]} : vector<16x512xf32> to vector<16x128xf32>
    %378 = math.tanh %377 : vector<16x128xf32>
    %379 = vector.extract_strided_slice %364 {offsets = [0, 384], sizes = [16, 128], strides = [1, 1]} : vector<16x512xf32> to vector<16x128xf32>
    %380 = arith.negf %379 : vector<16x128xf32>
    %381 = math.exp %380 : vector<16x128xf32>
    %cst_168 = arith.constant 1.000000e+00 : f32
    %382 = vector.broadcast %cst_168 : f32 to vector<16x128xf32>
    %383 = arith.addf %382, %381 : vector<16x128xf32>
    %384 = arith.divf %382, %383 : vector<16x128xf32>
    %385 = arith.mulf %376, %356 : vector<16x128xf32>
    %386 = arith.mulf %370, %378 : vector<16x128xf32>
    %387 = arith.addf %385, %386 : vector<16x128xf32>
    %388 = math.tanh %387 : vector<16x128xf32>
    %389 = arith.mulf %384, %388 : vector<16x128xf32>
    %c6_i32_169 = arith.constant 6 : i32
    %c1_i32_170 = arith.constant 1 : i32
    %390 = vector.broadcast %c6_i32_169 : i32 to vector<1x128xi32>
    %391 = vector.broadcast %c1_i32_170 : i32 to vector<1x128xi32>
    %392 = arith.select %2, %390, %391 : vector<1x128xi1>, vector<1x128xi32>
    %393 = vector.broadcast %22 : vector<16x1xi32> to vector<16x128xi32>
    %394 = vector.broadcast %392 : vector<1x128xi32> to vector<16x128xi32>
    %395 = arith.cmpi sgt, %393, %394 : vector<16x128xi32>
    %396 = arith.select %395, %389, %355 : vector<16x128xi1>, vector<16x128xf32>
    %397 = arith.select %395, %387, %356 : vector<16x128xi1>, vector<16x128xf32>
    %c6_171 = arith.constant 6 : index
    %c0_172 = arith.constant 0 : index
    %c0_173 = arith.constant 0 : index
    %398 = vector.load %arg15[%c6_171, %c0_172, %c0_173] : memref<8x16x128xf32, #tpu.memory_space<vmem>>, vector<1x16x128xf32>
    %399 = vector.shape_cast %398 : vector<1x16x128xf32> to vector<16x128xf32>
    %400 = vector.shape_cast %396 : vector<16x128xf32> to vector<1x16x128xf32>
    tpu.vector_store %arg15[%c6_171, %c0_172, %c0_173], %400 {strides = array<i32>} : memref<8x16x128xf32, #tpu.memory_space<vmem>>, vector<1x16x128xf32>,
    %c7_174 = arith.constant 7 : index
    %c0_175 = arith.constant 0 : index
    %c0_176 = arith.constant 0 : index
    %401 = vector.load %arg14[%c7_174, %c0_175, %c0_176] : memref<8x16x512xf32, #tpu.memory_space<vmem>>, vector<1x16x512xf32>
    %402 = vector.shape_cast %401 : vector<1x16x512xf32> to vector<16x512xf32>
    %c0_177 = arith.constant 0 : index
    %c0_178 = arith.constant 0 : index
    %403 = vector.load %arg6[%c0_177, %c0_178] : memref<128x512xf32, #tpu.memory_space<vmem>>, vector<128x512xf32>
    %cst_179 = arith.constant dense<0.000000e+00> : vector<16x512xf32>
    %404 = tpu.matmul %396, %403, %cst_179 {dimension_numbers = #tpu.dot_dimension_numbers<[1], [0], [0], [1], [0, 0, 1, 1], [], []>} : vector<16x128xf32>, vector<128x512xf32>, vector<16x512xf32> -> vector<16x512xf32>
    %405 = arith.addf %402, %404 : vector<16x512xf32>
    %406 = vector.extract_strided_slice %405 {offsets = [0, 0], sizes = [16, 128], strides = [1, 1]} : vector<16x512xf32> to vector<16x128xf32>
    %407 = arith.negf %406 : vector<16x128xf32>
    %408 = math.exp %407 : vector<16x128xf32>
    %cst_180 = arith.constant 1.000000e+00 : f32
    %409 = vector.broadcast %cst_180 : f32 to vector<16x128xf32>
    %410 = arith.addf %409, %408 : vector<16x128xf32>
    %411 = arith.divf %409, %410 : vector<16x128xf32>
    %412 = vector.extract_strided_slice %405 {offsets = [0, 128], sizes = [16, 128], strides = [1, 1]} : vector<16x512xf32> to vector<16x128xf32>
    %413 = arith.negf %412 : vector<16x128xf32>
    %414 = math.exp %413 : vector<16x128xf32>
    %cst_181 = arith.constant 1.000000e+00 : f32
    %415 = vector.broadcast %cst_181 : f32 to vector<16x128xf32>
    %416 = arith.addf %415, %414 : vector<16x128xf32>
    %417 = arith.divf %415, %416 : vector<16x128xf32>
    %418 = vector.extract_strided_slice %405 {offsets = [0, 256], sizes = [16, 128], strides = [1, 1]} : vector<16x512xf32> to vector<16x128xf32>
    %419 = math.tanh %418 : vector<16x128xf32>
    %420 = vector.extract_strided_slice %405 {offsets = [0, 384], sizes = [16, 128], strides = [1, 1]} : vector<16x512xf32> to vector<16x128xf32>
    %421 = arith.negf %420 : vector<16x128xf32>
    %422 = math.exp %421 : vector<16x128xf32>
    %cst_182 = arith.constant 1.000000e+00 : f32
    %423 = vector.broadcast %cst_182 : f32 to vector<16x128xf32>
    %424 = arith.addf %423, %422 : vector<16x128xf32>
    %425 = arith.divf %423, %424 : vector<16x128xf32>
    %426 = arith.mulf %417, %397 : vector<16x128xf32>
    %427 = arith.mulf %411, %419 : vector<16x128xf32>
    %428 = arith.addf %426, %427 : vector<16x128xf32>
    %429 = math.tanh %428 : vector<16x128xf32>
    %430 = arith.mulf %425, %429 : vector<16x128xf32>
    %c7_i32_183 = arith.constant 7 : i32
    %c0_i32_184 = arith.constant 0 : i32
    %431 = vector.broadcast %c7_i32_183 : i32 to vector<1x128xi32>
    %432 = vector.broadcast %c0_i32_184 : i32 to vector<1x128xi32>
    %433 = arith.select %2, %431, %432 : vector<1x128xi1>, vector<1x128xi32>
    %434 = vector.broadcast %22 : vector<16x1xi32> to vector<16x128xi32>
    %435 = vector.broadcast %433 : vector<1x128xi32> to vector<16x128xi32>
    %436 = arith.cmpi sgt, %434, %435 : vector<16x128xi32>
    %437 = arith.select %436, %430, %396 : vector<16x128xi1>, vector<16x128xf32>
    %c7_185 = arith.constant 7 : index
    %c0_186 = arith.constant 0 : index
    %c0_187 = arith.constant 0 : index
    %438 = vector.load %arg15[%c7_185, %c0_186, %c0_187] : memref<8x16x128xf32, #tpu.memory_space<vmem>>, vector<1x16x128xf32>
    %439 = vector.shape_cast %438 : vector<1x16x128xf32> to vector<16x128xf32>
    %440 = vector.shape_cast %437 : vector<16x128xf32> to vector<1x16x128xf32>
    tpu.vector_store %arg15[%c7_185, %c0_186, %c0_187], %440 {strides = array<i32>} : memref<8x16x128xf32, #tpu.memory_space<vmem>>, vector<1x16x128xf32>,
    %c0_188 = arith.constant 0 : index
    %c0_189 = arith.constant 0 : index
    %c0_190 = arith.constant 0 : index
    %441 = vector.load %arg15[%c0_188, %c0_189, %c0_190] : memref<8x16x128xf32, #tpu.memory_space<vmem>>, vector<1x16x128xf32>
    %442 = vector.shape_cast %441 : vector<1x16x128xf32> to vector<16x128xf32>
    %c7_191 = arith.constant 7 : index
    %c0_192 = arith.constant 0 : index
    %c0_193 = arith.constant 0 : index
    %443 = vector.load %arg15[%c7_191, %c0_192, %c0_193] : memref<8x16x128xf32, #tpu.memory_space<vmem>>, vector<1x16x128xf32>
    %444 = vector.shape_cast %443 : vector<1x16x128xf32> to vector<16x128xf32>
    %445 = vector.shape_cast %2 : vector<1x128xi1> to vector<1x128xi1>
    %446 = vector.broadcast %445 : vector<1x128xi1> to vector<16x128xi1>
    %447 = arith.select %446, %442, %444 : vector<16x128xi1>, vector<16x128xf32>
    %c1_194 = arith.constant 1 : index
    %c0_195 = arith.constant 0 : index
    %c0_196 = arith.constant 0 : index
    %448 = vector.load %arg15[%c1_194, %c0_195, %c0_196] : memref<8x16x128xf32, #tpu.memory_space<vmem>>, vector<1x16x128xf32>
    %449 = vector.shape_cast %448 : vector<1x16x128xf32> to vector<16x128xf32>
    %c6_197 = arith.constant 6 : index
    %c0_198 = arith.constant 0 : index
    %c0_199 = arith.constant 0 : index
    %450 = vector.load %arg15[%c6_197, %c0_198, %c0_199] : memref<8x16x128xf32, #tpu.memory_space<vmem>>, vector<1x16x128xf32>
    %451 = vector.shape_cast %450 : vector<1x16x128xf32> to vector<16x128xf32>
    %452 = vector.shape_cast %2 : vector<1x128xi1> to vector<1x128xi1>
    %453 = vector.broadcast %452 : vector<1x128xi1> to vector<16x128xi1>
    %454 = arith.select %453, %449, %451 : vector<16x128xi1>, vector<16x128xf32>
    %c2_200 = arith.constant 2 : index
    %c0_201 = arith.constant 0 : index
    %c0_202 = arith.constant 0 : index
    %455 = vector.load %arg15[%c2_200, %c0_201, %c0_202] : memref<8x16x128xf32, #tpu.memory_space<vmem>>, vector<1x16x128xf32>
    %456 = vector.shape_cast %455 : vector<1x16x128xf32> to vector<16x128xf32>
    %c5_203 = arith.constant 5 : index
    %c0_204 = arith.constant 0 : index
    %c0_205 = arith.constant 0 : index
    %457 = vector.load %arg15[%c5_203, %c0_204, %c0_205] : memref<8x16x128xf32, #tpu.memory_space<vmem>>, vector<1x16x128xf32>
    %458 = vector.shape_cast %457 : vector<1x16x128xf32> to vector<16x128xf32>
    %459 = vector.shape_cast %2 : vector<1x128xi1> to vector<1x128xi1>
    %460 = vector.broadcast %459 : vector<1x128xi1> to vector<16x128xi1>
    %461 = arith.select %460, %456, %458 : vector<16x128xi1>, vector<16x128xf32>
    %c3_206 = arith.constant 3 : index
    %c0_207 = arith.constant 0 : index
    %c0_208 = arith.constant 0 : index
    %462 = vector.load %arg15[%c3_206, %c0_207, %c0_208] : memref<8x16x128xf32, #tpu.memory_space<vmem>>, vector<1x16x128xf32>
    %463 = vector.shape_cast %462 : vector<1x16x128xf32> to vector<16x128xf32>
    %c4_209 = arith.constant 4 : index
    %c0_210 = arith.constant 0 : index
    %c0_211 = arith.constant 0 : index
    %464 = vector.load %arg15[%c4_209, %c0_210, %c0_211] : memref<8x16x128xf32, #tpu.memory_space<vmem>>, vector<1x16x128xf32>
    %465 = vector.shape_cast %464 : vector<1x16x128xf32> to vector<16x128xf32>
    %466 = vector.shape_cast %2 : vector<1x128xi1> to vector<1x128xi1>
    %467 = vector.broadcast %466 : vector<1x128xi1> to vector<16x128xi1>
    %468 = arith.select %467, %463, %465 : vector<16x128xi1>, vector<16x128xf32>
    %c4_212 = arith.constant 4 : index
    %c0_213 = arith.constant 0 : index
    %c0_214 = arith.constant 0 : index
    %469 = vector.load %arg15[%c4_212, %c0_213, %c0_214] : memref<8x16x128xf32, #tpu.memory_space<vmem>>, vector<1x16x128xf32>
    %470 = vector.shape_cast %469 : vector<1x16x128xf32> to vector<16x128xf32>
    %c3_215 = arith.constant 3 : index
    %c0_216 = arith.constant 0 : index
    %c0_217 = arith.constant 0 : index
    %471 = vector.load %arg15[%c3_215, %c0_216, %c0_217] : memref<8x16x128xf32, #tpu.memory_space<vmem>>, vector<1x16x128xf32>
    %472 = vector.shape_cast %471 : vector<1x16x128xf32> to vector<16x128xf32>
    %473 = vector.shape_cast %2 : vector<1x128xi1> to vector<1x128xi1>
    %474 = vector.broadcast %473 : vector<1x128xi1> to vector<16x128xi1>
    %475 = arith.select %474, %470, %472 : vector<16x128xi1>, vector<16x128xf32>
    %c5_218 = arith.constant 5 : index
    %c0_219 = arith.constant 0 : index
    %c0_220 = arith.constant 0 : index
    %476 = vector.load %arg15[%c5_218, %c0_219, %c0_220] : memref<8x16x128xf32, #tpu.memory_space<vmem>>, vector<1x16x128xf32>
    %477 = vector.shape_cast %476 : vector<1x16x128xf32> to vector<16x128xf32>
    %c2_221 = arith.constant 2 : index
    %c0_222 = arith.constant 0 : index
    %c0_223 = arith.constant 0 : index
    %478 = vector.load %arg15[%c2_221, %c0_222, %c0_223] : memref<8x16x128xf32, #tpu.memory_space<vmem>>, vector<1x16x128xf32>
    %479 = vector.shape_cast %478 : vector<1x16x128xf32> to vector<16x128xf32>
    %480 = vector.shape_cast %2 : vector<1x128xi1> to vector<1x128xi1>
    %481 = vector.broadcast %480 : vector<1x128xi1> to vector<16x128xi1>
    %482 = arith.select %481, %477, %479 : vector<16x128xi1>, vector<16x128xf32>
    %c6_224 = arith.constant 6 : index
    %c0_225 = arith.constant 0 : index
    %c0_226 = arith.constant 0 : index
    %483 = vector.load %arg15[%c6_224, %c0_225, %c0_226] : memref<8x16x128xf32, #tpu.memory_space<vmem>>, vector<1x16x128xf32>
    %484 = vector.shape_cast %483 : vector<1x16x128xf32> to vector<16x128xf32>
    %c1_227 = arith.constant 1 : index
    %c0_228 = arith.constant 0 : index
    %c0_229 = arith.constant 0 : index
    %485 = vector.load %arg15[%c1_227, %c0_228, %c0_229] : memref<8x16x128xf32, #tpu.memory_space<vmem>>, vector<1x16x128xf32>
    %486 = vector.shape_cast %485 : vector<1x16x128xf32> to vector<16x128xf32>
    %487 = vector.shape_cast %2 : vector<1x128xi1> to vector<1x128xi1>
    %488 = vector.broadcast %487 : vector<1x128xi1> to vector<16x128xi1>
    %489 = arith.select %488, %484, %486 : vector<16x128xi1>, vector<16x128xf32>
    %c7_230 = arith.constant 7 : index
    %c0_231 = arith.constant 0 : index
    %c0_232 = arith.constant 0 : index
    %490 = vector.load %arg15[%c7_230, %c0_231, %c0_232] : memref<8x16x128xf32, #tpu.memory_space<vmem>>, vector<1x16x128xf32>
    %491 = vector.shape_cast %490 : vector<1x16x128xf32> to vector<16x128xf32>
    %c0_233 = arith.constant 0 : index
    %c0_234 = arith.constant 0 : index
    %c0_235 = arith.constant 0 : index
    %492 = vector.load %arg15[%c0_233, %c0_234, %c0_235] : memref<8x16x128xf32, #tpu.memory_space<vmem>>, vector<1x16x128xf32>
    %493 = vector.shape_cast %492 : vector<1x16x128xf32> to vector<16x128xf32>
    %494 = vector.shape_cast %2 : vector<1x128xi1> to vector<1x128xi1>
    %495 = vector.broadcast %494 : vector<1x128xi1> to vector<16x128xi1>
    %496 = arith.select %495, %491, %493 : vector<16x128xi1>, vector<16x128xf32>
    %497 = vector.shape_cast %447 : vector<16x128xf32> to vector<1x16x128xf32>
    %498 = vector.shape_cast %454 : vector<16x128xf32> to vector<1x16x128xf32>
    %499 = vector.shape_cast %461 : vector<16x128xf32> to vector<1x16x128xf32>
    %500 = vector.shape_cast %468 : vector<16x128xf32> to vector<1x16x128xf32>
    %501 = vector.shape_cast %475 : vector<16x128xf32> to vector<1x16x128xf32>
    %502 = vector.shape_cast %482 : vector<16x128xf32> to vector<1x16x128xf32>
    %503 = vector.shape_cast %489 : vector<16x128xf32> to vector<1x16x128xf32>
    %504 = vector.shape_cast %496 : vector<16x128xf32> to vector<1x16x128xf32>
    %505 = tpu.concatenate %497, %498, %499, %500, %501, %502, %503, %504 in 0 : vector<1x16x128xf32>, vector<1x16x128xf32>, vector<1x16x128xf32>, vector<1x16x128xf32>, vector<1x16x128xf32>, vector<1x16x128xf32>, vector<1x16x128xf32>, vector<1x16x128xf32> -> vector<8x16x128xf32>
    %506 = vector.shape_cast %505 : vector<8x16x128xf32> to vector<128x128xf32>
    %c0_236 = arith.constant 0 : index
    %c0_237 = arith.constant 0 : index
    %507 = vector.load %arg7[%c0_236, %c0_237] : memref<128x512xf32, #tpu.memory_space<vmem>>, vector<128x512xf32>
    %cst_238 = arith.constant dense<0.000000e+00> : vector<128x512xf32>
    %508 = tpu.matmul %506, %507, %cst_238 {dimension_numbers = #tpu.dot_dimension_numbers<[1], [0], [0], [1], [0, 0, 1, 1], [], []>} : vector<128x128xf32>, vector<128x512xf32>, vector<128x512xf32> -> vector<128x512xf32>
    %c0_239 = arith.constant 0 : index
    %c0_240 = arith.constant 0 : index
    %509 = vector.load %arg8[%c0_239, %c0_240] : memref<1x512xf32, #tpu.memory_space<vmem>>, vector<1x512xf32>
    %510 = vector.broadcast %509 : vector<1x512xf32> to vector<128x512xf32>
    %511 = arith.addf %508, %510 : vector<128x512xf32>
    %512 = vector.shape_cast %511 : vector<128x512xf32> to vector<8x16x512xf32>
    %c0_241 = arith.constant 0 : index
    %c0_242 = arith.constant 0 : index
    %c0_243 = arith.constant 0 : index
    %513 = vector.load %arg13[%c0_241, %c0_242, %c0_243] : memref<8x16x512xf32, #tpu.memory_space<vmem>>, vector<8x16x512xf32>
    tpu.vector_store %arg13[%c0_241, %c0_242, %c0_243], %512 {strides = array<i32>} : memref<8x16x512xf32, #tpu.memory_space<vmem>>, vector<8x16x512xf32>,
    %c0_244 = arith.constant 0 : index
    %c0_245 = arith.constant 0 : index
    %c0_246 = arith.constant 0 : index
    %514 = vector.load %arg13[%c0_244, %c0_245, %c0_246] : memref<8x16x512xf32, #tpu.memory_space<vmem>>, vector<1x16x512xf32>
    %515 = vector.shape_cast %514 : vector<1x16x512xf32> to vector<16x512xf32>
    %c7_247 = arith.constant 7 : index
    %c0_248 = arith.constant 0 : index
    %c0_249 = arith.constant 0 : index
    %516 = vector.load %arg13[%c7_247, %c0_248, %c0_249] : memref<8x16x512xf32, #tpu.memory_space<vmem>>, vector<1x16x512xf32>
    %517 = vector.shape_cast %516 : vector<1x16x512xf32> to vector<16x512xf32>
    %518 = vector.shape_cast %21 : vector<1x512xi1> to vector<1x512xi1>
    %519 = vector.broadcast %518 : vector<1x512xi1> to vector<16x512xi1>
    %520 = arith.select %519, %515, %517 : vector<16x512xi1>, vector<16x512xf32>
    %c0_250 = arith.constant 0 : index
    %c0_251 = arith.constant 0 : index
    %c0_252 = arith.constant 0 : index
    %521 = vector.load %arg14[%c0_250, %c0_251, %c0_252] : memref<8x16x512xf32, #tpu.memory_space<vmem>>, vector<1x16x512xf32>
    %522 = vector.shape_cast %521 : vector<1x16x512xf32> to vector<16x512xf32>
    %523 = vector.shape_cast %520 : vector<16x512xf32> to vector<1x16x512xf32>
    tpu.vector_store %arg14[%c0_250, %c0_251, %c0_252], %523 {strides = array<i32>} : memref<8x16x512xf32, #tpu.memory_space<vmem>>, vector<1x16x512xf32>,
    %c1_253 = arith.constant 1 : index
    %c0_254 = arith.constant 0 : index
    %c0_255 = arith.constant 0 : index
    %524 = vector.load %arg13[%c1_253, %c0_254, %c0_255] : memref<8x16x512xf32, #tpu.memory_space<vmem>>, vector<1x16x512xf32>
    %525 = vector.shape_cast %524 : vector<1x16x512xf32> to vector<16x512xf32>
    %c6_256 = arith.constant 6 : index
    %c0_257 = arith.constant 0 : index
    %c0_258 = arith.constant 0 : index
    %526 = vector.load %arg13[%c6_256, %c0_257, %c0_258] : memref<8x16x512xf32, #tpu.memory_space<vmem>>, vector<1x16x512xf32>
    %527 = vector.shape_cast %526 : vector<1x16x512xf32> to vector<16x512xf32>
    %528 = vector.shape_cast %21 : vector<1x512xi1> to vector<1x512xi1>
    %529 = vector.broadcast %528 : vector<1x512xi1> to vector<16x512xi1>
    %530 = arith.select %529, %525, %527 : vector<16x512xi1>, vector<16x512xf32>
    %c1_259 = arith.constant 1 : index
    %c0_260 = arith.constant 0 : index
    %c0_261 = arith.constant 0 : index
    %531 = vector.load %arg14[%c1_259, %c0_260, %c0_261] : memref<8x16x512xf32, #tpu.memory_space<vmem>>, vector<1x16x512xf32>
    %532 = vector.shape_cast %531 : vector<1x16x512xf32> to vector<16x512xf32>
    %533 = vector.shape_cast %530 : vector<16x512xf32> to vector<1x16x512xf32>
    tpu.vector_store %arg14[%c1_259, %c0_260, %c0_261], %533 {strides = array<i32>} : memref<8x16x512xf32, #tpu.memory_space<vmem>>, vector<1x16x512xf32>,
    %c2_262 = arith.constant 2 : index
    %c0_263 = arith.constant 0 : index
    %c0_264 = arith.constant 0 : index
    %534 = vector.load %arg13[%c2_262, %c0_263, %c0_264] : memref<8x16x512xf32, #tpu.memory_space<vmem>>, vector<1x16x512xf32>
    %535 = vector.shape_cast %534 : vector<1x16x512xf32> to vector<16x512xf32>
    %c5_265 = arith.constant 5 : index
    %c0_266 = arith.constant 0 : index
    %c0_267 = arith.constant 0 : index
    %536 = vector.load %arg13[%c5_265, %c0_266, %c0_267] : memref<8x16x512xf32, #tpu.memory_space<vmem>>, vector<1x16x512xf32>
    %537 = vector.shape_cast %536 : vector<1x16x512xf32> to vector<16x512xf32>
    %538 = vector.shape_cast %21 : vector<1x512xi1> to vector<1x512xi1>
    %539 = vector.broadcast %538 : vector<1x512xi1> to vector<16x512xi1>
    %540 = arith.select %539, %535, %537 : vector<16x512xi1>, vector<16x512xf32>
    %c2_268 = arith.constant 2 : index
    %c0_269 = arith.constant 0 : index
    %c0_270 = arith.constant 0 : index
    %541 = vector.load %arg14[%c2_268, %c0_269, %c0_270] : memref<8x16x512xf32, #tpu.memory_space<vmem>>, vector<1x16x512xf32>
    %542 = vector.shape_cast %541 : vector<1x16x512xf32> to vector<16x512xf32>
    %543 = vector.shape_cast %540 : vector<16x512xf32> to vector<1x16x512xf32>
    tpu.vector_store %arg14[%c2_268, %c0_269, %c0_270], %543 {strides = array<i32>} : memref<8x16x512xf32, #tpu.memory_space<vmem>>, vector<1x16x512xf32>,
    %c3_271 = arith.constant 3 : index
    %c0_272 = arith.constant 0 : index
    %c0_273 = arith.constant 0 : index
    %544 = vector.load %arg13[%c3_271, %c0_272, %c0_273] : memref<8x16x512xf32, #tpu.memory_space<vmem>>, vector<1x16x512xf32>
    %545 = vector.shape_cast %544 : vector<1x16x512xf32> to vector<16x512xf32>
    %c4_274 = arith.constant 4 : index
    %c0_275 = arith.constant 0 : index
    %c0_276 = arith.constant 0 : index
    %546 = vector.load %arg13[%c4_274, %c0_275, %c0_276] : memref<8x16x512xf32, #tpu.memory_space<vmem>>, vector<1x16x512xf32>
    %547 = vector.shape_cast %546 : vector<1x16x512xf32> to vector<16x512xf32>
    %548 = vector.shape_cast %21 : vector<1x512xi1> to vector<1x512xi1>
    %549 = vector.broadcast %548 : vector<1x512xi1> to vector<16x512xi1>
    %550 = arith.select %549, %545, %547 : vector<16x512xi1>, vector<16x512xf32>
    %c3_277 = arith.constant 3 : index
    %c0_278 = arith.constant 0 : index
    %c0_279 = arith.constant 0 : index
    %551 = vector.load %arg14[%c3_277, %c0_278, %c0_279] : memref<8x16x512xf32, #tpu.memory_space<vmem>>, vector<1x16x512xf32>
    %552 = vector.shape_cast %551 : vector<1x16x512xf32> to vector<16x512xf32>
    %553 = vector.shape_cast %550 : vector<16x512xf32> to vector<1x16x512xf32>
    tpu.vector_store %arg14[%c3_277, %c0_278, %c0_279], %553 {strides = array<i32>} : memref<8x16x512xf32, #tpu.memory_space<vmem>>, vector<1x16x512xf32>,
    %c4_280 = arith.constant 4 : index
    %c0_281 = arith.constant 0 : index
    %c0_282 = arith.constant 0 : index
    %554 = vector.load %arg13[%c4_280, %c0_281, %c0_282] : memref<8x16x512xf32, #tpu.memory_space<vmem>>, vector<1x16x512xf32>
    %555 = vector.shape_cast %554 : vector<1x16x512xf32> to vector<16x512xf32>
    %c3_283 = arith.constant 3 : index
    %c0_284 = arith.constant 0 : index
    %c0_285 = arith.constant 0 : index
    %556 = vector.load %arg13[%c3_283, %c0_284, %c0_285] : memref<8x16x512xf32, #tpu.memory_space<vmem>>, vector<1x16x512xf32>
    %557 = vector.shape_cast %556 : vector<1x16x512xf32> to vector<16x512xf32>
    %558 = vector.shape_cast %21 : vector<1x512xi1> to vector<1x512xi1>
    %559 = vector.broadcast %558 : vector<1x512xi1> to vector<16x512xi1>
    %560 = arith.select %559, %555, %557 : vector<16x512xi1>, vector<16x512xf32>
    %c4_286 = arith.constant 4 : index
    %c0_287 = arith.constant 0 : index
    %c0_288 = arith.constant 0 : index
    %561 = vector.load %arg14[%c4_286, %c0_287, %c0_288] : memref<8x16x512xf32, #tpu.memory_space<vmem>>, vector<1x16x512xf32>
    %562 = vector.shape_cast %561 : vector<1x16x512xf32> to vector<16x512xf32>
    %563 = vector.shape_cast %560 : vector<16x512xf32> to vector<1x16x512xf32>
    tpu.vector_store %arg14[%c4_286, %c0_287, %c0_288], %563 {strides = array<i32>} : memref<8x16x512xf32, #tpu.memory_space<vmem>>, vector<1x16x512xf32>,
    %c5_289 = arith.constant 5 : index
    %c0_290 = arith.constant 0 : index
    %c0_291 = arith.constant 0 : index
    %564 = vector.load %arg13[%c5_289, %c0_290, %c0_291] : memref<8x16x512xf32, #tpu.memory_space<vmem>>, vector<1x16x512xf32>
    %565 = vector.shape_cast %564 : vector<1x16x512xf32> to vector<16x512xf32>
    %c2_292 = arith.constant 2 : index
    %c0_293 = arith.constant 0 : index
    %c0_294 = arith.constant 0 : index
    %566 = vector.load %arg13[%c2_292, %c0_293, %c0_294] : memref<8x16x512xf32, #tpu.memory_space<vmem>>, vector<1x16x512xf32>
    %567 = vector.shape_cast %566 : vector<1x16x512xf32> to vector<16x512xf32>
    %568 = vector.shape_cast %21 : vector<1x512xi1> to vector<1x512xi1>
    %569 = vector.broadcast %568 : vector<1x512xi1> to vector<16x512xi1>
    %570 = arith.select %569, %565, %567 : vector<16x512xi1>, vector<16x512xf32>
    %c5_295 = arith.constant 5 : index
    %c0_296 = arith.constant 0 : index
    %c0_297 = arith.constant 0 : index
    %571 = vector.load %arg14[%c5_295, %c0_296, %c0_297] : memref<8x16x512xf32, #tpu.memory_space<vmem>>, vector<1x16x512xf32>
    %572 = vector.shape_cast %571 : vector<1x16x512xf32> to vector<16x512xf32>
    %573 = vector.shape_cast %570 : vector<16x512xf32> to vector<1x16x512xf32>
    tpu.vector_store %arg14[%c5_295, %c0_296, %c0_297], %573 {strides = array<i32>} : memref<8x16x512xf32, #tpu.memory_space<vmem>>, vector<1x16x512xf32>,
    %c6_298 = arith.constant 6 : index
    %c0_299 = arith.constant 0 : index
    %c0_300 = arith.constant 0 : index
    %574 = vector.load %arg13[%c6_298, %c0_299, %c0_300] : memref<8x16x512xf32, #tpu.memory_space<vmem>>, vector<1x16x512xf32>
    %575 = vector.shape_cast %574 : vector<1x16x512xf32> to vector<16x512xf32>
    %c1_301 = arith.constant 1 : index
    %c0_302 = arith.constant 0 : index
    %c0_303 = arith.constant 0 : index
    %576 = vector.load %arg13[%c1_301, %c0_302, %c0_303] : memref<8x16x512xf32, #tpu.memory_space<vmem>>, vector<1x16x512xf32>
    %577 = vector.shape_cast %576 : vector<1x16x512xf32> to vector<16x512xf32>
    %578 = vector.shape_cast %21 : vector<1x512xi1> to vector<1x512xi1>
    %579 = vector.broadcast %578 : vector<1x512xi1> to vector<16x512xi1>
    %580 = arith.select %579, %575, %577 : vector<16x512xi1>, vector<16x512xf32>
    %c6_304 = arith.constant 6 : index
    %c0_305 = arith.constant 0 : index
    %c0_306 = arith.constant 0 : index
    %581 = vector.load %arg14[%c6_304, %c0_305, %c0_306] : memref<8x16x512xf32, #tpu.memory_space<vmem>>, vector<1x16x512xf32>
    %582 = vector.shape_cast %581 : vector<1x16x512xf32> to vector<16x512xf32>
    %583 = vector.shape_cast %580 : vector<16x512xf32> to vector<1x16x512xf32>
    tpu.vector_store %arg14[%c6_304, %c0_305, %c0_306], %583 {strides = array<i32>} : memref<8x16x512xf32, #tpu.memory_space<vmem>>, vector<1x16x512xf32>,
    %c7_307 = arith.constant 7 : index
    %c0_308 = arith.constant 0 : index
    %c0_309 = arith.constant 0 : index
    %584 = vector.load %arg13[%c7_307, %c0_308, %c0_309] : memref<8x16x512xf32, #tpu.memory_space<vmem>>, vector<1x16x512xf32>
    %585 = vector.shape_cast %584 : vector<1x16x512xf32> to vector<16x512xf32>
    %c0_310 = arith.constant 0 : index
    %c0_311 = arith.constant 0 : index
    %c0_312 = arith.constant 0 : index
    %586 = vector.load %arg13[%c0_310, %c0_311, %c0_312] : memref<8x16x512xf32, #tpu.memory_space<vmem>>, vector<1x16x512xf32>
    %587 = vector.shape_cast %586 : vector<1x16x512xf32> to vector<16x512xf32>
    %588 = vector.shape_cast %21 : vector<1x512xi1> to vector<1x512xi1>
    %589 = vector.broadcast %588 : vector<1x512xi1> to vector<16x512xi1>
    %590 = arith.select %589, %585, %587 : vector<16x512xi1>, vector<16x512xf32>
    %c7_313 = arith.constant 7 : index
    %c0_314 = arith.constant 0 : index
    %c0_315 = arith.constant 0 : index
    %591 = vector.load %arg14[%c7_313, %c0_314, %c0_315] : memref<8x16x512xf32, #tpu.memory_space<vmem>>, vector<1x16x512xf32>
    %592 = vector.shape_cast %591 : vector<1x16x512xf32> to vector<16x512xf32>
    %593 = vector.shape_cast %590 : vector<16x512xf32> to vector<1x16x512xf32>
    tpu.vector_store %arg14[%c7_313, %c0_314, %c0_315], %593 {strides = array<i32>} : memref<8x16x512xf32, #tpu.memory_space<vmem>>, vector<1x16x512xf32>,
    %cst_316 = arith.constant 0.000000e+00 : f32
    %594 = vector.broadcast %cst_316 : f32 to vector<16x128xf32>
    %cst_317 = arith.constant 0.000000e+00 : f32
    %595 = vector.broadcast %cst_317 : f32 to vector<16x128xf32>
    %c0_318 = arith.constant 0 : index
    %c0_319 = arith.constant 0 : index
    %c0_320 = arith.constant 0 : index
    %596 = vector.load %arg14[%c0_318, %c0_319, %c0_320] : memref<8x16x512xf32, #tpu.memory_space<vmem>>, vector<1x16x512xf32>
    %597 = vector.shape_cast %596 : vector<1x16x512xf32> to vector<16x512xf32>
    %c0_321 = arith.constant 0 : index
    %c0_322 = arith.constant 0 : index
    %598 = vector.load %arg9[%c0_321, %c0_322] : memref<128x512xf32, #tpu.memory_space<vmem>>, vector<128x512xf32>
    %cst_323 = arith.constant dense<0.000000e+00> : vector<16x512xf32>
    %599 = tpu.matmul %594, %598, %cst_323 {dimension_numbers = #tpu.dot_dimension_numbers<[1], [0], [0], [1], [0, 0, 1, 1], [], []>} : vector<16x128xf32>, vector<128x512xf32>, vector<16x512xf32> -> vector<16x512xf32>
    %600 = arith.addf %597, %599 : vector<16x512xf32>
    %601 = vector.extract_strided_slice %600 {offsets = [0, 0], sizes = [16, 128], strides = [1, 1]} : vector<16x512xf32> to vector<16x128xf32>
    %602 = arith.negf %601 : vector<16x128xf32>
    %603 = math.exp %602 : vector<16x128xf32>
    %cst_324 = arith.constant 1.000000e+00 : f32
    %604 = vector.broadcast %cst_324 : f32 to vector<16x128xf32>
    %605 = arith.addf %604, %603 : vector<16x128xf32>
    %606 = arith.divf %604, %605 : vector<16x128xf32>
    %607 = vector.extract_strided_slice %600 {offsets = [0, 128], sizes = [16, 128], strides = [1, 1]} : vector<16x512xf32> to vector<16x128xf32>
    %608 = arith.negf %607 : vector<16x128xf32>
    %609 = math.exp %608 : vector<16x128xf32>
    %cst_325 = arith.constant 1.000000e+00 : f32
    %610 = vector.broadcast %cst_325 : f32 to vector<16x128xf32>
    %611 = arith.addf %610, %609 : vector<16x128xf32>
    %612 = arith.divf %610, %611 : vector<16x128xf32>
    %613 = vector.extract_strided_slice %600 {offsets = [0, 256], sizes = [16, 128], strides = [1, 1]} : vector<16x512xf32> to vector<16x128xf32>
    %614 = math.tanh %613 : vector<16x128xf32>
    %615 = vector.extract_strided_slice %600 {offsets = [0, 384], sizes = [16, 128], strides = [1, 1]} : vector<16x512xf32> to vector<16x128xf32>
    %616 = arith.negf %615 : vector<16x128xf32>
    %617 = math.exp %616 : vector<16x128xf32>
    %cst_326 = arith.constant 1.000000e+00 : f32
    %618 = vector.broadcast %cst_326 : f32 to vector<16x128xf32>
    %619 = arith.addf %618, %617 : vector<16x128xf32>
    %620 = arith.divf %618, %619 : vector<16x128xf32>
    %621 = arith.mulf %612, %595 : vector<16x128xf32>
    %622 = arith.mulf %606, %614 : vector<16x128xf32>
    %623 = arith.addf %621, %622 : vector<16x128xf32>
    %624 = math.tanh %623 : vector<16x128xf32>
    %625 = arith.mulf %620, %624 : vector<16x128xf32>
    %c0_i32_327 = arith.constant 0 : i32
    %c7_i32_328 = arith.constant 7 : i32
    %626 = vector.broadcast %c0_i32_327 : i32 to vector<1x128xi32>
    %627 = vector.broadcast %c7_i32_328 : i32 to vector<1x128xi32>
    %628 = arith.select %2, %626, %627 : vector<1x128xi1>, vector<1x128xi32>
    %629 = vector.broadcast %22 : vector<16x1xi32> to vector<16x128xi32>
    %630 = vector.broadcast %628 : vector<1x128xi32> to vector<16x128xi32>
    %631 = arith.cmpi sgt, %629, %630 : vector<16x128xi32>
    %632 = arith.select %631, %625, %594 : vector<16x128xi1>, vector<16x128xf32>
    %633 = arith.select %631, %623, %595 : vector<16x128xi1>, vector<16x128xf32>
    %c0_329 = arith.constant 0 : index
    %c0_330 = arith.constant 0 : index
    %c0_331 = arith.constant 0 : index
    %634 = vector.load %arg15[%c0_329, %c0_330, %c0_331] : memref<8x16x128xf32, #tpu.memory_space<vmem>>, vector<1x16x128xf32>
    %635 = vector.shape_cast %634 : vector<1x16x128xf32> to vector<16x128xf32>
    %636 = vector.shape_cast %632 : vector<16x128xf32> to vector<1x16x128xf32>
    tpu.vector_store %arg15[%c0_329, %c0_330, %c0_331], %636 {strides = array<i32>} : memref<8x16x128xf32, #tpu.memory_space<vmem>>, vector<1x16x128xf32>,
    %c1_332 = arith.constant 1 : index
    %c0_333 = arith.constant 0 : index
    %c0_334 = arith.constant 0 : index
    %637 = vector.load %arg14[%c1_332, %c0_333, %c0_334] : memref<8x16x512xf32, #tpu.memory_space<vmem>>, vector<1x16x512xf32>
    %638 = vector.shape_cast %637 : vector<1x16x512xf32> to vector<16x512xf32>
    %c0_335 = arith.constant 0 : index
    %c0_336 = arith.constant 0 : index
    %639 = vector.load %arg9[%c0_335, %c0_336] : memref<128x512xf32, #tpu.memory_space<vmem>>, vector<128x512xf32>
    %cst_337 = arith.constant dense<0.000000e+00> : vector<16x512xf32>
    %640 = tpu.matmul %632, %639, %cst_337 {dimension_numbers = #tpu.dot_dimension_numbers<[1], [0], [0], [1], [0, 0, 1, 1], [], []>} : vector<16x128xf32>, vector<128x512xf32>, vector<16x512xf32> -> vector<16x512xf32>
    %641 = arith.addf %638, %640 : vector<16x512xf32>
    %642 = vector.extract_strided_slice %641 {offsets = [0, 0], sizes = [16, 128], strides = [1, 1]} : vector<16x512xf32> to vector<16x128xf32>
    %643 = arith.negf %642 : vector<16x128xf32>
    %644 = math.exp %643 : vector<16x128xf32>
    %cst_338 = arith.constant 1.000000e+00 : f32
    %645 = vector.broadcast %cst_338 : f32 to vector<16x128xf32>
    %646 = arith.addf %645, %644 : vector<16x128xf32>
    %647 = arith.divf %645, %646 : vector<16x128xf32>
    %648 = vector.extract_strided_slice %641 {offsets = [0, 128], sizes = [16, 128], strides = [1, 1]} : vector<16x512xf32> to vector<16x128xf32>
    %649 = arith.negf %648 : vector<16x128xf32>
    %650 = math.exp %649 : vector<16x128xf32>
    %cst_339 = arith.constant 1.000000e+00 : f32
    %651 = vector.broadcast %cst_339 : f32 to vector<16x128xf32>
    %652 = arith.addf %651, %650 : vector<16x128xf32>
    %653 = arith.divf %651, %652 : vector<16x128xf32>
    %654 = vector.extract_strided_slice %641 {offsets = [0, 256], sizes = [16, 128], strides = [1, 1]} : vector<16x512xf32> to vector<16x128xf32>
    %655 = math.tanh %654 : vector<16x128xf32>
    %656 = vector.extract_strided_slice %641 {offsets = [0, 384], sizes = [16, 128], strides = [1, 1]} : vector<16x512xf32> to vector<16x128xf32>
    %657 = arith.negf %656 : vector<16x128xf32>
    %658 = math.exp %657 : vector<16x128xf32>
    %cst_340 = arith.constant 1.000000e+00 : f32
    %659 = vector.broadcast %cst_340 : f32 to vector<16x128xf32>
    %660 = arith.addf %659, %658 : vector<16x128xf32>
    %661 = arith.divf %659, %660 : vector<16x128xf32>
    %662 = arith.mulf %653, %633 : vector<16x128xf32>
    %663 = arith.mulf %647, %655 : vector<16x128xf32>
    %664 = arith.addf %662, %663 : vector<16x128xf32>
    %665 = math.tanh %664 : vector<16x128xf32>
    %666 = arith.mulf %661, %665 : vector<16x128xf32>
    %c1_i32_341 = arith.constant 1 : i32
    %c6_i32_342 = arith.constant 6 : i32
    %667 = vector.broadcast %c1_i32_341 : i32 to vector<1x128xi32>
    %668 = vector.broadcast %c6_i32_342 : i32 to vector<1x128xi32>
    %669 = arith.select %2, %667, %668 : vector<1x128xi1>, vector<1x128xi32>
    %670 = vector.broadcast %22 : vector<16x1xi32> to vector<16x128xi32>
    %671 = vector.broadcast %669 : vector<1x128xi32> to vector<16x128xi32>
    %672 = arith.cmpi sgt, %670, %671 : vector<16x128xi32>
    %673 = arith.select %672, %666, %632 : vector<16x128xi1>, vector<16x128xf32>
    %674 = arith.select %672, %664, %633 : vector<16x128xi1>, vector<16x128xf32>
    %c1_343 = arith.constant 1 : index
    %c0_344 = arith.constant 0 : index
    %c0_345 = arith.constant 0 : index
    %675 = vector.load %arg15[%c1_343, %c0_344, %c0_345] : memref<8x16x128xf32, #tpu.memory_space<vmem>>, vector<1x16x128xf32>
    %676 = vector.shape_cast %675 : vector<1x16x128xf32> to vector<16x128xf32>
    %677 = vector.shape_cast %673 : vector<16x128xf32> to vector<1x16x128xf32>
    tpu.vector_store %arg15[%c1_343, %c0_344, %c0_345], %677 {strides = array<i32>} : memref<8x16x128xf32, #tpu.memory_space<vmem>>, vector<1x16x128xf32>,
    %c2_346 = arith.constant 2 : index
    %c0_347 = arith.constant 0 : index
    %c0_348 = arith.constant 0 : index
    %678 = vector.load %arg14[%c2_346, %c0_347, %c0_348] : memref<8x16x512xf32, #tpu.memory_space<vmem>>, vector<1x16x512xf32>
    %679 = vector.shape_cast %678 : vector<1x16x512xf32> to vector<16x512xf32>
    %c0_349 = arith.constant 0 : index
    %c0_350 = arith.constant 0 : index
    %680 = vector.load %arg9[%c0_349, %c0_350] : memref<128x512xf32, #tpu.memory_space<vmem>>, vector<128x512xf32>
    %cst_351 = arith.constant dense<0.000000e+00> : vector<16x512xf32>
    %681 = tpu.matmul %673, %680, %cst_351 {dimension_numbers = #tpu.dot_dimension_numbers<[1], [0], [0], [1], [0, 0, 1, 1], [], []>} : vector<16x128xf32>, vector<128x512xf32>, vector<16x512xf32> -> vector<16x512xf32>
    %682 = arith.addf %679, %681 : vector<16x512xf32>
    %683 = vector.extract_strided_slice %682 {offsets = [0, 0], sizes = [16, 128], strides = [1, 1]} : vector<16x512xf32> to vector<16x128xf32>
    %684 = arith.negf %683 : vector<16x128xf32>
    %685 = math.exp %684 : vector<16x128xf32>
    %cst_352 = arith.constant 1.000000e+00 : f32
    %686 = vector.broadcast %cst_352 : f32 to vector<16x128xf32>
    %687 = arith.addf %686, %685 : vector<16x128xf32>
    %688 = arith.divf %686, %687 : vector<16x128xf32>
    %689 = vector.extract_strided_slice %682 {offsets = [0, 128], sizes = [16, 128], strides = [1, 1]} : vector<16x512xf32> to vector<16x128xf32>
    %690 = arith.negf %689 : vector<16x128xf32>
    %691 = math.exp %690 : vector<16x128xf32>
    %cst_353 = arith.constant 1.000000e+00 : f32
    %692 = vector.broadcast %cst_353 : f32 to vector<16x128xf32>
    %693 = arith.addf %692, %691 : vector<16x128xf32>
    %694 = arith.divf %692, %693 : vector<16x128xf32>
    %695 = vector.extract_strided_slice %682 {offsets = [0, 256], sizes = [16, 128], strides = [1, 1]} : vector<16x512xf32> to vector<16x128xf32>
    %696 = math.tanh %695 : vector<16x128xf32>
    %697 = vector.extract_strided_slice %682 {offsets = [0, 384], sizes = [16, 128], strides = [1, 1]} : vector<16x512xf32> to vector<16x128xf32>
    %698 = arith.negf %697 : vector<16x128xf32>
    %699 = math.exp %698 : vector<16x128xf32>
    %cst_354 = arith.constant 1.000000e+00 : f32
    %700 = vector.broadcast %cst_354 : f32 to vector<16x128xf32>
    %701 = arith.addf %700, %699 : vector<16x128xf32>
    %702 = arith.divf %700, %701 : vector<16x128xf32>
    %703 = arith.mulf %694, %674 : vector<16x128xf32>
    %704 = arith.mulf %688, %696 : vector<16x128xf32>
    %705 = arith.addf %703, %704 : vector<16x128xf32>
    %706 = math.tanh %705 : vector<16x128xf32>
    %707 = arith.mulf %702, %706 : vector<16x128xf32>
    %c2_i32_355 = arith.constant 2 : i32
    %c5_i32_356 = arith.constant 5 : i32
    %708 = vector.broadcast %c2_i32_355 : i32 to vector<1x128xi32>
    %709 = vector.broadcast %c5_i32_356 : i32 to vector<1x128xi32>
    %710 = arith.select %2, %708, %709 : vector<1x128xi1>, vector<1x128xi32>
    %711 = vector.broadcast %22 : vector<16x1xi32> to vector<16x128xi32>
    %712 = vector.broadcast %710 : vector<1x128xi32> to vector<16x128xi32>
    %713 = arith.cmpi sgt, %711, %712 : vector<16x128xi32>
    %714 = arith.select %713, %707, %673 : vector<16x128xi1>, vector<16x128xf32>
    %715 = arith.select %713, %705, %674 : vector<16x128xi1>, vector<16x128xf32>
    %c2_357 = arith.constant 2 : index
    %c0_358 = arith.constant 0 : index
    %c0_359 = arith.constant 0 : index
    %716 = vector.load %arg15[%c2_357, %c0_358, %c0_359] : memref<8x16x128xf32, #tpu.memory_space<vmem>>, vector<1x16x128xf32>
    %717 = vector.shape_cast %716 : vector<1x16x128xf32> to vector<16x128xf32>
    %718 = vector.shape_cast %714 : vector<16x128xf32> to vector<1x16x128xf32>
    tpu.vector_store %arg15[%c2_357, %c0_358, %c0_359], %718 {strides = array<i32>} : memref<8x16x128xf32, #tpu.memory_space<vmem>>, vector<1x16x128xf32>,
    %c3_360 = arith.constant 3 : index
    %c0_361 = arith.constant 0 : index
    %c0_362 = arith.constant 0 : index
    %719 = vector.load %arg14[%c3_360, %c0_361, %c0_362] : memref<8x16x512xf32, #tpu.memory_space<vmem>>, vector<1x16x512xf32>
    %720 = vector.shape_cast %719 : vector<1x16x512xf32> to vector<16x512xf32>
    %c0_363 = arith.constant 0 : index
    %c0_364 = arith.constant 0 : index
    %721 = vector.load %arg9[%c0_363, %c0_364] : memref<128x512xf32, #tpu.memory_space<vmem>>, vector<128x512xf32>
    %cst_365 = arith.constant dense<0.000000e+00> : vector<16x512xf32>
    %722 = tpu.matmul %714, %721, %cst_365 {dimension_numbers = #tpu.dot_dimension_numbers<[1], [0], [0], [1], [0, 0, 1, 1], [], []>} : vector<16x128xf32>, vector<128x512xf32>, vector<16x512xf32> -> vector<16x512xf32>
    %723 = arith.addf %720, %722 : vector<16x512xf32>
    %724 = vector.extract_strided_slice %723 {offsets = [0, 0], sizes = [16, 128], strides = [1, 1]} : vector<16x512xf32> to vector<16x128xf32>
    %725 = arith.negf %724 : vector<16x128xf32>
    %726 = math.exp %725 : vector<16x128xf32>
    %cst_366 = arith.constant 1.000000e+00 : f32
    %727 = vector.broadcast %cst_366 : f32 to vector<16x128xf32>
    %728 = arith.addf %727, %726 : vector<16x128xf32>
    %729 = arith.divf %727, %728 : vector<16x128xf32>
    %730 = vector.extract_strided_slice %723 {offsets = [0, 128], sizes = [16, 128], strides = [1, 1]} : vector<16x512xf32> to vector<16x128xf32>
    %731 = arith.negf %730 : vector<16x128xf32>
    %732 = math.exp %731 : vector<16x128xf32>
    %cst_367 = arith.constant 1.000000e+00 : f32
    %733 = vector.broadcast %cst_367 : f32 to vector<16x128xf32>
    %734 = arith.addf %733, %732 : vector<16x128xf32>
    %735 = arith.divf %733, %734 : vector<16x128xf32>
    %736 = vector.extract_strided_slice %723 {offsets = [0, 256], sizes = [16, 128], strides = [1, 1]} : vector<16x512xf32> to vector<16x128xf32>
    %737 = math.tanh %736 : vector<16x128xf32>
    %738 = vector.extract_strided_slice %723 {offsets = [0, 384], sizes = [16, 128], strides = [1, 1]} : vector<16x512xf32> to vector<16x128xf32>
    %739 = arith.negf %738 : vector<16x128xf32>
    %740 = math.exp %739 : vector<16x128xf32>
    %cst_368 = arith.constant 1.000000e+00 : f32
    %741 = vector.broadcast %cst_368 : f32 to vector<16x128xf32>
    %742 = arith.addf %741, %740 : vector<16x128xf32>
    %743 = arith.divf %741, %742 : vector<16x128xf32>
    %744 = arith.mulf %735, %715 : vector<16x128xf32>
    %745 = arith.mulf %729, %737 : vector<16x128xf32>
    %746 = arith.addf %744, %745 : vector<16x128xf32>
    %747 = math.tanh %746 : vector<16x128xf32>
    %748 = arith.mulf %743, %747 : vector<16x128xf32>
    %c3_i32_369 = arith.constant 3 : i32
    %c4_i32_370 = arith.constant 4 : i32
    %749 = vector.broadcast %c3_i32_369 : i32 to vector<1x128xi32>
    %750 = vector.broadcast %c4_i32_370 : i32 to vector<1x128xi32>
    %751 = arith.select %2, %749, %750 : vector<1x128xi1>, vector<1x128xi32>
    %752 = vector.broadcast %22 : vector<16x1xi32> to vector<16x128xi32>
    %753 = vector.broadcast %751 : vector<1x128xi32> to vector<16x128xi32>
    %754 = arith.cmpi sgt, %752, %753 : vector<16x128xi32>
    %755 = arith.select %754, %748, %714 : vector<16x128xi1>, vector<16x128xf32>
    %756 = arith.select %754, %746, %715 : vector<16x128xi1>, vector<16x128xf32>
    %c3_371 = arith.constant 3 : index
    %c0_372 = arith.constant 0 : index
    %c0_373 = arith.constant 0 : index
    %757 = vector.load %arg15[%c3_371, %c0_372, %c0_373] : memref<8x16x128xf32, #tpu.memory_space<vmem>>, vector<1x16x128xf32>
    %758 = vector.shape_cast %757 : vector<1x16x128xf32> to vector<16x128xf32>
    %759 = vector.shape_cast %755 : vector<16x128xf32> to vector<1x16x128xf32>
    tpu.vector_store %arg15[%c3_371, %c0_372, %c0_373], %759 {strides = array<i32>} : memref<8x16x128xf32, #tpu.memory_space<vmem>>, vector<1x16x128xf32>,
    %c4_374 = arith.constant 4 : index
    %c0_375 = arith.constant 0 : index
    %c0_376 = arith.constant 0 : index
    %760 = vector.load %arg14[%c4_374, %c0_375, %c0_376] : memref<8x16x512xf32, #tpu.memory_space<vmem>>, vector<1x16x512xf32>
    %761 = vector.shape_cast %760 : vector<1x16x512xf32> to vector<16x512xf32>
    %c0_377 = arith.constant 0 : index
    %c0_378 = arith.constant 0 : index
    %762 = vector.load %arg9[%c0_377, %c0_378] : memref<128x512xf32, #tpu.memory_space<vmem>>, vector<128x512xf32>
    %cst_379 = arith.constant dense<0.000000e+00> : vector<16x512xf32>
    %763 = tpu.matmul %755, %762, %cst_379 {dimension_numbers = #tpu.dot_dimension_numbers<[1], [0], [0], [1], [0, 0, 1, 1], [], []>} : vector<16x128xf32>, vector<128x512xf32>, vector<16x512xf32> -> vector<16x512xf32>
    %764 = arith.addf %761, %763 : vector<16x512xf32>
    %765 = vector.extract_strided_slice %764 {offsets = [0, 0], sizes = [16, 128], strides = [1, 1]} : vector<16x512xf32> to vector<16x128xf32>
    %766 = arith.negf %765 : vector<16x128xf32>
    %767 = math.exp %766 : vector<16x128xf32>
    %cst_380 = arith.constant 1.000000e+00 : f32
    %768 = vector.broadcast %cst_380 : f32 to vector<16x128xf32>
    %769 = arith.addf %768, %767 : vector<16x128xf32>
    %770 = arith.divf %768, %769 : vector<16x128xf32>
    %771 = vector.extract_strided_slice %764 {offsets = [0, 128], sizes = [16, 128], strides = [1, 1]} : vector<16x512xf32> to vector<16x128xf32>
    %772 = arith.negf %771 : vector<16x128xf32>
    %773 = math.exp %772 : vector<16x128xf32>
    %cst_381 = arith.constant 1.000000e+00 : f32
    %774 = vector.broadcast %cst_381 : f32 to vector<16x128xf32>
    %775 = arith.addf %774, %773 : vector<16x128xf32>
    %776 = arith.divf %774, %775 : vector<16x128xf32>
    %777 = vector.extract_strided_slice %764 {offsets = [0, 256], sizes = [16, 128], strides = [1, 1]} : vector<16x512xf32> to vector<16x128xf32>
    %778 = math.tanh %777 : vector<16x128xf32>
    %779 = vector.extract_strided_slice %764 {offsets = [0, 384], sizes = [16, 128], strides = [1, 1]} : vector<16x512xf32> to vector<16x128xf32>
    %780 = arith.negf %779 : vector<16x128xf32>
    %781 = math.exp %780 : vector<16x128xf32>
    %cst_382 = arith.constant 1.000000e+00 : f32
    %782 = vector.broadcast %cst_382 : f32 to vector<16x128xf32>
    %783 = arith.addf %782, %781 : vector<16x128xf32>
    %784 = arith.divf %782, %783 : vector<16x128xf32>
    %785 = arith.mulf %776, %756 : vector<16x128xf32>
    %786 = arith.mulf %770, %778 : vector<16x128xf32>
    %787 = arith.addf %785, %786 : vector<16x128xf32>
    %788 = math.tanh %787 : vector<16x128xf32>
    %789 = arith.mulf %784, %788 : vector<16x128xf32>
    %c4_i32_383 = arith.constant 4 : i32
    %c3_i32_384 = arith.constant 3 : i32
    %790 = vector.broadcast %c4_i32_383 : i32 to vector<1x128xi32>
    %791 = vector.broadcast %c3_i32_384 : i32 to vector<1x128xi32>
    %792 = arith.select %2, %790, %791 : vector<1x128xi1>, vector<1x128xi32>
    %793 = vector.broadcast %22 : vector<16x1xi32> to vector<16x128xi32>
    %794 = vector.broadcast %792 : vector<1x128xi32> to vector<16x128xi32>
    %795 = arith.cmpi sgt, %793, %794 : vector<16x128xi32>
    %796 = arith.select %795, %789, %755 : vector<16x128xi1>, vector<16x128xf32>
    %797 = arith.select %795, %787, %756 : vector<16x128xi1>, vector<16x128xf32>
    %c4_385 = arith.constant 4 : index
    %c0_386 = arith.constant 0 : index
    %c0_387 = arith.constant 0 : index
    %798 = vector.load %arg15[%c4_385, %c0_386, %c0_387] : memref<8x16x128xf32, #tpu.memory_space<vmem>>, vector<1x16x128xf32>
    %799 = vector.shape_cast %798 : vector<1x16x128xf32> to vector<16x128xf32>
    %800 = vector.shape_cast %796 : vector<16x128xf32> to vector<1x16x128xf32>
    tpu.vector_store %arg15[%c4_385, %c0_386, %c0_387], %800 {strides = array<i32>} : memref<8x16x128xf32, #tpu.memory_space<vmem>>, vector<1x16x128xf32>,
    %c5_388 = arith.constant 5 : index
    %c0_389 = arith.constant 0 : index
    %c0_390 = arith.constant 0 : index
    %801 = vector.load %arg14[%c5_388, %c0_389, %c0_390] : memref<8x16x512xf32, #tpu.memory_space<vmem>>, vector<1x16x512xf32>
    %802 = vector.shape_cast %801 : vector<1x16x512xf32> to vector<16x512xf32>
    %c0_391 = arith.constant 0 : index
    %c0_392 = arith.constant 0 : index
    %803 = vector.load %arg9[%c0_391, %c0_392] : memref<128x512xf32, #tpu.memory_space<vmem>>, vector<128x512xf32>
    %cst_393 = arith.constant dense<0.000000e+00> : vector<16x512xf32>
    %804 = tpu.matmul %796, %803, %cst_393 {dimension_numbers = #tpu.dot_dimension_numbers<[1], [0], [0], [1], [0, 0, 1, 1], [], []>} : vector<16x128xf32>, vector<128x512xf32>, vector<16x512xf32> -> vector<16x512xf32>
    %805 = arith.addf %802, %804 : vector<16x512xf32>
    %806 = vector.extract_strided_slice %805 {offsets = [0, 0], sizes = [16, 128], strides = [1, 1]} : vector<16x512xf32> to vector<16x128xf32>
    %807 = arith.negf %806 : vector<16x128xf32>
    %808 = math.exp %807 : vector<16x128xf32>
    %cst_394 = arith.constant 1.000000e+00 : f32
    %809 = vector.broadcast %cst_394 : f32 to vector<16x128xf32>
    %810 = arith.addf %809, %808 : vector<16x128xf32>
    %811 = arith.divf %809, %810 : vector<16x128xf32>
    %812 = vector.extract_strided_slice %805 {offsets = [0, 128], sizes = [16, 128], strides = [1, 1]} : vector<16x512xf32> to vector<16x128xf32>
    %813 = arith.negf %812 : vector<16x128xf32>
    %814 = math.exp %813 : vector<16x128xf32>
    %cst_395 = arith.constant 1.000000e+00 : f32
    %815 = vector.broadcast %cst_395 : f32 to vector<16x128xf32>
    %816 = arith.addf %815, %814 : vector<16x128xf32>
    %817 = arith.divf %815, %816 : vector<16x128xf32>
    %818 = vector.extract_strided_slice %805 {offsets = [0, 256], sizes = [16, 128], strides = [1, 1]} : vector<16x512xf32> to vector<16x128xf32>
    %819 = math.tanh %818 : vector<16x128xf32>
    %820 = vector.extract_strided_slice %805 {offsets = [0, 384], sizes = [16, 128], strides = [1, 1]} : vector<16x512xf32> to vector<16x128xf32>
    %821 = arith.negf %820 : vector<16x128xf32>
    %822 = math.exp %821 : vector<16x128xf32>
    %cst_396 = arith.constant 1.000000e+00 : f32
    %823 = vector.broadcast %cst_396 : f32 to vector<16x128xf32>
    %824 = arith.addf %823, %822 : vector<16x128xf32>
    %825 = arith.divf %823, %824 : vector<16x128xf32>
    %826 = arith.mulf %817, %797 : vector<16x128xf32>
    %827 = arith.mulf %811, %819 : vector<16x128xf32>
    %828 = arith.addf %826, %827 : vector<16x128xf32>
    %829 = math.tanh %828 : vector<16x128xf32>
    %830 = arith.mulf %825, %829 : vector<16x128xf32>
    %c5_i32_397 = arith.constant 5 : i32
    %c2_i32_398 = arith.constant 2 : i32
    %831 = vector.broadcast %c5_i32_397 : i32 to vector<1x128xi32>
    %832 = vector.broadcast %c2_i32_398 : i32 to vector<1x128xi32>
    %833 = arith.select %2, %831, %832 : vector<1x128xi1>, vector<1x128xi32>
    %834 = vector.broadcast %22 : vector<16x1xi32> to vector<16x128xi32>
    %835 = vector.broadcast %833 : vector<1x128xi32> to vector<16x128xi32>
    %836 = arith.cmpi sgt, %834, %835 : vector<16x128xi32>
    %837 = arith.select %836, %830, %796 : vector<16x128xi1>, vector<16x128xf32>
    %838 = arith.select %836, %828, %797 : vector<16x128xi1>, vector<16x128xf32>
    %c5_399 = arith.constant 5 : index
    %c0_400 = arith.constant 0 : index
    %c0_401 = arith.constant 0 : index
    %839 = vector.load %arg15[%c5_399, %c0_400, %c0_401] : memref<8x16x128xf32, #tpu.memory_space<vmem>>, vector<1x16x128xf32>
    %840 = vector.shape_cast %839 : vector<1x16x128xf32> to vector<16x128xf32>
    %841 = vector.shape_cast %837 : vector<16x128xf32> to vector<1x16x128xf32>
    tpu.vector_store %arg15[%c5_399, %c0_400, %c0_401], %841 {strides = array<i32>} : memref<8x16x128xf32, #tpu.memory_space<vmem>>, vector<1x16x128xf32>,
    %c6_402 = arith.constant 6 : index
    %c0_403 = arith.constant 0 : index
    %c0_404 = arith.constant 0 : index
    %842 = vector.load %arg14[%c6_402, %c0_403, %c0_404] : memref<8x16x512xf32, #tpu.memory_space<vmem>>, vector<1x16x512xf32>
    %843 = vector.shape_cast %842 : vector<1x16x512xf32> to vector<16x512xf32>
    %c0_405 = arith.constant 0 : index
    %c0_406 = arith.constant 0 : index
    %844 = vector.load %arg9[%c0_405, %c0_406] : memref<128x512xf32, #tpu.memory_space<vmem>>, vector<128x512xf32>
    %cst_407 = arith.constant dense<0.000000e+00> : vector<16x512xf32>
    %845 = tpu.matmul %837, %844, %cst_407 {dimension_numbers = #tpu.dot_dimension_numbers<[1], [0], [0], [1], [0, 0, 1, 1], [], []>} : vector<16x128xf32>, vector<128x512xf32>, vector<16x512xf32> -> vector<16x512xf32>
    %846 = arith.addf %843, %845 : vector<16x512xf32>
    %847 = vector.extract_strided_slice %846 {offsets = [0, 0], sizes = [16, 128], strides = [1, 1]} : vector<16x512xf32> to vector<16x128xf32>
    %848 = arith.negf %847 : vector<16x128xf32>
    %849 = math.exp %848 : vector<16x128xf32>
    %cst_408 = arith.constant 1.000000e+00 : f32
    %850 = vector.broadcast %cst_408 : f32 to vector<16x128xf32>
    %851 = arith.addf %850, %849 : vector<16x128xf32>
    %852 = arith.divf %850, %851 : vector<16x128xf32>
    %853 = vector.extract_strided_slice %846 {offsets = [0, 128], sizes = [16, 128], strides = [1, 1]} : vector<16x512xf32> to vector<16x128xf32>
    %854 = arith.negf %853 : vector<16x128xf32>
    %855 = math.exp %854 : vector<16x128xf32>
    %cst_409 = arith.constant 1.000000e+00 : f32
    %856 = vector.broadcast %cst_409 : f32 to vector<16x128xf32>
    %857 = arith.addf %856, %855 : vector<16x128xf32>
    %858 = arith.divf %856, %857 : vector<16x128xf32>
    %859 = vector.extract_strided_slice %846 {offsets = [0, 256], sizes = [16, 128], strides = [1, 1]} : vector<16x512xf32> to vector<16x128xf32>
    %860 = math.tanh %859 : vector<16x128xf32>
    %861 = vector.extract_strided_slice %846 {offsets = [0, 384], sizes = [16, 128], strides = [1, 1]} : vector<16x512xf32> to vector<16x128xf32>
    %862 = arith.negf %861 : vector<16x128xf32>
    %863 = math.exp %862 : vector<16x128xf32>
    %cst_410 = arith.constant 1.000000e+00 : f32
    %864 = vector.broadcast %cst_410 : f32 to vector<16x128xf32>
    %865 = arith.addf %864, %863 : vector<16x128xf32>
    %866 = arith.divf %864, %865 : vector<16x128xf32>
    %867 = arith.mulf %858, %838 : vector<16x128xf32>
    %868 = arith.mulf %852, %860 : vector<16x128xf32>
    %869 = arith.addf %867, %868 : vector<16x128xf32>
    %870 = math.tanh %869 : vector<16x128xf32>
    %871 = arith.mulf %866, %870 : vector<16x128xf32>
    %c6_i32_411 = arith.constant 6 : i32
    %c1_i32_412 = arith.constant 1 : i32
    %872 = vector.broadcast %c6_i32_411 : i32 to vector<1x128xi32>
    %873 = vector.broadcast %c1_i32_412 : i32 to vector<1x128xi32>
    %874 = arith.select %2, %872, %873 : vector<1x128xi1>, vector<1x128xi32>
    %875 = vector.broadcast %22 : vector<16x1xi32> to vector<16x128xi32>
    %876 = vector.broadcast %874 : vector<1x128xi32> to vector<16x128xi32>
    %877 = arith.cmpi sgt, %875, %876 : vector<16x128xi32>
    %878 = arith.select %877, %871, %837 : vector<16x128xi1>, vector<16x128xf32>
    %879 = arith.select %877, %869, %838 : vector<16x128xi1>, vector<16x128xf32>
    %c6_413 = arith.constant 6 : index
    %c0_414 = arith.constant 0 : index
    %c0_415 = arith.constant 0 : index
    %880 = vector.load %arg15[%c6_413, %c0_414, %c0_415] : memref<8x16x128xf32, #tpu.memory_space<vmem>>, vector<1x16x128xf32>
    %881 = vector.shape_cast %880 : vector<1x16x128xf32> to vector<16x128xf32>
    %882 = vector.shape_cast %878 : vector<16x128xf32> to vector<1x16x128xf32>
    tpu.vector_store %arg15[%c6_413, %c0_414, %c0_415], %882 {strides = array<i32>} : memref<8x16x128xf32, #tpu.memory_space<vmem>>, vector<1x16x128xf32>,
    %c7_416 = arith.constant 7 : index
    %c0_417 = arith.constant 0 : index
    %c0_418 = arith.constant 0 : index
    %883 = vector.load %arg14[%c7_416, %c0_417, %c0_418] : memref<8x16x512xf32, #tpu.memory_space<vmem>>, vector<1x16x512xf32>
    %884 = vector.shape_cast %883 : vector<1x16x512xf32> to vector<16x512xf32>
    %c0_419 = arith.constant 0 : index
    %c0_420 = arith.constant 0 : index
    %885 = vector.load %arg9[%c0_419, %c0_420] : memref<128x512xf32, #tpu.memory_space<vmem>>, vector<128x512xf32>
    %cst_421 = arith.constant dense<0.000000e+00> : vector<16x512xf32>
    %886 = tpu.matmul %878, %885, %cst_421 {dimension_numbers = #tpu.dot_dimension_numbers<[1], [0], [0], [1], [0, 0, 1, 1], [], []>} : vector<16x128xf32>, vector<128x512xf32>, vector<16x512xf32> -> vector<16x512xf32>
    %887 = arith.addf %884, %886 : vector<16x512xf32>
    %888 = vector.extract_strided_slice %887 {offsets = [0, 0], sizes = [16, 128], strides = [1, 1]} : vector<16x512xf32> to vector<16x128xf32>
    %889 = arith.negf %888 : vector<16x128xf32>
    %890 = math.exp %889 : vector<16x128xf32>
    %cst_422 = arith.constant 1.000000e+00 : f32
    %891 = vector.broadcast %cst_422 : f32 to vector<16x128xf32>
    %892 = arith.addf %891, %890 : vector<16x128xf32>
    %893 = arith.divf %891, %892 : vector<16x128xf32>
    %894 = vector.extract_strided_slice %887 {offsets = [0, 128], sizes = [16, 128], strides = [1, 1]} : vector<16x512xf32> to vector<16x128xf32>
    %895 = arith.negf %894 : vector<16x128xf32>
    %896 = math.exp %895 : vector<16x128xf32>
    %cst_423 = arith.constant 1.000000e+00 : f32
    %897 = vector.broadcast %cst_423 : f32 to vector<16x128xf32>
    %898 = arith.addf %897, %896 : vector<16x128xf32>
    %899 = arith.divf %897, %898 : vector<16x128xf32>
    %900 = vector.extract_strided_slice %887 {offsets = [0, 256], sizes = [16, 128], strides = [1, 1]} : vector<16x512xf32> to vector<16x128xf32>
    %901 = math.tanh %900 : vector<16x128xf32>
    %902 = vector.extract_strided_slice %887 {offsets = [0, 384], sizes = [16, 128], strides = [1, 1]} : vector<16x512xf32> to vector<16x128xf32>
    %903 = arith.negf %902 : vector<16x128xf32>
    %904 = math.exp %903 : vector<16x128xf32>
    %cst_424 = arith.constant 1.000000e+00 : f32
    %905 = vector.broadcast %cst_424 : f32 to vector<16x128xf32>
    %906 = arith.addf %905, %904 : vector<16x128xf32>
    %907 = arith.divf %905, %906 : vector<16x128xf32>
    %908 = arith.mulf %899, %879 : vector<16x128xf32>
    %909 = arith.mulf %893, %901 : vector<16x128xf32>
    %910 = arith.addf %908, %909 : vector<16x128xf32>
    %911 = math.tanh %910 : vector<16x128xf32>
    %912 = arith.mulf %907, %911 : vector<16x128xf32>
    %c7_i32_425 = arith.constant 7 : i32
    %c0_i32_426 = arith.constant 0 : i32
    %913 = vector.broadcast %c7_i32_425 : i32 to vector<1x128xi32>
    %914 = vector.broadcast %c0_i32_426 : i32 to vector<1x128xi32>
    %915 = arith.select %2, %913, %914 : vector<1x128xi1>, vector<1x128xi32>
    %916 = vector.broadcast %22 : vector<16x1xi32> to vector<16x128xi32>
    %917 = vector.broadcast %915 : vector<1x128xi32> to vector<16x128xi32>
    %918 = arith.cmpi sgt, %916, %917 : vector<16x128xi32>
    %919 = arith.select %918, %912, %878 : vector<16x128xi1>, vector<16x128xf32>
    %c7_427 = arith.constant 7 : index
    %c0_428 = arith.constant 0 : index
    %c0_429 = arith.constant 0 : index
    %920 = vector.load %arg15[%c7_427, %c0_428, %c0_429] : memref<8x16x128xf32, #tpu.memory_space<vmem>>, vector<1x16x128xf32>
    %921 = vector.shape_cast %920 : vector<1x16x128xf32> to vector<16x128xf32>
    %922 = vector.shape_cast %919 : vector<16x128xf32> to vector<1x16x128xf32>
    tpu.vector_store %arg15[%c7_427, %c0_428, %c0_429], %922 {strides = array<i32>} : memref<8x16x128xf32, #tpu.memory_space<vmem>>, vector<1x16x128xf32>,
    %c0_430 = arith.constant 0 : index
    %c0_431 = arith.constant 0 : index
    %c0_432 = arith.constant 0 : index
    %923 = vector.load %arg15[%c0_430, %c0_431, %c0_432] : memref<8x16x128xf32, #tpu.memory_space<vmem>>, vector<1x16x128xf32>
    %924 = vector.shape_cast %923 : vector<1x16x128xf32> to vector<16x128xf32>
    %c7_433 = arith.constant 7 : index
    %c0_434 = arith.constant 0 : index
    %c0_435 = arith.constant 0 : index
    %925 = vector.load %arg15[%c7_433, %c0_434, %c0_435] : memref<8x16x128xf32, #tpu.memory_space<vmem>>, vector<1x16x128xf32>
    %926 = vector.shape_cast %925 : vector<1x16x128xf32> to vector<16x128xf32>
    %927 = vector.shape_cast %2 : vector<1x128xi1> to vector<1x128xi1>
    %928 = vector.broadcast %927 : vector<1x128xi1> to vector<16x128xi1>
    %929 = arith.select %928, %924, %926 : vector<16x128xi1>, vector<16x128xf32>
    %c1_436 = arith.constant 1 : index
    %c0_437 = arith.constant 0 : index
    %c0_438 = arith.constant 0 : index
    %930 = vector.load %arg15[%c1_436, %c0_437, %c0_438] : memref<8x16x128xf32, #tpu.memory_space<vmem>>, vector<1x16x128xf32>
    %931 = vector.shape_cast %930 : vector<1x16x128xf32> to vector<16x128xf32>
    %c6_439 = arith.constant 6 : index
    %c0_440 = arith.constant 0 : index
    %c0_441 = arith.constant 0 : index
    %932 = vector.load %arg15[%c6_439, %c0_440, %c0_441] : memref<8x16x128xf32, #tpu.memory_space<vmem>>, vector<1x16x128xf32>
    %933 = vector.shape_cast %932 : vector<1x16x128xf32> to vector<16x128xf32>
    %934 = vector.shape_cast %2 : vector<1x128xi1> to vector<1x128xi1>
    %935 = vector.broadcast %934 : vector<1x128xi1> to vector<16x128xi1>
    %936 = arith.select %935, %931, %933 : vector<16x128xi1>, vector<16x128xf32>
    %c2_442 = arith.constant 2 : index
    %c0_443 = arith.constant 0 : index
    %c0_444 = arith.constant 0 : index
    %937 = vector.load %arg15[%c2_442, %c0_443, %c0_444] : memref<8x16x128xf32, #tpu.memory_space<vmem>>, vector<1x16x128xf32>
    %938 = vector.shape_cast %937 : vector<1x16x128xf32> to vector<16x128xf32>
    %c5_445 = arith.constant 5 : index
    %c0_446 = arith.constant 0 : index
    %c0_447 = arith.constant 0 : index
    %939 = vector.load %arg15[%c5_445, %c0_446, %c0_447] : memref<8x16x128xf32, #tpu.memory_space<vmem>>, vector<1x16x128xf32>
    %940 = vector.shape_cast %939 : vector<1x16x128xf32> to vector<16x128xf32>
    %941 = vector.shape_cast %2 : vector<1x128xi1> to vector<1x128xi1>
    %942 = vector.broadcast %941 : vector<1x128xi1> to vector<16x128xi1>
    %943 = arith.select %942, %938, %940 : vector<16x128xi1>, vector<16x128xf32>
    %c3_448 = arith.constant 3 : index
    %c0_449 = arith.constant 0 : index
    %c0_450 = arith.constant 0 : index
    %944 = vector.load %arg15[%c3_448, %c0_449, %c0_450] : memref<8x16x128xf32, #tpu.memory_space<vmem>>, vector<1x16x128xf32>
    %945 = vector.shape_cast %944 : vector<1x16x128xf32> to vector<16x128xf32>
    %c4_451 = arith.constant 4 : index
    %c0_452 = arith.constant 0 : index
    %c0_453 = arith.constant 0 : index
    %946 = vector.load %arg15[%c4_451, %c0_452, %c0_453] : memref<8x16x128xf32, #tpu.memory_space<vmem>>, vector<1x16x128xf32>
    %947 = vector.shape_cast %946 : vector<1x16x128xf32> to vector<16x128xf32>
    %948 = vector.shape_cast %2 : vector<1x128xi1> to vector<1x128xi1>
    %949 = vector.broadcast %948 : vector<1x128xi1> to vector<16x128xi1>
    %950 = arith.select %949, %945, %947 : vector<16x128xi1>, vector<16x128xf32>
    %c4_454 = arith.constant 4 : index
    %c0_455 = arith.constant 0 : index
    %c0_456 = arith.constant 0 : index
    %951 = vector.load %arg15[%c4_454, %c0_455, %c0_456] : memref<8x16x128xf32, #tpu.memory_space<vmem>>, vector<1x16x128xf32>
    %952 = vector.shape_cast %951 : vector<1x16x128xf32> to vector<16x128xf32>
    %c3_457 = arith.constant 3 : index
    %c0_458 = arith.constant 0 : index
    %c0_459 = arith.constant 0 : index
    %953 = vector.load %arg15[%c3_457, %c0_458, %c0_459] : memref<8x16x128xf32, #tpu.memory_space<vmem>>, vector<1x16x128xf32>
    %954 = vector.shape_cast %953 : vector<1x16x128xf32> to vector<16x128xf32>
    %955 = vector.shape_cast %2 : vector<1x128xi1> to vector<1x128xi1>
    %956 = vector.broadcast %955 : vector<1x128xi1> to vector<16x128xi1>
    %957 = arith.select %956, %952, %954 : vector<16x128xi1>, vector<16x128xf32>
    %c5_460 = arith.constant 5 : index
    %c0_461 = arith.constant 0 : index
    %c0_462 = arith.constant 0 : index
    %958 = vector.load %arg15[%c5_460, %c0_461, %c0_462] : memref<8x16x128xf32, #tpu.memory_space<vmem>>, vector<1x16x128xf32>
    %959 = vector.shape_cast %958 : vector<1x16x128xf32> to vector<16x128xf32>
    %c2_463 = arith.constant 2 : index
    %c0_464 = arith.constant 0 : index
    %c0_465 = arith.constant 0 : index
    %960 = vector.load %arg15[%c2_463, %c0_464, %c0_465] : memref<8x16x128xf32, #tpu.memory_space<vmem>>, vector<1x16x128xf32>
    %961 = vector.shape_cast %960 : vector<1x16x128xf32> to vector<16x128xf32>
    %962 = vector.shape_cast %2 : vector<1x128xi1> to vector<1x128xi1>
    %963 = vector.broadcast %962 : vector<1x128xi1> to vector<16x128xi1>
    %964 = arith.select %963, %959, %961 : vector<16x128xi1>, vector<16x128xf32>
    %c6_466 = arith.constant 6 : index
    %c0_467 = arith.constant 0 : index
    %c0_468 = arith.constant 0 : index
    %965 = vector.load %arg15[%c6_466, %c0_467, %c0_468] : memref<8x16x128xf32, #tpu.memory_space<vmem>>, vector<1x16x128xf32>
    %966 = vector.shape_cast %965 : vector<1x16x128xf32> to vector<16x128xf32>
    %c1_469 = arith.constant 1 : index
    %c0_470 = arith.constant 0 : index
    %c0_471 = arith.constant 0 : index
    %967 = vector.load %arg15[%c1_469, %c0_470, %c0_471] : memref<8x16x128xf32, #tpu.memory_space<vmem>>, vector<1x16x128xf32>
    %968 = vector.shape_cast %967 : vector<1x16x128xf32> to vector<16x128xf32>
    %969 = vector.shape_cast %2 : vector<1x128xi1> to vector<1x128xi1>
    %970 = vector.broadcast %969 : vector<1x128xi1> to vector<16x128xi1>
    %971 = arith.select %970, %966, %968 : vector<16x128xi1>, vector<16x128xf32>
    %c7_472 = arith.constant 7 : index
    %c0_473 = arith.constant 0 : index
    %c0_474 = arith.constant 0 : index
    %972 = vector.load %arg15[%c7_472, %c0_473, %c0_474] : memref<8x16x128xf32, #tpu.memory_space<vmem>>, vector<1x16x128xf32>
    %973 = vector.shape_cast %972 : vector<1x16x128xf32> to vector<16x128xf32>
    %c0_475 = arith.constant 0 : index
    %c0_476 = arith.constant 0 : index
    %c0_477 = arith.constant 0 : index
    %974 = vector.load %arg15[%c0_475, %c0_476, %c0_477] : memref<8x16x128xf32, #tpu.memory_space<vmem>>, vector<1x16x128xf32>
    %975 = vector.shape_cast %974 : vector<1x16x128xf32> to vector<16x128xf32>
    %976 = vector.shape_cast %2 : vector<1x128xi1> to vector<1x128xi1>
    %977 = vector.broadcast %976 : vector<1x128xi1> to vector<16x128xi1>
    %978 = arith.select %977, %973, %975 : vector<16x128xi1>, vector<16x128xf32>
    %979 = vector.shape_cast %929 : vector<16x128xf32> to vector<1x16x128xf32>
    %980 = vector.shape_cast %936 : vector<16x128xf32> to vector<1x16x128xf32>
    %981 = vector.shape_cast %943 : vector<16x128xf32> to vector<1x16x128xf32>
    %982 = vector.shape_cast %950 : vector<16x128xf32> to vector<1x16x128xf32>
    %983 = vector.shape_cast %957 : vector<16x128xf32> to vector<1x16x128xf32>
    %984 = vector.shape_cast %964 : vector<16x128xf32> to vector<1x16x128xf32>
    %985 = vector.shape_cast %971 : vector<16x128xf32> to vector<1x16x128xf32>
    %986 = vector.shape_cast %978 : vector<16x128xf32> to vector<1x16x128xf32>
    %987 = tpu.concatenate %979, %980, %981, %982, %983, %984, %985, %986 in 0 : vector<1x16x128xf32>, vector<1x16x128xf32>, vector<1x16x128xf32>, vector<1x16x128xf32>, vector<1x16x128xf32>, vector<1x16x128xf32>, vector<1x16x128xf32>, vector<1x16x128xf32> -> vector<8x16x128xf32>
    %c0_478 = arith.constant 0 : index
    %c0_479 = arith.constant 0 : index
    %988 = vector.load %arg10[%c0_478, %c0_479] : memref<1x128xf32, #tpu.memory_space<vmem>>, vector<1x128xf32>
    %989 = vector.shape_cast %988 : vector<1x128xf32> to vector<1x1x128xf32>
    %990 = vector.broadcast %989 : vector<1x1x128xf32> to vector<8x16x128xf32>
    %991 = arith.mulf %987, %990 : vector<8x16x128xf32>
    %cst_480 = arith.constant dense<0.000000e+00> : vector<8x16xf32>
    %992 = vector.multi_reduction <add>, %991, %cst_480 [2] : vector<8x16x128xf32> to vector<8x16xf32>
    %c0_481 = arith.constant 0 : index
    %c0_482 = arith.constant 0 : index
    %993 = vector.load %arg11[%c0_481, %c0_482] : memref<1x1xf32, #tpu.memory_space<vmem>>, vector<1x1xf32>
    %994 = vector.broadcast %993 : vector<1x1xf32> to vector<8x16xf32>
    %995 = arith.addf %992, %994 : vector<8x16xf32>
    %cst_483 = arith.constant dense<0.000000e+00> : vector<1xf32>
    %996 = vector.multi_reduction <add>, %988, %cst_483 [1] : vector<1x128xf32> to vector<1xf32>
    %997 = vector.shape_cast %996 : vector<1xf32> to vector<1x1xf32>
    %cst_484 = arith.constant 1.200000e+01 : f32
    %998 = vector.broadcast %cst_484 : f32 to vector<1x1xf32>
    %999 = arith.mulf %998, %997 : vector<1x1xf32>
    %c0_485 = arith.constant 0 : index
    %c0_486 = arith.constant 0 : index
    %1000 = vector.load %arg11[%c0_485, %c0_486] : memref<1x1xf32, #tpu.memory_space<vmem>>, vector<1x1xf32>
    %1001 = arith.addf %999, %1000 : vector<1x1xf32>
    %c0_487 = arith.constant 0 : index
    %c0_488 = arith.constant 0 : index
    %c0_489 = arith.constant 0 : index
    %1002 = vector.load %arg3[%c0_487, %c0_488, %c0_489] : memref<1x8x16xf32, #tpu.memory_space<vmem>>, vector<1x8x16xf32>
    %1003 = vector.shape_cast %1002 : vector<1x8x16xf32> to vector<8x16xf32>
    %cst_490 = arith.constant 0.000000e+00 : f32
    %1004 = vector.broadcast %cst_490 : f32 to vector<8x16xf32>
    %1005 = arith.cmpf ogt, %1003, %1004 : vector<8x16xf32>
    %1006 = vector.shape_cast %1001 : vector<1x1xf32> to vector<1x1xf32>
    %1007 = vector.broadcast %1006 : vector<1x1xf32> to vector<8x16xf32>
    %1008 = arith.select %1005, %995, %1007 : vector<8x16xi1>, vector<8x16xf32>
    %1009 = arith.negf %1008 : vector<8x16xf32>
    %1010 = math.exp %1009 : vector<8x16xf32>
    %cst_491 = arith.constant 1.000000e+00 : f32
    %1011 = vector.broadcast %cst_491 : f32 to vector<8x16xf32>
    %1012 = arith.addf %1011, %1010 : vector<8x16xf32>
    %1013 = arith.divf %1011, %1012 : vector<8x16xf32>
    %c0_492 = arith.constant 0 : index
    %c0_493 = arith.constant 0 : index
    %c0_494 = arith.constant 0 : index
    %1014 = vector.load %arg12[%c0_492, %c0_493, %c0_494] : memref<1x8x16xf32, #tpu.memory_space<vmem>>, vector<1x8x16xf32>
    %1015 = vector.shape_cast %1014 : vector<1x8x16xf32> to vector<8x16xf32>
    %1016 = vector.shape_cast %1013 : vector<8x16xf32> to vector<1x8x16xf32>
    tpu.vector_store %arg12[%c0_492, %c0_493, %c0_494], %1016 {strides = array<i32>} : memref<1x8x16xf32, #tpu.memory_space<vmem>>, vector<1x8x16xf32>,
    return
  }
  func.func @transform_0(%arg0: i32) -> (i32, i32, i32) {
    %c0_i32 = arith.constant 0 : i32
    %c0_i32_0 = arith.constant 0 : i32
    %c0_i32_1 = arith.constant 0 : i32
    return %c0_i32, %arg0, %c0_i32_0 : i32, i32, i32
  }
  func.func @transform_1(%arg0: i32) -> (i32, i32) {
    %c0_i32 = arith.constant 0 : i32
    %c0_i32_0 = arith.constant 0 : i32
    return %arg0, %c0_i32 : i32, i32
  }
  func.func @transform_2(%arg0: i32) -> (i32, i32, i32) {
    %c0_i32 = arith.constant 0 : i32
    %c0_i32_0 = arith.constant 0 : i32
    %c0_i32_1 = arith.constant 0 : i32
    return %arg0, %c0_i32, %c0_i32_0 : i32, i32, i32
  }
  func.func @transform_3(%arg0: i32) -> (i32, i32) {
    %c0_i32 = arith.constant 0 : i32
    %c0_i32_0 = arith.constant 0 : i32
    %c0_i32_1 = arith.constant 0 : i32
    return %c0_i32, %c0_i32_0 : i32, i32
  }
  func.func @transform_4(%arg0: i32) -> (i32, i32) {
    %c0_i32 = arith.constant 0 : i32
    %c0_i32_0 = arith.constant 0 : i32
    %c0_i32_1 = arith.constant 0 : i32
    return %c0_i32, %c0_i32_0 : i32, i32
  }
  func.func @transform_5(%arg0: i32) -> (i32, i32) {
    %c0_i32 = arith.constant 0 : i32
    %c0_i32_0 = arith.constant 0 : i32
    %c0_i32_1 = arith.constant 0 : i32
    return %c0_i32, %c0_i32_0 : i32, i32
  }
  func.func @transform_6(%arg0: i32) -> (i32, i32) {
    %c0_i32 = arith.constant 0 : i32
    %c0_i32_0 = arith.constant 0 : i32
    %c0_i32_1 = arith.constant 0 : i32
    return %c0_i32, %c0_i32_0 : i32, i32
  }
  func.func @transform_7(%arg0: i32) -> (i32, i32) {
    %c0_i32 = arith.constant 0 : i32
    %c0_i32_0 = arith.constant 0 : i32
    %c0_i32_1 = arith.constant 0 : i32
    return %c0_i32, %c0_i32_0 : i32, i32
  }
  func.func @transform_8(%arg0: i32) -> (i32, i32) {
    %c0_i32 = arith.constant 0 : i32
    %c0_i32_0 = arith.constant 0 : i32
    %c0_i32_1 = arith.constant 0 : i32
    return %c0_i32, %c0_i32_0 : i32, i32
  }
  func.func @transform_9(%arg0: i32) -> (i32, i32) {
    %c0_i32 = arith.constant 0 : i32
    %c0_i32_0 = arith.constant 0 : i32
    %c0_i32_1 = arith.constant 0 : i32
    return %c0_i32, %c0_i32_0 : i32, i32
  }
  func.func @transform_10(%arg0: i32) -> (i32, i32) {
    %c0_i32 = arith.constant 0 : i32
    %c0_i32_0 = arith.constant 0 : i32
    %c0_i32_1 = arith.constant 0 : i32
    return %c0_i32, %c0_i32_0 : i32, i32
  }
  func.func @transform_11(%arg0: i32) -> (i32, i32, i32) {
    %c0_i32 = arith.constant 0 : i32
    %c0_i32_0 = arith.constant 0 : i32
    %c0_i32_1 = arith.constant 0 : i32
    return %arg0, %c0_i32, %c0_i32_0 : i32, i32, i32
  }
}

</mosaic_0001>

<bundles_post_ra>
// kernel: tpu_custom_call.1
= control target key start
LH: loop header
LB: loop body
LE: loop exit
PB: predicated region body
PF: predicated region fallthrough
CT: control target
= control target key end

     0   :  { %s12838_s0 = inlined_call_operand.hbm [shape: f32[8,16,32], index: 0, kind: input, shape index: {}]   ;;  %s12839_s1 = inlined_call_operand.vmem [shape: s32[16,1], index: 1, kind: input, shape index: {}]   ;;  %s12840_s2 = inlined_call_operand.vmem [shape: f32[1,8,16], index: 2, kind: input, shape index: {}]   ;;  %s12841_s3 = inlined_call_operand.hbm [shape: f32[32,512], index: 3, kind: input, shape index: {}]   ;;  %s12842_s4 = inlined_call_operand.vmem [shape: f32[1,512], index: 4, kind: input, shape index: {}]   ;;  %s12843_s5 = inlined_call_operand.hbm [shape: f32[128,512], index: 5, kind: input, shape index: {}]   ;;  %s12844_s6 = inlined_call_operand.hbm [shape: f32[128,512], index: 6, kind: input, shape index: {}]   ;;  %s12845_s7 = inlined_call_operand.vmem [shape: f32[1,512], index: 7, kind: input, shape index: {}]   ;;  %s12846_s8 = inlined_call_operand.hbm [shape: f32[128,512], index: 8, kind: input, shape index: {}]   ;;  %s12847_s9 = inlined_call_operand.vmem [shape: f32[1,128], index: 9, kind: input, shape index: {}]   ;;  %s12848_s10 = inlined_call_operand.<no memory space> [shape: f32[1,1], index: 10, kind: input, shape index: {}]   ;;  %s12849_s11 = inlined_call_operand.hbm [shape: f32[1,8,16], index: 11, kind: output, shape index: {}]  }
   0x1   :  { %v16_v0 = vstv %s12848_s10 }
   0x2   :  { %17 = vst [vmem:[#allocation5] sm:$0x1] %v16_v0 }
   0x3   :  { %18 = vsyncpa [#allocation7], 0 }
   0x4   :  { %19 = vsyncpa [#allocation10], 0 }
   0x5   :  { %20 = vsyncpa [#allocation13], 0  ;;  %s43_s21 = sshll.u32 %s12841_s3, 4  ;;  %s44_s21 = int_to_ptr.hbm [resolvable:$true] %s43_s21 }
   0x6   :  { %21 = vsyncpa [#allocation8], 0  ;;  %s7545_s22 = smov [#allocation9]   ;;  %s71_s26 = sshll.u32 %s12844_s6, 4  ;;  %s72_s26 = int_to_ptr.hbm [resolvable:$true] %s71_s26 }
   0x7   :  { %s45_s23 = sshll.u32 %s7545_s22, 4  ;;  %s7546_s27 = smov 512   ;;  %s46_s23 = int_to_ptr.vmem [resolvable:$true] %s45_s23 }
   0x8   :  { %s7547_s28 = smov 32   ;;  %s7548_s10 = smov [#allocation12]  }
   0x9   :  { %51 = dma.hbm_to_vmem [thread:$0]  %s44_s21, 2048, %s46_s23, [#allocation10], %s7546_s27, %s7546_s27, %s7547_s28  }
   0xa   :  { %s73_s29 = sshll.u32 %s7548_s10, 4  ;;  %s26_s12 = sshll.u32 %s12838_s0, 4  ;;  %s74_s29 = int_to_ptr.vmem [resolvable:$true] %s73_s29  ;;  %s27_s12 = int_to_ptr.hbm [resolvable:$true] %s26_s12 }
   0xb   :  { %79 = dma.hbm_to_vmem [thread:$0]  %s72_s26, 8192, %s74_s29, [#allocation13], %s7546_s27, %s7546_s27, %s7547_s28  }
   0xc   :  { %s7549_s6 = smov [#allocation6]   ;;  %s58_s16 = sshll.u32 %s12843_s5, 4  ;;  %s59_s16 = int_to_ptr.hbm [resolvable:$true] %s58_s16 }
   0xd   :  { %s28_s13 = sshll.u32 %s7549_s6, 4  ;;  %s7550_s17 = smov 128   ;;  %s29_s13 = int_to_ptr.vmem [resolvable:$true] %s28_s13 }
   0xe   :  { %s7551_s18 = smov 8   ;;  %s7552_s19 = smov [#allocation11]  }
   0xf   :  { %34 = dma.hbm_to_vmem [thread:$0]  %s27_s12, 2048, %s29_s13, [#allocation7], %s7550_s17, %s7550_s17, %s7551_s18  }
  0x10   :  { %s60_s20 = sshll.u32 %s7552_s19, 4  ;;  %s86_s22 = sshll.u32 %s12846_s8, 4  ;;  %s61_s20 = int_to_ptr.vmem [resolvable:$true] %s60_s20  ;;  %s87_s22 = int_to_ptr.hbm [resolvable:$true] %s86_s22 }
  0x11   :  { %66 = dma.hbm_to_vmem [thread:$0]  %s59_s16, 8192, %s61_s20, [#allocation10], %s7546_s27, %s7546_s27, %s7547_s28  }
  0x12   :  { %s7553_s23 = smov [#allocation14]  }
  0x13   :  { %s88_s24 = sshll.u32 %s7553_s23, 4  ;;  %s89_s24 = int_to_ptr.vmem [resolvable:$true] %s88_s24 }
  0x14   :  { %94 = dma.hbm_to_vmem [thread:$0]  %s87_s22, 8192, %s89_s24, [#allocation13], %s7546_s27, %s7546_s27, %s7547_s28  }
  0x15   :  { %7537 = dma.done.wait [#allocation7], 2048  }
  0x16   :  { %7538 = vsyncadd [#allocation7], 4294965248 }
  0x17   :  { %7539 = dma.done.wait [#allocation10], 10240  }
  0x18   :  { %7540 = vsyncadd [#allocation10], 4294957056 }
  0x19   :  { %7541 = dma.done.wait [#allocation13], 16384  }
  0x1a   :  { %7542 = vsyncadd [#allocation13], 4294950912  ;;  %v207_v1 = vld [vmem:[#allocation9 + $0x60] sm:$0xff]  ;;  %v208_v2 = vld [vmem:[#allocation9 + $0x68] sm:$0xff]  ;;  %vm221_vm0 = vcmask 261120   ;;  %s6662_s17 = sshll.u32 %s12849_s11, 4  ;;  %s6663_s17 = int_to_ptr.hbm [resolvable:$true] %s6662_s17 }
  0x1b   :  { %v209_v3 = vld [vmem:[#allocation9 + $0x70] sm:$0xff]  ;;  %282 = vmatpush.msra.mxu0 %v207_v1  ;;  %347 = vmatpush.msra.mxu1 %v208_v2  ;;  %v210_v4 = vld [vmem:[#allocation9 + $0x78] sm:$0xff]  ;;  %v203_v5 = vld [vmem:[#allocation9 + $0x40] sm:$0xff] }
  0x1c   :  { %v204_v6 = vld [vmem:[#allocation9 + $0x48] sm:$0xff]  ;;  %412 = vmatpush.msra.mxu2 %v209_v3  ;;  %477 = vmatpush.msra.mxu3 %v210_v4  ;;  %v205_v7 = vld [vmem:[#allocation9 + $0x50] sm:$0xff]  ;;  %v206_v8 = vld [vmem:[#allocation9 + $0x58] sm:$0xff] }
  0x1d   :  { %v199_v9 = vld [vmem:[#allocation9 + $0x20] sm:$0xff]  ;;  %283 = vmatpush.msra.mxu0 %v203_v5  ;;  %348 = vmatpush.msra.mxu1 %v204_v6  ;;  %v200_v10 = vld [vmem:[#allocation9 + $0x28] sm:$0xff]  ;;  %v201_v11 = vld [vmem:[#allocation9 + $0x30] sm:$0xff] }
  0x1e   :  { %v202_v12 = vld [vmem:[#allocation9 + $0x38] sm:$0xff]  ;;  %413 = vmatpush.msra.mxu2 %v205_v7  ;;  %478 = vmatpush.msra.mxu3 %v206_v8  ;;  %v195_v13 = vld [vmem:[#allocation9] sm:$0xff]  ;;  %v196_v14 = vld [vmem:[#allocation9 + $0x8] sm:$0xff] }
  0x1f   :  { %284 = vmatpush.msra.mxu0 %v199_v9  ;;  %349 = vmatpush.msra.mxu1 %v200_v10  ;;  %v197_v15 = vld [vmem:[#allocation9 + $0x10] sm:$0xff]  ;;  %v198_v16 = vld [vmem:[#allocation9 + $0x18] sm:$0xff]  ;;  %v179_v17 = vld [vmem:[#allocation6] sm:$0xff] }
  0x20   :  { %414 = vmatpush.msra.mxu2 %v201_v11  ;;  %479 = vmatpush.msra.mxu3 %v202_v12  ;;  %v7654_v18 = vld [vmem:[#allocation11 + $0x1e0] sm:$0xff]  ;;  %v7656_v19 = vld [vmem:[#allocation11 + $0x1e8] sm:$0xff]  ;;  %v7660_v20 = vld [vmem:[#allocation11 + $0x1f8] sm:$0xff] }
  0x21   :  { %285 = vmatpush.msra.mxu0 %v195_v13  ;;  %350 = vmatpush.msra.mxu1 %v196_v14  ;;  %v7662_v21 = vld [vmem:[#allocation11 + $0x1f0] sm:$0xff]  ;;  %v7666_v22 = vld [vmem:[#allocation11 + $0x1c0] sm:$0xff]  ;;  %v7668_v23 = vld [vmem:[#allocation11 + $0x1c8] sm:$0xff] }
  0x22   :  { %415 = vmatpush.msra.mxu2 %v197_v15  ;;  %480 = vmatpush.msra.mxu3 %v198_v16  ;;  %v7672_v24 = vld [vmem:[#allocation11 + $0x1d8] sm:$0xff]  ;;  %v7674_v25 = vld [vmem:[#allocation11 + $0x1d0] sm:$0xff]  ;;  %v7678_v26 = vld [vmem:[#allocation11 + $0x1a0] sm:$0xff] }
  0x23   :  { %6674 = vmatmul.msk.f32.vlgmr.msra.gmra.mxu0 %vm221_vm0, %v179_v17  ;;  %6690 = vmatmul.msk.f32.vlgmr.msra.gmra.mxu1 %vm221_vm0, %v179_v17  ;;  %v7680_v27 = vld [vmem:[#allocation11 + $0x1a8] sm:$0xff]  ;;  %v7684_v28 = vld [vmem:[#allocation11 + $0x1b8] sm:$0xff]  ;;  %v7686_v29 = vld [vmem:[#allocation11 + $0x1b0] sm:$0xff] }
  0x24   :  { %6706 = vmatmul.msk.f32.vlgmr.msra.gmra.mxu2 %vm221_vm0, %v179_v17  ;;  %6722 = vmatmul.msk.f32.vlgmr.msra.gmra.mxu3 %vm221_vm0, %v179_v17  ;;  %v180_v30 = vld [vmem:[#allocation6 + $0x8] sm:$0xff]  ;;  %v7693_v31 = vld [vmem:[#allocation11 + $0x180] sm:$0xff]  ;;  %v7700_v33 = vld [vmem:[#allocation11 + $0x198] sm:$0xff] }
  0x25   :  { %944 = vmatpush.msrb.mxu0 %v7654_v18  ;;  %967 = vmatpush.msrb.mxu1 %v7656_v19  ;;  %v7695_v32 = vld [vmem:[#allocation11 + $0x188] sm:$0xff]  ;;  %v7702_v34 = vld [vmem:[#allocation11 + $0x190] sm:$0xff]  ;;  %v7706_v35 = vld [vmem:[#allocation11 + $0x160] sm:$0xff] }
  0x26   :  { %1013 = vmatpush.msrb.mxu3 %v7660_v20  ;;  %990 = vmatpush.msrb.mxu2 %v7662_v21  ;;  %v7708_v36 = vld [vmem:[#allocation11 + $0x168] sm:$0xff]  ;;  %v7712_v37 = vld [vmem:[#allocation11 + $0x178] sm:$0xff]  ;;  %v7714_v38 = vld [vmem:[#allocation11 + $0x170] sm:$0xff] }
  0x27   :  { %945 = vmatpush.msrb.mxu0 %v7666_v22  ;;  %968 = vmatpush.msrb.mxu1 %v7668_v23  ;;  %v7718_v39 = vld [vmem:[#allocation11 + $0x140] sm:$0xff]  ;;  %v7720_v40 = vld [vmem:[#allocation11 + $0x148] sm:$0xff]  ;;  %v7724_v41 = vld [vmem:[#allocation11 + $0x158] sm:$0xff] }
  0x28   :  { %1014 = vmatpush.msrb.mxu3 %v7672_v24  ;;  %991 = vmatpush.msrb.mxu2 %v7674_v25  ;;  %v181_v42 = vld [vmem:[#allocation6 + $0x10] sm:$0xff]  ;;  %v7735_v43 = vld [vmem:[#allocation11 + $0x120] sm:$0xff]  ;;  %v7737_v44 = vld [vmem:[#allocation11 + $0x128] sm:$0xff] }
  0x29   :  { %946 = vmatpush.msrb.mxu0 %v7678_v26  ;;  %969 = vmatpush.msrb.mxu1 %v7680_v27  ;;  %v7739_v45 = vld [vmem:[#allocation11 + $0x138] sm:$0xff]  ;;  %v7743_v46 = vld [vmem:[#allocation11 + $0x150] sm:$0xff]  ;;  %v7751_v48 = vld [vmem:[#allocation11 + $0x100] sm:$0xff] }
  0x2a   :  { %1015 = vmatpush.msrb.mxu3 %v7684_v28  ;;  %992 = vmatpush.msrb.mxu2 %v7686_v29  ;;  %v182_v47 = vld [vmem:[#allocation6 + $0x18] sm:$0xff]  ;;  %v7753_v49 = vld [vmem:[#allocation11 + $0x108] sm:$0xff]  ;;  %v7759_v51 = vld [vmem:[#allocation11 + $0x130] sm:$0xff] }
  0x2b   :  { %6675 = vmatmul.msk.f32.gmra.mxu0 %vm221_vm0, %v180_v30  ;;  %6691 = vmatmul.msk.f32.gmra.mxu1 %vm221_vm0, %v180_v30  ;;  %v7755_v50 = vld [vmem:[#allocation11 + $0x118] sm:$0xff]  ;;  %v183_v52 = vld [vmem:[#allocation6 + $0x20] sm:$0xff]  ;;  %v7769_v54 = vld [vmem:[#allocation11 + $0xe8] sm:$0xff] }
  0x2c   :  { %6707 = vmatmul.msk.f32.gmra.mxu2 %vm221_vm0, %v180_v30  ;;  %6723 = vmatmul.msk.f32.gmra.mxu3 %vm221_vm0, %v180_v30  ;;  %v7767_v53 = vld [vmem:[#allocation11 + $0xe0] sm:$0xff]  ;;  %v7771_v55 = vld [vmem:[#allocation11 + $0xf8] sm:$0xff]  ;;  %v7775_v56 = vld [vmem:[#allocation11 + $0x110] sm:$0xff] }
  0x2d   :  { %947 = vmatpush.msrb.mxu0 %v7693_v31  ;;  %970 = vmatpush.msrb.mxu1 %v7695_v32  ;;  %v184_v57 = vld [vmem:[#allocation6 + $0x28] sm:$0xff]  ;;  %v7783_v58 = vld [vmem:[#allocation11 + $0xc0] sm:$0xff]  ;;  %v7787_v60 = vld [vmem:[#allocation11 + $0xd8] sm:$0xff] }
  0x2e   :  { %1016 = vmatpush.msrb.mxu3 %v7700_v33  ;;  %993 = vmatpush.msrb.mxu2 %v7702_v34  ;;  %v7785_v59 = vld [vmem:[#allocation11 + $0xc8] sm:$0xff]  ;;  %v7791_v61 = vld [vmem:[#allocation11 + $0xf0] sm:$0xff]  ;;  %v7799_v63 = vld [vmem:[#allocation11 + $0xa0] sm:$0xff] }
  0x2f   :  { %948 = vmatpush.msrb.mxu0 %v7706_v35  ;;  %971 = vmatpush.msrb.mxu1 %v7708_v36  ;;  %v185_v62 = vld [vmem:[#allocation6 + $0x30] sm:$0xff]  ;;  %v7801_v0 = vld [vmem:[#allocation11 + $0xa8] sm:$0xff]  ;;  %v7803_v1 = vld [vmem:[#allocation11 + $0xb8] sm:$0xff] }
  0x30   :  { %1017 = vmatpush.msrb.mxu3 %v7712_v37  ;;  %994 = vmatpush.msrb.mxu2 %v7714_v38  ;;  %v7807_v2 = vld [vmem:[#allocation11 + $0xd0] sm:$0xff]  ;;  %v186_v3 = vld [vmem:[#allocation6 + $0x38] sm:$0xff]  ;;  %v7815_v4 = vld [vmem:[#allocation11 + $0x80] sm:$0xff] }
  0x31   :  { %949 = vmatpush.msrb.mxu0 %v7718_v39  ;;  %972 = vmatpush.msrb.mxu1 %v7720_v40  ;;  %v7817_v5 = vld [vmem:[#allocation11 + $0x88] sm:$0xff]  ;;  %v7819_v6 = vld [vmem:[#allocation11 + $0x98] sm:$0xff]  ;;  %v7823_v7 = vld [vmem:[#allocation11 + $0xb0] sm:$0xff] }
  0x32   :  { %1018 = vmatpush.msrb.mxu3 %v7724_v41  ;;  %995 = vmatpush.msrb.mxu2 %v7743_v46  ;;  %v187_v8 = vld [vmem:[#allocation6 + $0x40] sm:$0xff]  ;;  %v7833_v10 = vld [vmem:[#allocation11 + $0x68] sm:$0xff]  ;;  %v7835_v11 = vld [vmem:[#allocation11 + $0x78] sm:$0xff] }
  0x33   :  { %6676 = vmatmul.msk.f32.gmra.mxu0 %vm221_vm0, %v181_v42  ;;  %6692 = vmatmul.msk.f32.gmra.mxu1 %vm221_vm0, %v181_v42  ;;  %v7831_v9 = vld [vmem:[#allocation11 + $0x60] sm:$0xff]  ;;  %v7839_v12 = vld [vmem:[#allocation11 + $0x90] sm:$0xff]  ;;  %v188_v13 = vld [vmem:[#allocation6 + $0x48] sm:$0xff] }
  0x34   :  { %6708 = vmatmul.msk.f32.gmra.mxu2 %vm221_vm0, %v181_v42  ;;  %6724 = vmatmul.msk.f32.gmra.mxu3 %vm221_vm0, %v181_v42  ;;  %v7847_v14 = vld [vmem:[#allocation11 + $0x40] sm:$0xff]  ;;  %v7849_v15 = vld [vmem:[#allocation11 + $0x48] sm:$0xff]  ;;  %v7851_v16 = vld [vmem:[#allocation11 + $0x58] sm:$0xff] }
  0x35   :  { %950 = vmatpush.msrb.mxu0 %v7735_v43  ;;  %973 = vmatpush.msrb.mxu1 %v7737_v44  ;;  %v7855_v17 = vld [vmem:[#allocation11 + $0x70] sm:$0xff]  ;;  %v7863_v42 = vld [vmem:[#allocation11 + $0x20] sm:$0xff] }
  0x36   :  { %1019 = vmatpush.msrb.mxu3 %v7739_v45  ;;  %996 = vmatpush.msrb.mxu2 %v7759_v51  ;;  %v189_v30 = vld [vmem:[#allocation6 + $0x50] sm:$0xff] }
  0x37   :  { %951 = vmatpush.msrb.mxu0 %v7751_v48  ;;  %974 = vmatpush.msrb.mxu1 %v7753_v49 }
  0x38   :  { %1020 = vmatpush.msrb.mxu3 %v7755_v50  ;;  %997 = vmatpush.msrb.mxu2 %v7775_v56 }
  0x39   :  { %952 = vmatpush.msrb.mxu0 %v7767_v53  ;;  %975 = vmatpush.msrb.mxu1 %v7769_v54 }
  0x3a   :  { %1021 = vmatpush.msrb.mxu3 %v7771_v55  ;;  %998 = vmatpush.msrb.mxu2 %v7791_v61 }
  0x3b   :  { %6677 = vmatmul.msk.f32.gmra.mxu0 %vm221_vm0, %v182_v47  ;;  %6693 = vmatmul.msk.f32.gmra.mxu1 %vm221_vm0, %v182_v47 }
  0x3c   :  { %6709 = vmatmul.msk.f32.gmra.mxu2 %vm221_vm0, %v182_v47  ;;  %6725 = vmatmul.msk.f32.gmra.mxu3 %vm221_vm0, %v182_v47  ;;  %v7865_v47 = vld [vmem:[#allocation11 + $0x28] sm:$0xff] }
  0x3d   :  { %953 = vmatpush.msrb.mxu0 %v7783_v58  ;;  %976 = vmatpush.msrb.mxu1 %v7785_v59 }
  0x3e   :  { %1022 = vmatpush.msrb.mxu3 %v7787_v60  ;;  %999 = vmatpush.msrb.mxu2 %v7807_v2 }
  0x3f   :  { %954 = vmatpush.msrb.mxu0 %v7799_v63  ;;  %977 = vmatpush.msrb.mxu1 %v7801_v0 }
  0x40   :  { %1023 = vmatpush.msrb.mxu3 %v7803_v1  ;;  %1000 = vmatpush.msrb.mxu2 %v7823_v7 }
  0x41   :  { %955 = vmatpush.msrb.mxu0 %v7815_v4  ;;  %978 = vmatpush.msrb.mxu1 %v7817_v5 }
  0x42   :  { %1024 = vmatpush.msrb.mxu3 %v7819_v6  ;;  %1001 = vmatpush.msrb.mxu2 %v7839_v12 }
  0x43   :  { %6678 = vmatmul.msk.f32.gmra.mxu0 %vm221_vm0, %v183_v52  ;;  %6694 = vmatmul.msk.f32.gmra.mxu1 %vm221_vm0, %v183_v52 }
  0x44   :  { %6710 = vmatmul.msk.f32.gmra.mxu2 %vm221_vm0, %v183_v52  ;;  %6726 = vmatmul.msk.f32.gmra.mxu3 %vm221_vm0, %v183_v52  ;;  %v7867_v52 = vld [vmem:[#allocation11 + $0x38] sm:$0xff] }
  0x45   :  { %956 = vmatpush.msrb.mxu0 %v7831_v9  ;;  %979 = vmatpush.msrb.mxu1 %v7833_v10  ;;  %13271 = vst [vmem:[#allocation20_spill] sm:$0xff] %v7867_v52 }
  0x46   :  { %1025 = vmatpush.msrb.mxu3 %v7835_v11  ;;  %1002 = vmatpush.msrb.mxu2 %v7855_v17 }
  0x47   :  { %957 = vmatpush.msrb.mxu0 %v7847_v14  ;;  %980 = vmatpush.msrb.mxu1 %v7849_v15 }
  0x48   :  { %1026 = vmatpush.msrb.mxu3 %v7851_v16 }
  0x49   :  { %958 = vmatpush.msrb.mxu0 %v7863_v42  ;;  %981 = vmatpush.msrb.mxu1 %v7865_v47 }
  0x4a   :  { %1027 = vmatpush.msrb.mxu3 %v7867_v52  ;;  %v7895_v52 = vld [vmem:[#allocation11 + $0x10] sm:$0xff] }
  0x4b   :  { %6679 = vmatmul.msk.f32.gmra.mxu0 %vm221_vm0, %v184_v57  ;;  %6695 = vmatmul.msk.f32.gmra.mxu1 %vm221_vm0, %v184_v57 }
  0x4c   :  { %6711 = vmatmul.msk.f32.gmra.mxu2 %vm221_vm0, %v184_v57  ;;  %6727 = vmatmul.msk.f32.gmra.mxu3 %vm221_vm0, %v184_v57  ;;  %v7871_v57 = vld [vmem:[#allocation11 + $0x50] sm:$0xff] }
  0x4d   :  { %1003 = vmatpush.msrb.mxu2 %v7871_v57 }
  0x53   :  { %6680 = vmatmul.msk.f32.gmra.mxu0 %vm221_vm0, %v185_v62  ;;  %6696 = vmatmul.msk.f32.gmra.mxu1 %vm221_vm0, %v185_v62 }
  0x54   :  { %6712 = vmatmul.msk.f32.gmra.mxu2 %vm221_vm0, %v185_v62  ;;  %6728 = vmatmul.msk.f32.gmra.mxu3 %vm221_vm0, %v185_v62  ;;  %v190_v62 = vld [vmem:[#allocation6 + $0x58] sm:$0xff] }
  0x5b   :  { %6681 = vmatmul.msk.f32.gmra.mxu0 %vm221_vm0, %v186_v3  ;;  %6697 = vmatmul.msk.f32.gmra.mxu1 %vm221_vm0, %v186_v3 }
  0x5c   :  { %6713 = vmatmul.msk.f32.gmra.mxu2 %vm221_vm0, %v186_v3  ;;  %6729 = vmatmul.msk.f32.gmra.mxu3 %vm221_vm0, %v186_v3  ;;  %v7879_v3 = vld [vmem:[#allocation11] sm:$0xff] }
  0x5d   :  { %959 = vmatpush.msrb.mxu0 %v7879_v3 }
  0x5f   :  { %1257 = vmatpush.msra.mxu0 %v7654_v18  ;;  %v192_v18 = vld [vmem:[#allocation6 + $0x68] sm:$0xff] }
  0x61   :  { %1258 = vmatpush.msra.mxu0 %v7666_v22 }
  0x63   :  { %6682 = vmatmul.msk.f32.gmra.mxu0 %vm221_vm0, %v187_v8  ;;  %6698 = vmatmul.msk.f32.gmra.mxu1 %vm221_vm0, %v187_v8 }
  0x64   :  { %6714 = vmatmul.msk.f32.gmra.mxu2 %vm221_vm0, %v187_v8  ;;  %6730 = vmatmul.msk.f32.gmra.mxu3 %vm221_vm0, %v187_v8  ;;  %v7881_v8 = vld [vmem:[#allocation11 + $0x8] sm:$0xff] }
  0x65   :  { %982 = vmatpush.msrb.mxu1 %v7881_v8  ;;  %1259 = vmatpush.msra.mxu0 %v7678_v26 }
  0x67   :  { %1280 = vmatpush.msra.mxu1 %v7656_v19  ;;  %1260 = vmatpush.msra.mxu0 %v7693_v31  ;;  %v193_v19 = vld [vmem:[#allocation6 + $0x70] sm:$0xff] }
  0x69   :  { %1281 = vmatpush.msra.mxu1 %v7668_v23  ;;  %1261 = vmatpush.msra.mxu0 %v7706_v35  ;;  %v12851_v23 = vmov 0.0  }
  0x6b   :  { %6683 = vmatmul.msk.f32.gmra.mxu0 %vm221_vm0, %v188_v13  ;;  %6699 = vmatmul.msk.f32.gmra.mxu1 %vm221_vm0, %v188_v13 }
  0x6c   :  { %6715 = vmatmul.msk.f32.gmra.mxu2 %vm221_vm0, %v188_v13  ;;  %6731 = vmatmul.msk.f32.gmra.mxu3 %vm221_vm0, %v188_v13  ;;  %v191_v13 = vld [vmem:[#allocation6 + $0x60] sm:$0xff] }
  0x6d   :  { %1282 = vmatpush.msra.mxu1 %v7680_v27  ;;  %1262 = vmatpush.msra.mxu0 %v7718_v39 }
  0x6f   :  { %1283 = vmatpush.msra.mxu1 %v7695_v32  ;;  %1263 = vmatpush.msra.mxu0 %v7735_v43 }
  0x71   :  { %1284 = vmatpush.msra.mxu1 %v7708_v36  ;;  %1264 = vmatpush.msra.mxu0 %v7751_v48 }
  0x73   :  { %6684 = vmatmul.msk.f32.gmra.mxu0 %vm221_vm0, %v189_v30  ;;  %6700 = vmatmul.msk.f32.gmra.mxu1 %vm221_vm0, %v189_v30 }
  0x74   :  { %6716 = vmatmul.msk.f32.gmra.mxu2 %vm221_vm0, %v189_v30  ;;  %6732 = vmatmul.msk.f32.gmra.mxu3 %vm221_vm0, %v189_v30  ;;  %v7887_v30 = vld [vmem:[#allocation11 + $0x30] sm:$0xff] }
  0x75   :  { %1004 = vmatpush.msrb.mxu2 %v7887_v30  ;;  %1285 = vmatpush.msra.mxu1 %v7720_v40 }
  0x76   :  { %1265 = vmatpush.msra.mxu0 %v7767_v53 }
  0x77   :  { %1005 = vmatpush.msrb.mxu2 %v7895_v52  ;;  %1286 = vmatpush.msra.mxu1 %v7737_v44 }
  0x78   :  { %1266 = vmatpush.msra.mxu0 %v7783_v58 }
  0x79   :  { %1303 = vmatpush.msra.mxu2 %v7662_v21  ;;  %1287 = vmatpush.msra.mxu1 %v7753_v49 }
  0x7a   :  { %1267 = vmatpush.msra.mxu0 %v7799_v63 }
  0x7b   :  { %6685 = vmatmul.msk.f32.gmra.mxu0 %vm221_vm0, %v190_v62  ;;  %6701 = vmatmul.msk.f32.gmra.mxu1 %vm221_vm0, %v190_v62 }
  0x7c   :  { %6717 = vmatmul.msk.f32.gmra.mxu2 %vm221_vm0, %v190_v62  ;;  %6733 = vmatmul.msk.f32.gmra.mxu3 %vm221_vm0, %v190_v62  ;;  %v7892_v62 = vld [vmem:[#allocation11 + $0x18] sm:$0xff] }
  0x7d   :  { %1028 = vmatpush.msrb.mxu3 %v7892_v62  ;;  %1304 = vmatpush.msra.mxu2 %v7674_v25 }
  0x7e   :  { %1288 = vmatpush.msra.mxu1 %v7769_v54  ;;  %1268 = vmatpush.msra.mxu0 %v7815_v4  ;;  %v119_v54 = vlaneseq }
  0x7f   :  { %1326 = vmatpush.msra.mxu3 %v7660_v20  ;;  %1305 = vmatpush.msra.mxu2 %v7686_v29  ;;  %v194_v20 = vld [vmem:[#allocation6 + $0x78] sm:$0xff]  ;;  %v12853_v29 = vmov 0  }
  0x80   :  { %1289 = vmatpush.msra.mxu1 %v7785_v59  ;;  %1269 = vmatpush.msra.mxu0 %v7831_v9  ;;  %v8038_v58 = vand.u32 127, %v119_v54 }
  0x81   :  { %1327 = vmatpush.msra.mxu3 %v7672_v24  ;;  %1306 = vmatpush.msra.mxu2 %v7702_v34 }
  0x82   :  { %1290 = vmatpush.msra.mxu1 %v7801_v0  ;;  %1270 = vmatpush.msra.mxu0 %v7847_v14  ;;  %v122_v0 = vadd.s32 128, %v8038_v58  ;;  %v123_v9 = vadd.s32 256, %v8038_v58  ;;  %vm121_vm1 = vcmp.lt.s32.totalorder %v8038_v58, 64  ;;  %v13274_v14 = vmov 0 }
  0x83   :  { %6686 = vmatmul.msk.f32.gmra.mxu0 %vm221_vm0, %v191_v13  ;;  %6702 = vmatmul.msk.f32.gmra.mxu1 %vm221_vm0, %v191_v13 }
  0x84   :  { %6718 = vmatmul.msk.f32.gmra.mxu2 %vm221_vm0, %v191_v13  ;;  %6734 = vmatmul.msk.f32.gmra.mxu3 %vm221_vm0, %v191_v13 }
  0x85   :  { %1328 = vmatpush.msra.mxu3 %v7684_v28  ;;  %1307 = vmatpush.msra.mxu2 %v7714_v38  ;;  %v13272_v28 = vld [vmem:[#allocation20_spill] sm:$0xff] }
  0x86   :  { %1291 = vmatpush.msra.mxu1 %v7817_v5  ;;  %1271 = vmatpush.msra.mxu0 %v7863_v42  ;;  %v178_v38 = vld [vmem:[%s12839_s1 + $0x8] sm:$0xff]  ;;  %13273 = vst [vmem:[#allocation20_spill] sm:$0xff] %v8038_v58 }
  0x87   :  { %1329 = vmatpush.msra.mxu3 %v7700_v33  ;;  %1308 = vmatpush.msra.mxu2 %v7743_v46  ;;  %v177_v33 = vld [vmem:[%s12839_s1] sm:$0xff] }
  0x88   :  { %1292 = vmatpush.msra.mxu1 %v7833_v10  ;;  %1272 = vmatpush.msra.mxu0 %v7879_v3  ;;  %v124_v10 = vadd.s32 384, %v8038_v58 }
  0x89   :  { %1330 = vmatpush.msra.mxu3 %v7712_v37  ;;  %1309 = vmatpush.msra.mxu2 %v7759_v51 }
  0x8a   :  { %1293 = vmatpush.msra.mxu1 %v7849_v15  ;;  %6872 = vset.pattern.permute.xlu0 %v12853_v29 }
  0x8b   :  { %6687 = vmatmul.msk.f32.gmra.mxu0 %vm221_vm0, %v192_v18  ;;  %6703 = vmatmul.msk.f32.gmra.mxu1 %vm221_vm0, %v192_v18 }
  0x8c   :  { %6719 = vmatmul.msk.f32.gmra.mxu2 %vm221_vm0, %v192_v18  ;;  %6735 = vmatmul.msk.f32.gmra.mxu3 %vm221_vm0, %v192_v18 }
  0x8d   :  { %1331 = vmatpush.msra.mxu3 %v7724_v41  ;;  %1310 = vmatpush.msra.mxu2 %v7775_v56 }
  0x8e   :  { %1294 = vmatpush.msra.mxu1 %v7865_v47  ;;  %6873 = vset.pattern.permute.xlu1 %v12853_v29  ;;  %v143_v47 = vand.u32 127, %v123_v9 }
  0x8f   :  { %1332 = vmatpush.msra.mxu3 %v7739_v45  ;;  %1311 = vmatpush.msra.mxu2 %v7791_v61 }
  0x90   :  { %1295 = vmatpush.msra.mxu1 %v7881_v8  ;;  %1172 = vperm.xlu0 %6872, %v177_v33   ;;  %vm8084_vm3 = vcmp.lt.s32.totalorder %v143_v47, 64 }
  0x91   :  { %1333 = vmatpush.msra.mxu3 %v7755_v50  ;;  %1312 = vmatpush.msra.mxu2 %v7807_v2  ;;  %v136_v2 = vand.u32 127, %v122_v0 }
  0x93   :  { %6688 = vmatmul.msk.f32.gmra.mxu0 %vm221_vm0, %v193_v19  ;;  %6704 = vmatmul.msk.f32.gmra.mxu1 %vm221_vm0, %v193_v19  ;;  %vm8051_vm2 = vcmp.lt.s32.totalorder %v136_v2, 64 }
  0x94   :  { %6720 = vmatmul.msk.f32.gmra.mxu2 %vm221_vm0, %v193_v19  ;;  %6736 = vmatmul.msk.f32.gmra.mxu3 %vm221_vm0, %v193_v19  ;;  %v13275_v14 = vsel %vm8051_vm2, 4294967295, %v13274_v14  ;;  %v13283_v19 = vmov 0 }
  0x95   :  { %1334 = vmatpush.msra.mxu3 %v7771_v55  ;;  %1313 = vmatpush.msra.mxu2 %v7823_v7  ;;  %13276 = vst [vmem:[#allocation21_spill] sm:$0xff] %v13275_v14  ;;  %v13284_v19 = vsel %vm8084_vm3, 4294967295, %v13283_v19  ;;  %v8707_v14 = vld [vmem:[#allocation11 + $0x60] sm:$0xff] }
  0x96   :  { %13285 = vst [vmem:[#allocation28_spill] sm:$0xff] %v13284_v19  ;;  %v10445_v19 = vld [vmem:[#allocation14 + $0x88] sm:$0xff] }
  0x97   :  { %1335 = vmatpush.msra.mxu3 %v7787_v60  ;;  %1314 = vmatpush.msra.mxu2 %v7839_v12  ;;  %13375 = vst [vmem:[#allocation109_spill] sm:$0xff] %v8707_v14 }
  0x98   :  { %1175 = vperm.xlu0 %6872, %v178_v38  }
  0x99   :  { %1336 = vmatpush.msra.mxu3 %v7803_v1  ;;  %1315 = vmatpush.msra.mxu2 %v7855_v17  ;;  %v211_v1 = vld [vmem:[%s12842_s4] sm:$0xf] }
  0x9a   :  { %v8044_v4 = vperm.slane %v211_v1, 0  ;;  %v8046_v5 = vperm.slane %v211_v1, 1  ;;  %v8077_v8 = vperm.slane %v211_v1, 2  ;;  %v8079_v13 = vperm.slane %v211_v1, 3 }
  0x9b   :  { %6689 = vmatmul.msk.f32.gmra.mxu0 %vm221_vm0, %v194_v20  ;;  %6705 = vmatmul.msk.f32.gmra.mxu1 %vm221_vm0, %v194_v20 }
  0x9c   :  { %6721 = vmatmul.msk.f32.gmra.mxu2 %vm221_vm0, %v194_v20  ;;  %6737 = vmatmul.msk.f32.gmra.mxu3 %vm221_vm0, %v194_v20  ;;  %v13286_v20 = vmov 0 }
  0x9d   :  { %1337 = vmatpush.msra.mxu3 %v7819_v6  ;;  %1316 = vmatpush.msra.mxu2 %v7871_v57 }
  0x9f   :  { %1338 = vmatpush.msra.mxu3 %v7835_v11  ;;  %1317 = vmatpush.msra.mxu2 %v7887_v30 }
  0xa0   :  { %v7956_v21 = vpop.f32.mrf.mxu0  ;;  %v7958_v22 = vpop.f32.mrf.mxu1 }
  0xa1   :  { %1339 = vmatpush.msra.mxu3 %v7851_v16  ;;  %1318 = vmatpush.msra.mxu2 %v7895_v52  ;;  %v150_v52 = vand.u32 127, %v124_v10 }
  0xa3   :  { %960 = vmatmul.f32.vlgmr.msrb.gmra.mxu0 %v12851_v23  ;;  %983 = vmatmul.f32.vlgmr.msrb.gmra.mxu1 %v12851_v23  ;;  %vm8088_vm4 = vcmp.lt.s32.totalorder %v150_v52, 64 }
  0xa4   :  { %1006 = vmatmul.f32.vlgmr.msrb.gmra.mxu2 %v12851_v23  ;;  %1029 = vmatmul.f32.vlgmr.msrb.gmra.mxu3 %v12851_v23  ;;  %v13287_v20 = vsel %vm8088_vm4, 4294967295, %v13286_v20 }
  0xa5   :  { %1340 = vmatpush.msra.mxu3 %v13272_v28  ;;  %13288 = vst [vmem:[#allocation29_spill] sm:$0xff] %v13287_v20 }
  0xa7   :  { %v7974_v24 = vpop.f32.mrf.mxu2  ;;  %v7976_v25 = vpop.f32.mrf.mxu3  ;;  %1341 = vmatpush.msra.mxu3 %v7892_v62 }
  0xa8   :  { %v7980_v26 = vpop.f32.mrf.mxu0  ;;  %v7982_v27 = vpop.f32.mrf.mxu1 }
  0xab   :  { %963 = vmatmul.f32.gmra.mxu0 %v12851_v23  ;;  %986 = vmatmul.f32.gmra.mxu1 %v12851_v23 }
  0xac   :  { %1009 = vmatmul.f32.gmra.mxu2 %v12851_v23  ;;  %1032 = vmatmul.f32.gmra.mxu3 %v12851_v23 }
  0xaf   :  { %v7996_v31 = vpop.f32.mrf.mxu2  ;;  %v7998_v32 = vpop.f32.mrf.mxu3 }
  0xb0   :  { %v8003_v34 = vpop.f32.mrf.mxu0  ;;  %v8005_v35 = vpop.f32.mrf.mxu1 }
  0xb7   :  { %v8007_v36 = vpop.f32.mrf.mxu2  ;;  %v8009_v37 = vpop.f32.mrf.mxu3 }
  0xb8   :  { %v8014_v39 = vpop.f32.mrf.mxu0  ;;  %v8016_v40 = vpop.f32.mrf.mxu1 }
  0xbf   :  { %v8018_v41 = vpop.f32.mrf.mxu2  ;;  %v8020_v43 = vpop.f32.mrf.mxu3 }
  0xc0   :  { %v8022_v44 = vpop.f32.mrf.mxu0  ;;  %v8024_v45 = vpop.f32.mrf.mxu1 }
  0xc7   :  { %v8026_v46 = vpop.f32.mrf.mxu2  ;;  %v8028_v48 = vpop.f32.mrf.mxu3 }
  0xc8   :  { %v8030_v49 = vpop.f32.mrf.mxu0  ;;  %v8032_v50 = vpop.f32.mrf.mxu1  ;;  %v8177_v23 = vadd.f32 %v8026_v46, %v8077_v8 }
  0xc9   :  { %v8195_v46 = vadd.f32 %v8032_v50, %v8046_v5 }
  0xca   :  { %13306 = vst [vmem:[#allocation47_spill] sm:$0xff] %v8177_v23 }
  0xcb   :  { %13311 = vst [vmem:[#allocation52_spill] sm:$0xff] %v8195_v46 }
  0xcf   :  { %v8034_v51 = vpop.f32.mrf.mxu2  ;;  %v8036_v53 = vpop.f32.mrf.mxu3 }
  0xd0   :  { %v305_v55 = vpop.f32.mrf.mxu0  ;;  %v370_v56 = vpop.f32.mrf.mxu1 }
  0xd1   :  { %v8056_v15 = vadd.f32 %v305_v55, %v8044_v4  ;;  %v8059_v16 = vadd.f32 %v370_v56, %v8046_v5 }
  0xd3   :  { %13277 = vst [vmem:[#allocation22_spill] sm:$0xff] %v8056_v15 }
  0xd4   :  { %13278 = vst [vmem:[#allocation23_spill] sm:$0xff] %v8059_v16 }
  0xd7   :  { %v435_v59 = vpop.f32.mrf.mxu2  ;;  %v500_v60 = vpop.f32.mrf.mxu3 }
  0xd8   :  { %v308_v61 = vpop.f32.mrf.mxu0  ;;  %v373_v63 = vpop.f32.mrf.mxu1  ;;  %v8082_v30 = vadd.f32 %v435_v59, %v8077_v8  ;;  %v8093_v28 = vadd.f32 %v500_v60, %v8079_v13 }
  0xd9   :  { %v8102_v56 = vadd.f32 %v308_v61, %v8044_v4  ;;  %v8105_v59 = vadd.f32 %v373_v63, %v8046_v5 }
  0xda   :  { %13282 = vst [vmem:[#allocation27_spill] sm:$0xff] %v8082_v30 }
  0xdb   :  { %13289 = vst [vmem:[#allocation30_spill] sm:$0xff] %v8093_v28 }
  0xdc   :  { %13292 = vst [vmem:[#allocation33_spill] sm:$0xff] %v8102_v56 }
  0xdd   :  { %13293 = vst [vmem:[#allocation34_spill] sm:$0xff] %v8105_v59 }
  0xdf   :  { %v438_v6 = vpop.f32.mrf.mxu2  ;;  %v503_v7 = vpop.f32.mrf.mxu3 }
  0xe0   :  { %v311_v11 = vpop.f32.mrf.mxu0  ;;  %v376_v12 = vpop.f32.mrf.mxu1  ;;  %v8132_v9 = vadd.f32 %v438_v6, %v8077_v8  ;;  %v8149_v6 = vadd.f32 %v8024_v45, %v8046_v5 }
  0xe1   :  { %v8062_v17 = vadd.f32 %v311_v11, %v8044_v4  ;;  %v8065_v42 = vadd.f32 %v376_v12, %v8046_v5  ;;  %v8135_v12 = vadd.f32 %v503_v7, %v8079_v13 }
  0xe2   :  { %13297 = vst [vmem:[#allocation38_spill] sm:$0xff] %v8132_v9 }
  0xe3   :  { %13279 = vst [vmem:[#allocation24_spill] sm:$0xff] %v8062_v17  ;;  %v8071_v57 = vsel %vm121_vm1, %v8062_v17, %v8056_v15 }
  0xe4   :  { %13280 = vst [vmem:[#allocation25_spill] sm:$0xff] %v8065_v42 }
  0xe5   :  { %13281 = vst [vmem:[#allocation26_spill] sm:$0xff] %v8071_v57 }
  0xe6   :  { %13298 = vst [vmem:[#allocation39_spill] sm:$0xff] %v8135_v12 }
  0xe7   :  { %v441_v62 = vpop.f32.mrf.mxu2  ;;  %v506_v18 = vpop.f32.mrf.mxu3  ;;  %13302 = vst [vmem:[#allocation43_spill] sm:$0xff] %v8149_v6 }
  0xe8   :  { %v8096_v33 = vadd.f32 %v441_v62, %v8077_v8  ;;  %v8099_v38 = vadd.f32 %v506_v18, %v8079_v13  ;;  %v314_v54 = vpop.f32.mrf.mxu0  ;;  %v379_v55 = vpop.f32.mrf.mxu1 }
  0xe9   :  { %v8108_v0 = vadd.f32 %v314_v54, %v8044_v4  ;;  %v8111_v60 = vadd.f32 %v379_v55, %v8046_v5  ;;  %v8145_v54 = vadd.f32 %v8022_v44, %v8044_v4 }
  0xea   :  { %13290 = vst [vmem:[#allocation31_spill] sm:$0xff] %v8096_v33 }
  0xeb   :  { %13291 = vst [vmem:[#allocation32_spill] sm:$0xff] %v8099_v38  ;;  %v8125_v63 = vsel %vm121_vm1, %v8108_v0, %v8102_v56  ;;  %v8355_v56 = vadd.f32 %v7974_v24, %v8077_v8  ;;  %v8371_v38 = vadd.f32 %v7982_v27, %v8046_v5 }
  0xec   :  { %13294 = vst [vmem:[#allocation35_spill] sm:$0xff] %v8108_v0 }
  0xed   :  { %13295 = vst [vmem:[#allocation36_spill] sm:$0xff] %v8111_v60  ;;  %v8331_v60 = vadd.f32 %v7958_v22, %v8046_v5  ;;  %v291_v22 = vadd.f32 %v7980_v26, %v8044_v4 }
  0xee   :  { %13296 = vst [vmem:[#allocation37_spill] sm:$0xff] %v8125_v63 }
  0xef   :  { %v444_v10 = vpop.f32.mrf.mxu2  ;;  %v509_v11 = vpop.f32.mrf.mxu3  ;;  %13301 = vst [vmem:[#allocation42_spill] sm:$0xff] %v8145_v54 }
  0xf0   :  { %v8138_v47 = vadd.f32 %v444_v10, %v8077_v8  ;;  %v8141_v52 = vadd.f32 %v509_v11, %v8079_v13  ;;  %v317_v62 = vpop.f32.mrf.mxu0  ;;  %v382_v18 = vpop.f32.mrf.mxu1  ;;  %v8181_v10 = vadd.f32 %v8028_v48, %v8079_v13  ;;  %v8191_v11 = vadd.f32 %v8030_v49, %v8044_v4  ;;  %13333 = vst [vmem:[#allocation74_spill] sm:$0xff] %v8331_v60 }
  0xf1   :  { %v8152_v55 = vadd.f32 %v317_v62, %v8044_v4  ;;  %v8155_v7 = vadd.f32 %v382_v18, %v8046_v5  ;;  %v8227_v49 = vadd.f32 %v8036_v53, %v8079_v13  ;;  %13336 = vst [vmem:[#allocation77_spill] sm:$0xff] %v8355_v56 }
  0xf2   :  { %13299 = vst [vmem:[#allocation40_spill] sm:$0xff] %v8138_v47 }
  0xf3   :  { %13300 = vst [vmem:[#allocation41_spill] sm:$0xff] %v8141_v52  ;;  %v8169_v45 = vsel %vm121_vm1, %v8152_v55, %v8145_v54 }
  0xf4   :  { %13303 = vst [vmem:[#allocation44_spill] sm:$0xff] %v8152_v55  ;;  %v8659_v55 = vld [vmem:[#allocation11 + $0xc8] sm:$0xff] }
  0xf5   :  { %13304 = vst [vmem:[#allocation45_spill] sm:$0xff] %v8155_v7 }
  0xf6   :  { %13305 = vst [vmem:[#allocation46_spill] sm:$0xff] %v8169_v45 }
  0xf7   :  { %v447_v62 = vpop.f32.mrf.mxu2  ;;  %v512_v18 = vpop.f32.mrf.mxu3  ;;  %13307 = vst [vmem:[#allocation48_spill] sm:$0xff] %v8181_v10  ;;  %v8625_v10 = vld [vmem:[#allocation11 + $0x130] sm:$0xff] }
  0xf8   :  { %v8184_v44 = vadd.f32 %v447_v62, %v8077_v8  ;;  %v8187_v2 = vadd.f32 %v512_v18, %v8079_v13  ;;  %v320_v1 = vpop.f32.mrf.mxu0  ;;  %v385_v61 = vpop.f32.mrf.mxu1  ;;  %13310 = vst [vmem:[#allocation51_spill] sm:$0xff] %v8191_v11  ;;  %v8223_v62 = vadd.f32 %v8034_v51, %v8077_v8  ;;  %v8241_v51 = vadd.f32 %v8005_v35, %v8046_v5 }
  0xf9   :  { %v8198_v3 = vadd.f32 %v320_v1, %v8044_v4  ;;  %v8201_v48 = vadd.f32 %v385_v61, %v8046_v5  ;;  %13316 = vst [vmem:[#allocation57_spill] sm:$0xff] %v8227_v49  ;;  %v8237_v1 = vadd.f32 %v8003_v34, %v8044_v4  ;;  %v8273_v34 = vadd.f32 %v8009_v37, %v8079_v13  ;;  %v8605_v49 = vld [vmem:[#allocation11 + $0x150] sm:$0xff] }
  0xfa   :  { %13308 = vst [vmem:[#allocation49_spill] sm:$0xff] %v8184_v44 }
  0xfb   :  { %13309 = vst [vmem:[#allocation50_spill] sm:$0xff] %v8187_v2  ;;  %v8215_v50 = vsel %vm121_vm1, %v8198_v3, %v8191_v11  ;;  %v8621_v11 = vld [vmem:[#allocation11 + $0x120] sm:$0xff] }
  0xfc   :  { %13312 = vst [vmem:[#allocation53_spill] sm:$0xff] %v8198_v3  ;;  %v8623_v3 = vld [vmem:[#allocation11 + $0x128] sm:$0xff] }
  0xfd   :  { %13313 = vst [vmem:[#allocation54_spill] sm:$0xff] %v8201_v48 }
  0xfe   :  { %13314 = vst [vmem:[#allocation55_spill] sm:$0xff] %v8215_v50 }
  0xff   :  { %v450_v61 = vpop.f32.mrf.mxu2  ;;  %v515_v18 = vpop.f32.mrf.mxu3  ;;  %13315 = vst [vmem:[#allocation56_spill] sm:$0xff] %v8223_v62  ;;  %v8601_v62 = vld [vmem:[#allocation11 + $0x140] sm:$0xff] }
 0x100   :  { %v8230_v29 = vadd.f32 %v450_v61, %v8077_v8  ;;  %v8233_v50 = vadd.f32 %v515_v18, %v8079_v13  ;;  %v323_v45 = vpop.f32.mrf.mxu0  ;;  %v388_v63 = vpop.f32.mrf.mxu1  ;;  %13319 = vst [vmem:[#allocation60_spill] sm:$0xff] %v8241_v51  ;;  %v8269_v61 = vadd.f32 %v8007_v36, %v8077_v8  ;;  %v8287_v36 = vadd.f32 %v8016_v40, %v8046_v5 }
 0x101   :  { %v8244_v57 = vadd.f32 %v323_v45, %v8044_v4  ;;  %v8247_v53 = vadd.f32 %v388_v63, %v8046_v5  ;;  %13323 = vst [vmem:[#allocation64_spill] sm:$0xff] %v8273_v34  ;;  %v8283_v63 = vadd.f32 %v8014_v39, %v8044_v4  ;;  %v8319_v39 = vadd.f32 %v8020_v43, %v8079_v13 }
 0x102   :  { %13317 = vst [vmem:[#allocation58_spill] sm:$0xff] %v8230_v29  ;;  %v8603_v29 = vld [vmem:[#allocation11 + $0x148] sm:$0xff] }
 0x103   :  { %13318 = vst [vmem:[#allocation59_spill] sm:$0xff] %v8233_v50  ;;  %v8261_v35 = vsel %vm121_vm1, %v8244_v57, %v8237_v1  ;;  %v8609_v50 = vld [vmem:[#allocation11 + $0x158] sm:$0xff]  ;;  %v653_v23 = vsel %vm121_vm1, %v8237_v1, %v8244_v57  ;;  %v654_v46 = vsel %vm8051_vm2, %v8241_v51, %v8247_v53  ;;  %v8633_v1 = vld [vmem:[#allocation11 + $0x100] sm:$0xff]  ;;  %v8635_v51 = vld [vmem:[#allocation11 + $0x108] sm:$0xff] }
 0x104   :  { %13320 = vst [vmem:[#allocation61_spill] sm:$0xff] %v8247_v53  ;;  %v8629_v57 = vld [vmem:[#allocation11 + $0x138] sm:$0xff]  ;;  %v8637_v53 = vld [vmem:[#allocation11 + $0x110] sm:$0xff] }
 0x105   :  { %13321 = vst [vmem:[#allocation62_spill] sm:$0xff] %v8261_v35 }
 0x106   :  { %13322 = vst [vmem:[#allocation63_spill] sm:$0xff] %v8269_v61 }
 0x107   :  { %v453_v45 = vpop.f32.mrf.mxu2  ;;  %v518_v18 = vpop.f32.mrf.mxu3  ;;  %13326 = vst [vmem:[#allocation67_spill] sm:$0xff] %v8287_v36 }
 0x108   :  { %v8276_v9 = vadd.f32 %v453_v45, %v8077_v8  ;;  %v8279_v35 = vadd.f32 %v518_v18, %v8079_v13  ;;  %v326_v47 = vpop.f32.mrf.mxu0  ;;  %v391_v12 = vpop.f32.mrf.mxu1  ;;  %v8315_v45 = vadd.f32 %v8018_v41, %v8077_v8  ;;  %13330 = vst [vmem:[#allocation71_spill] sm:$0xff] %v8319_v39 }
 0x109   :  { %v8290_v52 = vadd.f32 %v326_v47, %v8044_v4  ;;  %v8293_v37 = vadd.f32 %v391_v12, %v8046_v5  ;;  %v288_v12 = vadd.f32 %v7956_v21, %v8044_v4  ;;  %13340 = vst [vmem:[#allocation81_spill] sm:$0xff] %v8371_v38 }
 0x10a   :  { %13324 = vst [vmem:[#allocation65_spill] sm:$0xff] %v8276_v9 }
 0x10b   :  { %13325 = vst [vmem:[#allocation66_spill] sm:$0xff] %v8279_v35  ;;  %v8307_v40 = vsel %vm121_vm1, %v8290_v52, %v8283_v63 }
 0x10c   :  { %13327 = vst [vmem:[#allocation68_spill] sm:$0xff] %v8293_v37 }
 0x10d   :  { %13328 = vst [vmem:[#allocation69_spill] sm:$0xff] %v8307_v40 }
 0x10e   :  { %13329 = vst [vmem:[#allocation70_spill] sm:$0xff] %v8315_v45 }
 0x10f   :  { %v456_v47 = vpop.f32.mrf.mxu2  ;;  %v521_v18 = vpop.f32.mrf.mxu3  ;;  %13364 = vst [vmem:[#allocation98_spill] sm:$0xff] %v8659_v55 }
 0x110   :  { %v8322_v30 = vadd.f32 %v456_v47, %v8077_v8  ;;  %v8325_v40 = vadd.f32 %v521_v18, %v8079_v13  ;;  %v329_v33 = vpop.f32.mrf.mxu0  ;;  %v394_v59 = vpop.f32.mrf.mxu1  ;;  %v8359_v47 = vadd.f32 %v7976_v25, %v8079_v13 }
 0x111   :  { %v330_v41 = vadd.f32 %v329_v33, %v8044_v4  ;;  %v8335_v43 = vadd.f32 %v394_v59, %v8046_v5 }
 0x112   :  { %13331 = vst [vmem:[#allocation72_spill] sm:$0xff] %v8322_v30 }
 0x113   :  { %13332 = vst [vmem:[#allocation73_spill] sm:$0xff] %v8325_v40  ;;  %v8347_v21 = vsel %vm121_vm1, %v330_v41, %v288_v12 }
 0x114   :  { %13334 = vst [vmem:[#allocation75_spill] sm:$0xff] %v8335_v43 }
 0x115   :  { %13335 = vst [vmem:[#allocation76_spill] sm:$0xff] %v8347_v21 }
 0x116   :  { %13337 = vst [vmem:[#allocation78_spill] sm:$0xff] %v8359_v47 }
 0x117   :  { %v459_v33 = vpop.f32.mrf.mxu2  ;;  %v524_v59 = vpop.f32.mrf.mxu3 }
 0x118   :  { %v8362_v18 = vadd.f32 %v459_v33, %v8077_v8  ;;  %v8365_v21 = vadd.f32 %v524_v59, %v8079_v13  ;;  %v332_v0 = vpop.f32.mrf.mxu0  ;;  %v397_v28 = vpop.f32.mrf.mxu1 }
 0x119   :  { %v333_v24 = vadd.f32 %v332_v0, %v8044_v4  ;;  %v8375_v25 = vadd.f32 %v397_v28, %v8046_v5  ;;  %v8395_v4 = vadd.f32 %v7996_v31, %v8077_v8  ;;  %v8399_v5 = vadd.f32 %v7998_v32, %v8079_v13 }
 0x11a   :  { %13338 = vst [vmem:[#allocation79_spill] sm:$0xff] %v8362_v18  ;;  %v620_v31 = vsel %vm8051_vm2, %v8331_v60, %v8335_v43 }
 0x11b   :  { %13339 = vst [vmem:[#allocation80_spill] sm:$0xff] %v8365_v21  ;;  %v8387_v26 = vsel %vm121_vm1, %v333_v24, %v291_v22 }
 0x11c   :  { %13341 = vst [vmem:[#allocation82_spill] sm:$0xff] %v8375_v25 }
 0x11d   :  { %13342 = vst [vmem:[#allocation83_spill] sm:$0xff] %v8387_v26  ;;  %v619_v26 = vsel %vm121_vm1, %v288_v12, %v330_v41 }
 0x11e   :  { %13343 = vst [vmem:[#allocation84_spill] sm:$0xff] %v8395_v4 }
 0x11f   :  { %13344 = vst [vmem:[#allocation85_spill] sm:$0xff] %v8399_v5  ;;  %v462_v28 = vpop.f32.mrf.mxu2  ;;  %v527_v0 = vpop.f32.mrf.mxu3 }
 0x120   :  { %v8402_v33 = vadd.f32 %v462_v28, %v8077_v8  ;;  %v8405_v59 = vadd.f32 %v527_v0, %v8079_v13  ;;  %v961_v27 = vpop.f32.mrf.mxu0  ;;  %v984_v16 = vpop.f32.mrf.mxu1  ;;  %v623_v28 = vsel %vm121_vm1, %v291_v22, %v333_v24  ;;  %v621_v22 = vsel %vm8084_vm3, %v8355_v56, %v8362_v18 }
 0x121   :  { %v1036_v32 = vadd.f32 %v961_v27, %v619_v26  ;;  %v1037_v42 = vadd.f32 %v984_v16, %v620_v31  ;;  %v622_v26 = vsel %vm8088_vm4, %v8359_v47, %v8365_v21  ;;  %v624_v31 = vsel %vm8051_vm2, %v8371_v38, %v8375_v25 }
 0x122   :  { %13345 = vst [vmem:[#allocation86_spill] sm:$0xff] %v8402_v33 }
 0x123   :  { %13346 = vst [vmem:[#allocation87_spill] sm:$0xff] %v8405_v59  ;;  %v6738_v12 = vmul.f32 -1.442695, %v1036_v32  ;;  %v6740_v41 = vmul.f32 -1.442695, %v1037_v42 }
 0x125   :  { %6876 = vpow2.f32 %v6738_v12 }
 0x126   :  { %6878 = vpow2.f32 %v6740_v41 }
 0x127   :  { %v1030_v16 = vpop.f32.mrf.mxu3  ;;  %v1007_v47 = vpop.f32.mrf.mxu2 }
 0x128   :  { %v1039_v27 = vadd.f32 %v1030_v16, %v622_v26  ;;  %v964_v0 = vpop.f32.mrf.mxu0  ;;  %v987_v32 = vpop.f32.mrf.mxu1 }
 0x129   :  { %v1040_v42 = vadd.f32 %v964_v0, %v623_v28  ;;  %v1041_v12 = vadd.f32 %v987_v32, %v624_v31  ;;  %v1038_v28 = vadd.f32 %v1007_v47, %v621_v22  ;;  %v625_v22 = vsel %vm8084_vm3, %v8395_v4, %v8402_v33 }
 0x12a   :  { %v6742_v41 = vmul.f32 -1.442695, %v1039_v27 }
 0x12b   :  { %v6877_v8 = vpop.eup %6876  ;;  %v6739_v13 = vmul.f32 -1.442695, %v1040_v42  ;;  %v6741_v26 = vmul.f32 -1.442695, %v1041_v12 }
 0x12c   :  { %v6879_v60 = vpop.eup %6878  ;;  %v1050_v43 = vadd.f32 1.0, %v6877_v8  ;;  %6880 = vpow2.f32 %v6742_v41  ;;  %v626_v8 = vsel %vm8088_vm4, %v8399_v5, %v8405_v59 }
 0x12d   :  { %v1088_v16 = vadd.f32 1.0, %v6879_v60  ;;  %6882 = vpow2.f32 %v6739_v13 }
 0x12e   :  { %6884 = vrcp.f32 %v1050_v43  ;;  %vm1057_vm8 = vweird.f32 %v1050_v43 }
 0x12f   :  { %6886 = vrcp.f32 %v1088_v16  ;;  %v1033_v24 = vpop.f32.mrf.mxu3  ;;  %v1101_v5 = vand.u32 2147483648, %v1088_v16  ;;  %v1099_v59 = vand.u32 2147483647, %v1088_v16  ;;  %vm1095_vm7 = vweird.f32 %v1088_v16 }
 0x130   :  { %6888 = vpow2.f32 %v6741_v26  ;;  %v1043_v27 = vadd.f32 %v1033_v24, %v626_v8  ;;  %v1010_v24 = vpop.f32.mrf.mxu2 }
 0x131   :  { %6890 = vtanh.f32 %v1038_v28  ;;  %v1063_v28 = vand.u32 2147483648, %v1050_v43  ;;  %v1042_v25 = vadd.f32 %v1010_v24, %v625_v22  ;;  %v1102_v4 = vor.u32 1.1754944e-38, %v1101_v5 }
 0x132   :  { %v6881_v0 = vpop.eup %6880  ;;  %v6743_v42 = vmul.f32 -1.442695, %v1043_v27  ;;  %vm1100_vm12 = vcmp.eq.f32.partialorder %v1099_v59, 8.507059e+37 }
 0x133   :  { %v6883_v31 = vpop.eup %6882  ;;  %v8439_v60 = vadd.f32 1.0, %v6881_v0  ;;  %v1061_v0 = vand.u32 2147483647, %v1050_v43 }
 0x134   :  { %v6885_v13 = vpop.eup %6884  ;;  %v8441_v32 = vadd.f32 1.0, %v6883_v31 }
 0x135   :  { %v6887_v12 = vpop.eup %6886  ;;  %v1053_v41 = vmul.f32 %v6885_v13, %v1050_v43  ;;  %6892 = vrcp.f32 %v8439_v60  ;;  %vm1058_vm5 = vweird.f32 %v6885_v13  ;;  %vm1062_vm9 = vcmp.eq.f32.partialorder %v1061_v0, 8.507059e+37 }
 0x136   :  { %v6889_v47 = vpop.eup %6888  ;;  %v1091_v26 = vmul.f32 %v6887_v12, %v1088_v16  ;;  %6894 = vrcp.f32 %v8441_v32  ;;  %vm1096_vm6 = vweird.f32 %v6887_v12  ;;  %vm1059_vm10 = vmor %vm1057_vm8, %vm1058_vm5  ;;  %v1078_v43 = vand.u32 2147483648, %v8441_v32 }
 0x137   :  { %v1054_v8 = vsub.f32 1.0, %v1053_v41  ;;  %v8449_v31 = vadd.f32 1.0, %v6889_v47  ;;  %6896 = vpow2.f32 %v6743_v42  ;;  %v6891_v56 = vpop.eup %6890  ;;  %vm1097_vm11 = vmor %vm1095_vm7, %vm1096_vm6  ;;  %v1141_v59 = vand.u32 2147483648, %v8439_v60 }
 0x138   :  { %v1092_v27 = vsub.f32 1.0, %v1091_v26  ;;  %v1064_v26 = vor.u32 1.1754944e-38, %v1063_v28  ;;  %vm1072_vm14 = vweird.f32 %v8441_v32  ;;  %vm1135_vm6 = vweird.f32 %v8439_v60 }
 0x139   :  { %v1055_v38 = vmul.f32 %v6885_v13, %v1054_v8  ;;  %6898 = vrcp.f32 %v8449_v31  ;;  %vm1110_vm8 = vweird.f32 %v8449_v31 }
 0x13a   :  { %v1093_v18 = vmul.f32 %v6887_v12, %v1092_v27  ;;  %6900 = vtanh.f32 %v1042_v25 }
 0x13b   :  { %v8452_v21 = vpop.eup %6892  ;;  %v1056_v41 = vadd.f32 %v6885_v13, %v1055_v38 }
 0x13c   :  { %v6895_v47 = vpop.eup %6894  ;;  %v1094_v33 = vadd.f32 %v6887_v12, %v1093_v18  ;;  %v1131_v42 = vmul.f32 %v8452_v21, %v8439_v60  ;;  %vm1136_vm15 = vweird.f32 %v8452_v21 }
 0x13d   :  { %v1060_v8 = vsel %vm1059_vm10, %v6885_v13, %v1056_v41  ;;  %v1068_v22 = vmul.f32 %v6895_v47, %v8441_v32  ;;  %v6897_v24 = vpop.eup %6896  ;;  %vm1073_vm13 = vweird.f32 %v6895_v47 }
 0x13e   :  { %v1065_v27 = vsel %vm1062_vm9, %v1064_v26, %v1060_v8  ;;  %v1098_v16 = vsel %vm1097_vm11, %v6887_v12, %v1094_v33  ;;  %v1132_v38 = vsub.f32 1.0, %v1131_v42  ;;  %v8458_v18 = vadd.f32 1.0, %v6897_v24  ;;  %vm1074_vm0 = vmor %vm1072_vm14, %vm1073_vm13 }
 0x13f   :  { %v6899_v0 = vpop.eup %6898  ;;  %v1103_v5 = vsel %vm1100_vm12, %v1102_v4, %v1098_v16  ;;  %v1162_v15 = vmul.f32 %v6891_v56, %v1065_v27  ;;  %v1069_v28 = vsub.f32 1.0, %v1068_v22  ;;  %v1076_v33 = vand.u32 2147483647, %v8441_v32  ;;  %vm8476_vm9 = vmor %vm1135_vm6, %vm1136_vm15 }
 0x140   :  { %v1160_v17 = vmul.f32 0.0, %v1103_v5  ;;  %v1133_v13 = vmul.f32 %v8452_v21, %v1132_v38  ;;  %v1106_v41 = vmul.f32 %v6899_v0, %v8449_v31  ;;  %6902 = vrcp.f32 %v8458_v18  ;;  %v6901_v26 = vpop.eup %6900 }
 0x141   :  { %v1070_v25 = vmul.f32 %v6895_v47, %v1069_v28  ;;  %v1116_v56 = vand.u32 2147483648, %v8449_v31  ;;  %v1079_v8 = vor.u32 1.1754944e-38, %v1078_v43  ;;  %vm1111_vm5 = vweird.f32 %v6899_v0 }
 0x142   :  { %v8465_v12 = vadd.f32 %v1162_v15, %v1160_v17  ;;  %v1107_v4 = vsub.f32 1.0, %v1106_v41  ;;  %v1134_v22 = vadd.f32 %v8452_v21, %v1133_v13  ;;  %v1114_v15 = vand.u32 2147483647, %v8449_v31  ;;  %vm1112_vm10 = vmor %vm1110_vm8, %vm1111_vm5 }
 0x143   :  { %v1071_v42 = vadd.f32 %v6895_v47, %v1070_v25  ;;  %vm1077_vm7 = vcmp.eq.f32.partialorder %v1076_v33, 8.507059e+37  ;;  %v1139_v32 = vand.u32 2147483647, %v8439_v60  ;;  %v13349_v5 = vmov 0  }
 0x144   :  { %6904 = vtanh.f32 %v8465_v12  ;;  %v1108_v24 = vmul.f32 %v6899_v0, %v1107_v4  ;;  %v8483_v28 = vsel %vm121_vm1, 7, %v13349_v5  ;;  %v1117_v13 = vor.u32 1.1754944e-38, %v1116_v56 }
 0x145   :  { %v1075_v17 = vsel %vm1074_vm0, %v6895_v47, %v1071_v42  ;;  %13350 = vst [vmem:[#allocation88_spill] sm:$0xff] %v8483_v28  ;;  %v1138_v60 = vsel %vm8476_vm9, %v8452_v21, %v1134_v22  ;;  %v1142_v47 = vor.u32 1.1754944e-38, %v1141_v59  ;;  %vm1115_vm11 = vcmp.eq.f32.partialorder %v1114_v15, 8.507059e+37  ;;  %v8597_v28 = vld [vmem:[#allocation11 + $0x178] sm:$0xff] }
 0x146   :  { %v1080_v27 = vsel %vm1077_vm7, %v1079_v8, %v1075_v17  ;;  %v1109_v16 = vadd.f32 %v6899_v0, %v1108_v24  ;;  %v6903_v43 = vpop.eup %6902  ;;  %v7556_v4 = vmov 7   ;;  %v8491_v8 = vpop.permute.xlu0 %1172  ;;  %vm1140_vm12 = vcmp.eq.f32.partialorder %v1139_v32, 8.507059e+37 }
 0x147   :  { %v1163_v41 = vmul.f32 %v6901_v26, %v1080_v27  ;;  %v1146_v25 = vmul.f32 %v6903_v43, %v8458_v18  ;;  %v1170_v42 = vsel %vm121_vm1, 0, %v7556_v4  ;;  %13351 = vst [vmem:[#allocation89_spill] sm:$0xff] %v8491_v8  ;;  %v1143_v5 = vsel %vm1140_vm12, %v1142_v47, %v1138_v60  ;;  %v8555_v4 = vld [vmem:[#allocation11 + $0x1c8] sm:$0xff] }
 0x148   :  { %v1113_v31 = vsel %vm1112_vm10, %v6899_v0, %v1109_v16  ;;  %vm8500_vm14 = vcmp.gt.s32.totalorder %v8491_v8, %v1170_v42  ;;  %v13353_v59 = vmov 0  ;;  %vm1151_vm15 = vweird.f32 %v6903_v43 }
 0x149   :  { %v1118_v33 = vsel %vm1115_vm11, %v1117_v13, %v1113_v31  ;;  %v1147_v17 = vsub.f32 1.0, %v1146_v25  ;;  %v13354_v59 = vsel %vm8500_vm14, 4294967295, %v13353_v59  ;;  %v1156_v26 = vand.u32 2147483648, %v8458_v18  ;;  %v8549_v25 = vld [vmem:[#allocation11 + $0x1f8] sm:$0xff] }
 0x14a   :  { %v6905_v56 = vpop.eup %6904  ;;  %v1161_v24 = vmul.f32 0.0, %v1118_v33  ;;  %13355 = vst [vmem:[#allocation91_spill] sm:$0xff] %v13354_v59  ;;  %vm1150_vm0 = vweird.f32 %v8458_v18  ;;  %v1154_v15 = vand.u32 2147483647, %v8458_v18  ;;  %v13358_v31 = vmov 0  ;;  %v8541_v18 = vld [vmem:[#allocation11 + $0x1e0] sm:$0xff]  ;;  %1634 = vmatpush.msrb.mxu3 %v8549_v25 }
 0x14b   :  { %v8493_v38 = vmul.f32 %v6905_v56, %v1143_v5  ;;  %v1148_v0 = vmul.f32 %v6903_v43, %v1147_v17  ;;  %vm1152_vm5 = vmor %vm1150_vm0, %vm1151_vm15  ;;  %v1157_v27 = vor.u32 1.1754944e-38, %v1156_v26  ;;  %1565 = vmatpush.msrb.mxu0 %v8541_v18  ;;  %v8553_v33 = vld [vmem:[#allocation11 + $0x1c0] sm:$0xff]  ;;  %v8561_v56 = vld [vmem:[#allocation11 + $0x1d8] sm:$0xff] }
 0x14c   :  { %v8497_v21 = vadd.f32 %v1163_v41, %v1161_v24  ;;  %vm1155_vm6 = vcmp.eq.f32.partialorder %v1154_v15, 8.507059e+37  ;;  %v8545_v41 = vld [vmem:[#allocation11 + $0x1f0] sm:$0xff]  ;;  %1635 = vmatpush.msrb.mxu3 %v8561_v56  ;;  %v8565_v24 = vld [vmem:[#allocation11 + $0x1a0] sm:$0xff]  ;;  %v8567_v17 = vld [vmem:[#allocation11 + $0x1a8] sm:$0xff] }
 0x14d   :  { %13352 = vst [vmem:[#allocation90_spill] sm:$0xff] %v8493_v38  ;;  %6744 = vmatmul.msk.f32.vlgmr.msra.gmra.mxu0 %vm8500_vm14, %v8493_v38  ;;  %6746 = vmatmul.msk.f32.vlgmr.msra.gmra.mxu1 %vm8500_vm14, %v8493_v38  ;;  %v1149_v22 = vadd.f32 %v6903_v43, %v1148_v0  ;;  %v8569_v5 = vld [vmem:[#allocation11 + $0x1b0] sm:$0xff]  ;;  %v8573_v0 = vld [vmem:[#allocation11 + $0x1b8] sm:$0xff]  ;;  %v8577_v26 = vld [vmem:[#allocation11 + $0x180] sm:$0xff] }
 0x14e   :  { %6906 = vtanh.f32 %v8497_v21  ;;  %6748 = vmatmul.msk.f32.vlgmr.msra.gmra.mxu2 %vm8500_vm14, %v8493_v38  ;;  %6750 = vmatmul.msk.f32.vlgmr.msra.gmra.mxu3 %vm8500_vm14, %v8493_v38  ;;  %v8520_v16 = vpop.permute.xlu0 %1175  ;;  %v8581_v15 = vld [vmem:[#allocation11 + $0x190] sm:$0xff]  ;;  %v13450_v59 = vld [vmem:[#allocation32_spill] sm:$0xff] }
 0x14f   :  { %v1153_v32 = vsel %vm1152_vm5, %v6903_v43, %v1149_v22  ;;  %13356 = vst [vmem:[#allocation92_spill] sm:$0xff] %v8520_v16  ;;  %vm8525_vm7 = vcmp.gt.s32.totalorder %v8520_v16, %v1170_v42  ;;  %v8543_v43 = vld [vmem:[#allocation11 + $0x1e8] sm:$0xff]  ;;  %1611 = vmatpush.msrb.mxu2 %v8545_v41  ;;  %v8557_v42 = vld [vmem:[#allocation11 + $0x1d0] sm:$0xff]  ;;  %1566 = vmatpush.msrb.mxu0 %v8553_v33 }
 0x150   :  { %v1158_v60 = vsel %vm1155_vm6, %v1157_v27, %v1153_v32  ;;  %v13359_v31 = vsel %vm8525_vm7, 4294967295, %v13358_v31  ;;  %1588 = vmatpush.msrb.mxu1 %v8543_v43  ;;  %1636 = vmatpush.msrb.mxu3 %v8573_v0  ;;  %v8579_v22 = vld [vmem:[#allocation11 + $0x188] sm:$0xff]  ;;  %v8585_v32 = vld [vmem:[#allocation11 + $0x198] sm:$0xff]  ;;  %v8589_v27 = vld [vmem:[#allocation11 + $0x160] sm:$0xff] }
 0x151   :  { %13360 = vst [vmem:[#allocation94_spill] sm:$0xff] %v13359_v31  ;;  %1612 = vmatpush.msrb.mxu2 %v8557_v42  ;;  %1567 = vmatpush.msrb.mxu0 %v8565_v24  ;;  %v8677_v31 = vld [vmem:[#allocation11 + $0xb0] sm:$0xff] }
 0x152   :  { %1589 = vmatpush.msrb.mxu1 %v8555_v4  ;;  %1637 = vmatpush.msrb.mxu3 %v8585_v32  ;;  %13369 = vst [vmem:[#allocation103_spill] sm:$0xff] %v8677_v31 }
 0x153   :  { %1613 = vmatpush.msrb.mxu2 %v8569_v5  ;;  %1568 = vmatpush.msrb.mxu0 %v8577_v26 }
 0x154   :  { %v6907_v13 = vpop.eup %6906  ;;  %1590 = vmatpush.msrb.mxu1 %v8567_v17  ;;  %1638 = vmatpush.msrb.mxu3 %v8597_v28 }
 0x155   :  { %v8522_v47 = vmul.f32 %v6907_v13, %v1158_v60  ;;  %1614 = vmatpush.msrb.mxu2 %v8581_v15  ;;  %v8591_v13 = vld [vmem:[#allocation11 + $0x168] sm:$0xff]  ;;  %v8593_v60 = vld [vmem:[#allocation11 + $0x170] sm:$0xff]  ;;  %1569 = vmatpush.msrb.mxu0 %v8589_v27 }
 0x156   :  { %1591 = vmatpush.msrb.mxu1 %v8579_v22  ;;  %1639 = vmatpush.msrb.mxu3 %v8609_v50 }
 0x157   :  { %13357 = vst [vmem:[#allocation93_spill] sm:$0xff] %v8522_v47  ;;  %6745 = vmatmul.msk.f32.gmra.mxu0 %vm8525_vm7, %v8522_v47  ;;  %6747 = vmatmul.msk.f32.gmra.mxu1 %vm8525_vm7, %v8522_v47 }
 0x158   :  { %6749 = vmatmul.msk.f32.gmra.mxu2 %vm8525_vm7, %v8522_v47  ;;  %6751 = vmatmul.msk.f32.gmra.mxu3 %vm8525_vm7, %v8522_v47  ;;  %v8661_v47 = vld [vmem:[#allocation11 + $0xd0] sm:$0xff] }
 0x159   :  { %1592 = vmatpush.msrb.mxu1 %v8591_v13  ;;  %1615 = vmatpush.msrb.mxu2 %v8593_v60  ;;  %13365 = vst [vmem:[#allocation99_spill] sm:$0xff] %v8661_v47 }
 0x15a   :  { %1570 = vmatpush.msrb.mxu0 %v8601_v62  ;;  %1640 = vmatpush.msrb.mxu3 %v8629_v57 }
 0x15b   :  { %1593 = vmatpush.msrb.mxu1 %v8603_v29  ;;  %1616 = vmatpush.msrb.mxu2 %v8605_v49 }
 0x15c   :  { %1571 = vmatpush.msrb.mxu0 %v8621_v11 }
 0x15d   :  { %1594 = vmatpush.msrb.mxu1 %v8623_v3  ;;  %1617 = vmatpush.msrb.mxu2 %v8625_v10 }
 0x15e   :  { %1572 = vmatpush.msrb.mxu0 %v8633_v1 }
 0x15f   :  { %1595 = vmatpush.msrb.mxu1 %v8635_v51  ;;  %1618 = vmatpush.msrb.mxu2 %v8637_v53 }
 0x1ca   :  { %v1274_v44 = vpop.f32.mrf.mxu0  ;;  %v1297_v48 = vpop.f32.mrf.mxu1 }
 0x1cb   :  { %v1349_v2 = vadd.f32 %v1274_v44, %v653_v23  ;;  %v1350_v6 = vadd.f32 %v1297_v48, %v654_v46  ;;  %v8641_v23 = vld [vmem:[#allocation11 + $0x118] sm:$0xff]  ;;  %v8645_v44 = vld [vmem:[#allocation11 + $0xe0] sm:$0xff]  ;;  %v8647_v46 = vld [vmem:[#allocation11 + $0xe8] sm:$0xff] }
 0x1cc   :  { %1641 = vmatpush.msrb.mxu3 %v8641_v23  ;;  %v8649_v48 = vld [vmem:[#allocation11 + $0xf0] sm:$0xff]  ;;  %1573 = vmatpush.msrb.mxu0 %v8645_v44 }
 0x1cd   :  { %v6752_v7 = vmul.f32 -1.442695, %v1349_v2  ;;  %v6754_v54 = vmul.f32 -1.442695, %v1350_v6  ;;  %13361 = vst [vmem:[#allocation95_spill] sm:$0xff] %v8649_v48  ;;  %1596 = vmatpush.msrb.mxu1 %v8647_v46  ;;  %v8653_v2 = vld [vmem:[#allocation11 + $0xf8] sm:$0xff]  ;;  %1619 = vmatpush.msrb.mxu2 %v8649_v48 }
 0x1ce   :  { %13362 = vst [vmem:[#allocation96_spill] sm:$0xff] %v8653_v2  ;;  %1642 = vmatpush.msrb.mxu3 %v8653_v2  ;;  %v8657_v6 = vld [vmem:[#allocation11 + $0xc0] sm:$0xff]  ;;  %v8675_v48 = vld [vmem:[#allocation11 + $0xa8] sm:$0xff] }
 0x1cf   :  { %6908 = vpow2.f32 %v6752_v7  ;;  %13363 = vst [vmem:[#allocation97_spill] sm:$0xff] %v8657_v6  ;;  %v656_v7 = vsel %vm8088_vm4, %v8273_v34, %v8279_v35  ;;  %1574 = vmatpush.msrb.mxu0 %v8657_v6  ;;  %1597 = vmatpush.msrb.mxu1 %v8659_v55  ;;  %v8673_v2 = vld [vmem:[#allocation11 + $0xa0] sm:$0xff]  ;;  %v8681_v34 = vld [vmem:[#allocation11 + $0xb8] sm:$0xff] }
 0x1d0   :  { %6910 = vpow2.f32 %v6754_v54  ;;  %v8669_v54 = vld [vmem:[#allocation11 + $0xd8] sm:$0xff]  ;;  %1620 = vmatpush.msrb.mxu2 %v8661_v47  ;;  %13367 = vst [vmem:[#allocation101_spill] sm:$0xff] %v8673_v2 }
 0x1d1   :  { %v1343_v16 = vpop.f32.mrf.mxu3  ;;  %13366 = vst [vmem:[#allocation100_spill] sm:$0xff] %v8669_v54  ;;  %1643 = vmatpush.msrb.mxu3 %v8669_v54  ;;  %1575 = vmatpush.msrb.mxu0 %v8673_v2  ;;  %v658_v54 = vsel %vm8051_vm2, %v8287_v36, %v8293_v37  ;;  %v8695_v2 = vld [vmem:[#allocation11 + $0x88] sm:$0xff] }
 0x1d2   :  { %v1352_v38 = vadd.f32 %v1343_v16, %v656_v7  ;;  %13368 = vst [vmem:[#allocation102_spill] sm:$0xff] %v8675_v48  ;;  %1598 = vmatpush.msrb.mxu1 %v8675_v48  ;;  %v657_v16 = vsel %vm121_vm1, %v8283_v63, %v8290_v52  ;;  %1621 = vmatpush.msrb.mxu2 %v8677_v31  ;;  %v8693_v48 = vld [vmem:[#allocation11 + $0x80] sm:$0xff]  ;;  %v8701_v63 = vld [vmem:[#allocation11 + $0x98] sm:$0xff] }
 0x1d3   :  { %13370 = vst [vmem:[#allocation104_spill] sm:$0xff] %v8681_v34  ;;  %1644 = vmatpush.msrb.mxu3 %v8681_v34  ;;  %1576 = vmatpush.msrb.mxu0 %v8693_v48  ;;  %v8709_v34 = vld [vmem:[#allocation11 + $0x68] sm:$0xff] }
 0x1d4   :  { %v6756_v35 = vmul.f32 -1.442695, %v1352_v38  ;;  %v1277_v7 = vpop.f32.mrf.mxu0  ;;  %v1300_v47 = vpop.f32.mrf.mxu1  ;;  %13371 = vst [vmem:[#allocation105_spill] sm:$0xff] %v8693_v48  ;;  %v8697_v38 = vld [vmem:[#allocation11 + $0x90] sm:$0xff]  ;;  %1599 = vmatpush.msrb.mxu1 %v8695_v2 }
 0x1d5   :  { %13372 = vst [vmem:[#allocation106_spill] sm:$0xff] %v8695_v2  ;;  %v6909_v55 = vpop.eup %6908  ;;  %v1353_v6 = vadd.f32 %v1277_v7, %v657_v16  ;;  %v1354_v52 = vadd.f32 %v1300_v47, %v658_v54  ;;  %1622 = vmatpush.msrb.mxu2 %v8697_v38  ;;  %1645 = vmatpush.msrb.mxu3 %v8701_v63  ;;  %v8711_v16 = vld [vmem:[#allocation11 + $0x70] sm:$0xff]  ;;  %v8759_v2 = vld [vmem:[#allocation11 + $0x18] sm:$0xff] }
 0x1d6   :  { %13373 = vst [vmem:[#allocation107_spill] sm:$0xff] %v8697_v38  ;;  %v6911_v36 = vpop.eup %6910  ;;  %v8703_v37 = vadd.f32 1.0, %v6909_v55  ;;  %6912 = vpow2.f32 %v6756_v35  ;;  %1577 = vmatpush.msrb.mxu0 %v8707_v14  ;;  %1600 = vmatpush.msrb.mxu1 %v8709_v34  ;;  %v8717_v55 = vld [vmem:[#allocation11 + $0x78] sm:$0xff]  ;;  %v8722_v35 = vld [vmem:[#allocation11 + $0x40] sm:$0xff] }
 0x1d7   :  { %13374 = vst [vmem:[#allocation108_spill] sm:$0xff] %v8701_v63  ;;  %v8713_v47 = vadd.f32 1.0, %v6911_v36  ;;  %v6753_v54 = vmul.f32 -1.442695, %v1353_v6  ;;  %v6755_v7 = vmul.f32 -1.442695, %v1354_v52  ;;  %1623 = vmatpush.msrb.mxu2 %v8711_v16  ;;  %1646 = vmatpush.msrb.mxu3 %v8717_v55  ;;  %v1320_v6 = vpop.f32.mrf.mxu2 }
 0x1d8   :  { %13376 = vst [vmem:[#allocation110_spill] sm:$0xff] %v8709_v34  ;;  %6914 = vrcp.f32 %v8703_v37  ;;  %v8724_v63 = vld [vmem:[#allocation11 + $0x48] sm:$0xff]  ;;  %v8726_v36 = vld [vmem:[#allocation11 + $0x50] sm:$0xff]  ;;  %1578 = vmatpush.msrb.mxu0 %v8722_v35  ;;  %v8731_v52 = vld [vmem:[#allocation11 + $0x58] sm:$0xff]  ;;  %vm1370_vm11 = vweird.f32 %v8703_v37 }
 0x1d9   :  { %13377 = vst [vmem:[#allocation111_spill] sm:$0xff] %v8711_v16  ;;  %6916 = vrcp.f32 %v8713_v47  ;;  %1601 = vmatpush.msrb.mxu1 %v8724_v63  ;;  %v8733_v34 = vld [vmem:[#allocation11 + $0x20] sm:$0xff]  ;;  %v8735_v16 = vld [vmem:[#allocation11 + $0x28] sm:$0xff]  ;;  %1624 = vmatpush.msrb.mxu2 %v8726_v36  ;;  %v8741_v14 = vld [vmem:[#allocation11 + $0x38] sm:$0xff]  ;;  %vm1408_vm10 = vweird.f32 %v8713_v47 }
 0x1da   :  { %13378 = vst [vmem:[#allocation112_spill] sm:$0xff] %v8717_v55  ;;  %6918 = vpow2.f32 %v6753_v54  ;;  %1647 = vmatpush.msrb.mxu3 %v8731_v52  ;;  %v8739_v55 = vld [vmem:[#allocation11 + $0x30] sm:$0xff]  ;;  %v8743_v38 = vld [vmem:[#allocation11] sm:$0xff]  ;;  %v660_v54 = vsel %vm8088_vm4, %v8319_v39, %v8325_v40  ;;  %1579 = vmatpush.msrb.mxu0 %v8733_v34 }
 0x1db   :  { %13379 = vst [vmem:[#allocation113_spill] sm:$0xff] %v8722_v35  ;;  %6920 = vpow2.f32 %v6755_v7  ;;  %1602 = vmatpush.msrb.mxu1 %v8735_v16  ;;  %v8757_v35 = vld [vmem:[#allocation11 + $0x10] sm:$0xff]  ;;  %1625 = vmatpush.msrb.mxu2 %v8739_v55 }
 0x1dc   :  { %13380 = vst [vmem:[#allocation114_spill] sm:$0xff] %v8724_v63  ;;  %v655_v63 = vsel %vm8084_vm3, %v8269_v61, %v8276_v9  ;;  %v6913_v48 = vpop.eup %6912  ;;  %1648 = vmatpush.msrb.mxu3 %v8741_v14  ;;  %1580 = vmatpush.msrb.mxu0 %v8743_v38 }
 0x1dd   :  { %13381 = vst [vmem:[#allocation115_spill] sm:$0xff] %v8726_v36  ;;  %v1346_v36 = vpop.f32.mrf.mxu3  ;;  %v1351_v31 = vadd.f32 %v1320_v6, %v655_v63  ;;  %v8763_v7 = vadd.f32 1.0, %v6913_v48  ;;  %1626 = vmatpush.msrb.mxu2 %v8757_v35 }
 0x1de   :  { %13382 = vst [vmem:[#allocation116_spill] sm:$0xff] %v8731_v52  ;;  %v8755_v52 = vld [vmem:[#allocation11 + $0x8] sm:$0xff]  ;;  %v1356_v61 = vadd.f32 %v1346_v36, %v660_v54  ;;  %v8767_v39 = vpop.eup %6914  ;;  %1649 = vmatpush.msrb.mxu3 %v8759_v2  ;;  %1873 = vmatpush.msra.mxu0 %v8541_v18  ;;  %v1374_v54 = vand.u32 2147483647, %v8703_v37 }
 0x1df   :  { %13383 = vst [vmem:[#allocation117_spill] sm:$0xff] %v8759_v2  ;;  %1603 = vmatpush.msrb.mxu1 %v8755_v52  ;;  %v8771_v9 = vpop.eup %6916  ;;  %v1366_v63 = vmul.f32 %v8767_v39, %v8703_v37  ;;  %6922 = vrcp.f32 %v8763_v7  ;;  %1919 = vmatpush.msra.mxu2 %v8545_v41  ;;  %vm1371_vm8 = vweird.f32 %v8767_v39 }
 0x1e0   :  { %v6757_v40 = vmul.f32 -1.442695, %v1356_v61  ;;  %v6919_v48 = vpop.eup %6918  ;;  %v1404_v36 = vmul.f32 %v8771_v9, %v8713_v47  ;;  %6924 = vtanh.f32 %v1351_v31  ;;  %1942 = vmatpush.msra.mxu3 %v8549_v25  ;;  %1874 = vmatpush.msra.mxu0 %v8553_v33  ;;  %v1376_v31 = vand.u32 2147483648, %v8703_v37  ;;  %v1323_v25 = vpop.f32.mrf.mxu2  ;;  %vm8821_vm12 = vmor %vm1370_vm11, %vm1371_vm8 }
 0x1e1   :  { %1896 = vmatpush.msra.mxu1 %v8543_v43  ;;  %v6921_v61 = vpop.eup %6920  ;;  %v1367_v6 = vsub.f32 1.0, %v1366_v63  ;;  %v8783_v20 = vadd.f32 1.0, %v6919_v48  ;;  %v1414_v43 = vand.u32 2147483648, %v8713_v47  ;;  %1920 = vmatpush.msra.mxu2 %v8557_v42  ;;  %vm1409_vm9 = vweird.f32 %v8771_v9 }
 0x1e2   :  { %6926 = vpow2.f32 %v6757_v40  ;;  %v1405_v18 = vsub.f32 1.0, %v1404_v36  ;;  %v8789_v2 = vadd.f32 1.0, %v6921_v61  ;;  %1943 = vmatpush.msra.mxu3 %v8561_v56  ;;  %v1412_v40 = vand.u32 2147483647, %v8713_v47  ;;  %1875 = vmatpush.msra.mxu0 %v8565_v24  ;;  %vm8834_vm15 = vmor %vm1408_vm10, %vm1409_vm9 }
 0x1e3   :  { %1897 = vmatpush.msra.mxu1 %v8555_v4  ;;  %v1368_v41 = vmul.f32 %v8767_v39, %v1367_v6  ;;  %6928 = vrcp.f32 %v8783_v20  ;;  %v659_v4 = vsel %vm8084_vm3, %v8315_v45, %v8322_v30  ;;  %1921 = vmatpush.msra.mxu2 %v8569_v5  ;;  %v7557_v24 = vmov 6   ;;  %v9228_v45 = vld [vmem:[#allocation11 + $0xe8] sm:$0xff]  ;;  %v9230_v30 = vld [vmem:[#allocation11 + $0xf0] sm:$0xff] }
 0x1e4   :  { %v1406_v33 = vmul.f32 %v8771_v9, %v1405_v18  ;;  %6930 = vrcp.f32 %v8789_v2  ;;  %1944 = vmatpush.msra.mxu3 %v8573_v0  ;;  %1876 = vmatpush.msra.mxu0 %v8577_v26  ;;  %v1377_v63 = vor.u32 1.1754944e-38, %v1376_v31  ;;  %v1355_v36 = vadd.f32 %v1323_v25, %v659_v4  ;;  %v13394_v0 = vld [vmem:[#allocation97_spill] sm:$0xff] }
 0x1e5   :  { %1898 = vmatpush.msra.mxu1 %v8567_v17  ;;  %v8808_v42 = vpop.eup %6922  ;;  %v1369_v56 = vadd.f32 %v8767_v39, %v1368_v41  ;;  %v8815_v17 = vsel %vm121_vm1, 1, %v7557_v24  ;;  %1922 = vmatpush.msra.mxu2 %v8581_v15  ;;  %v1415_v61 = vor.u32 1.1754944e-38, %v1414_v43  ;;  %vm1375_vm0 = vcmp.eq.f32.partialorder %v1374_v54, 8.507059e+37 }
 0x1e6   :  { %13384 = vst [vmem:[#allocation118_spill] sm:$0xff] %v8815_v17  ;;  %v6925_v5 = vpop.eup %6924  ;;  %v1407_v48 = vadd.f32 %v8771_v9, %v1406_v33  ;;  %v1444_v37 = vmul.f32 %v8808_v42, %v8763_v7  ;;  %1945 = vmatpush.msra.mxu3 %v8585_v32  ;;  %vm1413_vm5 = vcmp.eq.f32.partialorder %v1412_v40, 8.507059e+37  ;;  %1877 = vmatpush.msra.mxu0 %v8589_v27  ;;  %6932 = vtanh.f32 %v1355_v36  ;;  %v13397_v36 = vld [vmem:[#allocation100_spill] sm:$0xff]  ;;  %v9214_v33 = vld [vmem:[#allocation11 + $0x110] sm:$0xff] }
 0x1e7   :  { %1899 = vmatpush.msra.mxu1 %v8579_v22  ;;  %v1373_v6 = vsel %vm8821_vm12, %v8767_v39, %v1369_v56  ;;  %1923 = vmatpush.msra.mxu2 %v8593_v60  ;;  %v1181_v39 = vsel %vm8500_vm14, %v8465_v12, 0.0  ;;  %vm12968_vm6 = vcmp.gt.s32.totalorder %v8491_v8, %v8815_v17  ;;  %vm1448_vm8 = vweird.f32 %v8763_v7  ;;  %v13398_v22 = vld [vmem:[#allocation101_spill] sm:$0xff] }
 0x1e8   :  { %v6927_v26 = vpop.eup %6926  ;;  %v1378_v15 = vsel %vm1375_vm0, %v1377_v63, %v1373_v6  ;;  %v1411_v32 = vsel %vm8834_vm15, %v8771_v9, %v1407_v48  ;;  %v1445_v47 = vsub.f32 1.0, %v1444_v37  ;;  %1946 = vmatpush.msra.mxu3 %v8597_v28  ;;  %1878 = vmatpush.msra.mxu0 %v8601_v62  ;;  %v1452_v12 = vand.u32 2147483647, %v8763_v7  ;;  %v13396_v37 = vld [vmem:[#allocation99_spill] sm:$0xff] }
 0x1e9   :  { %1900 = vmatpush.msra.mxu1 %v8591_v13  ;;  %v8846_v18 = vadd.f32 1.0, %v6927_v26  ;;  %v8850_v43 = vpop.eup %6928  ;;  %v1416_v27 = vsel %vm1413_vm5, %v1415_v61, %v1411_v32  ;;  %v1475_v13 = vmul.f32 %v6925_v5, %v1378_v15  ;;  %1924 = vmatpush.msra.mxu2 %v8605_v49  ;;  %v1454_v31 = vand.u32 2147483648, %v8763_v7  ;;  %v13399_v61 = vld [vmem:[#allocation102_spill] sm:$0xff] }
 0x1ea   :  { %v8859_v9 = vpop.eup %6930  ;;  %v1473_v60 = vmul.f32 %v1416_v27, %v1181_v39  ;;  %v1446_v28 = vmul.f32 %v8808_v42, %v1445_v47  ;;  %v1381_v54 = vmul.f32 %v8850_v43, %v8783_v20  ;;  %1947 = vmatpush.msra.mxu3 %v8609_v50  ;;  %1879 = vmatpush.msra.mxu0 %v8621_v11  ;;  %v1389_v49 = vand.u32 2147483647, %v8783_v20  ;;  %v13401_v27 = vld [vmem:[#allocation104_spill] sm:$0xff] }
 0x1eb   :  { %1901 = vmatpush.msra.mxu1 %v8603_v29  ;;  %v1419_v29 = vmul.f32 %v8859_v9, %v8789_v2  ;;  %6934 = vrcp.f32 %v8846_v18  ;;  %1925 = vmatpush.msra.mxu2 %v8625_v10  ;;  %vm1449_vm9 = vweird.f32 %v8808_v42  ;;  %v1391_v25 = vand.u32 2147483648, %v8783_v20 }
 0x1ec   :  { %v1477_v62 = vadd.f32 %v1475_v13, %v1473_v60  ;;  %v1382_v41 = vsub.f32 1.0, %v1381_v54  ;;  %1948 = vmatpush.msra.mxu3 %v8629_v57  ;;  %v1447_v50 = vadd.f32 %v8808_v42, %v1446_v28  ;;  %1880 = vmatpush.msra.mxu0 %v8633_v1  ;;  %vm1386_vm10 = vweird.f32 %v8850_v43  ;;  %v6933_v1 = vpop.eup %6932  ;;  %vm8901_vm12 = vmor %vm1448_vm8, %vm1449_vm9  ;;  %v13402_v28 = vld [vmem:[#allocation105_spill] sm:$0xff]  ;;  %v13403_v54 = vld [vmem:[#allocation106_spill] sm:$0xff] }
 0x1ed   :  { %1902 = vmatpush.msra.mxu1 %v8623_v3  ;;  %v1420_v40 = vsub.f32 1.0, %v1419_v29  ;;  %v1429_v3 = vand.u32 2147483648, %v8789_v2  ;;  %1926 = vmatpush.msra.mxu2 %v8637_v53  ;;  %vm1424_vm11 = vweird.f32 %v8859_v9  ;;  %v1427_v57 = vand.u32 2147483647, %v8789_v2  ;;  %v13413_v53 = vld [vmem:[#allocation112_spill] sm:$0xff] }
 0x1ee   :  { %6936 = vtanh.f32 %v1477_v62  ;;  %v1383_v11 = vmul.f32 %v8850_v43, %v1382_v41  ;;  %1949 = vmatpush.msra.mxu3 %v8641_v23  ;;  %1881 = vmatpush.msra.mxu0 %v8645_v44  ;;  %v1455_v23 = vor.u32 1.1754944e-38, %v1454_v31  ;;  %v1182_v4 = vsel %vm8525_vm7, %v8497_v21, 0.0  ;;  %v13392_v44 = vld [vmem:[#allocation95_spill] sm:$0xff]  ;;  %v13407_v31 = vld [vmem:[#allocation108_spill] sm:$0xff] }
 0x1ef   :  { %1903 = vmatpush.msra.mxu1 %v8635_v51  ;;  %v1421_v10 = vmul.f32 %v8859_v9, %v1420_v40  ;;  %v8893_v51 = vsel %vm12968_vm6, %v1477_v62, %v1181_v39  ;;  %vm1385_vm15 = vweird.f32 %v8783_v20  ;;  %1927 = vmatpush.msra.mxu2 %v13392_v44  ;;  %vm1423_vm0 = vweird.f32 %v8789_v2  ;;  %v13395_v20 = vld [vmem:[#allocation98_spill] sm:$0xff]  ;;  %v13400_v39 = vld [vmem:[#allocation103_spill] sm:$0xff] }
 0x1f0   :  { %v1384_v56 = vadd.f32 %v8850_v43, %v1383_v11  ;;  %vm1387_vm5 = vmor %vm1385_vm15, %vm1386_vm10  ;;  %v1392_v7 = vor.u32 1.1754944e-38, %v1391_v25  ;;  %v1451_v21 = vsel %vm8901_vm12, %v8808_v42, %v1447_v50  ;;  %1882 = vmatpush.msra.mxu0 %v13394_v0  ;;  %v1430_v63 = vor.u32 1.1754944e-38, %v1429_v3  ;;  %v13406_v62 = vld [vmem:[#allocation107_spill] sm:$0xff]  ;;  %v13409_v50 = vld [vmem:[#allocation109_spill] sm:$0xff] }
 0x1f1   :  { %1904 = vmatpush.msra.mxu1 %v8647_v46  ;;  %v13393_v46 = vld [vmem:[#allocation96_spill] sm:$0xff]  ;;  %v8912_v24 = vpop.eup %6934  ;;  %v1422_v5 = vadd.f32 %v8859_v9, %v1421_v10  ;;  %vm1425_vm8 = vmor %vm1423_vm0, %vm1424_vm11  ;;  %vm1390_vm9 = vcmp.eq.f32.partialorder %v1389_v49, 8.507059e+37  ;;  %1928 = vmatpush.msra.mxu2 %v13396_v37  ;;  %vm1453_vm10 = vcmp.eq.f32.partialorder %v1452_v12, 8.507059e+37  ;;  %vm1428_vm12 = vcmp.eq.f32.partialorder %v1427_v57, 8.507059e+37  ;;  %v13404_v12 = vld [vmem:[#allocation90_spill] sm:$0xff] }
 0x1f2   :  { %1950 = vmatpush.msra.mxu3 %v13393_v46  ;;  %v1388_v2 = vsel %vm1387_vm5, %v8850_v43, %v1384_v56  ;;  %v1459_v48 = vmul.f32 %v8912_v24, %v8846_v18  ;;  %1883 = vmatpush.msra.mxu0 %v13398_v22  ;;  %v1456_v43 = vsel %vm1453_vm10, %v1455_v23, %v1451_v21  ;;  %v8941_v29 = vsel %vm8500_vm14, %v13404_v12, 0.0  ;;  %v13410_v40 = vld [vmem:[#allocation110_spill] sm:$0xff]  ;;  %v13411_v3 = vld [vmem:[#allocation92_spill] sm:$0xff]  ;;  %v13414_v23 = vld [vmem:[#allocation113_spill] sm:$0xff] }
 0x1f3   :  { %1905 = vmatpush.msra.mxu1 %v13395_v20  ;;  %v1393_v42 = vsel %vm1390_vm9, %v1392_v7, %v1388_v2  ;;  %v1426_v26 = vsel %vm1425_vm8, %v8859_v9, %v1422_v5  ;;  %1929 = vmatpush.msra.mxu2 %v13400_v39  ;;  %13405 = vst [vmem:[#allocation95_spill] sm:$0xff] %v8941_v29  ;;  %vm1464_vm11 = vweird.f32 %v8912_v24  ;;  %v1469_v11 = vand.u32 2147483648, %v8846_v18  ;;  %v13415_v56 = vld [vmem:[#allocation114_spill] sm:$0xff]  ;;  %v13416_v46 = vld [vmem:[#allocation115_spill] sm:$0xff]  ;;  %v13417_v7 = vld [vmem:[#allocation116_spill] sm:$0xff] }
 0x1f4   :  { %1951 = vmatpush.msra.mxu3 %v13397_v36  ;;  %v6937_v6 = vpop.eup %6936  ;;  %v1431_v15 = vsel %vm1428_vm12, %v1430_v63, %v1426_v26  ;;  %v1476_v32 = vmul.f32 %v6933_v1, %v1393_v42  ;;  %v1460_v47 = vsub.f32 1.0, %v1459_v48  ;;  %1884 = vmatpush.msra.mxu0 %v13402_v28  ;;  %vm12967_vm15 = vcmp.gt.s32.totalorder %v13411_v3, %v8815_v17  ;;  %v13412_v1 = vld [vmem:[#allocation111_spill] sm:$0xff]  ;;  %v13418_v21 = vld [vmem:[#allocation117_spill] sm:$0xff]  ;;  %v13427_v22 = vld [vmem:[#allocation50_spill] sm:$0xff] }
 0x1f5   :  { %1906 = vmatpush.msra.mxu1 %v13399_v61  ;;  %v1474_v13 = vmul.f32 %v1431_v15, %v1182_v4  ;;  %v1481_v60 = vmul.f32 %v6937_v6, %v1456_v43  ;;  %1930 = vmatpush.msra.mxu2 %v13406_v62  ;;  %vm1463_vm0 = vweird.f32 %v8846_v18  ;;  %v1467_v57 = vand.u32 2147483647, %v8846_v18  ;;  %v13419_v0 = vld [vmem:[#allocation93_spill] sm:$0xff]  ;;  %v13425_v20 = vld [vmem:[#allocation43_spill] sm:$0xff]  ;;  %v13428_v61 = vld [vmem:[#allocation48_spill] sm:$0xff] }
 0x1f6   :  { %1952 = vmatpush.msra.mxu3 %v13401_v27  ;;  %v1461_v9 = vmul.f32 %v8912_v24, %v1460_v47  ;;  %1885 = vmatpush.msra.mxu0 %v13409_v50  ;;  %vm1465_vm5 = vmor %vm1463_vm0, %vm1464_vm11  ;;  %v691_v15 = vsel %vm8088_vm4, %v13428_v61, %v13427_v22  ;;  %v13430_v27 = vld [vmem:[#allocation53_spill] sm:$0xff]  ;;  %v9212_v17 = vld [vmem:[#allocation11 + $0x108] sm:$0xff] }
 0x1f7   :  { %1907 = vmatpush.msra.mxu1 %v13403_v54  ;;  %v1478_v41 = vadd.f32 %v1476_v32, %v1474_v13  ;;  %v8949_v49 = vsel %vm12968_vm6, %v1481_v60, %v8941_v29  ;;  %1931 = vmatpush.msra.mxu2 %v13412_v1  ;;  %vm1468_vm8 = vcmp.eq.f32.partialorder %v1467_v57, 8.507059e+37  ;;  %v13431_v13 = vld [vmem:[#allocation51_spill] sm:$0xff]  ;;  %v13432_v54 = vld [vmem:[#allocation54_spill] sm:$0xff]  ;;  %v9256_v61 = vld [vmem:[#allocation11 + $0xb0] sm:$0xff] }
 0x1f8   :  { %1953 = vmatpush.msra.mxu3 %v13407_v31  ;;  %13408 = vst [vmem:[#allocation96_spill] sm:$0xff] %v8949_v49  ;;  %v1462_v25 = vadd.f32 %v8912_v24, %v1461_v9  ;;  %1581 = vmatmul.f32.vlgmr.msrb.gmra.mxu0 %v8949_v49  ;;  %v692_v60 = vsel %vm121_vm1, %v13431_v13, %v13430_v27  ;;  %v13433_v9 = vld [vmem:[#allocation52_spill] sm:$0xff]  ;;  %v9226_v29 = vld [vmem:[#allocation11 + $0xe0] sm:$0xff] }
 0x1f9   :  { %1908 = vmatpush.msra.mxu1 %v13410_v40  ;;  %6938 = vtanh.f32 %v1478_v41  ;;  %1627 = vmatmul.f32.vlgmr.msrb.gmra.mxu2 %v8949_v49  ;;  %v8965_v10 = vsel %vm12967_vm15, %v1478_v41, %v1182_v4  ;;  %v1470_v4 = vor.u32 1.1754944e-38, %v1469_v11  ;;  %v693_v12 = vsel %vm8051_vm2, %v13433_v9, %v13432_v54  ;;  %v9254_v54 = vld [vmem:[#allocation11 + $0xa8] sm:$0xff]  ;;  %13457 = vst [vmem:[#allocation107_spill] sm:$0xff] %v9256_v61  ;;  %v13470_v63 = vld [vmem:[#allocation31_spill] sm:$0xff] }
 0x1fa   :  { %1604 = vmatmul.f32.vlgmr.msrb.gmra.mxu1 %v8949_v49  ;;  %1650 = vmatmul.f32.vlgmr.msrb.gmra.mxu3 %v8949_v49  ;;  %v1466_v44 = vsel %vm1465_vm5, %v8912_v24, %v1462_v25  ;;  %13456 = vst [vmem:[#allocation90_spill] sm:$0xff] %v9254_v54 }
 0x1fb   :  { %1954 = vmatpush.msra.mxu3 %v13413_v53  ;;  %1886 = vmatpush.msra.mxu0 %v13414_v23  ;;  %v1471_v5 = vsel %vm1468_vm8, %v1470_v4, %v1466_v44  ;;  %v13434_v23 = vld [vmem:[#allocation49_spill] sm:$0xff] }
 0x1fc   :  { %1909 = vmatpush.msra.mxu1 %v13415_v56  ;;  %1932 = vmatpush.msra.mxu2 %v13416_v46  ;;  %v13435_v56 = vld [vmem:[#allocation47_spill] sm:$0xff] }
 0x1fd   :  { %1955 = vmatpush.msra.mxu3 %v13417_v7  ;;  %1887 = vmatpush.msra.mxu0 %v8733_v34  ;;  %v8987_v34 = vsel %vm8525_vm7, %v13419_v0, 0.0  ;;  %v690_v44 = vsel %vm8084_vm3, %v13435_v56, %v13434_v23  ;;  %v13436_v46 = vld [vmem:[#allocation59_spill] sm:$0xff]  ;;  %v13437_v7 = vld [vmem:[#allocation57_spill] sm:$0xff]  ;;  %v9246_v56 = vld [vmem:[#allocation11 + $0xd8] sm:$0xff] }
 0x1fe   :  { %1910 = vmatpush.msra.mxu1 %v8735_v16  ;;  %1933 = vmatpush.msra.mxu2 %v8739_v55  ;;  %13420 = vst [vmem:[#allocation97_spill] sm:$0xff] %v8987_v34  ;;  %v13423_v16 = vld [vmem:[#allocation42_spill] sm:$0xff]  ;;  %v695_v4 = vsel %vm8088_vm4, %v13437_v7, %v13436_v46  ;;  %v9242_v7 = vld [vmem:[#allocation11 + $0xd0] sm:$0xff] }
 0x1ff   :  { %1956 = vmatpush.msra.mxu3 %v8741_v14  ;;  %v6939_v18 = vpop.eup %6938  ;;  %1888 = vmatpush.msra.mxu0 %v8743_v38  ;;  %v13422_v38 = vld [vmem:[#allocation44_spill] sm:$0xff]  ;;  %13453 = vst [vmem:[#allocation104_spill] sm:$0xff] %v9242_v7 }
 0x200   :  { %1911 = vmatpush.msra.mxu1 %v8755_v52  ;;  %v1482_v24 = vmul.f32 %v6939_v18, %v1471_v5  ;;  %1934 = vmatpush.msra.mxu2 %v8757_v35  ;;  %v688_v55 = vsel %vm121_vm1, %v13423_v16, %v13422_v38  ;;  %v13424_v52 = vld [vmem:[#allocation45_spill] sm:$0xff]  ;;  %13454 = vst [vmem:[#allocation105_spill] sm:$0xff] %v9246_v56 }
 0x201   :  { %1957 = vmatpush.msra.mxu3 %v13418_v21  ;;  %v689_v2 = vsel %vm8051_vm2, %v13425_v20, %v13424_v52 }
 0x202   :  { %v8993_v14 = vsel %vm12967_vm15, %v1482_v24, %v8987_v34 }
 0x203   :  { %13421 = vst [vmem:[#allocation98_spill] sm:$0xff] %v8993_v14  ;;  %1584 = vmatmul.f32.gmra.mxu0 %v8993_v14  ;;  %1607 = vmatmul.f32.gmra.mxu1 %v8993_v14 }
 0x204   :  { %1630 = vmatmul.f32.gmra.mxu2 %v8993_v14  ;;  %1653 = vmatmul.f32.gmra.mxu3 %v8993_v14 }
 0x275   :  { %v1582_v35 = vpop.f32.mrf.mxu0 }
 0x276   :  { %v1657_v37 = vadd.f32 %v1582_v35, %v688_v55  ;;  %v13438_v35 = vld [vmem:[#allocation58_spill] sm:$0xff] }
 0x277   :  { %v1605_v48 = vpop.f32.mrf.mxu1 }
 0x278   :  { %v1658_v36 = vadd.f32 %v1605_v48, %v689_v2  ;;  %v6758_v42 = vmul.f32 -1.442695, %v1657_v37  ;;  %v13439_v2 = vld [vmem:[#allocation56_spill] sm:$0xff] }
 0x279   :  { %v694_v48 = vsel %vm8084_vm3, %v13439_v2, %v13438_v35  ;;  %v9234_v2 = vld [vmem:[#allocation11 + $0xf8] sm:$0xff] }
 0x27a   :  { %v6760_v26 = vmul.f32 -1.442695, %v1658_v36  ;;  %6940 = vpow2.f32 %v6758_v42 }
 0x27c   :  { %6942 = vpow2.f32 %v6760_v26  ;;  %v1628_v11 = vpop.f32.mrf.mxu2 }
 0x27d   :  { %v1651_v32 = vpop.f32.mrf.mxu3  ;;  %v1659_v5 = vadd.f32 %v1628_v11, %v690_v44 }
 0x27e   :  { %v1660_v47 = vadd.f32 %v1651_v32, %v691_v15 }
 0x280   :  { %v6762_v43 = vmul.f32 -1.442695, %v1660_v47  ;;  %v6941_v39 = vpop.eup %6940  ;;  %v1585_v28 = vpop.f32.mrf.mxu0 }
 0x281   :  { %v1608_v62 = vpop.f32.mrf.mxu1  ;;  %v1671_v41 = vadd.f32 1.0, %v6941_v39  ;;  %v1661_v50 = vadd.f32 %v1585_v28, %v692_v60 }
 0x282   :  { %v6943_v31 = vpop.eup %6942  ;;  %6944 = vpow2.f32 %v6762_v43  ;;  %v1662_v40 = vadd.f32 %v1608_v62, %v693_v12  ;;  %v7558_v12 = vmov 5  }
 0x283   :  { %v1709_v25 = vadd.f32 1.0, %v6943_v31  ;;  %6946 = vrcp.f32 %v1671_v41  ;;  %v6759_v57 = vmul.f32 -1.442695, %v1661_v50  ;;  %v1682_v36 = vand.u32 2147483647, %v1671_v41 }
 0x284   :  { %v6761_v1 = vmul.f32 -1.442695, %v1662_v40  ;;  %v1684_v47 = vand.u32 2147483648, %v1671_v41  ;;  %v9040_v62 = vsel %vm121_vm1, 2, %v7558_v12  ;;  %vm1678_vm11 = vweird.f32 %v1671_v41 }
 0x285   :  { %6948 = vrcp.f32 %v1709_v25  ;;  %v1722_v32 = vand.u32 2147483648, %v1709_v25  ;;  %v1720_v43 = vand.u32 2147483647, %v1709_v25  ;;  %13440 = vst [vmem:[#allocation99_spill] sm:$0xff] %v9040_v62  ;;  %vm1716_vm12 = vweird.f32 %v1709_v25 }
 0x286   :  { %6950 = vpow2.f32 %v6759_v57  ;;  %v1685_v11 = vor.u32 1.1754944e-38, %v1684_v47  ;;  %vm1683_vm8 = vcmp.eq.f32.partialorder %v1682_v36, 8.507059e+37 }
 0x287   :  { %v1654_v18 = vpop.f32.mrf.mxu3  ;;  %6952 = vpow2.f32 %v6761_v1  ;;  %v1631_v40 = vpop.f32.mrf.mxu2  ;;  %v1723_v44 = vor.u32 1.1754944e-38, %v1722_v32  ;;  %vm1721_vm15 = vcmp.eq.f32.partialorder %v1720_v43, 8.507059e+37 }
 0x288   :  { %v6945_v53 = vpop.eup %6944  ;;  %v1664_v21 = vadd.f32 %v1654_v18, %v695_v4 }
 0x289   :  { %v9027_v24 = vadd.f32 1.0, %v6945_v53  ;;  %v6947_v0 = vpop.eup %6946 }
 0x28a   :  { %v1674_v16 = vmul.f32 %v6947_v0, %v1671_v41  ;;  %v6763_v42 = vmul.f32 -1.442695, %v1664_v21  ;;  %vm1679_vm9 = vweird.f32 %v6947_v0 }
 0x28b   :  { %v6949_v38 = vpop.eup %6948  ;;  %6954 = vrcp.f32 %v9027_v24  ;;  %vm1680_vm0 = vmor %vm1678_vm11, %vm1679_vm9  ;;  %vm13128_vm9 = vcmp.gt.s32.totalorder %v8491_v8, %v9040_v62  ;;  %v1760_v47 = vand.u32 2147483647, %v9027_v24  ;;  %v1762_v43 = vand.u32 2147483648, %v9027_v24 }
 0x28c   :  { %v1712_v55 = vmul.f32 %v6949_v38, %v1709_v25  ;;  %v1675_v37 = vsub.f32 1.0, %v1674_v16  ;;  %6956 = vtanh.f32 %v1659_v5  ;;  %v6951_v26 = vpop.eup %6950  ;;  %vm1717_vm10 = vweird.f32 %v6949_v38 }
 0x28d   :  { %v6953_v39 = vpop.eup %6952  ;;  %v9034_v13 = vadd.f32 1.0, %v6951_v26  ;;  %6958 = vpow2.f32 %v6763_v42  ;;  %vm1718_vm5 = vmor %vm1716_vm12, %vm1717_vm10  ;;  %v1663_v5 = vadd.f32 %v1631_v40, %v694_v48  ;;  %vm1756_vm10 = vweird.f32 %v9027_v24 }
 0x28e   :  { %v1713_v15 = vsub.f32 1.0, %v1712_v55  ;;  %v1676_v27 = vmul.f32 %v6947_v0, %v1675_v37  ;;  %v9036_v28 = vadd.f32 1.0, %v6953_v39 }
 0x28f   :  { %6960 = vrcp.f32 %v9034_v13  ;;  %v1699_v12 = vand.u32 2147483648, %v9034_v13 }
 0x290   :  { %v1714_v60 = vmul.f32 %v6949_v38, %v1713_v15  ;;  %v1677_v50 = vadd.f32 %v6947_v0, %v1676_v27  ;;  %6962 = vrcp.f32 %v9036_v28 }
 0x291   :  { %v9042_v31 = vpop.eup %6954  ;;  %6964 = vtanh.f32 %v1663_v5 }
 0x292   :  { %v1715_v57 = vadd.f32 %v6949_v38, %v1714_v60  ;;  %v1752_v1 = vmul.f32 %v9042_v31, %v9027_v24  ;;  %v6957_v53 = vpop.eup %6956  ;;  %v1681_v4 = vsel %vm1680_vm0, %v6947_v0, %v1677_v50  ;;  %v1697_v60 = vand.u32 2147483647, %v9034_v13 }
 0x293   :  { %v1686_v25 = vsel %vm1683_vm8, %v1685_v11, %v1681_v4  ;;  %v6959_v21 = vpop.eup %6958  ;;  %v1737_v11 = vand.u32 2147483648, %v9036_v28  ;;  %v1763_v4 = vor.u32 1.1754944e-38, %v1762_v43  ;;  %vm1693_vm8 = vweird.f32 %v9034_v13 }
 0x294   :  { %v1719_v41 = vsel %vm1718_vm5, %v6949_v38, %v1715_v57  ;;  %v1753_v18 = vsub.f32 1.0, %v1752_v1  ;;  %v1783_v55 = vmul.f32 %v6957_v53, %v1686_v25  ;;  %v9051_v26 = vadd.f32 1.0, %v6959_v21 }
 0x295   :  { %v1724_v16 = vsel %vm1721_vm15, %v1723_v44, %v1719_v41  ;;  %v6961_v15 = vpop.eup %6960  ;;  %vm1757_vm15 = vweird.f32 %v9042_v31  ;;  %v1735_v53 = vand.u32 2147483647, %v9036_v28  ;;  %vm1761_vm5 = vcmp.eq.f32.partialorder %v1760_v47, 8.507059e+37 }
 0x296   :  { %v1781_v37 = vmul.f32 %v1724_v16, %v8893_v51  ;;  %v1754_v42 = vmul.f32 %v9042_v31, %v1753_v18  ;;  %v6963_v0 = vpop.eup %6962  ;;  %v1689_v38 = vmul.f32 %v6961_v15, %v9034_v13  ;;  %6966 = vrcp.f32 %v9051_v26  ;;  %vm9073_vm12 = vmor %vm1756_vm10, %vm1757_vm15 }
 0x297   :  { %v1727_v32 = vmul.f32 %v6963_v0, %v9036_v28  ;;  %vm1694_vm11 = vweird.f32 %v6961_v15  ;;  %vm1732_vm0 = vweird.f32 %v6963_v0  ;;  %vm1731_vm10 = vweird.f32 %v9036_v28 }
 0x298   :  { %v1785_v36 = vadd.f32 %v1783_v55, %v1781_v37  ;;  %v1755_v48 = vadd.f32 %v9042_v31, %v1754_v42  ;;  %v1690_v39 = vsub.f32 1.0, %v1689_v38  ;;  %vm1695_vm15 = vmor %vm1693_vm8, %vm1694_vm11  ;;  %vm1698_vm6 = vcmp.eq.f32.partialorder %v1697_v60, 8.507059e+37 }
 0x299   :  { %v1728_v27 = vsub.f32 1.0, %v1727_v32  ;;  %v1700_v41 = vor.u32 1.1754944e-38, %v1699_v12  ;;  %vm1733_vm13 = vmor %vm1731_vm10, %vm1732_vm0  ;;  %v1738_v21 = vor.u32 1.1754944e-38, %v1737_v11  ;;  %v1777_v43 = vand.u32 2147483648, %v9051_v26 }
 0x29a   :  { %6968 = vtanh.f32 %v1785_v36  ;;  %v9069_v50 = vsel %vm13128_vm9, %v1785_v36, %v8893_v51  ;;  %v1691_v57 = vmul.f32 %v6961_v15, %v1690_v39  ;;  %v1759_v44 = vsel %vm9073_vm12, %v9042_v31, %v1755_v48  ;;  %v6965_v51 = vpop.eup %6964 }
 0x29b   :  { %v1729_v1 = vmul.f32 %v6963_v0, %v1728_v27  ;;  %v1764_v55 = vsel %vm1761_vm5, %v1763_v4, %v1759_v44  ;;  %vm1736_vm12 = vcmp.eq.f32.partialorder %v1735_v53, 8.507059e+37  ;;  %vm1771_vm11 = vweird.f32 %v9051_v26  ;;  %v9122_v53 = vld [vmem:[#allocation11 + $0x1f0] sm:$0xff]  ;;  %v9126_v44 = vld [vmem:[#allocation11 + $0x1f8] sm:$0xff]  ;;  %v9132_v4 = vld [vmem:[#allocation11 + $0x1c8] sm:$0xff] }
 0x29c   :  { %v1692_v24 = vadd.f32 %v6961_v15, %v1691_v57  ;;  %v6967_v25 = vpop.eup %6966  ;;  %v1775_v27 = vand.u32 2147483647, %v9051_v26  ;;  %v1778_v12 = vor.u32 1.1754944e-38, %v1777_v43  ;;  %2227 = vmatpush.msrb.mxu2 %v9122_v53  ;;  %2250 = vmatpush.msrb.mxu3 %v9126_v44  ;;  %v9176_v43 = vld [vmem:[#allocation11 + $0x168] sm:$0xff] }
 0x29d   :  { %v1730_v18 = vadd.f32 %v6963_v0, %v1729_v1  ;;  %v1767_v31 = vmul.f32 %v6967_v25, %v9051_v26  ;;  %v9120_v26 = vld [vmem:[#allocation11 + $0x1e8] sm:$0xff] }
 0x29e   :  { %v1696_v16 = vsel %vm1695_vm15, %v6961_v15, %v1692_v24  ;;  %vm1776_vm5 = vcmp.eq.f32.partialorder %v1775_v27, 8.507059e+37  ;;  %2204 = vmatpush.msrb.mxu1 %v9120_v26  ;;  %v9134_v24 = vld [vmem:[#allocation11 + $0x1d0] sm:$0xff] }
 0x29f   :  { %v1701_v37 = vsel %vm1698_vm6, %v1700_v41, %v1696_v16  ;;  %v1734_v42 = vsel %vm1733_vm13, %v6963_v0, %v1730_v18  ;;  %v1768_v48 = vsub.f32 1.0, %v1767_v31  ;;  %vm1772_vm13 = vweird.f32 %v6967_v25  ;;  %2228 = vmatpush.msrb.mxu2 %v9134_v24  ;;  %v9142_v41 = vld [vmem:[#allocation11 + $0x1a0] sm:$0xff]  ;;  %v9144_v18 = vld [vmem:[#allocation11 + $0x1a8] sm:$0xff]  ;;  %v9178_v27 = vld [vmem:[#allocation11 + $0x170] sm:$0xff] }
 0x2a0   :  { %v6969_v5 = vpop.eup %6968  ;;  %v1739_v13 = vsel %vm1736_vm12, %v1738_v21, %v1734_v42  ;;  %v1784_v38 = vmul.f32 %v6965_v51, %v1701_v37  ;;  %vm13061_vm6 = vcmp.gt.s32.totalorder %v13411_v3, %v9040_v62  ;;  %vm1773_vm0 = vmor %vm1771_vm11, %vm1772_vm13  ;;  %v9130_v51 = vld [vmem:[#allocation11 + $0x1c0] sm:$0xff]  ;;  %2205 = vmatpush.msrb.mxu1 %v9132_v4  ;;  %v9150_v21 = vld [vmem:[#allocation11 + $0x1b8] sm:$0xff] }
 0x2a1   :  { %v1789_v36 = vmul.f32 %v6969_v5, %v1764_v55  ;;  %v1782_v28 = vmul.f32 %v1739_v13, %v8965_v10  ;;  %v1769_v47 = vmul.f32 %v6967_v25, %v1768_v48  ;;  %v9146_v5 = vld [vmem:[#allocation11 + $0x1b0] sm:$0xff]  ;;  %v9154_v16 = vld [vmem:[#allocation11 + $0x180] sm:$0xff]  ;;  %v9156_v31 = vld [vmem:[#allocation11 + $0x188] sm:$0xff] }
 0x2a2   :  { %2206 = vmatpush.msrb.mxu1 %v9144_v18  ;;  %2229 = vmatpush.msrb.mxu2 %v9146_v5  ;;  %v9158_v55 = vld [vmem:[#allocation11 + $0x190] sm:$0xff]  ;;  %v9162_v37 = vld [vmem:[#allocation11 + $0x198] sm:$0xff]  ;;  %v13446_v42 = vld [vmem:[#allocation24_spill] sm:$0xff] }
 0x2a3   :  { %v9091_v32 = vsel %vm13128_vm9, %v1789_v36, %v8949_v49  ;;  %v1786_v15 = vadd.f32 %v1784_v38, %v1782_v28  ;;  %v1770_v0 = vadd.f32 %v6967_v25, %v1769_v47  ;;  %v13447_v36 = vld [vmem:[#allocation22_spill] sm:$0xff]  ;;  %v13448_v48 = vld [vmem:[#allocation25_spill] sm:$0xff]  ;;  %v13449_v28 = vld [vmem:[#allocation23_spill] sm:$0xff] }
 0x2a4   :  { %13443 = vst [vmem:[#allocation100_spill] sm:$0xff] %v9091_v32  ;;  %1889 = vmatmul.f32.vlgmr.msra.gmra.mxu0 %v9091_v32  ;;  %1912 = vmatmul.f32.vlgmr.msra.gmra.mxu1 %v9091_v32  ;;  %v723_v13 = vsel %vm121_vm1, %v13447_v36, %v13446_v42  ;;  %v724_v47 = vsel %vm8051_vm2, %v13449_v28, %v13448_v48  ;;  %v9190_v42 = vld [vmem:[#allocation11 + $0x150] sm:$0xff]  ;;  %v13462_v28 = vld [vmem:[#allocation35_spill] sm:$0xff]  ;;  %v13464_v3 = vld [vmem:[#allocation36_spill] sm:$0xff] }
 0x2a5   :  { %1935 = vmatmul.f32.vlgmr.msra.gmra.mxu2 %v9091_v32  ;;  %1958 = vmatmul.f32.vlgmr.msra.gmra.mxu3 %v9091_v32  ;;  %6970 = vtanh.f32 %v1786_v15  ;;  %v9104_v39 = vsel %vm13061_vm6, %v1786_v15, %v8965_v10  ;;  %v1774_v60 = vsel %vm1773_vm0, %v6967_v25, %v1770_v0  ;;  %v9118_v10 = vld [vmem:[#allocation11 + $0x1e0] sm:$0xff]  ;;  %v9138_v25 = vld [vmem:[#allocation11 + $0x1d8] sm:$0xff]  ;;  %v13463_v48 = vld [vmem:[#allocation33_spill] sm:$0xff] }
 0x2a6   :  { %13444 = vst [vmem:[#allocation101_spill] sm:$0xff] %v9104_v39  ;;  %v1779_v11 = vsel %vm1776_vm5, %v1778_v12, %v1774_v60  ;;  %2181 = vmatpush.msrb.mxu0 %v9118_v10  ;;  %2251 = vmatpush.msrb.mxu3 %v9138_v25  ;;  %v9174_v0 = vld [vmem:[#allocation11 + $0x160] sm:$0xff]  ;;  %v13465_v39 = vld [vmem:[#allocation34_spill] sm:$0xff] }
 0x2a7   :  { %2207 = vmatpush.msrb.mxu1 %v9156_v31  ;;  %2230 = vmatpush.msrb.mxu2 %v9158_v55  ;;  %v9288_v32 = vld [vmem:[#allocation11 + $0x60] sm:$0xff] }
 0x2a8   :  { %2182 = vmatpush.msrb.mxu0 %v9130_v51  ;;  %2252 = vmatpush.msrb.mxu3 %v9150_v21  ;;  %13467 = vst [vmem:[#allocation113_spill] sm:$0xff] %v9288_v32 }
 0x2a9   :  { %2208 = vmatpush.msrb.mxu1 %v9176_v43  ;;  %2231 = vmatpush.msrb.mxu2 %v9178_v27 }
 0x2aa   :  { %2183 = vmatpush.msrb.mxu0 %v9142_v41  ;;  %2253 = vmatpush.msrb.mxu3 %v9162_v37 }
 0x2ab   :  { %v6971_v40 = vpop.eup %6970  ;;  %2232 = vmatpush.msrb.mxu2 %v9190_v42 }
 0x2ac   :  { %v1790_v57 = vmul.f32 %v6971_v40, %v1779_v11  ;;  %2184 = vmatpush.msrb.mxu0 %v9154_v16  ;;  %v9182_v40 = vld [vmem:[#allocation11 + $0x178] sm:$0xff]  ;;  %v9186_v11 = vld [vmem:[#allocation11 + $0x140] sm:$0xff] }
 0x2ad   :  { %2254 = vmatpush.msrb.mxu3 %v9182_v40 }
 0x2ae   :  { %v9112_v1 = vsel %vm13061_vm6, %v1790_v57, %v8993_v14  ;;  %2185 = vmatpush.msrb.mxu0 %v9174_v0  ;;  %v9188_v57 = vld [vmem:[#allocation11 + $0x148] sm:$0xff]  ;;  %v13451_v14 = vld [vmem:[#allocation30_spill] sm:$0xff] }
 0x2af   :  { %13445 = vst [vmem:[#allocation102_spill] sm:$0xff] %v9112_v1  ;;  %1892 = vmatmul.f32.gmra.mxu0 %v9112_v1  ;;  %1915 = vmatmul.f32.gmra.mxu1 %v9112_v1 }
 0x2b0   :  { %1938 = vmatmul.f32.gmra.mxu2 %v9112_v1  ;;  %1961 = vmatmul.f32.gmra.mxu3 %v9112_v1  ;;  %v727_v1 = vsel %vm121_vm1, %v13463_v48, %v13462_v28  ;;  %v9290_v48 = vld [vmem:[#allocation11 + $0x68] sm:$0xff]  ;;  %v9292_v28 = vld [vmem:[#allocation11 + $0x70] sm:$0xff] }
 0x2b1   :  { %2186 = vmatpush.msrb.mxu0 %v9186_v11  ;;  %2209 = vmatpush.msrb.mxu1 %v9188_v57  ;;  %13468 = vst [vmem:[#allocation114_spill] sm:$0xff] %v9290_v48 }
 0x2b2   :  { %13469 = vst [vmem:[#allocation115_spill] sm:$0xff] %v9292_v28 }
 0x321   :  { %v1890_v38 = vpop.f32.mrf.mxu0  ;;  %v1913_v15 = vpop.f32.mrf.mxu1 }
 0x322   :  { %v1965_v60 = vadd.f32 %v1890_v38, %v723_v13  ;;  %v1966_v12 = vadd.f32 %v1913_v15, %v724_v47  ;;  %v9194_v13 = vld [vmem:[#allocation11 + $0x158] sm:$0xff]  ;;  %v9198_v38 = vld [vmem:[#allocation11 + $0x120] sm:$0xff]  ;;  %v9200_v47 = vld [vmem:[#allocation11 + $0x128] sm:$0xff] }
 0x323   :  { %2255 = vmatpush.msrb.mxu3 %v9194_v13  ;;  %v9202_v15 = vld [vmem:[#allocation11 + $0x130] sm:$0xff]  ;;  %2187 = vmatpush.msrb.mxu0 %v9198_v38 }
 0x324   :  { %v6764_v36 = vmul.f32 -1.442695, %v1965_v60  ;;  %v6766_v62 = vmul.f32 -1.442695, %v1966_v12  ;;  %2210 = vmatpush.msrb.mxu1 %v9200_v47  ;;  %v9206_v60 = vld [vmem:[#allocation11 + $0x138] sm:$0xff]  ;;  %2233 = vmatpush.msrb.mxu2 %v9202_v15  ;;  %v9210_v12 = vld [vmem:[#allocation11 + $0x100] sm:$0xff] }
 0x325   :  { %2256 = vmatpush.msrb.mxu3 %v9206_v60  ;;  %2188 = vmatpush.msrb.mxu0 %v9210_v12 }
 0x326   :  { %6972 = vpow2.f32 %v6764_v36  ;;  %v726_v36 = vsel %vm8088_vm4, %v13451_v14, %v13450_v59  ;;  %2211 = vmatpush.msrb.mxu1 %v9212_v17  ;;  %2234 = vmatpush.msrb.mxu2 %v9214_v33  ;;  %v9269_v14 = vld [vmem:[#allocation11 + $0x88] sm:$0xff] }
 0x327   :  { %6974 = vpow2.f32 %v6766_v62  ;;  %v9222_v62 = vld [vmem:[#allocation11 + $0x118] sm:$0xff]  ;;  %2189 = vmatpush.msrb.mxu0 %v9226_v29  ;;  %13460 = vst [vmem:[#allocation110_spill] sm:$0xff] %v9269_v14 }
 0x328   :  { %v1959_v49 = vpop.f32.mrf.mxu3  ;;  %2257 = vmatpush.msrb.mxu3 %v9222_v62  ;;  %2212 = vmatpush.msrb.mxu1 %v9228_v45  ;;  %v1936_v59 = vpop.f32.mrf.mxu2 }
 0x329   :  { %v1968_v34 = vadd.f32 %v1959_v49, %v726_v36  ;;  %2235 = vmatpush.msrb.mxu2 %v9230_v30  ;;  %v9238_v49 = vld [vmem:[#allocation11 + $0xc0] sm:$0xff]  ;;  %v9240_v36 = vld [vmem:[#allocation11 + $0xc8] sm:$0xff] }
 0x32a   :  { %2258 = vmatpush.msrb.mxu3 %v9234_v2  ;;  %13452 = vst [vmem:[#allocation103_spill] sm:$0xff] %v9240_v36  ;;  %2190 = vmatpush.msrb.mxu0 %v9238_v49 }
 0x32b   :  { %v6768_v35 = vmul.f32 -1.442695, %v1968_v34  ;;  %2213 = vmatpush.msrb.mxu1 %v9240_v36  ;;  %2236 = vmatpush.msrb.mxu2 %v9242_v7  ;;  %v9252_v34 = vld [vmem:[#allocation11 + $0xa0] sm:$0xff] }
 0x32c   :  { %v6973_v46 = vpop.eup %6972  ;;  %2259 = vmatpush.msrb.mxu3 %v9246_v56  ;;  %13455 = vst [vmem:[#allocation106_spill] sm:$0xff] %v9252_v34  ;;  %v1893_v20 = vpop.f32.mrf.mxu0  ;;  %2191 = vmatpush.msrb.mxu0 %v9252_v34 }
 0x32d   :  { %v6975_v23 = vpop.eup %6974  ;;  %v9248_v9 = vadd.f32 1.0, %v6973_v46  ;;  %6976 = vpow2.f32 %v6768_v35  ;;  %v1916_v52 = vpop.f32.mrf.mxu1  ;;  %2214 = vmatpush.msrb.mxu1 %v9254_v54  ;;  %v9262_v46 = vld [vmem:[#allocation11 + $0xb8] sm:$0xff]  ;;  %2237 = vmatpush.msrb.mxu2 %v9256_v61  ;;  %v9267_v35 = vld [vmem:[#allocation11 + $0x80] sm:$0xff]  ;;  %v728_v61 = vsel %vm8051_vm2, %v13465_v39, %v13464_v3  ;;  %v1969_v54 = vadd.f32 %v1893_v20, %v727_v1 }
 0x32e   :  { %v9258_v22 = vadd.f32 1.0, %v6975_v23  ;;  %13458 = vst [vmem:[#allocation108_spill] sm:$0xff] %v9262_v46  ;;  %2260 = vmatpush.msrb.mxu3 %v9262_v46  ;;  %v9271_v23 = vld [vmem:[#allocation11 + $0x90] sm:$0xff]  ;;  %2192 = vmatpush.msrb.mxu0 %v9267_v35  ;;  %v9284_v46 = vld [vmem:[#allocation11 + $0x98] sm:$0xff]  ;;  %v1970_v34 = vadd.f32 %v1916_v52, %v728_v61  ;;  %v13471_v39 = vld [vmem:[#allocation27_spill] sm:$0xff] }
 0x32f   :  { %6978 = vrcp.f32 %v9248_v9  ;;  %13459 = vst [vmem:[#allocation109_spill] sm:$0xff] %v9267_v35  ;;  %2215 = vmatpush.msrb.mxu1 %v9269_v14  ;;  %2238 = vmatpush.msrb.mxu2 %v9271_v23  ;;  %v725_v3 = vsel %vm8084_vm3, %v13471_v39, %v13470_v63  ;;  %v9300_v52 = vld [vmem:[#allocation11 + $0x78] sm:$0xff]  ;;  %v6765_v1 = vmul.f32 -1.442695, %v1969_v54  ;;  %v9312_v63 = vld [vmem:[#allocation11 + $0x50] sm:$0xff]  ;;  %v9320_v54 = vld [vmem:[#allocation11 + $0x20] sm:$0xff]  ;;  %vm1986_vm15 = vweird.f32 %v9248_v9 }
 0x330   :  { %13461 = vst [vmem:[#allocation111_spill] sm:$0xff] %v9271_v23  ;;  %6980 = vrcp.f32 %v9258_v22  ;;  %2261 = vmatpush.msrb.mxu3 %v9284_v46  ;;  %2193 = vmatpush.msrb.mxu0 %v9288_v32  ;;  %v1967_v61 = vadd.f32 %v1936_v59, %v725_v3  ;;  %v9306_v23 = vld [vmem:[#allocation11 + $0x48] sm:$0xff]  ;;  %v6767_v39 = vmul.f32 -1.442695, %v1970_v34  ;;  %v9324_v34 = vld [vmem:[#allocation11 + $0x30] sm:$0xff]  ;;  %v13480_v32 = vld [vmem:[#allocation39_spill] sm:$0xff]  ;;  %vm2024_vm12 = vweird.f32 %v9258_v22 }
 0x331   :  { %13466 = vst [vmem:[#allocation112_spill] sm:$0xff] %v9284_v46  ;;  %2216 = vmatpush.msrb.mxu1 %v9290_v48  ;;  %2239 = vmatpush.msrb.mxu2 %v9292_v28  ;;  %v9304_v46 = vld [vmem:[#allocation11 + $0x40] sm:$0xff]  ;;  %v9314_v48 = vld [vmem:[#allocation11 + $0x58] sm:$0xff]  ;;  %6982 = vpow2.f32 %v6765_v1  ;;  %v13479_v28 = vld [vmem:[#allocation41_spill] sm:$0xff]  ;;  %v2030_v36 = vand.u32 2147483648, %v9258_v22 }
 0x332   :  { %13472 = vst [vmem:[#allocation116_spill] sm:$0xff] %v9300_v52  ;;  %2262 = vmatpush.msrb.mxu3 %v9300_v52  ;;  %2194 = vmatpush.msrb.mxu0 %v9304_v46  ;;  %v9333_v1 = vld [vmem:[#allocation11 + $0x38] sm:$0xff]  ;;  %v730_v35 = vsel %vm8088_vm4, %v13480_v32, %v13479_v28  ;;  %v1990_v32 = vand.u32 2147483647, %v9248_v9  ;;  %v1992_v28 = vand.u32 2147483648, %v9248_v9 }
 0x333   :  { %v6977_v20 = vpop.eup %6976  ;;  %13473 = vst [vmem:[#allocation117_spill] sm:$0xff] %v9304_v46  ;;  %2217 = vmatpush.msrb.mxu1 %v9306_v23  ;;  %v1962_v3 = vpop.f32.mrf.mxu3  ;;  %2240 = vmatpush.msrb.mxu2 %v9312_v63 }
 0x334   :  { %13474 = vst [vmem:[#allocation93_spill] sm:$0xff] %v9306_v23  ;;  %v9308_v14 = vadd.f32 1.0, %v6977_v20  ;;  %2263 = vmatpush.msrb.mxu3 %v9314_v48  ;;  %v9322_v20 = vld [vmem:[#allocation11 + $0x28] sm:$0xff]  ;;  %2195 = vmatpush.msrb.mxu0 %v9320_v54  ;;  %v1972_v7 = vadd.f32 %v1962_v3, %v730_v35  ;;  %vm1991_vm11 = vcmp.eq.f32.partialorder %v1990_v32, 8.507059e+37 }
 0x335   :  { %13475 = vst [vmem:[#allocation44_spill] sm:$0xff] %v9312_v63  ;;  %v9316_v59 = vpop.eup %6978  ;;  %2218 = vmatpush.msrb.mxu1 %v9322_v20  ;;  %v9337_v63 = vld [vmem:[#allocation11 + $0x8] sm:$0xff]  ;;  %2241 = vmatpush.msrb.mxu2 %v9324_v34 }
 0x336   :  { %13476 = vst [vmem:[#allocation42_spill] sm:$0xff] %v9314_v48  ;;  %v9326_v46 = vpop.eup %6980  ;;  %v1982_v23 = vmul.f32 %v9316_v59, %v9248_v9  ;;  %6984 = vrcp.f32 %v9308_v14  ;;  %v9335_v48 = vld [vmem:[#allocation11] sm:$0xff]  ;;  %2264 = vmatpush.msrb.mxu3 %v9333_v1  ;;  %vm1987_vm8 = vweird.f32 %v9316_v59  ;;  %v6769_v35 = vmul.f32 -1.442695, %v1972_v7  ;;  %v13490_v9 = vld [vmem:[#allocation105_spill] sm:$0xff] }
 0x337   :  { %13477 = vst [vmem:[#allocation53_spill] sm:$0xff] %v9320_v54  ;;  %v2020_v52 = vmul.f32 %v9326_v46, %v9258_v22  ;;  %6986 = vtanh.f32 %v1967_v61  ;;  %v9349_v54 = vld [vmem:[#allocation11 + $0x18] sm:$0xff]  ;;  %2196 = vmatpush.msrb.mxu0 %v9335_v48  ;;  %2219 = vmatpush.msrb.mxu1 %v9337_v63  ;;  %vm2025_vm10 = vweird.f32 %v9326_v46  ;;  %vm9378_vm13 = vmor %vm1986_vm15, %vm1987_vm8 }
 0x338   :  { %13478 = vst [vmem:[#allocation51_spill] sm:$0xff] %v9322_v20  ;;  %v9347_v20 = vld [vmem:[#allocation11 + $0x10] sm:$0xff]  ;;  %v1983_v56 = vsub.f32 1.0, %v1982_v23  ;;  %6988 = vpow2.f32 %v6767_v39  ;;  %2265 = vmatpush.msrb.mxu3 %v9349_v54  ;;  %v2028_v39 = vand.u32 2147483647, %v9258_v22  ;;  %v6983_v23 = vpop.eup %6982  ;;  %vm2026_vm0 = vmor %vm2024_vm12, %vm2025_vm10  ;;  %vm2064_vm10 = vweird.f32 %v9308_v14 }
 0x339   :  { %v2021_v61 = vsub.f32 1.0, %v2020_v52  ;;  %2242 = vmatpush.msrb.mxu2 %v9347_v20  ;;  %2489 = vmatpush.msra.mxu0 %v9118_v10  ;;  %v9372_v10 = vadd.f32 1.0, %v6983_v23  ;;  %6990 = vpow2.f32 %v6769_v35  ;;  %v2068_v35 = vand.u32 2147483647, %v9308_v14 }
 0x33a   :  { %v1984_v6 = vmul.f32 %v9316_v59, %v1983_v56  ;;  %2512 = vmatpush.msra.mxu1 %v9120_v26  ;;  %2558 = vmatpush.msra.mxu3 %v9126_v44  ;;  %vm2029_vm5 = vcmp.eq.f32.partialorder %v2028_v39, 8.507059e+37 }
 0x33b   :  { %v2022_v52 = vmul.f32 %v9326_v46, %v2021_v61  ;;  %2535 = vmatpush.msra.mxu2 %v9122_v53  ;;  %2490 = vmatpush.msra.mxu0 %v9130_v51  ;;  %v1993_v53 = vor.u32 1.1754944e-38, %v1992_v28  ;;  %6992 = vrcp.f32 %v9372_v10  ;;  %v13485_v61 = vld [vmem:[#allocation38_spill] sm:$0xff] }
 0x33c   :  { %v9368_v56 = vpop.eup %6984  ;;  %v1985_v7 = vadd.f32 %v9316_v59, %v1984_v6  ;;  %2513 = vmatpush.msra.mxu1 %v9132_v4  ;;  %2559 = vmatpush.msra.mxu3 %v9138_v25  ;;  %v2031_v4 = vor.u32 1.1754944e-38, %v2030_v36 }
 0x33d   :  { %v6987_v26 = vpop.eup %6986  ;;  %v2023_v44 = vadd.f32 %v9326_v46, %v2022_v52  ;;  %v2060_v6 = vmul.f32 %v9368_v56, %v9308_v14  ;;  %2536 = vmatpush.msra.mxu2 %v9134_v24  ;;  %2491 = vmatpush.msra.mxu0 %v9142_v41  ;;  %vm2065_vm8 = vweird.f32 %v9368_v56 }
 0x33e   :  { %v6989_v51 = vpop.eup %6988  ;;  %v1989_v32 = vsel %vm9378_vm13, %v9316_v59, %v1985_v7  ;;  %2514 = vmatpush.msra.mxu1 %v9144_v18  ;;  %2560 = vmatpush.msra.mxu3 %v9150_v21  ;;  %vm9443_vm12 = vmor %vm2064_vm10, %vm2065_vm8 }
 0x33f   :  { %v1994_v24 = vsel %vm1991_vm11, %v1993_v53, %v1989_v32  ;;  %v2027_v25 = vsel %vm2026_vm0, %v9326_v46, %v2023_v44  ;;  %v2061_v28 = vsub.f32 1.0, %v2060_v6  ;;  %v9398_v3 = vadd.f32 1.0, %v6989_v51  ;;  %2537 = vmatpush.msra.mxu2 %v9146_v5  ;;  %2492 = vmatpush.msra.mxu0 %v9154_v16  ;;  %v6991_v46 = vpop.eup %6990  ;;  %v1939_v5 = vpop.f32.mrf.mxu2  ;;  %v13491_v6 = vld [vmem:[#allocation100_spill] sm:$0xff]  ;;  %v13493_v51 = vld [vmem:[#allocation106_spill] sm:$0xff] }
 0x340   :  { %v2032_v22 = vsel %vm2029_vm5, %v2031_v4, %v2027_v25  ;;  %v2091_v36 = vmul.f32 %v6987_v26, %v1994_v24  ;;  %2515 = vmatpush.msra.mxu1 %v9156_v31  ;;  %2561 = vmatpush.msra.mxu3 %v9162_v37  ;;  %v9411_v16 = vadd.f32 1.0, %v6991_v46  ;;  %v7559_v31 = vmov 4   ;;  %v13494_v4 = vld [vmem:[#allocation90_spill] sm:$0xff]  ;;  %v13497_v46 = vld [vmem:[#allocation101_spill] sm:$0xff] }
 0x341   :  { %v2089_v41 = vmul.f32 %v2032_v22, %v9069_v50  ;;  %v2062_v18 = vmul.f32 %v9368_v56, %v2061_v28  ;;  %6994 = vrcp.f32 %v9398_v3  ;;  %2538 = vmatpush.msra.mxu2 %v9158_v55  ;;  %2493 = vmatpush.msra.mxu0 %v9174_v0  ;;  %v9415_v59 = vsel %vm121_vm1, 3, %v7559_v31  ;;  %v9419_v55 = vpop.eup %6992  ;;  %v13499_v31 = vld [vmem:[#allocation110_spill] sm:$0xff] }
 0x342   :  { %2516 = vmatpush.msra.mxu1 %v9176_v43  ;;  %13483 = vst [vmem:[#allocation24_spill] sm:$0xff] %v9415_v59  ;;  %2562 = vmatpush.msra.mxu3 %v9182_v40  ;;  %v2070_v0 = vand.u32 2147483648, %v9308_v14  ;;  %v13484_v43 = vld [vmem:[#allocation40_spill] sm:$0xff]  ;;  %vm13016_vm15 = vcmp.gt.s32.totalorder %v8491_v8, %v9415_v59  ;;  %vm2002_vm13 = vweird.f32 %v9419_v55  ;;  %vm2069_vm11 = vcmp.eq.f32.partialorder %v2068_v35, 8.507059e+37 }
 0x343   :  { %v2093_v21 = vadd.f32 %v2091_v36, %v2089_v41  ;;  %2539 = vmatpush.msra.mxu2 %v9178_v27  ;;  %v2063_v37 = vadd.f32 %v9368_v56, %v2062_v18  ;;  %v729_v39 = vsel %vm8084_vm3, %v13485_v61, %v13484_v43  ;;  %2494 = vmatpush.msra.mxu0 %v9186_v11  ;;  %vm2001_vm0 = vweird.f32 %v9372_v10  ;;  %v13495_v41 = vld [vmem:[#allocation107_spill] sm:$0xff]  ;;  %v13496_v18 = vld [vmem:[#allocation108_spill] sm:$0xff] }
 0x344   :  { %2517 = vmatpush.msra.mxu1 %v9188_v57  ;;  %v1997_v27 = vmul.f32 %v9419_v55, %v9372_v10  ;;  %v1971_v40 = vadd.f32 %v1939_v5, %v729_v39  ;;  %2563 = vmatpush.msra.mxu3 %v9194_v13  ;;  %v2007_v13 = vand.u32 2147483648, %v9372_v10  ;;  %vm2003_vm8 = vmor %vm2001_vm0, %vm2002_vm13  ;;  %v13502_v39 = vld [vmem:[#allocation113_spill] sm:$0xff]  ;;  %v13504_v35 = vld [vmem:[#allocation92_spill] sm:$0xff] }
 0x345   :  { %6996 = vtanh.f32 %v2093_v21  ;;  %2540 = vmatpush.msra.mxu2 %v9190_v42  ;;  %2495 = vmatpush.msra.mxu0 %v9198_v38  ;;  %v9452_v14 = vsel %vm13016_vm15, %v2093_v21, %v9069_v50  ;;  %v2071_v38 = vor.u32 1.1754944e-38, %v2070_v0  ;;  %v2067_v23 = vsel %vm9443_vm12, %v9368_v56, %v2063_v37  ;;  %v13498_v21 = vld [vmem:[#allocation109_spill] sm:$0xff]  ;;  %v13501_v37 = vld [vmem:[#allocation112_spill] sm:$0xff] }
 0x346   :  { %6998 = vrcp.f32 %v9411_v16  ;;  %2518 = vmatpush.msra.mxu1 %v9200_v47  ;;  %v1998_v42 = vsub.f32 1.0, %v1997_v27  ;;  %2564 = vmatpush.msra.mxu3 %v9206_v60  ;;  %v2005_v50 = vand.u32 2147483647, %v9372_v10  ;;  %v2045_v60 = vand.u32 2147483648, %v9398_v3  ;;  %v13488_v10 = vld [vmem:[#allocation103_spill] sm:$0xff]  ;;  %v13503_v27 = vld [vmem:[#allocation114_spill] sm:$0xff] }
 0x347   :  { %v6995_v11 = vpop.eup %6994  ;;  %2541 = vmatpush.msra.mxu2 %v9202_v15  ;;  %2496 = vmatpush.msra.mxu0 %v9210_v12  ;;  %7000 = vtanh.f32 %v1971_v40  ;;  %v2008_v56 = vor.u32 1.1754944e-38, %v2007_v13  ;;  %v2072_v7 = vsel %vm2069_vm11, %v2071_v38, %v2067_v23  ;;  %vm2039_vm12 = vweird.f32 %v9398_v3  ;;  %v13506_v57 = vld [vmem:[#allocation116_spill] sm:$0xff]  ;;  %v13507_v38 = vld [vmem:[#allocation117_spill] sm:$0xff] }
 0x348   :  { %v2035_v47 = vmul.f32 %v6995_v11, %v9398_v3  ;;  %2519 = vmatpush.msra.mxu1 %v9212_v17  ;;  %v1999_v52 = vmul.f32 %v9419_v55, %v1998_v42  ;;  %2565 = vmatpush.msra.mxu3 %v9222_v62  ;;  %vm2040_vm5 = vweird.f32 %v6995_v11  ;;  %vm2006_vm10 = vcmp.eq.f32.partialorder %v2005_v50, 8.507059e+37  ;;  %v13510_v50 = vld [vmem:[#allocation42_spill] sm:$0xff] }
 0x349   :  { %2542 = vmatpush.msra.mxu2 %v9214_v33  ;;  %2497 = vmatpush.msra.mxu0 %v9226_v29  ;;  %vm2041_vm13 = vmor %vm2039_vm12, %vm2040_vm5  ;;  %v2046_v24 = vor.u32 1.1754944e-38, %v2045_v60  ;;  %vm13015_vm5 = vcmp.gt.s32.totalorder %v13504_v35, %v9415_v59  ;;  %v2085_v42 = vand.u32 2147483648, %v9411_v16  ;;  %v2083_v23 = vand.u32 2147483647, %v9411_v16  ;;  %v9796_v59 = vld [vmem:[#allocation11 + $0x90] sm:$0xff] }
 0x34a   :  { %v2036_v15 = vsub.f32 1.0, %v2035_v47  ;;  %2520 = vmatpush.msra.mxu1 %v9228_v45  ;;  %v2000_v12 = vadd.f32 %v9419_v55, %v1999_v52  ;;  %2566 = vmatpush.msra.mxu3 %v9234_v2  ;;  %v2043_v45 = vand.u32 2147483647, %v9398_v3  ;;  %v13489_v2 = vld [vmem:[#allocation104_spill] sm:$0xff]  ;;  %v13508_v47 = vld [vmem:[#allocation93_spill] sm:$0xff]  ;;  %13558 = vst [vmem:[#allocation114_spill] sm:$0xff] %v9796_v59 }
 0x34b   :  { %v6997_v17 = vpop.eup %6996  ;;  %2543 = vmatpush.msra.mxu2 %v9230_v30  ;;  %2498 = vmatpush.msra.mxu0 %v9238_v49  ;;  %v13509_v52 = vld [vmem:[#allocation44_spill] sm:$0xff]  ;;  %vm2084_vm12 = vcmp.eq.f32.partialorder %v2083_v23, 8.507059e+37 }
 0x34c   :  { %v9474_v33 = vpop.eup %6998  ;;  %v2037_v62 = vmul.f32 %v6995_v11, %v2036_v15  ;;  %v2097_v29 = vmul.f32 %v6997_v17, %v2072_v7  ;;  %2521 = vmatpush.msra.mxu1 %v13488_v10  ;;  %v2004_v26 = vsel %vm2003_vm8, %v9419_v55, %v2000_v12  ;;  %2567 = vmatpush.msra.mxu3 %v13490_v9  ;;  %vm2044_vm11 = vcmp.eq.f32.partialorder %v2043_v45, 8.507059e+37  ;;  %v13500_v55 = vld [vmem:[#allocation111_spill] sm:$0xff]  ;;  %v13511_v15 = vld [vmem:[#allocation53_spill] sm:$0xff] }
 0x34d   :  { %v2075_v30 = vmul.f32 %v9474_v33, %v9411_v16  ;;  %2544 = vmatpush.msra.mxu2 %v13489_v2  ;;  %v2009_v53 = vsel %vm2006_vm10, %v2008_v56, %v2004_v26  ;;  %2499 = vmatpush.msra.mxu0 %v13493_v51  ;;  %v7001_v32 = vpop.eup %7000  ;;  %vm2080_vm0 = vweird.f32 %v9474_v33  ;;  %vm2079_vm8 = vweird.f32 %v9411_v16  ;;  %v13512_v17 = vld [vmem:[#allocation51_spill] sm:$0xff] }
 0x34e   :  { %v2038_v44 = vadd.f32 %v6995_v11, %v2037_v62  ;;  %v9491_v49 = vsel %vm13016_vm15, %v2097_v29, %v13491_v6  ;;  %2522 = vmatpush.msra.mxu1 %v13494_v4  ;;  %v2092_v3 = vmul.f32 %v7001_v32, %v2009_v53  ;;  %2568 = vmatpush.msra.mxu3 %v13496_v18  ;;  %vm2081_vm10 = vmor %vm2079_vm8, %vm2080_vm0  ;;  %v2086_v12 = vor.u32 1.1754944e-38, %v2085_v42  ;;  %v13513_v62 = vld [vmem:[#allocation102_spill] sm:$0xff]  ;;  %v13518_v45 = vld [vmem:[#allocation23_spill] sm:$0xff] }
 0x34f   :  { %13492 = vst [vmem:[#allocation22_spill] sm:$0xff] %v9491_v49  ;;  %v2076_v25 = vsub.f32 1.0, %v2075_v30  ;;  %2197 = vmatmul.f32.vlgmr.msrb.gmra.mxu0 %v9491_v49  ;;  %2220 = vmatmul.f32.vlgmr.msrb.gmra.mxu1 %v9491_v49  ;;  %v13521_v53 = vld [vmem:[#allocation32_spill] sm:$0xff]  ;;  %v9800_v6 = vld [vmem:[#allocation11 + $0x98] sm:$0xff]  ;;  %v10443_v9 = vld [vmem:[#allocation14 + $0x80] sm:$0xff] }
 0x350   :  { %v2042_v28 = vsel %vm2041_vm13, %v6995_v11, %v2038_v44  ;;  %2243 = vmatmul.f32.vlgmr.msrb.gmra.mxu2 %v9491_v49  ;;  %2266 = vmatmul.f32.vlgmr.msrb.gmra.mxu3 %v9491_v49  ;;  %v13505_v11 = vld [vmem:[#allocation115_spill] sm:$0xff]  ;;  %v13522_v44 = vld [vmem:[#allocation30_spill] sm:$0xff] }
 0x351   :  { %v2047_v22 = vsel %vm2044_vm11, %v2046_v24, %v2042_v28  ;;  %v2077_v36 = vmul.f32 %v9474_v33, %v2076_v25  ;;  %2545 = vmatpush.msra.mxu2 %v13495_v41  ;;  %2500 = vmatpush.msra.mxu0 %v13498_v21  ;;  %v13523_v51 = vsel %vm8088_vm4, %v13521_v53, %v13522_v44 }
 0x352   :  { %v2090_v5 = vmul.f32 %v2047_v22, %v13497_v46  ;;  %2523 = vmatpush.msra.mxu1 %v13499_v31  ;;  %2569 = vmatpush.msra.mxu3 %v13501_v37  ;;  %13559 = vst [vmem:[#allocation115_spill] sm:$0xff] %v9800_v6 }
 0x353   :  { %2546 = vmatpush.msra.mxu2 %v13500_v55  ;;  %2501 = vmatpush.msra.mxu0 %v13502_v39  ;;  %v2078_v40 = vadd.f32 %v9474_v33, %v2077_v36  ;;  %v13527_v55 = vld [vmem:[#allocation37_spill] sm:$0xff]  ;;  %v13529_v39 = vld [vmem:[#allocation34_spill] sm:$0xff] }
 0x354   :  { %v2094_v0 = vadd.f32 %v2092_v3, %v2090_v5  ;;  %2524 = vmatpush.msra.mxu1 %v13503_v27  ;;  %2570 = vmatpush.msra.mxu3 %v13506_v57  ;;  %v13525_v5 = vld [vmem:[#allocation27_spill] sm:$0xff]  ;;  %13679 = vst [vmem:[#allocation34_spill] sm:$0xff] %v10445_v19 }
 0x355   :  { %2547 = vmatpush.msra.mxu2 %v13505_v11  ;;  %2502 = vmatpush.msra.mxu0 %v13507_v38  ;;  %v2082_v60 = vsel %vm2081_vm10, %v9474_v33, %v2078_v40  ;;  %v13517_v33 = vld [vmem:[#allocation25_spill] sm:$0xff] }
 0x356   :  { %7002 = vtanh.f32 %v2094_v0  ;;  %v9521_v13 = vsel %vm13015_vm5, %v2094_v0, %v13497_v46  ;;  %2525 = vmatpush.msra.mxu1 %v13508_v47  ;;  %2571 = vmatpush.msra.mxu3 %v13510_v50  ;;  %v2087_v56 = vsel %vm2084_vm12, %v2086_v12, %v2082_v60  ;;  %v13519_v29 = vsel %vm8051_vm2, %v13517_v33, %v13518_v45  ;;  %v13524_v46 = vld [vmem:[#allocation31_spill] sm:$0xff]  ;;  %v13528_v0 = vld [vmem:[#allocation36_spill] sm:$0xff] }
 0x357   :  { %2548 = vmatpush.msra.mxu2 %v13509_v52  ;;  %2503 = vmatpush.msra.mxu0 %v13511_v15  ;;  %v13526_v21 = vsel %vm8084_vm3, %v13524_v46, %v13525_v5  ;;  %v13530_v27 = vsel %vm8051_vm2, %v13528_v0, %v13529_v39  ;;  %v7560_v5 = vmov 3   ;;  %13678 = vst [vmem:[#allocation36_spill] sm:$0xff] %v10443_v9 }
 0x358   :  { %2526 = vmatpush.msra.mxu1 %v13512_v17  ;;  %2572 = vmatpush.msra.mxu3 %v9333_v1 }
 0x359   :  { %2549 = vmatpush.msra.mxu2 %v9324_v34  ;;  %2504 = vmatpush.msra.mxu0 %v9335_v48 }
 0x35a   :  { %2527 = vmatpush.msra.mxu1 %v9337_v63  ;;  %2573 = vmatpush.msra.mxu3 %v9349_v54  ;;  %v13515_v54 = vld [vmem:[#allocation26_spill] sm:$0xff] }
 0x35b   :  { %2550 = vmatpush.msra.mxu2 %v9347_v20 }
 0x35c   :  { %v7003_v16 = vpop.eup %7002 }
 0x35d   :  { %v2098_v7 = vmul.f32 %v7003_v16, %v2087_v56 }
 0x35f   :  { %v9542_v34 = vsel %vm13015_vm5, %v2098_v7, %v13513_v62 }
 0x360   :  { %13514 = vst [vmem:[#allocation35_spill] sm:$0xff] %v9542_v34  ;;  %2200 = vmatmul.f32.gmra.mxu0 %v9542_v34  ;;  %2223 = vmatmul.f32.gmra.mxu1 %v9542_v34 }
 0x361   :  { %2246 = vmatmul.f32.gmra.mxu2 %v9542_v34  ;;  %2269 = vmatmul.f32.gmra.mxu3 %v9542_v34 }
 0x3cc   :  { %v2198_v63 = vpop.f32.mrf.mxu0  ;;  %v2221_v48 = vpop.f32.mrf.mxu1 }
 0x3cd   :  { %v2273_v20 = vadd.f32 %v2198_v63, %v13515_v54  ;;  %v2274_v10 = vadd.f32 %v2221_v48, %v13519_v29  ;;  %v13531_v63 = vld [vmem:[#allocation41_spill] sm:$0xff]  ;;  %v13532_v48 = vld [vmem:[#allocation39_spill] sm:$0xff] }
 0x3ce   :  { %v13533_v54 = vsel %vm8088_vm4, %v13531_v63, %v13532_v48 }
 0x3cf   :  { %v6770_v26 = vmul.f32 -1.442695, %v2273_v20  ;;  %v6772_v30 = vmul.f32 -1.442695, %v2274_v10 }
 0x3d1   :  { %7004 = vpow2.f32 %v6770_v26 }
 0x3d2   :  { %7006 = vpow2.f32 %v6772_v30 }
 0x3d3   :  { %v2267_v2 = vpop.f32.mrf.mxu3  ;;  %v2244_v22 = vpop.f32.mrf.mxu2 }
 0x3d4   :  { %v2276_v4 = vadd.f32 %v2267_v2, %v13523_v51  ;;  %v2275_v31 = vadd.f32 %v2244_v22, %v13526_v21  ;;  %v9585_v21 = vsel %vm121_vm1, 4, %v7560_v5 }
 0x3d5   :  { %13534 = vst [vmem:[#allocation33_spill] sm:$0xff] %v9585_v21 }
 0x3d6   :  { %v6774_v32 = vmul.f32 -1.442695, %v2276_v4 }
 0x3d7   :  { %v7005_v24 = vpop.eup %7004 }
 0x3d8   :  { %v7007_v25 = vpop.eup %7006  ;;  %v2287_v28 = vadd.f32 1.0, %v7005_v24  ;;  %7008 = vpow2.f32 %v6774_v32 }
 0x3d9   :  { %v2325_v3 = vadd.f32 1.0, %v7007_v25 }
 0x3da   :  { %7010 = vrcp.f32 %v2287_v28  ;;  %v2298_v15 = vand.u32 2147483647, %v2287_v28  ;;  %v2300_v12 = vand.u32 2147483648, %v2287_v28  ;;  %vm2294_vm8 = vweird.f32 %v2287_v28 }
 0x3db   :  { %7012 = vrcp.f32 %v2325_v3  ;;  %v2338_v60 = vand.u32 2147483648, %v2325_v3  ;;  %v2336_v7 = vand.u32 2147483647, %v2325_v3  ;;  %vm2332_vm0 = vweird.f32 %v2325_v3 }
 0x3dc   :  { %vm2299_vm12 = vcmp.eq.f32.partialorder %v2298_v15, 8.507059e+37  ;;  %v2301_v30 = vor.u32 1.1754944e-38, %v2300_v12 }
 0x3dd   :  { %v2201_v36 = vpop.f32.mrf.mxu0  ;;  %v2224_v41 = vpop.f32.mrf.mxu1  ;;  %v2339_v51 = vor.u32 1.1754944e-38, %v2338_v60  ;;  %vm2337_vm15 = vcmp.eq.f32.partialorder %v2336_v7, 8.507059e+37 }
 0x3de   :  { %v7009_v18 = vpop.eup %7008  ;;  %v2277_v37 = vadd.f32 %v2201_v36, %v13527_v55  ;;  %v2278_v40 = vadd.f32 %v2224_v41, %v13530_v27 }
 0x3df   :  { %v9570_v11 = vadd.f32 1.0, %v7009_v18 }
 0x3e0   :  { %v7011_v57 = vpop.eup %7010  ;;  %v6771_v42 = vmul.f32 -1.442695, %v2277_v37  ;;  %v6773_v38 = vmul.f32 -1.442695, %v2278_v40 }
 0x3e1   :  { %v7013_v47 = vpop.eup %7012  ;;  %v2290_v23 = vmul.f32 %v7011_v57, %v2287_v28  ;;  %7014 = vrcp.f32 %v9570_v11  ;;  %vm2295_vm13 = vweird.f32 %v7011_v57  ;;  %v2378_v39 = vand.u32 2147483648, %v9570_v11 }
 0x3e2   :  { %v2328_v52 = vmul.f32 %v7013_v47, %v2325_v3  ;;  %7016 = vtanh.f32 %v2275_v31  ;;  %vm2333_vm11 = vweird.f32 %v7013_v47  ;;  %vm2296_vm10 = vmor %vm2294_vm8, %vm2295_vm13  ;;  %vm2372_vm13 = vweird.f32 %v9570_v11 }
 0x3e3   :  { %v2291_v50 = vsub.f32 1.0, %v2290_v23  ;;  %7018 = vpow2.f32 %v6771_v42  ;;  %vm2334_vm5 = vmor %vm2332_vm0, %vm2333_vm11  ;;  %v2376_v40 = vand.u32 2147483647, %v9570_v11 }
 0x3e4   :  { %v2329_v17 = vsub.f32 1.0, %v2328_v52  ;;  %7020 = vpow2.f32 %v6773_v38  ;;  %v2270_v16 = vpop.f32.mrf.mxu3  ;;  %v2247_v55 = vpop.f32.mrf.mxu2 }
 0x3e5   :  { %v2292_v56 = vmul.f32 %v7011_v57, %v2291_v50  ;;  %v2280_v20 = vadd.f32 %v2270_v16, %v13533_v54  ;;  %vm2377_vm0 = vcmp.eq.f32.partialorder %v2376_v40, 8.507059e+37  ;;  %v9655_v40 = vld [vmem:[#allocation11 + $0x1c0] sm:$0xff] }
 0x3e6   :  { %v2330_v33 = vmul.f32 %v7013_v47, %v2329_v17 }
 0x3e7   :  { %v7015_v45 = vpop.eup %7014  ;;  %v2293_v29 = vadd.f32 %v7011_v57, %v2292_v56  ;;  %v6775_v10 = vmul.f32 -1.442695, %v2280_v20 }
 0x3e8   :  { %v7017_v26 = vpop.eup %7016  ;;  %v2331_v2 = vadd.f32 %v7013_v47, %v2330_v33  ;;  %v2368_v53 = vmul.f32 %v7015_v45, %v9570_v11  ;;  %v2379_v11 = vor.u32 1.1754944e-38, %v2378_v39  ;;  %v9647_v39 = vld [vmem:[#allocation11 + $0x1f0] sm:$0xff] }
 0x3e9   :  { %v7019_v44 = vpop.eup %7018  ;;  %v2297_v4 = vsel %vm2296_vm10, %v7011_v57, %v2293_v29  ;;  %7022 = vpow2.f32 %v6775_v10  ;;  %v13535_v57 = vsel %vm8084_vm3, %v13484_v43, %v13485_v61  ;;  %2843 = vmatpush.msrb.mxu2 %v9647_v39 }
 0x3ea   :  { %v7021_v32 = vpop.eup %7020  ;;  %v2302_v24 = vsel %vm2299_vm12, %v2301_v30, %v2297_v4  ;;  %v2335_v25 = vsel %vm2334_vm5, %v7013_v47, %v2331_v2  ;;  %v2369_v3 = vsub.f32 1.0, %v2368_v53  ;;  %v2288_v22 = vadd.f32 1.0, %v7019_v44 }
 0x3eb   :  { %v2340_v28 = vsel %vm2337_vm15, %v2339_v51, %v2335_v25  ;;  %v2399_v36 = vmul.f32 %v7017_v26, %v2302_v24  ;;  %v9579_v41 = vadd.f32 1.0, %v7021_v32  ;;  %vm2373_vm5 = vweird.f32 %v7015_v45 }
 0x3ec   :  { %v2397_v18 = vmul.f32 %v2340_v28, %v9452_v14  ;;  %v2370_v46 = vmul.f32 %v7015_v45, %v2369_v3  ;;  %7024 = vrcp.f32 %v2288_v22  ;;  %vm13017_vm15 = vcmp.gt.s32.totalorder %v8491_v8, %v9585_v21  ;;  %vm2374_vm11 = vmor %vm2372_vm13, %vm2373_vm5 }
 0x3ed   :  { %7026 = vrcp.f32 %v9579_v41  ;;  %v2279_v42 = vadd.f32 %v2247_v55, %v13535_v57  ;;  %v2353_v60 = vand.u32 2147483648, %v9579_v41  ;;  %v2315_v12 = vand.u32 2147483648, %v2288_v22  ;;  %v9657_v57 = vld [vmem:[#allocation11 + $0x1c8] sm:$0xff] }
 0x3ee   :  { %v2401_v31 = vadd.f32 %v2399_v36, %v2397_v18  ;;  %v2371_v0 = vadd.f32 %v7015_v45, %v2370_v46  ;;  %v2313_v56 = vand.u32 2147483647, %v2288_v22  ;;  %v2351_v54 = vand.u32 2147483647, %v9579_v41 }
 0x3ef   :  { %v7023_v37 = vpop.eup %7022  ;;  %vm2309_vm12 = vweird.f32 %v2288_v22  ;;  %vm2347_vm5 = vweird.f32 %v9579_v41  ;;  %v2316_v29 = vor.u32 1.1754944e-38, %v2315_v12  ;;  %v2354_v30 = vor.u32 1.1754944e-38, %v2353_v60  ;;  %v13539_v60 = vld [vmem:[#allocation45_spill] sm:$0xff]  ;;  %v13540_v12 = vld [vmem:[#allocation43_spill] sm:$0xff] }
 0x3f0   :  { %7028 = vtanh.f32 %v2401_v31  ;;  %v9588_v27 = vadd.f32 1.0, %v7023_v37  ;;  %v9603_v38 = vsel %vm13017_vm15, %v2401_v31, %v9452_v14  ;;  %v2375_v50 = vsel %vm2374_vm11, %v7015_v45, %v2371_v0  ;;  %v9645_v0 = vld [vmem:[#allocation11 + $0x1e8] sm:$0xff] }
 0x3f1   :  { %v2380_v14 = vsel %vm2377_vm0, %v2379_v11, %v2375_v50  ;;  %vm2314_vm0 = vcmp.eq.f32.partialorder %v2313_v56, 8.507059e+37  ;;  %2820 = vmatpush.msrb.mxu1 %v9645_v0  ;;  %v9671_v50 = vld [vmem:[#allocation11 + $0x1b0] sm:$0xff]  ;;  %v9685_v56 = vld [vmem:[#allocation11 + $0x180] sm:$0xff] }
 0x3f2   :  { %v7025_v47 = vpop.eup %7024  ;;  %7030 = vrcp.f32 %v9588_v27  ;;  %v2393_v28 = vand.u32 2147483648, %v9588_v27 }
 0x3f3   :  { %v7027_v23 = vpop.eup %7026  ;;  %v2305_v52 = vmul.f32 %v7025_v47, %v2288_v22  ;;  %7032 = vtanh.f32 %v2279_v42  ;;  %vm2310_vm8 = vweird.f32 %v7025_v47  ;;  %v9659_v42 = vld [vmem:[#allocation11 + $0x1d0] sm:$0xff]  ;;  %2821 = vmatpush.msrb.mxu1 %v9657_v57 }
 0x3f4   :  { %v2343_v15 = vmul.f32 %v7027_v23, %v9579_v41  ;;  %vm2348_vm10 = vweird.f32 %v7027_v23  ;;  %vm2311_vm13 = vmor %vm2309_vm12, %vm2310_vm8  ;;  %v2391_v41 = vand.u32 2147483647, %v9588_v27  ;;  %v2394_v46 = vor.u32 1.1754944e-38, %v2393_v28  ;;  %2844 = vmatpush.msrb.mxu2 %v9659_v42 }
 0x3f5   :  { %v2306_v17 = vsub.f32 1.0, %v2305_v52  ;;  %vm2349_vm11 = vmor %vm2347_vm5, %vm2348_vm10  ;;  %vm13059_vm10 = vcmp.gt.s32.totalorder %v13504_v35, %v9585_v21  ;;  %v9669_v52 = vld [vmem:[#allocation11 + $0x1a8] sm:$0xff]  ;;  %v13560_v35 = vld [vmem:[#allocation55_spill] sm:$0xff] }
 0x3f6   :  { %v7029_v43 = vpop.eup %7028  ;;  %v2344_v61 = vsub.f32 1.0, %v2343_v15  ;;  %vm2392_vm5 = vcmp.eq.f32.partialorder %v2391_v41, 8.507059e+37  ;;  %2822 = vmatpush.msrb.mxu1 %v9669_v52  ;;  %2845 = vmatpush.msrb.mxu2 %v9671_v50  ;;  %v9734_v41 = vld [vmem:[#allocation11 + $0x138] sm:$0xff]  ;;  %v9794_v21 = vld [vmem:[#allocation11 + $0x88] sm:$0xff] }
 0x3f7   :  { %v2307_v16 = vmul.f32 %v7025_v47, %v2306_v17  ;;  %v2405_v7 = vmul.f32 %v7029_v43, %v2380_v14  ;;  %v9675_v17 = vld [vmem:[#allocation11 + $0x1b8] sm:$0xff]  ;;  %v13541_v14 = vsel %vm8051_vm2, %v13539_v60, %v13540_v12  ;;  %13557 = vst [vmem:[#allocation113_spill] sm:$0xff] %v9794_v21 }
 0x3f8   :  { %v7031_v63 = vpop.eup %7030  ;;  %v2345_v48 = vmul.f32 %v7027_v23, %v2344_v61  ;;  %v13538_v43 = vld [vmem:[#allocation46_spill] sm:$0xff] }
 0x3f9   :  { %v2308_v20 = vadd.f32 %v7025_v47, %v2307_v16  ;;  %v2383_v33 = vmul.f32 %v7031_v63, %v9588_v27  ;;  %v9614_v45 = vsel %vm13017_vm15, %v2405_v7, %v9491_v49  ;;  %v7033_v26 = vpop.eup %7032  ;;  %vm2352_vm15 = vcmp.eq.f32.partialorder %v2351_v54, 8.507059e+37  ;;  %v9687_v7 = vld [vmem:[#allocation11 + $0x188] sm:$0xff] }
 0x3fa   :  { %v2346_v10 = vadd.f32 %v7027_v23, %v2345_v48  ;;  %2505 = vmatmul.f32.vlgmr.msra.gmra.mxu0 %v9614_v45  ;;  %2528 = vmatmul.f32.vlgmr.msra.gmra.mxu1 %v9614_v45  ;;  %vm2388_vm8 = vweird.f32 %v7031_v63  ;;  %v9693_v48 = vld [vmem:[#allocation11 + $0x198] sm:$0xff] }
 0x3fb   :  { %v2312_v2 = vsel %vm2311_vm13, %v7025_v47, %v2308_v20  ;;  %v2384_v53 = vsub.f32 1.0, %v2383_v33  ;;  %2551 = vmatmul.f32.vlgmr.msra.gmra.mxu2 %v9614_v45  ;;  %2574 = vmatmul.f32.vlgmr.msra.gmra.mxu3 %v9614_v45  ;;  %v9663_v47 = vld [vmem:[#allocation11 + $0x1d8] sm:$0xff]  ;;  %v9697_v33 = vld [vmem:[#allocation11 + $0x160] sm:$0xff] }
 0x3fc   :  { %v2317_v44 = vsel %vm2314_vm0, %v2316_v29, %v2312_v2  ;;  %v2350_v51 = vsel %vm2349_vm11, %v7027_v23, %v2346_v10  ;;  %v9667_v23 = vld [vmem:[#allocation11 + $0x1a0] sm:$0xff]  ;;  %2823 = vmatpush.msrb.mxu1 %v9687_v7  ;;  %v9699_v29 = vld [vmem:[#allocation11 + $0x168] sm:$0xff]  ;;  %v9703_v10 = vld [vmem:[#allocation11 + $0x170] sm:$0xff] }
 0x3fd   :  { %v2355_v4 = vsel %vm2352_vm15, %v2354_v30, %v2350_v51  ;;  %v2400_v32 = vmul.f32 %v7033_v26, %v2317_v44  ;;  %v2385_v24 = vmul.f32 %v7031_v63, %v2384_v53  ;;  %vm2387_vm15 = vweird.f32 %v9588_v27  ;;  %v9651_v27 = vld [vmem:[#allocation11 + $0x1f8] sm:$0xff]  ;;  %v9709_v30 = vld [vmem:[#allocation11 + $0x140] sm:$0xff]  ;;  %v9711_v2 = vld [vmem:[#allocation11 + $0x148] sm:$0xff] }
 0x3fe   :  { %v2398_v25 = vmul.f32 %v2355_v4, %v9521_v13  ;;  %vm2389_vm12 = vmor %vm2387_vm15, %vm2388_vm8  ;;  %2866 = vmatpush.msrb.mxu3 %v9651_v27  ;;  %2824 = vmatpush.msrb.mxu1 %v9699_v29  ;;  %v9705_v26 = vld [vmem:[#allocation11 + $0x178] sm:$0xff]  ;;  %v9713_v53 = vld [vmem:[#allocation11 + $0x150] sm:$0xff] }
 0x3ff   :  { %v2386_v22 = vadd.f32 %v7031_v63, %v2385_v24  ;;  %v9717_v44 = vld [vmem:[#allocation11 + $0x158] sm:$0xff]  ;;  %v9721_v4 = vld [vmem:[#allocation11 + $0x120] sm:$0xff]  ;;  %v9725_v24 = vld [vmem:[#allocation11 + $0x130] sm:$0xff] }
 0x400   :  { %v2402_v3 = vadd.f32 %v2400_v32, %v2398_v25  ;;  %2867 = vmatpush.msrb.mxu3 %v9663_v47  ;;  %2825 = vmatpush.msrb.mxu1 %v9711_v2  ;;  %v9723_v32 = vld [vmem:[#allocation11 + $0x128] sm:$0xff]  ;;  %v13542_v25 = vld [vmem:[#allocation50_spill] sm:$0xff] }
 0x401   :  { %v2390_v18 = vsel %vm2389_vm12, %v7031_v63, %v2386_v22  ;;  %v9689_v63 = vld [vmem:[#allocation11 + $0x190] sm:$0xff] }
 0x402   :  { %7034 = vtanh.f32 %v2402_v3  ;;  %v9629_v36 = vsel %vm13059_vm10, %v2402_v3, %v9521_v13  ;;  %v2395_v31 = vsel %vm2392_vm5, %v2394_v46, %v2390_v18  ;;  %v9643_v13 = vld [vmem:[#allocation11 + $0x1e0] sm:$0xff]  ;;  %2868 = vmatpush.msrb.mxu3 %v9675_v17  ;;  %2846 = vmatpush.msrb.mxu2 %v9689_v63  ;;  %v13543_v3 = vld [vmem:[#allocation48_spill] sm:$0xff] }
 0x403   :  { %13536 = vst [vmem:[#allocation40_spill] sm:$0xff] %v9629_v36  ;;  %2797 = vmatpush.msrb.mxu0 %v9643_v13  ;;  %v13544_v22 = vsel %vm8088_vm4, %v13542_v25, %v13543_v3  ;;  %2826 = vmatpush.msrb.mxu1 %v9723_v32  ;;  %v9738_v18 = vld [vmem:[#allocation11 + $0x100] sm:$0xff]  ;;  %v9740_v46 = vld [vmem:[#allocation11 + $0x108] sm:$0xff]  ;;  %v9775_v25 = vld [vmem:[#allocation11 + $0xd8] sm:$0xff] }
 0x404   :  { %2869 = vmatpush.msrb.mxu3 %v9693_v48  ;;  %2847 = vmatpush.msrb.mxu2 %v9703_v10  ;;  %13551 = vst [vmem:[#allocation108_spill] sm:$0xff] %v9775_v25  ;;  %v9780_v3 = vld [vmem:[#allocation11 + $0xa0] sm:$0xff] }
 0x405   :  { %2798 = vmatpush.msrb.mxu0 %v9655_v40  ;;  %2827 = vmatpush.msrb.mxu1 %v9740_v46  ;;  %13552 = vst [vmem:[#allocation101_spill] sm:$0xff] %v9780_v3 }
 0x406   :  { %2870 = vmatpush.msrb.mxu3 %v9705_v26  ;;  %2848 = vmatpush.msrb.mxu2 %v9713_v53 }
 0x407   :  { %2799 = vmatpush.msrb.mxu0 %v9667_v23 }
 0x408   :  { %v7035_v5 = vpop.eup %7034  ;;  %2871 = vmatpush.msrb.mxu3 %v9717_v44  ;;  %2849 = vmatpush.msrb.mxu2 %v9725_v24 }
 0x409   :  { %v2406_v55 = vmul.f32 %v7035_v5, %v2395_v31  ;;  %2800 = vmatpush.msrb.mxu0 %v9685_v56  ;;  %v9742_v5 = vld [vmem:[#allocation11 + $0x110] sm:$0xff] }
 0x40a   :  { %2872 = vmatpush.msrb.mxu3 %v9734_v41  ;;  %2850 = vmatpush.msrb.mxu2 %v9742_v5 }
 0x40b   :  { %v9637_v37 = vsel %vm13059_vm10, %v2406_v55, %v9542_v34  ;;  %2801 = vmatpush.msrb.mxu0 %v9697_v33  ;;  %v9746_v55 = vld [vmem:[#allocation11 + $0x118] sm:$0xff] }
 0x40c   :  { %13537 = vst [vmem:[#allocation38_spill] sm:$0xff] %v9637_v37  ;;  %2508 = vmatmul.f32.gmra.mxu0 %v9637_v37  ;;  %2531 = vmatmul.f32.gmra.mxu1 %v9637_v37 }
 0x40d   :  { %2554 = vmatmul.f32.gmra.mxu2 %v9637_v37  ;;  %2577 = vmatmul.f32.gmra.mxu3 %v9637_v37 }
 0x40e   :  { %2802 = vmatpush.msrb.mxu0 %v9709_v30  ;;  %2873 = vmatpush.msrb.mxu3 %v9746_v55 }
 0x410   :  { %2803 = vmatpush.msrb.mxu0 %v9721_v4 }
 0x412   :  { %2804 = vmatpush.msrb.mxu0 %v9738_v18 }
 0x477   :  { %v2506_v11 = vpop.f32.mrf.mxu0  ;;  %v2529_v15 = vpop.f32.mrf.mxu1 }
 0x478   :  { %v2581_v61 = vadd.f32 %v2506_v11, %v13538_v43  ;;  %v2582_v16 = vadd.f32 %v2529_v15, %v13541_v14  ;;  %v9750_v15 = vld [vmem:[#allocation11 + $0xe0] sm:$0xff]  ;;  %v9752_v43 = vld [vmem:[#allocation11 + $0xe8] sm:$0xff]  ;;  %v9760_v14 = vld [vmem:[#allocation11 + $0xf8] sm:$0xff] }
 0x479   :  { %13545 = vst [vmem:[#allocation103_spill] sm:$0xff] %v9752_v43  ;;  %2805 = vmatpush.msrb.mxu0 %v9750_v15  ;;  %2828 = vmatpush.msrb.mxu1 %v9752_v43 }
 0x47a   :  { %v6776_v54 = vmul.f32 -1.442695, %v2581_v61  ;;  %v6778_v20 = vmul.f32 -1.442695, %v2582_v16  ;;  %v9754_v61 = vld [vmem:[#allocation11 + $0xf0] sm:$0xff]  ;;  %13547 = vst [vmem:[#allocation105_spill] sm:$0xff] %v9760_v14  ;;  %2874 = vmatpush.msrb.mxu3 %v9760_v14 }
 0x47b   :  { %13546 = vst [vmem:[#allocation104_spill] sm:$0xff] %v9754_v61  ;;  %2851 = vmatpush.msrb.mxu2 %v9754_v61 }
 0x47c   :  { %7036 = vpow2.f32 %v6776_v54  ;;  %v9766_v54 = vld [vmem:[#allocation11 + $0xc0] sm:$0xff]  ;;  %2875 = vmatpush.msrb.mxu3 %v9775_v25 }
 0x47d   :  { %7038 = vpow2.f32 %v6778_v20  ;;  %13548 = vst [vmem:[#allocation106_spill] sm:$0xff] %v9766_v54  ;;  %v9768_v20 = vld [vmem:[#allocation11 + $0xc8] sm:$0xff]  ;;  %2806 = vmatpush.msrb.mxu0 %v9766_v54  ;;  %v9812_v25 = vld [vmem:[#allocation11 + $0x60] sm:$0xff] }
 0x47e   :  { %v2575_v51 = vpop.f32.mrf.mxu3  ;;  %13549 = vst [vmem:[#allocation90_spill] sm:$0xff] %v9768_v20  ;;  %2829 = vmatpush.msrb.mxu1 %v9768_v20 }
 0x47f   :  { %v2584_v28 = vadd.f32 %v2575_v51, %v13544_v22  ;;  %v9770_v51 = vld [vmem:[#allocation11 + $0xd0] sm:$0xff]  ;;  %v9782_v22 = vld [vmem:[#allocation11 + $0xa8] sm:$0xff]  ;;  %2807 = vmatpush.msrb.mxu0 %v9780_v3  ;;  %13564 = vst [vmem:[#allocation116_spill] sm:$0xff] %v9812_v25 }
 0x480   :  { %13550 = vst [vmem:[#allocation107_spill] sm:$0xff] %v9770_v51  ;;  %2852 = vmatpush.msrb.mxu2 %v9770_v51  ;;  %2830 = vmatpush.msrb.mxu1 %v9782_v22 }
 0x481   :  { %v6780_v31 = vmul.f32 -1.442695, %v2584_v28  ;;  %13553 = vst [vmem:[#allocation109_spill] sm:$0xff] %v9782_v22  ;;  %v9784_v28 = vld [vmem:[#allocation11 + $0xb0] sm:$0xff] }
 0x482   :  { %v7037_v11 = vpop.eup %7036  ;;  %13554 = vst [vmem:[#allocation110_spill] sm:$0xff] %v9784_v28  ;;  %2853 = vmatpush.msrb.mxu2 %v9784_v28  ;;  %2831 = vmatpush.msrb.mxu1 %v9794_v21  ;;  %v13562_v28 = vld [vmem:[#allocation52_spill] sm:$0xff]  ;;  %v9816_v21 = vld [vmem:[#allocation11 + $0x70] sm:$0xff] }
 0x483   :  { %v7039_v60 = vpop.eup %7038  ;;  %v9756_v12 = vadd.f32 1.0, %v7037_v11  ;;  %7040 = vpow2.f32 %v6780_v31  ;;  %v9788_v31 = vld [vmem:[#allocation11 + $0xb8] sm:$0xff]  ;;  %v2552_v11 = vpop.f32.mrf.mxu2  ;;  %13566 = vst [vmem:[#allocation93_spill] sm:$0xff] %v9816_v21 }
 0x484   :  { %v9762_v16 = vadd.f32 1.0, %v7039_v60  ;;  %13555 = vst [vmem:[#allocation111_spill] sm:$0xff] %v9788_v31  ;;  %2876 = vmatpush.msrb.mxu3 %v9788_v31  ;;  %v9792_v60 = vld [vmem:[#allocation11 + $0x80] sm:$0xff]  ;;  %v13561_v31 = vld [vmem:[#allocation54_spill] sm:$0xff]  ;;  %2854 = vmatpush.msrb.mxu2 %v9796_v59 }
 0x485   :  { %7042 = vrcp.f32 %v9756_v12  ;;  %13556 = vst [vmem:[#allocation112_spill] sm:$0xff] %v9792_v60  ;;  %2808 = vmatpush.msrb.mxu0 %v9792_v60  ;;  %v13563_v22 = vsel %vm8051_vm2, %v13561_v31, %v13562_v28  ;;  %v9814_v60 = vld [vmem:[#allocation11 + $0x68] sm:$0xff]  ;;  %v9836_v31 = vld [vmem:[#allocation11 + $0x40] sm:$0xff]  ;;  %v2608_v54 = vand.u32 2147483648, %v9756_v12  ;;  %vm2602_vm0 = vweird.f32 %v9756_v12 }
 0x486   :  { %7044 = vrcp.f32 %v9762_v16  ;;  %2877 = vmatpush.msrb.mxu3 %v9800_v6  ;;  %13565 = vst [vmem:[#allocation117_spill] sm:$0xff] %v9814_v60  ;;  %2832 = vmatpush.msrb.mxu1 %v9814_v60  ;;  %v9847_v60 = vld [vmem:[#allocation11 + $0x58] sm:$0xff]  ;;  %v9851_v6 = vld [vmem:[#allocation11 + $0x20] sm:$0xff]  ;;  %v2646_v20 = vand.u32 2147483648, %v9762_v16  ;;  %vm2640_vm8 = vweird.f32 %v9762_v16 }
 0x487   :  { %2809 = vmatpush.msrb.mxu0 %v9812_v25  ;;  %2855 = vmatpush.msrb.mxu2 %v9816_v21  ;;  %13571 = vst [vmem:[#allocation42_spill] sm:$0xff] %v9836_v31 }
 0x488   :  { %13574 = vst [vmem:[#allocation26_spill] sm:$0xff] %v9847_v60 }
 0x489   :  { %v7041_v34 = vpop.eup %7040  ;;  %v2509_v49 = vpop.f32.mrf.mxu0  ;;  %2810 = vmatpush.msrb.mxu0 %v9836_v31  ;;  %13575 = vst [vmem:[#allocation25_spill] sm:$0xff] %v9851_v6  ;;  %v9858_v31 = vld [vmem:[#allocation11 + $0x30] sm:$0xff] }
 0x48a   :  { %v2532_v62 = vpop.f32.mrf.mxu1  ;;  %v9802_v37 = vadd.f32 1.0, %v7041_v34  ;;  %v2585_v36 = vadd.f32 %v2509_v49, %v13560_v35  ;;  %v13567_v49 = vld [vmem:[#allocation49_spill] sm:$0xff]  ;;  %v13568_v35 = vld [vmem:[#allocation47_spill] sm:$0xff]  ;;  %13577 = vst [vmem:[#allocation32_spill] sm:$0xff] %v9858_v31 }
 0x48b   :  { %v2586_v3 = vadd.f32 %v2532_v62, %v13563_v22  ;;  %v9818_v34 = vpop.eup %7042  ;;  %v13569_v1 = vsel %vm8084_vm3, %v13567_v49, %v13568_v35  ;;  %v9827_v62 = vld [vmem:[#allocation11 + $0x78] sm:$0xff]  ;;  %v2606_v35 = vand.u32 2147483647, %v9756_v12  ;;  %2811 = vmatpush.msrb.mxu0 %v9851_v6  ;;  %v9869_v6 = vld [vmem:[#allocation11 + $0x8] sm:$0xff] }
 0x48c   :  { %v2583_v51 = vadd.f32 %v2552_v11, %v13569_v1  ;;  %13570 = vst [vmem:[#allocation44_spill] sm:$0xff] %v9827_v62  ;;  %v9829_v22 = vpop.eup %7044  ;;  %v2598_v28 = vmul.f32 %v9818_v34, %v9756_v12  ;;  %7046 = vrcp.f32 %v9802_v37  ;;  %2878 = vmatpush.msrb.mxu3 %v9827_v62  ;;  %v9838_v1 = vld [vmem:[#allocation11 + $0x48] sm:$0xff]  ;;  %v9840_v11 = vld [vmem:[#allocation11 + $0x50] sm:$0xff]  ;;  %v6777_v25 = vmul.f32 -1.442695, %v2585_v36  ;;  %v9860_v36 = vld [vmem:[#allocation11 + $0x38] sm:$0xff] }
 0x48d   :  { %13572 = vst [vmem:[#allocation53_spill] sm:$0xff] %v9838_v1  ;;  %v2636_v49 = vmul.f32 %v9829_v22, %v9762_v16  ;;  %2833 = vmatpush.msrb.mxu1 %v9838_v1  ;;  %v6779_v62 = vmul.f32 -1.442695, %v2586_v3  ;;  %2856 = vmatpush.msrb.mxu2 %v9840_v11  ;;  %v9856_v1 = vld [vmem:[#allocation11 + $0x28] sm:$0xff]  ;;  %vm2603_vm13 = vweird.f32 %v9818_v34  ;;  %vm2641_vm11 = vweird.f32 %v9829_v22 }
 0x48e   :  { %13573 = vst [vmem:[#allocation51_spill] sm:$0xff] %v9840_v11  ;;  %v2599_v21 = vsub.f32 1.0, %v2598_v28  ;;  %2879 = vmatpush.msrb.mxu3 %v9847_v60  ;;  %7048 = vtanh.f32 %v2583_v51  ;;  %v2644_v28 = vand.u32 2147483647, %v9762_v16  ;;  %v9867_v51 = vld [vmem:[#allocation11] sm:$0xff]  ;;  %v9871_v60 = vld [vmem:[#allocation11 + $0x10] sm:$0xff]  ;;  %vm2604_vm15 = vmor %vm2602_vm0, %vm2603_vm13 }
 0x48f   :  { %v2637_v59 = vsub.f32 1.0, %v2636_v49  ;;  %13576 = vst [vmem:[#allocation23_spill] sm:$0xff] %v9856_v1  ;;  %7050 = vpow2.f32 %v6777_v25  ;;  %2834 = vmatpush.msrb.mxu1 %v9856_v1  ;;  %2857 = vmatpush.msrb.mxu2 %v9858_v31  ;;  %v13579_v25 = vld [vmem:[#allocation57_spill] sm:$0xff]  ;;  %v9882_v31 = vld [vmem:[#allocation11 + $0x18] sm:$0xff]  ;;  %vm9900_vm12 = vmor %vm2640_vm8, %vm2641_vm11  ;;  %v2647_v16 = vor.u32 1.1754944e-38, %v2646_v20  ;;  %vm2607_vm5 = vcmp.eq.f32.partialorder %v2606_v35, 8.507059e+37 }
 0x490   :  { %v2600_v3 = vmul.f32 %v9818_v34, %v2599_v21  ;;  %v2578_v49 = vpop.f32.mrf.mxu3  ;;  %7052 = vpow2.f32 %v6779_v62  ;;  %v13578_v21 = vld [vmem:[#allocation59_spill] sm:$0xff]  ;;  %2880 = vmatpush.msrb.mxu3 %v9860_v36  ;;  %2812 = vmatpush.msrb.mxu0 %v9867_v51  ;;  %vm2645_vm13 = vcmp.eq.f32.partialorder %v2644_v28, 8.507059e+37  ;;  %vm2680_vm8 = vweird.f32 %v9802_v37 }
 0x491   :  { %v2638_v11 = vmul.f32 %v9829_v22, %v2637_v59  ;;  %v13580_v14 = vsel %vm8088_vm4, %v13578_v21, %v13579_v25  ;;  %2835 = vmatpush.msrb.mxu1 %v9869_v6  ;;  %2858 = vmatpush.msrb.mxu2 %v9871_v60  ;;  %v2609_v59 = vor.u32 1.1754944e-38, %v2608_v54 }
 0x492   :  { %v2588_v61 = vadd.f32 %v2578_v49, %v13580_v14  ;;  %v9884_v1 = vpop.eup %7046  ;;  %v2601_v43 = vadd.f32 %v9818_v34, %v2600_v3  ;;  %2881 = vmatpush.msrb.mxu3 %v9882_v31  ;;  %3105 = vmatpush.msra.mxu0 %v9643_v13 }
 0x493   :  { %v2639_v14 = vadd.f32 %v9829_v22, %v2638_v11  ;;  %v2676_v62 = vmul.f32 %v9884_v1, %v9802_v37  ;;  %3128 = vmatpush.msra.mxu1 %v9645_v0  ;;  %3151 = vmatpush.msra.mxu2 %v9647_v39  ;;  %vm2681_vm11 = vweird.f32 %v9884_v1 }
 0x494   :  { %v2605_v3 = vsel %vm2604_vm15, %v9818_v34, %v2601_v43  ;;  %v6781_v54 = vmul.f32 -1.442695, %v2588_v61  ;;  %v7049_v11 = vpop.eup %7048  ;;  %3174 = vmatpush.msra.mxu3 %v9651_v27  ;;  %3106 = vmatpush.msra.mxu0 %v9655_v40  ;;  %v7561_v40 = vmov 2   ;;  %vm9953_vm15 = vmor %vm2680_vm8, %vm2681_vm11 }
 0x495   :  { %v2610_v49 = vsel %vm2607_vm5, %v2609_v59, %v2605_v3  ;;  %v2643_v13 = vsel %vm9900_vm12, %v9829_v22, %v2639_v14  ;;  %v2677_v21 = vsub.f32 1.0, %v2676_v62  ;;  %v7051_v20 = vpop.eup %7050  ;;  %3129 = vmatpush.msra.mxu1 %v9657_v57  ;;  %3152 = vmatpush.msra.mxu2 %v9659_v42  ;;  %v9924_v35 = vsel %vm121_vm1, 5, %v7561_v40  ;;  %v13591_v3 = vld [vmem:[#allocation105_spill] sm:$0xff] }
 0x496   :  { %v2648_v43 = vsel %vm2645_vm13, %v2647_v16, %v2643_v13  ;;  %v2707_v34 = vmul.f32 %v7049_v11, %v2610_v49  ;;  %7054 = vpow2.f32 %v6781_v54  ;;  %v7053_v0 = vpop.eup %7052  ;;  %v9916_v22 = vadd.f32 1.0, %v7051_v20  ;;  %3175 = vmatpush.msra.mxu3 %v9663_v47  ;;  %3107 = vmatpush.msra.mxu0 %v9667_v23  ;;  %13583 = vst [vmem:[#allocation30_spill] sm:$0xff] %v9924_v35  ;;  %v13592_v54 = vld [vmem:[#allocation106_spill] sm:$0xff]  ;;  %v13594_v20 = vld [vmem:[#allocation107_spill] sm:$0xff] }
 0x497   :  { %v2705_v39 = vmul.f32 %v2648_v43, %v9603_v38  ;;  %v2678_v61 = vmul.f32 %v9884_v1, %v2677_v21  ;;  %v9920_v27 = vadd.f32 1.0, %v7053_v0  ;;  %3130 = vmatpush.msra.mxu1 %v9669_v52  ;;  %3153 = vmatpush.msra.mxu2 %v9671_v50  ;;  %v2686_v47 = vand.u32 2147483648, %v9802_v37  ;;  %v2555_v50 = vpop.f32.mrf.mxu2  ;;  %v13593_v21 = vld [vmem:[#allocation90_spill] sm:$0xff] }
 0x498   :  { %7056 = vrcp.f32 %v9916_v22  ;;  %3176 = vmatpush.msra.mxu3 %v9675_v17  ;;  %3108 = vmatpush.msra.mxu0 %v9685_v56  ;;  %vm13057_vm0 = vcmp.gt.s32.totalorder %v8491_v8, %v9924_v35  ;;  %v2684_v52 = vand.u32 2147483647, %v9802_v37  ;;  %vm2617_vm11 = vweird.f32 %v9916_v22  ;;  %v13602_v56 = vld [vmem:[#allocation113_spill] sm:$0xff] }
 0x499   :  { %v2709_v57 = vadd.f32 %v2707_v34, %v2705_v39  ;;  %v2679_v42 = vadd.f32 %v9884_v1, %v2678_v61  ;;  %7058 = vrcp.f32 %v9920_v27  ;;  %3131 = vmatpush.msra.mxu1 %v9687_v7  ;;  %3154 = vmatpush.msra.mxu2 %v9689_v63  ;;  %v2687_v63 = vor.u32 1.1754944e-38, %v2686_v47  ;;  %v13595_v39 = vld [vmem:[#allocation108_spill] sm:$0xff]  ;;  %v13596_v61 = vld [vmem:[#allocation101_spill] sm:$0xff] }
 0x49a   :  { %3177 = vmatpush.msra.mxu3 %v9693_v48  ;;  %3109 = vmatpush.msra.mxu0 %v9697_v33  ;;  %v13586_v48 = vld [vmem:[#allocation58_spill] sm:$0xff]  ;;  %v13587_v33 = vld [vmem:[#allocation56_spill] sm:$0xff]  ;;  %vm2685_vm12 = vcmp.eq.f32.partialorder %v2684_v52, 8.507059e+37  ;;  %v2661_v25 = vand.u32 2147483648, %v9920_v27  ;;  %vm2655_vm8 = vweird.f32 %v9920_v27  ;;  %v13600_v52 = vld [vmem:[#allocation111_spill] sm:$0xff] }
 0x49b   :  { %7060 = vtanh.f32 %v2709_v57  ;;  %v9947_v17 = vsel %vm13057_vm0, %v2709_v57, %v9603_v38  ;;  %3132 = vmatpush.msra.mxu1 %v9699_v29  ;;  %3155 = vmatpush.msra.mxu2 %v9703_v10  ;;  %v2683_v38 = vsel %vm9953_vm15, %v9884_v1, %v2679_v42  ;;  %v13588_v29 = vsel %vm8084_vm3, %v13586_v48, %v13587_v33  ;;  %v13597_v57 = vld [vmem:[#allocation109_spill] sm:$0xff]  ;;  %v13598_v42 = vld [vmem:[#allocation110_spill] sm:$0xff]  ;;  %v13599_v47 = vld [vmem:[#allocation40_spill] sm:$0xff] }
 0x49c   :  { %v7055_v23 = vpop.eup %7054  ;;  %3178 = vmatpush.msra.mxu3 %v9705_v26  ;;  %3110 = vmatpush.msra.mxu0 %v9709_v30  ;;  %v2587_v10 = vadd.f32 %v2555_v50, %v13588_v29  ;;  %v2688_v1 = vsel %vm2685_vm12, %v2687_v63, %v2683_v38  ;;  %v2662_v11 = vor.u32 1.1754944e-38, %v2661_v25  ;;  %v13601_v50 = vld [vmem:[#allocation112_spill] sm:$0xff]  ;;  %v13603_v38 = vld [vmem:[#allocation114_spill] sm:$0xff]  ;;  %v13604_v63 = vld [vmem:[#allocation115_spill] sm:$0xff] }
 0x49d   :  { %v9957_v7 = vadd.f32 1.0, %v7055_v23  ;;  %3133 = vmatpush.msra.mxu1 %v9711_v2  ;;  %3156 = vmatpush.msra.mxu2 %v9713_v53  ;;  %v13605_v48 = vld [vmem:[#allocation116_spill] sm:$0xff]  ;;  %v13613_v25 = vld [vmem:[#allocation26_spill] sm:$0xff] }
 0x49e   :  { %v7057_v37 = vpop.eup %7056  ;;  %3179 = vmatpush.msra.mxu3 %v9717_v44  ;;  %3111 = vmatpush.msra.mxu0 %v9721_v4  ;;  %v13606_v29 = vld [vmem:[#allocation92_spill] sm:$0xff] }
 0x49f   :  { %7062 = vrcp.f32 %v9957_v7  ;;  %v7059_v26 = vpop.eup %7058  ;;  %v2613_v30 = vmul.f32 %v7057_v37, %v9916_v22  ;;  %3134 = vmatpush.msra.mxu1 %v9723_v32  ;;  %3157 = vmatpush.msra.mxu2 %v9725_v24  ;;  %v2623_v32 = vand.u32 2147483648, %v9916_v22  ;;  %vm2618_vm5 = vweird.f32 %v7057_v37 }
 0x4a0   :  { %v2651_v53 = vmul.f32 %v7059_v26, %v9920_v27  ;;  %3180 = vmatpush.msra.mxu3 %v9734_v41  ;;  %3112 = vmatpush.msra.mxu0 %v9738_v18  ;;  %7064 = vtanh.f32 %v2587_v10  ;;  %v2621_v41 = vand.u32 2147483647, %v9916_v22  ;;  %vm2656_vm13 = vweird.f32 %v7059_v26  ;;  %vm2619_vm15 = vmor %vm2617_vm11, %vm2618_vm5  ;;  %v13607_v10 = vld [vmem:[#allocation117_spill] sm:$0xff] }
 0x4a1   :  { %v7061_v2 = vpop.eup %7060  ;;  %v2614_v28 = vsub.f32 1.0, %v2613_v30  ;;  %3135 = vmatpush.msra.mxu1 %v9740_v46  ;;  %3158 = vmatpush.msra.mxu2 %v9742_v5  ;;  %v13589_v46 = vld [vmem:[#allocation103_spill] sm:$0xff]  ;;  %v13590_v5 = vld [vmem:[#allocation104_spill] sm:$0xff]  ;;  %v2624_v12 = vor.u32 1.1754944e-38, %v2623_v32  ;;  %vm2657_vm12 = vmor %vm2655_vm8, %vm2656_vm13  ;;  %vm13058_vm13 = vcmp.gt.s32.totalorder %v13606_v29, %v9924_v35  ;;  %v2701_v30 = vand.u32 2147483648, %v9957_v7 }
 0x4a2   :  { %v2713_v44 = vmul.f32 %v7061_v2, %v2688_v1  ;;  %v2652_v4 = vsub.f32 1.0, %v2651_v53  ;;  %3181 = vmatpush.msra.mxu3 %v9746_v55  ;;  %3113 = vmatpush.msra.mxu0 %v9750_v15  ;;  %v2659_v55 = vand.u32 2147483647, %v9920_v27  ;;  %v13609_v53 = vld [vmem:[#allocation44_spill] sm:$0xff]  ;;  %v13610_v1 = vld [vmem:[#allocation42_spill] sm:$0xff]  ;;  %vm2695_vm11 = vweird.f32 %v9957_v7  ;;  %v13614_v32 = vld [vmem:[#allocation25_spill] sm:$0xff] }
 0x4a3   :  { %v2615_v24 = vmul.f32 %v7057_v37, %v2614_v28  ;;  %3136 = vmatpush.msra.mxu1 %v13589_v46  ;;  %3159 = vmatpush.msra.mxu2 %v13590_v5  ;;  %v2699_v28 = vand.u32 2147483647, %v9957_v7  ;;  %v13616_v46 = vld [vmem:[#allocation32_spill] sm:$0xff]  ;;  %v2702_v5 = vor.u32 1.1754944e-38, %v2701_v30  ;;  %v10431_v35 = vld [vmem:[#allocation14 + $0xb8] sm:$0xff] }
 0x4a4   :  { %v9991_v18 = vsel %vm13057_vm0, %v2713_v44, %v9614_v45  ;;  %v2653_v14 = vmul.f32 %v7059_v26, %v2652_v4  ;;  %3182 = vmatpush.msra.mxu3 %v13591_v3  ;;  %3114 = vmatpush.msra.mxu0 %v13592_v54  ;;  %vm2622_vm0 = vcmp.eq.f32.partialorder %v2621_v41, 8.507059e+37  ;;  %vm2660_vm5 = vcmp.eq.f32.partialorder %v2659_v55, 8.507059e+37  ;;  %v13611_v44 = vld [vmem:[#allocation53_spill] sm:$0xff]  ;;  %v13612_v4 = vld [vmem:[#allocation51_spill] sm:$0xff]  ;;  %v13630_v30 = vld [vmem:[#allocation68_spill] sm:$0xff]  ;;  %13676 = vst [vmem:[#allocation37_spill] sm:$0xff] %v10431_v35 }
 0x4a5   :  { %v9995_v59 = vpop.eup %7062  ;;  %2813 = vmatmul.f32.vlgmr.msrb.gmra.mxu0 %v9991_v18  ;;  %2836 = vmatmul.f32.vlgmr.msrb.gmra.mxu1 %v9991_v18  ;;  %v2616_v15 = vadd.f32 %v7057_v37, %v2615_v24  ;;  %v13615_v41 = vld [vmem:[#allocation23_spill] sm:$0xff] }
 0x4a6   :  { %v2691_v62 = vmul.f32 %v9995_v59, %v9957_v7  ;;  %2859 = vmatmul.f32.vlgmr.msrb.gmra.mxu2 %v9991_v18  ;;  %2882 = vmatmul.f32.vlgmr.msrb.gmra.mxu3 %v9991_v18  ;;  %v2654_v16 = vadd.f32 %v7059_v26, %v2653_v14  ;;  %v7065_v43 = vpop.eup %7064 }
 0x4a7   :  { %v2620_v49 = vsel %vm2619_vm15, %v7057_v37, %v2616_v15  ;;  %3137 = vmatpush.msra.mxu1 %v13593_v21  ;;  %3160 = vmatpush.msra.mxu2 %v13594_v20  ;;  %vm2700_vm15 = vcmp.eq.f32.partialorder %v2699_v28, 8.507059e+37  ;;  %v13624_v21 = vld [vmem:[#allocation64_spill] sm:$0xff] }
 0x4a8   :  { %v2692_v13 = vsub.f32 1.0, %v2691_v62  ;;  %v2625_v34 = vsel %vm2622_vm0, %v2624_v12, %v2620_v49  ;;  %v2658_v0 = vsel %vm2657_vm12, %v7059_v26, %v2654_v16  ;;  %3183 = vmatpush.msra.mxu3 %v13595_v39  ;;  %3115 = vmatpush.msra.mxu0 %v13596_v61  ;;  %vm2696_vm0 = vweird.f32 %v9995_v59  ;;  %v13608_v26 = vld [vmem:[#allocation93_spill] sm:$0xff]  ;;  %v13621_v12 = vld [vmem:[#allocation60_spill] sm:$0xff] }
 0x4a9   :  { %v2663_v22 = vsel %vm2660_vm5, %v2662_v11, %v2658_v0  ;;  %v2708_v27 = vmul.f32 %v7065_v43, %v2625_v34  ;;  %3138 = vmatpush.msra.mxu1 %v13597_v57  ;;  %3161 = vmatpush.msra.mxu2 %v13598_v42  ;;  %vm2697_vm8 = vmor %vm2695_vm11, %vm2696_vm0  ;;  %v13620_v62 = vld [vmem:[#allocation61_spill] sm:$0xff]  ;;  %v13627_v42 = vld [vmem:[#allocation63_spill] sm:$0xff] }
 0x4aa   :  { %v2693_v40 = vmul.f32 %v9995_v59, %v2692_v13  ;;  %v2706_v23 = vmul.f32 %v2663_v22, %v13599_v47  ;;  %3184 = vmatpush.msra.mxu3 %v13600_v52  ;;  %3116 = vmatpush.msra.mxu0 %v13601_v50  ;;  %v13622_v16 = vsel %vm8051_vm2, %v13620_v62, %v13621_v12  ;;  %v13623_v13 = vld [vmem:[#allocation66_spill] sm:$0xff]  ;;  %v13626_v57 = vld [vmem:[#allocation65_spill] sm:$0xff] }
 0x4ab   :  { %3139 = vmatpush.msra.mxu1 %v13602_v56  ;;  %3162 = vmatpush.msra.mxu2 %v13603_v38  ;;  %v13625_v20 = vsel %vm8088_vm4, %v13623_v13, %v13624_v21 }
 0x4ac   :  { %v2710_v37 = vadd.f32 %v2708_v27, %v2706_v23  ;;  %3185 = vmatpush.msra.mxu3 %v13604_v63  ;;  %3117 = vmatpush.msra.mxu0 %v13605_v48  ;;  %v2694_v33 = vadd.f32 %v9995_v59, %v2693_v40 }
 0x4ad   :  { %3140 = vmatpush.msra.mxu1 %v13607_v10  ;;  %3163 = vmatpush.msra.mxu2 %v13608_v26  ;;  %v13629_v10 = vld [vmem:[#allocation69_spill] sm:$0xff] }
 0x4ae   :  { %7066 = vtanh.f32 %v2710_v37  ;;  %v10035_v2 = vsel %vm13058_vm13, %v2710_v37, %v13599_v47  ;;  %3186 = vmatpush.msra.mxu3 %v13609_v53  ;;  %3118 = vmatpush.msra.mxu0 %v13610_v1  ;;  %v2698_v24 = vsel %vm2697_vm8, %v9995_v59, %v2694_v33  ;;  %v13617_v59 = vld [vmem:[#allocation38_spill] sm:$0xff]  ;;  %v13628_v47 = vsel %vm8084_vm3, %v13626_v57, %v13627_v42  ;;  %v13631_v53 = vld [vmem:[#allocation67_spill] sm:$0xff] }
 0x4af   :  { %3141 = vmatpush.msra.mxu1 %v13611_v44  ;;  %3164 = vmatpush.msra.mxu2 %v13612_v4  ;;  %v2703_v14 = vsel %vm2700_vm15, %v2702_v5, %v2698_v24  ;;  %v13632_v1 = vsel %vm8051_vm2, %v13630_v30, %v13631_v53 }
 0x4b0   :  { %3187 = vmatpush.msra.mxu3 %v13613_v25  ;;  %3119 = vmatpush.msra.mxu0 %v13614_v32 }
 0x4b1   :  { %3142 = vmatpush.msra.mxu1 %v13615_v41  ;;  %3165 = vmatpush.msra.mxu2 %v13616_v46 }
 0x4b2   :  { %3188 = vmatpush.msra.mxu3 %v9860_v36  ;;  %3120 = vmatpush.msra.mxu0 %v9867_v51  ;;  %v13618_v36 = vld [vmem:[#allocation62_spill] sm:$0xff] }
 0x4b3   :  { %3143 = vmatpush.msra.mxu1 %v9869_v6  ;;  %3166 = vmatpush.msra.mxu2 %v9871_v60 }
 0x4b4   :  { %v7067_v7 = vpop.eup %7066  ;;  %3189 = vmatpush.msra.mxu3 %v9882_v31  ;;  %v10447_v31 = vld [vmem:[#allocation14 + $0x98] sm:$0xff] }
 0x4b5   :  { %v2714_v55 = vmul.f32 %v7067_v7, %v2703_v14  ;;  %13680 = vst [vmem:[#allocation41_spill] sm:$0xff] %v10447_v31 }
 0x4b7   :  { %v10057_v15 = vsel %vm13058_vm13, %v2714_v55, %v13617_v59 }
 0x4b8   :  { %2816 = vmatmul.f32.gmra.mxu0 %v10057_v15  ;;  %2839 = vmatmul.f32.gmra.mxu1 %v10057_v15 }
 0x4b9   :  { %2862 = vmatmul.f32.gmra.mxu2 %v10057_v15  ;;  %2885 = vmatmul.f32.gmra.mxu3 %v10057_v15 }
 0x522   :  { %v2814_v6 = vpop.f32.mrf.mxu0  ;;  %v2837_v60 = vpop.f32.mrf.mxu1 }
 0x523   :  { %v2889_v51 = vadd.f32 %v2814_v6, %v13618_v36  ;;  %v2890_v3 = vadd.f32 %v2837_v60, %v13622_v16 }
 0x525   :  { %v6782_v54 = vmul.f32 -1.442695, %v2889_v51  ;;  %v6784_v11 = vmul.f32 -1.442695, %v2890_v3  ;;  %v13633_v3 = vld [vmem:[#allocation73_spill] sm:$0xff] }
 0x527   :  { %7068 = vpow2.f32 %v6782_v54  ;;  %v13634_v54 = vld [vmem:[#allocation71_spill] sm:$0xff] }
 0x528   :  { %7070 = vpow2.f32 %v6784_v11  ;;  %v13635_v11 = vsel %vm8088_vm4, %v13633_v3, %v13634_v54 }
 0x529   :  { %v2883_v49 = vpop.f32.mrf.mxu3  ;;  %v2860_v27 = vpop.f32.mrf.mxu2 }
 0x52a   :  { %v2892_v43 = vadd.f32 %v2883_v49, %v13625_v20  ;;  %v2891_v23 = vadd.f32 %v2860_v27, %v13628_v47 }
 0x52c   :  { %v6786_v34 = vmul.f32 -1.442695, %v2892_v43 }
 0x52d   :  { %v7069_v0 = vpop.eup %7068 }
 0x52e   :  { %v7071_v39 = vpop.eup %7070  ;;  %v2903_v61 = vadd.f32 1.0, %v7069_v0  ;;  %7072 = vpow2.f32 %v6786_v34 }
 0x52f   :  { %v2941_v22 = vadd.f32 1.0, %v7071_v39 }
 0x530   :  { %7074 = vrcp.f32 %v2903_v61  ;;  %v2914_v25 = vand.u32 2147483647, %v2903_v61  ;;  %v2916_v32 = vand.u32 2147483648, %v2903_v61  ;;  %vm2910_vm11 = vweird.f32 %v2903_v61 }
 0x531   :  { %7076 = vrcp.f32 %v2941_v22  ;;  %v2954_v4 = vand.u32 2147483648, %v2941_v22  ;;  %v2952_v7 = vand.u32 2147483647, %v2941_v22  ;;  %vm2948_vm0 = vweird.f32 %v2941_v22 }
 0x532   :  { %v2917_v60 = vor.u32 1.1754944e-38, %v2916_v32  ;;  %vm2915_vm13 = vcmp.eq.f32.partialorder %v2914_v25, 8.507059e+37 }
 0x533   :  { %v2955_v12 = vor.u32 1.1754944e-38, %v2954_v4  ;;  %vm2953_vm10 = vcmp.eq.f32.partialorder %v2952_v7, 8.507059e+37 }
 0x534   :  { %v7073_v40 = vpop.eup %7072 }
 0x535   :  { %v10079_v52 = vadd.f32 1.0, %v7073_v40  ;;  %v2817_v56 = vpop.f32.mrf.mxu0  ;;  %v2840_v38 = vpop.f32.mrf.mxu1 }
 0x536   :  { %v7075_v50 = vpop.eup %7074  ;;  %v2893_v26 = vadd.f32 %v2817_v56, %v13629_v10  ;;  %v2894_v28 = vadd.f32 %v2840_v38, %v13632_v1  ;;  %v13637_v1 = vld [vmem:[#allocation72_spill] sm:$0xff] }
 0x537   :  { %v7077_v37 = vpop.eup %7076  ;;  %v2906_v63 = vmul.f32 %v7075_v50, %v2903_v61  ;;  %7078 = vrcp.f32 %v10079_v52  ;;  %vm2911_vm12 = vweird.f32 %v7075_v50  ;;  %v2994_v56 = vand.u32 2147483648, %v10079_v52 }
 0x538   :  { %v2944_v48 = vmul.f32 %v7077_v37, %v2941_v22  ;;  %7080 = vtanh.f32 %v2891_v23  ;;  %v6783_v41 = vmul.f32 -1.442695, %v2893_v26  ;;  %v6785_v46 = vmul.f32 -1.442695, %v2894_v28  ;;  %vm2912_vm8 = vmor %vm2910_vm11, %vm2911_vm12  ;;  %v13638_v28 = vld [vmem:[#allocation70_spill] sm:$0xff] }
 0x539   :  { %v2907_v33 = vsub.f32 1.0, %v2906_v63  ;;  %vm2949_vm5 = vweird.f32 %v7077_v37  ;;  %v7562_v23 = vmov 1   ;;  %v2992_v38 = vand.u32 2147483647, %v10079_v52 }
 0x53a   :  { %v2945_v44 = vsub.f32 1.0, %v2944_v48  ;;  %7082 = vpow2.f32 %v6783_v41  ;;  %vm2950_vm15 = vmor %vm2948_vm0, %vm2949_vm5 }
 0x53b   :  { %v2908_v24 = vmul.f32 %v7075_v50, %v2907_v33  ;;  %7084 = vpow2.f32 %v6785_v46  ;;  %v2995_v33 = vor.u32 1.1754944e-38, %v2994_v56  ;;  %vm2993_vm0 = vcmp.eq.f32.partialorder %v2992_v38, 8.507059e+37 }
 0x53c   :  { %v2946_v5 = vmul.f32 %v7077_v37, %v2945_v44  ;;  %v2886_v6 = vpop.f32.mrf.mxu3  ;;  %v2863_v10 = vpop.f32.mrf.mxu2  ;;  %v13639_v44 = vsel %vm8084_vm3, %v13637_v1, %v13638_v28  ;;  %v3431_v1 = vld [vmem:[#allocation12 + $0x1d0] sm:$0xff]  ;;  %v13640_v28 = vld [vmem:[#allocation76_spill] sm:$0xff] }
 0x53d   :  { %v7079_v14 = vpop.eup %7078  ;;  %v2909_v55 = vadd.f32 %v7075_v50, %v2908_v24  ;;  %v2896_v49 = vadd.f32 %v2886_v6, %v13635_v11  ;;  %v2895_v4 = vadd.f32 %v2863_v10, %v13639_v44  ;;  %v3436_v10 = vld [vmem:[#allocation12 + $0x1f8] sm:$0xff] }
 0x53e   :  { %v2947_v36 = vadd.f32 %v7077_v37, %v2946_v5  ;;  %v2984_v51 = vmul.f32 %v7079_v14, %v10079_v52  ;;  %v7081_v62 = vpop.eup %7080  ;;  %vm2989_vm12 = vweird.f32 %v7079_v14  ;;  %3642 = vmatpush.msrb.mxu3 %v3436_v10  ;;  %v3408_v10 = vld [vmem:[#allocation12 + $0x118] sm:$0xff] }
 0x53f   :  { %v2913_v16 = vsel %vm2912_vm8, %v7075_v50, %v2909_v55  ;;  %v6787_v0 = vmul.f32 -1.442695, %v2896_v49  ;;  %v10097_v50 = vsel %vm121_vm1, 6, %v7562_v23 }
 0x540   :  { %v2918_v13 = vsel %vm2915_vm13, %v2917_v60, %v2913_v16  ;;  %v2951_v21 = vsel %vm2950_vm15, %v7077_v37, %v2947_v36  ;;  %v2985_v20 = vsub.f32 1.0, %v2984_v51  ;;  %v7083_v22 = vpop.eup %7082  ;;  %13636 = vst [vmem:[#allocation31_spill] sm:$0xff] %v10097_v50  ;;  %vm13060_vm5 = vcmp.gt.s32.totalorder %v8491_v8, %v10097_v50 }
 0x541   :  { %v2956_v43 = vsel %vm2953_vm10, %v2955_v12, %v2951_v21  ;;  %v3015_v34 = vmul.f32 %v7081_v62, %v2918_v13  ;;  %7086 = vpow2.f32 %v6787_v0  ;;  %v7085_v27 = vpop.eup %7084  ;;  %v2904_v57 = vadd.f32 1.0, %v7083_v22 }
 0x542   :  { %v3013_v39 = vmul.f32 %v2956_v43, %v9947_v17  ;;  %v2986_v61 = vmul.f32 %v7079_v14, %v2985_v20  ;;  %v2942_v47 = vadd.f32 1.0, %v7085_v27  ;;  %vm2988_vm10 = vweird.f32 %v10079_v52 }
 0x543   :  { %vm2990_vm13 = vmor %vm2988_vm10, %vm2989_vm12  ;;  %v2931_v7 = vand.u32 2147483648, %v2904_v57  ;;  %v2929_v60 = vand.u32 2147483647, %v2904_v57  ;;  %vm2925_vm15 = vweird.f32 %v2904_v57 }
 0x544   :  { %v3017_v40 = vadd.f32 %v3015_v34, %v3013_v39  ;;  %v2987_v42 = vadd.f32 %v7079_v14, %v2986_v61  ;;  %v2969_v55 = vand.u32 2147483648, %v2942_v47  ;;  %v2967_v51 = vand.u32 2147483647, %v2942_v47 }
 0x545   :  { %vm2963_vm12 = vweird.f32 %v2942_v47  ;;  %v2932_v16 = vor.u32 1.1754944e-38, %v2931_v7  ;;  %v3427_v7 = vld [vmem:[#allocation12 + $0x1b0] sm:$0xff] }
 0x546   :  { %7088 = vtanh.f32 %v3017_v40  ;;  %v2991_v63 = vsel %vm2990_vm13, %v7079_v14, %v2987_v42  ;;  %v10108_v48 = vsel %vm13060_vm5, %v3017_v40, %v9947_v17  ;;  %v2970_v11 = vor.u32 1.1754944e-38, %v2969_v55 }
 0x547   :  { %7090 = vrcp.f32 %v2904_v57  ;;  %v7087_v37 = vpop.eup %7086  ;;  %v2996_v52 = vsel %vm2993_vm0, %v2995_v33, %v2991_v63  ;;  %vm2930_vm0 = vcmp.eq.f32.partialorder %v2929_v60, 8.507059e+37  ;;  %v3434_v63 = vld [vmem:[#allocation12 + $0x1e8] sm:$0xff]  ;;  %v3435_v33 = vld [vmem:[#allocation12 + $0x1f0] sm:$0xff]  ;;  %v3421_v60 = vld [vmem:[#allocation12 + $0x180] sm:$0xff] }
 0x548   :  { %7092 = vrcp.f32 %v2942_v47  ;;  %v2982_v26 = vadd.f32 1.0, %v7087_v37  ;;  %3512 = vmatpush.msrb.mxu1 %v3434_v63  ;;  %3577 = vmatpush.msrb.mxu2 %v3435_v33  ;;  %v3407_v63 = vld [vmem:[#allocation12 + $0x110] sm:$0xff] }
 0x54a   :  { %7094 = vrcp.f32 %v2982_v26  ;;  %v3009_v27 = vand.u32 2147483648, %v2982_v26  ;;  %3578 = vmatpush.msrb.mxu2 %v3431_v1 }
 0x54b   :  { %7096 = vtanh.f32 %v2895_v4  ;;  %v13641_v4 = vld [vmem:[#allocation75_spill] sm:$0xff] }
 0x54c   :  { %v7089_v30 = vpop.eup %7088  ;;  %3579 = vmatpush.msrb.mxu2 %v3427_v7  ;;  %v13648_v7 = vld [vmem:[#allocation77_spill] sm:$0xff] }
 0x54d   :  { %v7091_v53 = vpop.eup %7090  ;;  %v3021_v25 = vmul.f32 %v7089_v30, %v2996_v52  ;;  %v3429_v52 = vld [vmem:[#allocation12 + $0x1c0] sm:$0xff] }
 0x54e   :  { %v7093_v32 = vpop.eup %7092  ;;  %v2921_v24 = vmul.f32 %v7091_v53, %v2904_v57  ;;  %vm2926_vm11 = vweird.f32 %v7091_v53  ;;  %v3007_v57 = vand.u32 2147483647, %v2982_v26 }
 0x54f   :  { %v2959_v41 = vmul.f32 %v7093_v32, %v2942_v47  ;;  %v10119_v17 = vsel %vm13060_vm5, %v3021_v25, %v9991_v18  ;;  %vm2964_vm8 = vweird.f32 %v7093_v32  ;;  %vm2927_vm10 = vmor %vm2925_vm15, %vm2926_vm11  ;;  %vm2968_vm5 = vcmp.eq.f32.partialorder %v2967_v51, 8.507059e+37  ;;  %v13642_v25 = vld [vmem:[#allocation74_spill] sm:$0xff]  ;;  %v3423_v51 = vld [vmem:[#allocation12 + $0x190] sm:$0xff] }
 0x550   :  { %v2922_v46 = vsub.f32 1.0, %v2921_v24  ;;  %3121 = vmatmul.f32.vlgmr.msra.gmra.mxu0 %v10119_v17  ;;  %3144 = vmatmul.f32.vlgmr.msra.gmra.mxu1 %v10119_v17  ;;  %v7095_v14 = vpop.eup %7094  ;;  %vm2965_vm13 = vmor %vm2963_vm12, %vm2964_vm8  ;;  %vm13127_vm11 = vcmp.gt.s32.totalorder %v13606_v29, %v10097_v50  ;;  %vm3003_vm8 = vweird.f32 %v2982_v26  ;;  %v3010_v47 = vor.u32 1.1754944e-38, %v3009_v27  ;;  %v3410_v27 = vld [vmem:[#allocation12 + $0x128] sm:$0xff] }
 0x551   :  { %v2960_v5 = vsub.f32 1.0, %v2959_v41  ;;  %3167 = vmatmul.f32.vlgmr.msra.gmra.mxu2 %v10119_v17  ;;  %3190 = vmatmul.f32.vlgmr.msra.gmra.mxu3 %v10119_v17  ;;  %v2999_v62 = vmul.f32 %v7095_v14, %v2982_v26  ;;  %v7097_v13 = vpop.eup %7096  ;;  %vm3004_vm6 = vweird.f32 %v7095_v14  ;;  %vm3008_vm15 = vcmp.eq.f32.partialorder %v3007_v57, 8.507059e+37  ;;  %v3432_v41 = vld [vmem:[#allocation12 + $0x1d8] sm:$0xff]  ;;  %v3411_v57 = vld [vmem:[#allocation12 + $0x130] sm:$0xff]  ;;  %v10429_v50 = vld [vmem:[#allocation14 + $0xa8] sm:$0xff] }
 0x552   :  { %v2923_v6 = vmul.f32 %v7091_v53, %v2922_v46  ;;  %3643 = vmatpush.msrb.mxu3 %v3432_v41  ;;  %v3425_v46 = vld [vmem:[#allocation12 + $0x1a0] sm:$0xff]  ;;  %3580 = vmatpush.msrb.mxu2 %v3423_v51  ;;  %v3394_v41 = vld [vmem:[#allocation12 + $0xa8] sm:$0xff]  ;;  %13675 = vst [vmem:[#allocation27_spill] sm:$0xff] %v10429_v50 }
 0x553   :  { %v2961_v36 = vmul.f32 %v7093_v32, %v2960_v5  ;;  %v3000_v54 = vsub.f32 1.0, %v2999_v62  ;;  %v3426_v5 = vld [vmem:[#allocation12 + $0x1a8] sm:$0xff]  ;;  %v3424_v62 = vld [vmem:[#allocation12 + $0x198] sm:$0xff]  ;;  %v3389_v51 = vld [vmem:[#allocation12 + $0x80] sm:$0xff] }
 0x554   :  { %v2924_v12 = vadd.f32 %v7091_v53, %v2923_v6  ;;  %v3428_v6 = vld [vmem:[#allocation12 + $0x1b8] sm:$0xff] }
 0x555   :  { %v2962_v3 = vadd.f32 %v7093_v32, %v2961_v36  ;;  %v3001_v0 = vmul.f32 %v7095_v14, %v3000_v54  ;;  %3644 = vmatpush.msrb.mxu3 %v3428_v6  ;;  %v3422_v36 = vld [vmem:[#allocation12 + $0x188] sm:$0xff] }
 0x556   :  { %v2928_v49 = vsel %vm2927_vm10, %v7091_v53, %v2924_v12  ;;  %v3430_v53 = vld [vmem:[#allocation12 + $0x1c8] sm:$0xff]  ;;  %v3417_v12 = vld [vmem:[#allocation12 + $0x160] sm:$0xff] }
 0x557   :  { %v2933_v21 = vsel %vm2930_vm0, %v2932_v16, %v2928_v49  ;;  %v2966_v20 = vsel %vm2965_vm13, %v7093_v32, %v2962_v3  ;;  %v3002_v22 = vadd.f32 %v7095_v14, %v3001_v0  ;;  %v13643_v32 = vsel %vm8051_vm2, %v13641_v4, %v13642_v25  ;;  %3513 = vmatpush.msrb.mxu1 %v3430_v53  ;;  %v3418_v16 = vld [vmem:[#allocation12 + $0x168] sm:$0xff]  ;;  %v3419_v3 = vld [vmem:[#allocation12 + $0x170] sm:$0xff]  ;;  %v3404_v53 = vld [vmem:[#allocation12 + $0xf8] sm:$0xff] }
 0x558   :  { %v2971_v43 = vsel %vm2968_vm5, %v2970_v11, %v2966_v20  ;;  %v3016_v34 = vmul.f32 %v7097_v13, %v2933_v21  ;;  %vm3005_vm5 = vmor %vm3003_vm8, %vm3004_vm6  ;;  %3645 = vmatpush.msrb.mxu3 %v3424_v62  ;;  %v3420_v11 = vld [vmem:[#allocation12 + $0x178] sm:$0xff]  ;;  %v13644_v49 = vld [vmem:[#allocation80_spill] sm:$0xff]  ;;  %3581 = vmatpush.msrb.mxu2 %v3419_v3 }
 0x559   :  { %v3014_v39 = vmul.f32 %v2971_v43, %v10035_v2  ;;  %v3006_v42 = vsel %vm3005_vm5, %v7095_v14, %v3002_v22  ;;  %3514 = vmatpush.msrb.mxu1 %v3426_v5  ;;  %v13645_v13 = vld [vmem:[#allocation78_spill] sm:$0xff]  ;;  %v3413_v43 = vld [vmem:[#allocation12 + $0x140] sm:$0xff]  ;;  %v3415_v0 = vld [vmem:[#allocation12 + $0x150] sm:$0xff] }
 0x55a   :  { %v3011_v56 = vsel %vm3008_vm15, %v3010_v47, %v3006_v42  ;;  %v13646_v21 = vsel %vm8088_vm4, %v13644_v49, %v13645_v13  ;;  %3646 = vmatpush.msrb.mxu3 %v3420_v11  ;;  %3582 = vmatpush.msrb.mxu2 %v3415_v0  ;;  %v3409_v22 = vld [vmem:[#allocation12 + $0x120] sm:$0xff]  ;;  %v3412_v47 = vld [vmem:[#allocation12 + $0x138] sm:$0xff]  ;;  %v3399_v4 = vld [vmem:[#allocation12 + $0xd0] sm:$0xff] }
 0x55b   :  { %v3018_v61 = vadd.f32 %v3016_v34, %v3014_v39  ;;  %3515 = vmatpush.msrb.mxu1 %v3422_v36  ;;  %v3414_v34 = vld [vmem:[#allocation12 + $0x148] sm:$0xff]  ;;  %v3416_v39 = vld [vmem:[#allocation12 + $0x158] sm:$0xff]  ;;  %v13647_v5 = vld [vmem:[#allocation79_spill] sm:$0xff] }
 0x55c   :  { %3647 = vmatpush.msrb.mxu3 %v3416_v39  ;;  %3583 = vmatpush.msrb.mxu2 %v3411_v57  ;;  %v3400_v25 = vld [vmem:[#allocation12 + $0xd8] sm:$0xff]  ;;  %v3390_v62 = vld [vmem:[#allocation12 + $0x88] sm:$0xff]  ;;  %v3385_v49 = vld [vmem:[#allocation12 + $0x60] sm:$0xff] }
 0x55d   :  { %7098 = vtanh.f32 %v3018_v61  ;;  %v10132_v40 = vsel %vm13127_vm11, %v3018_v61, %v10035_v2  ;;  %v3433_v2 = vld [vmem:[#allocation12 + $0x1e0] sm:$0xff]  ;;  %3516 = vmatpush.msrb.mxu1 %v3418_v16  ;;  %v3386_v13 = vld [vmem:[#allocation12 + $0x68] sm:$0xff]  ;;  %v3388_v0 = vld [vmem:[#allocation12 + $0x78] sm:$0xff] }
 0x55e   :  { %3447 = vmatpush.msrb.mxu0 %v3433_v2  ;;  %3648 = vmatpush.msrb.mxu3 %v3412_v47  ;;  %v3406_v2 = vld [vmem:[#allocation12 + $0x108] sm:$0xff]  ;;  %v13651_v57 = vld [vmem:[#allocation82_spill] sm:$0xff] }
 0x55f   :  { %3517 = vmatpush.msrb.mxu1 %v3414_v34  ;;  %3584 = vmatpush.msrb.mxu2 %v3407_v63  ;;  %v3387_v34 = vld [vmem:[#allocation12 + $0x70] sm:$0xff] }
 0x560   :  { %3448 = vmatpush.msrb.mxu0 %v3429_v52  ;;  %3649 = vmatpush.msrb.mxu3 %v3408_v10  ;;  %v3403_v52 = vld [vmem:[#allocation12 + $0xf0] sm:$0xff] }
 0x561   :  { %3518 = vmatpush.msrb.mxu1 %v3410_v27  ;;  %3585 = vmatpush.msrb.mxu2 %v3403_v52  ;;  %v3383_v63 = vld [vmem:[#allocation12 + $0x50] sm:$0xff] }
 0x562   :  { %3449 = vmatpush.msrb.mxu0 %v3425_v46  ;;  %3650 = vmatpush.msrb.mxu3 %v3404_v53  ;;  %v3395_v46 = vld [vmem:[#allocation12 + $0xb0] sm:$0xff]  ;;  %v3384_v53 = vld [vmem:[#allocation12 + $0x58] sm:$0xff] }
 0x563   :  { %v7099_v23 = vpop.eup %7098  ;;  %3519 = vmatpush.msrb.mxu1 %v3406_v2  ;;  %3586 = vmatpush.msrb.mxu2 %v3399_v4  ;;  %v3382_v2 = vld [vmem:[#allocation12 + $0x48] sm:$0xff] }
 0x564   :  { %v3022_v38 = vmul.f32 %v7099_v23, %v3011_v56  ;;  %3450 = vmatpush.msrb.mxu0 %v3421_v60  ;;  %3651 = vmatpush.msrb.mxu3 %v3400_v25  ;;  %v3396_v60 = vld [vmem:[#allocation12 + $0xb8] sm:$0xff]  ;;  %v3377_v25 = vld [vmem:[#allocation12 + $0x20] sm:$0xff] }
 0x565   :  { %3587 = vmatpush.msrb.mxu2 %v3395_v46  ;;  %v3379_v46 = vld [vmem:[#allocation12 + $0x30] sm:$0xff] }
 0x566   :  { %v10138_v37 = vsel %vm13127_vm11, %v3022_v38, %v10057_v15  ;;  %3451 = vmatpush.msrb.mxu0 %v3417_v12  ;;  %v3405_v38 = vld [vmem:[#allocation12 + $0x100] sm:$0xff]  ;;  %3652 = vmatpush.msrb.mxu3 %v3396_v60  ;;  %v3391_v12 = vld [vmem:[#allocation12 + $0x90] sm:$0xff]  ;;  %v3374_v60 = vld [vmem:[#allocation12 + $0x8] sm:$0xff] }
 0x567   :  { %3124 = vmatmul.f32.gmra.mxu0 %v10138_v37  ;;  %3147 = vmatmul.f32.gmra.mxu1 %v10138_v37 }
 0x568   :  { %3170 = vmatmul.f32.gmra.mxu2 %v10138_v37  ;;  %3193 = vmatmul.f32.gmra.mxu3 %v10138_v37 }
 0x569   :  { %3452 = vmatpush.msrb.mxu0 %v3413_v43  ;;  %3588 = vmatpush.msrb.mxu2 %v3391_v12 }
 0x56b   :  { %3453 = vmatpush.msrb.mxu0 %v3409_v22  ;;  %v13650_v22 = vld [vmem:[#allocation83_spill] sm:$0xff]  ;;  %3589 = vmatpush.msrb.mxu2 %v3387_v34  ;;  %v10225_v34 = vld [vmem:[#allocation14 + $0x1f8] sm:$0xff] }
 0x56d   :  { %3454 = vmatpush.msrb.mxu0 %v3405_v38  ;;  %v3381_v38 = vld [vmem:[#allocation12 + $0x40] sm:$0xff]  ;;  %3590 = vmatpush.msrb.mxu2 %v3383_v63 }
 0x56f   :  { %3591 = vmatpush.msrb.mxu2 %v3379_v46 }
 0x5cd   :  { %v3122_v26 = vpop.f32.mrf.mxu0  ;;  %v3145_v30 = vpop.f32.mrf.mxu1 }
 0x5ce   :  { %v3197_v44 = vadd.f32 %v3122_v26, %v13640_v28  ;;  %v3198_v24 = vadd.f32 %v3145_v30, %v13643_v32  ;;  %v3401_v26 = vld [vmem:[#allocation12 + $0xe0] sm:$0xff]  ;;  %v3402_v30 = vld [vmem:[#allocation12 + $0xe8] sm:$0xff] }
 0x5cf   :  { %3455 = vmatpush.msrb.mxu0 %v3401_v26  ;;  %3520 = vmatpush.msrb.mxu1 %v3402_v30  ;;  %v3397_v28 = vld [vmem:[#allocation12 + $0xc0] sm:$0xff] }
 0x5d0   :  { %v6788_v14 = vmul.f32 -1.442695, %v3197_v44  ;;  %v6790_v55 = vmul.f32 -1.442695, %v3198_v24  ;;  %v3398_v44 = vld [vmem:[#allocation12 + $0xc8] sm:$0xff]  ;;  %v3393_v24 = vld [vmem:[#allocation12 + $0xa0] sm:$0xff] }
 0x5d1   :  { %3456 = vmatpush.msrb.mxu0 %v3397_v28  ;;  %3521 = vmatpush.msrb.mxu1 %v3398_v44  ;;  %v10259_v28 = vld [vmem:[#allocation14 + $0x1d8] sm:$0xff] }
 0x5d2   :  { %7100 = vpow2.f32 %v6788_v14  ;;  %v13649_v14 = vsel %vm8084_vm3, %v13647_v5, %v13648_v7  ;;  %v3373_v5 = vld [vmem:[#allocation12] sm:$0xff] }
 0x5d3   :  { %7102 = vpow2.f32 %v6790_v55  ;;  %3457 = vmatpush.msrb.mxu0 %v3393_v24  ;;  %3522 = vmatpush.msrb.mxu1 %v3394_v41 }
 0x5d4   :  { %v3191_v54 = vpop.f32.mrf.mxu3  ;;  %v3168_v1 = vpop.f32.mrf.mxu2 }
 0x5d5   :  { %v3200_v20 = vadd.f32 %v3191_v54, %v13646_v21  ;;  %v3199_v55 = vadd.f32 %v3168_v1, %v13649_v14  ;;  %3458 = vmatpush.msrb.mxu0 %v3389_v51  ;;  %3523 = vmatpush.msrb.mxu1 %v3390_v62  ;;  %v3392_v54 = vld [vmem:[#allocation12 + $0x98] sm:$0xff]  ;;  %v3375_v51 = vld [vmem:[#allocation12 + $0x10] sm:$0xff] }
 0x5d6   :  { %3653 = vmatpush.msrb.mxu3 %v3392_v54  ;;  %v3376_v62 = vld [vmem:[#allocation12 + $0x18] sm:$0xff]  ;;  %3592 = vmatpush.msrb.mxu2 %v3375_v51 }
 0x5d7   :  { %v6792_v61 = vmul.f32 -1.442695, %v3200_v20  ;;  %3459 = vmatpush.msrb.mxu0 %v3385_v49  ;;  %3524 = vmatpush.msrb.mxu1 %v3386_v13  ;;  %v10218_v49 = vld [vmem:[#allocation14 + $0x1e0] sm:$0xff]  ;;  %v10220_v13 = vld [vmem:[#allocation14 + $0x1e8] sm:$0xff] }
 0x5d8   :  { %v7101_v42 = vpop.eup %7100  ;;  %3654 = vmatpush.msrb.mxu3 %v3388_v0 }
 0x5d9   :  { %v7103_v23 = vpop.eup %7102  ;;  %v10155_v56 = vadd.f32 1.0, %v7101_v42  ;;  %7104 = vpow2.f32 %v6792_v61  ;;  %v13652_v42 = vld [vmem:[#allocation81_spill] sm:$0xff]  ;;  %3460 = vmatpush.msrb.mxu0 %v3381_v38  ;;  %3525 = vmatpush.msrb.mxu1 %v3382_v2 }
 0x5da   :  { %v10157_v33 = vadd.f32 1.0, %v7103_v23  ;;  %v13653_v47 = vsel %vm8051_vm2, %v13651_v57, %v13652_v42  ;;  %3655 = vmatpush.msrb.mxu3 %v3384_v53  ;;  %v10255_v53 = vld [vmem:[#allocation14 + $0x1c0] sm:$0xff] }
 0x5db   :  { %7106 = vrcp.f32 %v10155_v56  ;;  %vm3218_vm6 = vweird.f32 %v10155_v56  ;;  %v3224_v61 = vand.u32 2147483648, %v10155_v56  ;;  %v3222_v30 = vand.u32 2147483647, %v10155_v56  ;;  %3461 = vmatpush.msrb.mxu0 %v3377_v25 }
 0x5dc   :  { %7108 = vrcp.f32 %v10157_v33  ;;  %v3262_v10 = vand.u32 2147483648, %v10157_v33  ;;  %v3260_v52 = vand.u32 2147483647, %v10157_v33  ;;  %vm3256_vm0 = vweird.f32 %v10157_v33 }
 0x5dd   :  { %v3225_v7 = vor.u32 1.1754944e-38, %v3224_v61  ;;  %vm3223_vm5 = vcmp.eq.f32.partialorder %v3222_v30, 8.507059e+37  ;;  %3462 = vmatpush.msrb.mxu0 %v3373_v5  ;;  %v13659_v61 = vld [vmem:[#allocation85_spill] sm:$0xff]  ;;  %v13664_v5 = vld [vmem:[#allocation84_spill] sm:$0xff] }
 0x5de   :  { %v3263_v54 = vor.u32 1.1754944e-38, %v3262_v10  ;;  %vm3261_vm15 = vcmp.eq.f32.partialorder %v3260_v52, 8.507059e+37 }
 0x5df   :  { %v7105_v32 = vpop.eup %7104  ;;  %4099 = vmatpush.msra.mxu0 %v10218_v49 }
 0x5e0   :  { %v10166_v6 = vadd.f32 1.0, %v7105_v32  ;;  %v3378_v32 = vld [vmem:[#allocation12 + $0x28] sm:$0xff] }
 0x5e1   :  { %v10168_v36 = vpop.eup %7106  ;;  %3526 = vmatpush.msrb.mxu1 %v3378_v32  ;;  %4100 = vmatpush.msra.mxu0 %v10255_v53 }
 0x5e2   :  { %v10170_v16 = vpop.eup %7108  ;;  %v3214_v3 = vmul.f32 %v10168_v36, %v10155_v56  ;;  %7110 = vrcp.f32 %v10166_v6  ;;  %vm3219_vm12 = vweird.f32 %v10168_v36  ;;  %v3380_v56 = vld [vmem:[#allocation12 + $0x38] sm:$0xff] }
 0x5e3   :  { %v3252_v11 = vmul.f32 %v10170_v16, %v10157_v33  ;;  %7112 = vtanh.f32 %v3199_v55  ;;  %vm3257_vm10 = vweird.f32 %v10170_v16  ;;  %vm10196_vm13 = vmor %vm3218_vm6, %vm3219_vm12  ;;  %3656 = vmatpush.msrb.mxu3 %v3380_v56  ;;  %3527 = vmatpush.msrb.mxu1 %v3374_v60  ;;  %vm3296_vm12 = vweird.f32 %v10166_v6  ;;  %v13663_v56 = vld [vmem:[#allocation86_spill] sm:$0xff] }
 0x5e4   :  { %v3215_v21 = vsub.f32 1.0, %v3214_v3  ;;  %v3125_v20 = vpop.f32.mrf.mxu0  ;;  %v3148_v43 = vpop.f32.mrf.mxu1  ;;  %vm10211_vm8 = vmor %vm3256_vm0, %vm3257_vm10 }
 0x5e5   :  { %v3253_v39 = vsub.f32 1.0, %v3252_v11  ;;  %v3201_v27 = vadd.f32 %v3125_v20, %v13650_v22  ;;  %v3202_v23 = vadd.f32 %v3148_v43, %v13653_v47  ;;  %3657 = vmatpush.msrb.mxu3 %v3376_v62  ;;  %4122 = vmatpush.msra.mxu1 %v10220_v13 }
 0x5e6   :  { %v3216_v26 = vmul.f32 %v10168_v36, %v3215_v21 }
 0x5e7   :  { %v3254_v1 = vmul.f32 %v10170_v16, %v3253_v39  ;;  %v6789_v44 = vmul.f32 -1.442695, %v3201_v27  ;;  %v6791_v4 = vmul.f32 -1.442695, %v3202_v23  ;;  %v13658_v39 = vld [vmem:[#allocation87_spill] sm:$0xff]  ;;  %4168 = vmatpush.msra.mxu3 %v10225_v34 }
 0x5e8   :  { %v10200_v24 = vpop.eup %7110  ;;  %v3217_v41 = vadd.f32 %v10168_v36, %v3216_v26  ;;  %v13660_v22 = vsel %vm8088_vm4, %v13658_v39, %v13659_v61  ;;  %v3300_v26 = vand.u32 2147483647, %v10166_v6 }
 0x5e9   :  { %v3255_v14 = vadd.f32 %v10170_v16, %v3254_v1  ;;  %v3292_v55 = vmul.f32 %v10200_v24, %v10166_v6  ;;  %7114 = vpow2.f32 %v6789_v44  ;;  %v7113_v12 = vpop.eup %7112  ;;  %vm3297_vm6 = vweird.f32 %v10200_v24  ;;  %v10257_v1 = vld [vmem:[#allocation14 + $0x1c8] sm:$0xff]  ;;  %4169 = vmatpush.msra.mxu3 %v10259_v28 }
 0x5ea   :  { %v3221_v11 = vsel %vm10196_vm13, %v10168_v36, %v3217_v41  ;;  %7116 = vpow2.f32 %v6791_v4  ;;  %vm10248_vm10 = vmor %vm3296_vm12, %vm3297_vm6  ;;  %4123 = vmatpush.msra.mxu1 %v10257_v1  ;;  %vm3301_vm13 = vcmp.eq.f32.partialorder %v3300_v26, 8.507059e+37 }
 0x5eb   :  { %v3226_v21 = vsel %vm3223_vm5, %v3225_v7, %v3221_v11  ;;  %v3259_v33 = vsel %vm10211_vm8, %v10170_v16, %v3255_v14  ;;  %v3293_v20 = vsub.f32 1.0, %v3292_v55  ;;  %v3194_v43 = vpop.f32.mrf.mxu3  ;;  %v3171_v4 = vpop.f32.mrf.mxu2  ;;  %v13665_v7 = vsel %vm8084_vm3, %v13663_v56, %v13664_v5  ;;  %v13668_v11 = vld [vmem:[#allocation95_spill] sm:$0xff]  ;;  %v10310_v56 = vld [vmem:[#allocation14 + $0x188] sm:$0xff]  ;;  %v10312_v5 = vld [vmem:[#allocation14 + $0x198] sm:$0xff] }
 0x5ec   :  { %v3264_v36 = vsel %vm3261_vm15, %v3263_v54, %v3259_v33  ;;  %v3323_v0 = vmul.f32 %v7113_v12, %v3226_v21  ;;  %v3204_v27 = vadd.f32 %v3194_v43, %v13660_v22  ;;  %v3203_v14 = vadd.f32 %v3171_v4, %v13665_v7  ;;  %v13666_v12 = vld [vmem:[#allocation88_spill] sm:$0xff]  ;;  %v10288_v43 = vld [vmem:[#allocation14 + $0x1a0] sm:$0xff] }
 0x5ed   :  { %v3321_v57 = vmul.f32 %v3264_v36, %v10108_v48  ;;  %v3294_v16 = vmul.f32 %v10200_v24, %v3293_v20  ;;  %v3302_v48 = vand.u32 2147483648, %v10166_v6  ;;  %v10263_v6 = vld [vmem:[#allocation14 + $0x1f0] sm:$0xff]  ;;  %vm13667_vm0 = vcmp.gt.s32.totalorder %v8491_v8, %v13666_v12  ;;  %v10290_v36 = vld [vmem:[#allocation14 + $0x1a8] sm:$0xff]  ;;  %4101 = vmatpush.msra.mxu0 %v10288_v43  ;;  %v13677_v8 = vld [vmem:[#allocation35_spill] sm:$0xff] }
 0x5ee   :  { %v6793_v42 = vmul.f32 -1.442695, %v3204_v27  ;;  %4145 = vmatpush.msra.mxu2 %v10263_v6  ;;  %v10296_v27 = vld [vmem:[#allocation14 + $0x1d0] sm:$0xff]  ;;  %4124 = vmatpush.msra.mxu1 %v10290_v36 }
 0x5ef   :  { %v7115_v47 = vpop.eup %7114  ;;  %v3325_v23 = vadd.f32 %v3323_v0, %v3321_v57  ;;  %v3295_v63 = vadd.f32 %v10200_v24, %v3294_v16  ;;  %v3303_v44 = vor.u32 1.1754944e-38, %v3302_v48  ;;  %v10292_v0 = vld [vmem:[#allocation14 + $0x1b8] sm:$0xff] }
 0x5f0   :  { %v7117_v38 = vpop.eup %7116  ;;  %v10237_v2 = vadd.f32 1.0, %v7115_v47  ;;  %7118 = vpow2.f32 %v6793_v42  ;;  %4170 = vmatpush.msra.mxu3 %v10292_v0  ;;  %4146 = vmatpush.msra.mxu2 %v10296_v27 }
 0x5f1   :  { %7120 = vtanh.f32 %v3325_v23  ;;  %v10242_v10 = vadd.f32 1.0, %v7117_v38  ;;  %v3299_v52 = vsel %vm10248_vm10, %v10200_v24, %v3295_v63  ;;  %4125 = vmatpush.msra.mxu1 %v10310_v56 }
 0x5f2   :  { %7122 = vrcp.f32 %v10237_v2  ;;  %v3304_v41 = vsel %vm3301_vm13, %v3303_v44, %v3299_v52  ;;  %v3239_v20 = vand.u32 2147483648, %v10237_v2  ;;  %v3237_v22 = vand.u32 2147483647, %v10237_v2  ;;  %4171 = vmatpush.msra.mxu3 %v10312_v5 }
 0x5f3   :  { %7124 = vrcp.f32 %v10242_v10  ;;  %v3277_v39 = vand.u32 2147483648, %v10242_v10  ;;  %v3275_v16 = vand.u32 2147483647, %v10242_v10  ;;  %vm3233_vm15 = vweird.f32 %v10237_v2 }
 0x5f4   :  { %vm3271_vm6 = vweird.f32 %v10242_v10  ;;  %v3240_v23 = vor.u32 1.1754944e-38, %v3239_v20  ;;  %vm3238_vm13 = vcmp.eq.f32.partialorder %v3237_v22, 8.507059e+37  ;;  %v13669_v22 = vld [vmem:[#allocation97_spill] sm:$0xff] }
 0x5f5   :  { %v3278_v48 = vor.u32 1.1754944e-38, %v3277_v39 }
 0x5f6   :  { %v7119_v25 = vpop.eup %7118 }
 0x5f7   :  { %v7121_v32 = vpop.eup %7120  ;;  %v10267_v24 = vadd.f32 1.0, %v7119_v25 }
 0x5f8   :  { %v7123_v46 = vpop.eup %7122  ;;  %v3329_v55 = vmul.f32 %v7121_v32, %v3304_v41  ;;  %v10308_v41 = vld [vmem:[#allocation14 + $0x180] sm:$0xff] }
 0x5f9   :  { %v7125_v60 = vpop.eup %7124  ;;  %v3229_v51 = vmul.f32 %v7123_v46, %v10237_v2  ;;  %7126 = vrcp.f32 %v10267_v24  ;;  %vm3234_vm8 = vweird.f32 %v7123_v46  ;;  %4102 = vmatpush.msra.mxu0 %v10308_v41 }
 0x5fa   :  { %v3267_v62 = vmul.f32 %v7125_v60, %v10242_v10  ;;  %v10281_v3 = vsel %vm13667_vm0, %v3329_v55, %v10119_v17  ;;  %7128 = vtanh.f32 %v3203_v14  ;;  %vm3272_vm5 = vweird.f32 %v7125_v60  ;;  %vm3235_vm12 = vmor %vm3233_vm15, %vm3234_vm8 }
 0x5fb   :  { %v3230_v54 = vsub.f32 1.0, %v3229_v51  ;;  %v3345_v21 = vsel %vm121_vm1, %v13668_v11, %v10281_v3  ;;  %vm3273_vm10 = vmor %vm3271_vm6, %vm3272_vm5  ;;  %vm3276_vm0 = vcmp.eq.f32.partialorder %v3275_v16, 8.507059e+37  ;;  %vm3311_vm5 = vweird.f32 %v10267_v24  ;;  %v10347_v16 = vld [vmem:[#allocation14 + $0x140] sm:$0xff] }
 0x5fc   :  { %v3268_v33 = vsub.f32 1.0, %v3267_v62  ;;  %3463 = vmatmul.f32.vlgmr.msrb.gmra.mxu0 %v3345_v21  ;;  %3528 = vmatmul.f32.vlgmr.msrb.gmra.mxu1 %v3345_v21  ;;  %v3315_v55 = vand.u32 2147483647, %v10267_v24  ;;  %v10323_v62 = vld [vmem:[#allocation14 + $0x160] sm:$0xff] }
 0x5fd   :  { %v3231_v61 = vmul.f32 %v7123_v46, %v3230_v54  ;;  %3593 = vmatmul.f32.vlgmr.msrb.gmra.mxu2 %v3345_v21  ;;  %3658 = vmatmul.f32.vlgmr.msrb.gmra.mxu3 %v3345_v21  ;;  %v10325_v54 = vld [vmem:[#allocation14 + $0x168] sm:$0xff]  ;;  %v10327_v21 = vld [vmem:[#allocation14 + $0x178] sm:$0xff] }
 0x5fe   :  { %v3269_v57 = vmul.f32 %v7125_v60, %v3268_v33  ;;  %vm3316_vm6 = vcmp.eq.f32.partialorder %v3315_v55, 8.507059e+37  ;;  %4103 = vmatpush.msra.mxu0 %v10323_v62  ;;  %4126 = vmatpush.msra.mxu1 %v10325_v54  ;;  %v10331_v33 = vld [vmem:[#allocation14 + $0x190] sm:$0xff]  ;;  %v10397_v55 = vld [vmem:[#allocation14 + $0xe8] sm:$0xff] }
 0x5ff   :  { %v7127_v42 = vpop.eup %7126  ;;  %v3232_v47 = vadd.f32 %v7123_v46, %v3231_v61  ;;  %4172 = vmatpush.msra.mxu3 %v10327_v21 }
 0x600   :  { %v3270_v38 = vadd.f32 %v7125_v60, %v3269_v57  ;;  %v3307_v63 = vmul.f32 %v7127_v42, %v10267_v24  ;;  %v7129_v30 = vpop.eup %7128  ;;  %vm3312_vm8 = vweird.f32 %v7127_v42  ;;  %4104 = vmatpush.msra.mxu0 %v10347_v16 }
 0x601   :  { %v3236_v26 = vsel %vm3235_vm12, %v7123_v46, %v3232_v47  ;;  %v10316_v46 = vld [vmem:[#allocation14 + $0x1b0] sm:$0xff]  ;;  %vm3313_vm15 = vmor %vm3311_vm5, %vm3312_vm8  ;;  %vm13124_vm12 = vcmp.gt.s32.totalorder %v13606_v29, %v13666_v12  ;;  %v10351_v47 = vld [vmem:[#allocation14 + $0x158] sm:$0xff] }
 0x602   :  { %v3241_v52 = vsel %vm3238_vm13, %v3240_v23, %v3236_v26  ;;  %v3274_v44 = vsel %vm3273_vm10, %v7125_v60, %v3270_v38  ;;  %v3308_v2 = vsub.f32 1.0, %v3307_v63  ;;  %4147 = vmatpush.msra.mxu2 %v10316_v46  ;;  %v10355_v23 = vld [vmem:[#allocation14 + $0x170] sm:$0xff]  ;;  %4173 = vmatpush.msra.mxu3 %v10351_v47  ;;  %v13670_v38 = vld [vmem:[#allocation96_spill] sm:$0xff]  ;;  %v10427_v12 = vld [vmem:[#allocation14 + $0xa0] sm:$0xff] }
 0x603   :  { %v3279_v4 = vsel %vm3276_vm0, %v3278_v48, %v3274_v44  ;;  %v3324_v25 = vmul.f32 %v7129_v30, %v3241_v52  ;;  %v3351_v63 = vsel %vm121_vm1, %v13670_v38, %v10119_v17  ;;  %v10363_v48 = vld [vmem:[#allocation14 + $0x120] sm:$0xff]  ;;  %v10365_v26 = vld [vmem:[#allocation14 + $0x128] sm:$0xff]  ;;  %v10367_v30 = vld [vmem:[#allocation14 + $0x138] sm:$0xff] }
 0x604   :  { %v3322_v32 = vmul.f32 %v3279_v4, %v10132_v40  ;;  %v3309_v10 = vmul.f32 %v7127_v42, %v3308_v2  ;;  %v3317_v40 = vand.u32 2147483648, %v10267_v24  ;;  %4148 = vmatpush.msra.mxu2 %v10331_v33  ;;  %4105 = vmatpush.msra.mxu0 %v10363_v48  ;;  %v10371_v52 = vld [vmem:[#allocation14 + $0x150] sm:$0xff]  ;;  %v13671_v44 = vld [vmem:[#allocation98_spill] sm:$0xff]  ;;  %v10379_v4 = vld [vmem:[#allocation14 + $0x100] sm:$0xff] }
 0x605   :  { %4174 = vmatpush.msra.mxu3 %v10367_v30  ;;  %v3352_v2 = vsel %vm121_vm1, %v13671_v44, %v10138_v37  ;;  %v10435_v29 = vld [vmem:[#allocation14 + $0xd0] sm:$0xff] }
 0x606   :  { %v3326_v7 = vadd.f32 %v3324_v25, %v3322_v32  ;;  %v3310_v14 = vadd.f32 %v7127_v42, %v3309_v10  ;;  %v3318_v51 = vor.u32 1.1754944e-38, %v3317_v40  ;;  %4149 = vmatpush.msra.mxu2 %v10355_v23  ;;  %v10381_v25 = vld [vmem:[#allocation14 + $0x108] sm:$0xff]  ;;  %v10383_v32 = vld [vmem:[#allocation14 + $0x118] sm:$0xff]  ;;  %4106 = vmatpush.msra.mxu0 %v10379_v4  ;;  %v10387_v10 = vld [vmem:[#allocation14 + $0x130] sm:$0xff] }
 0x607   :  { %4175 = vmatpush.msra.mxu3 %v10383_v32  ;;  %v10395_v40 = vld [vmem:[#allocation14 + $0xe0] sm:$0xff] }
 0x608   :  { %7130 = vtanh.f32 %v3326_v7  ;;  %v3314_v60 = vsel %vm3313_vm15, %v7127_v42, %v3310_v14  ;;  %v10349_v42 = vld [vmem:[#allocation14 + $0x148] sm:$0xff]  ;;  %4150 = vmatpush.msra.mxu2 %v10371_v52  ;;  %4107 = vmatpush.msra.mxu0 %v10395_v40 }
 0x609   :  { %v3319_v39 = vsel %vm3316_vm6, %v3318_v51, %v3314_v60  ;;  %4127 = vmatpush.msra.mxu1 %v10349_v42  ;;  %v13672_v7 = vld [vmem:[#allocation100_spill] sm:$0xff]  ;;  %v10399_v60 = vld [vmem:[#allocation14 + $0xf8] sm:$0xff]  ;;  %v10403_v51 = vld [vmem:[#allocation14 + $0x110] sm:$0xff] }
 0x60a   :  { %4151 = vmatpush.msra.mxu2 %v10387_v10  ;;  %v3357_v14 = vsel %vm121_vm1, %v13672_v7, %v9991_v18  ;;  %4176 = vmatpush.msra.mxu3 %v10399_v60 }
 0x60b   :  { %4128 = vmatpush.msra.mxu1 %v10365_v26 }
 0x60c   :  { %4152 = vmatpush.msra.mxu2 %v10403_v51 }
 0x60d   :  { %4129 = vmatpush.msra.mxu1 %v10381_v25 }
 0x60e   :  { %v7131_v20 = vpop.eup %7130 }
 0x60f   :  { %v3330_v24 = vmul.f32 %v7131_v20, %v3319_v39  ;;  %4130 = vmatpush.msra.mxu1 %v10397_v55  ;;  %v13673_v20 = vld [vmem:[#allocation102_spill] sm:$0xff] }
 0x610   :  { %v3358_v39 = vsel %vm121_vm1, %v13673_v20, %v10057_v15 }
 0x611   :  { %v10341_v61 = vsel %vm13124_vm12, %v3330_v24, %v10138_v37  ;;  %v10411_v24 = vld [vmem:[#allocation14 + $0xc0] sm:$0xff] }
 0x612   :  { %v3346_v57 = vsel %vm121_vm1, %v13669_v22, %v10341_v61  ;;  %4108 = vmatpush.msra.mxu0 %v10411_v24 }
 0x613   :  { %3466 = vmatmul.f32.gmra.mxu0 %v3346_v57  ;;  %3531 = vmatmul.f32.gmra.mxu1 %v3346_v57 }
 0x614   :  { %3596 = vmatmul.f32.gmra.mxu2 %v3346_v57  ;;  %3661 = vmatmul.f32.gmra.mxu3 %v3346_v57  ;;  %v10413_v57 = vld [vmem:[#allocation14 + $0xc8] sm:$0xff] }
 0x615   :  { %4131 = vmatpush.msra.mxu1 %v10413_v57  ;;  %4109 = vmatpush.msra.mxu0 %v10427_v12 }
 0x617   :  { %4132 = vmatpush.msra.mxu1 %v10429_v50  ;;  %4110 = vmatpush.msra.mxu0 %v10443_v9  ;;  %v10459_v50 = vld [vmem:[#allocation14 + $0x60] sm:$0xff]  ;;  %v10461_v9 = vld [vmem:[#allocation14 + $0x68] sm:$0xff] }
 0x618   :  { %13681 = vst [vmem:[#allocation39_spill] sm:$0xff] %v10461_v9 }
 0x619   :  { %4133 = vmatpush.msra.mxu1 %v10445_v19  ;;  %v10463_v19 = vld [vmem:[#allocation14 + $0x78] sm:$0xff]  ;;  %4111 = vmatpush.msra.mxu0 %v10459_v50 }
 0x61a   :  { %13682 = vst [vmem:[#allocation46_spill] sm:$0xff] %v10463_v19 }
 0x61b   :  { %3469 = vmatmul.f32.gmra.mxu0 %v3351_v63  ;;  %3534 = vmatmul.f32.gmra.mxu1 %v3351_v63 }
 0x61c   :  { %3599 = vmatmul.f32.gmra.mxu2 %v3351_v63  ;;  %3664 = vmatmul.f32.gmra.mxu3 %v3351_v63  ;;  %v10415_v63 = vld [vmem:[#allocation14 + $0xd8] sm:$0xff] }
 0x61d   :  { %4177 = vmatpush.msra.mxu3 %v10415_v63  ;;  %4134 = vmatpush.msra.mxu1 %v10461_v9  ;;  %v10479_v9 = vld [vmem:[#allocation14 + $0x58] sm:$0xff] }
 0x61e   :  { %13684 = vst [vmem:[#allocation43_spill] sm:$0xff] %v10479_v9 }
 0x61f   :  { %4178 = vmatpush.msra.mxu3 %v10431_v35  ;;  %v10451_v35 = vld [vmem:[#allocation14 + $0xb0] sm:$0xff] }
 0x621   :  { %4179 = vmatpush.msra.mxu3 %v10447_v31  ;;  %v10467_v31 = vld [vmem:[#allocation14 + $0x90] sm:$0xff] }
 0x623   :  { %3472 = vmatmul.f32.gmra.mxu0 %v3352_v2  ;;  %3537 = vmatmul.f32.gmra.mxu1 %v3352_v2 }
 0x624   :  { %3602 = vmatmul.f32.gmra.mxu2 %v3352_v2  ;;  %3667 = vmatmul.f32.gmra.mxu3 %v3352_v2  ;;  %v10419_v2 = vld [vmem:[#allocation14 + $0xf0] sm:$0xff] }
 0x625   :  { %4153 = vmatpush.msra.mxu2 %v10419_v2  ;;  %4180 = vmatpush.msra.mxu3 %v10463_v19  ;;  %v10483_v19 = vld [vmem:[#allocation14 + $0x70] sm:$0xff] }
 0x627   :  { %4154 = vmatpush.msra.mxu2 %v10435_v29  ;;  %4181 = vmatpush.msra.mxu3 %v10479_v9  ;;  %v10499_v9 = vld [vmem:[#allocation14 + $0x50] sm:$0xff] }
 0x629   :  { %4155 = vmatpush.msra.mxu2 %v10451_v35 }
 0x62b   :  { %3475 = vmatmul.f32.gmra.mxu0 %v3357_v14  ;;  %3540 = vmatmul.f32.gmra.mxu1 %v3357_v14 }
 0x62c   :  { %3605 = vmatmul.f32.gmra.mxu2 %v3357_v14  ;;  %3670 = vmatmul.f32.gmra.mxu3 %v3357_v14  ;;  %v13674_v14 = vld [vmem:[#allocation22_spill] sm:$0xff] }
 0x62d   :  { %4156 = vmatpush.msra.mxu2 %v10467_v31 }
 0x62f   :  { %4157 = vmatpush.msra.mxu2 %v10483_v19 }
 0x631   :  { %4158 = vmatpush.msra.mxu2 %v10499_v9 }
 0x633   :  { %3478 = vmatmul.f32.gmra.mxu0 %v3358_v39  ;;  %3543 = vmatmul.f32.gmra.mxu1 %v3358_v39 }
 0x634   :  { %3608 = vmatmul.f32.gmra.mxu2 %v3358_v39  ;;  %3673 = vmatmul.f32.gmra.mxu3 %v3358_v39  ;;  %v3363_v39 = vsel %vm121_vm1, %v13674_v14, %v9614_v45 }
 0x63b   :  { %3481 = vmatmul.f32.gmra.mxu0 %v3363_v39  ;;  %3546 = vmatmul.f32.gmra.mxu1 %v3363_v39 }
 0x63c   :  { %3611 = vmatmul.f32.gmra.mxu2 %v3363_v39  ;;  %3676 = vmatmul.f32.gmra.mxu3 %v3363_v39  ;;  %v3364_v39 = vsel %vm121_vm1, %v13677_v8, %v13617_v59 }
 0x643   :  { %3484 = vmatmul.f32.gmra.mxu0 %v3364_v39  ;;  %3549 = vmatmul.f32.gmra.mxu1 %v3364_v39 }
 0x644   :  { %3614 = vmatmul.f32.gmra.mxu2 %v3364_v39  ;;  %3679 = vmatmul.f32.gmra.mxu3 %v3364_v39  ;;  %v3365_v39 = vsel %vm121_vm1, %v9614_v45, %v13674_v14  ;;  %v3366_v45 = vsel %vm121_vm1, %v13617_v59, %v13677_v8  ;;  %v10475_v14 = vld [vmem:[#allocation14 + $0x40] sm:$0xff]  ;;  %v3367_v8 = vsel %vm121_vm1, %v9991_v18, %v13672_v7 }
 0x645   :  { %4112 = vmatpush.msra.mxu0 %v10475_v14  ;;  %v10491_v59 = vld [vmem:[#allocation14 + $0x20] sm:$0xff]  ;;  %v3368_v18 = vsel %vm121_vm1, %v10057_v15, %v13673_v20  ;;  %v3369_v15 = vsel %vm121_vm1, %v10119_v17, %v13670_v38  ;;  %v3370_v17 = vsel %vm121_vm1, %v10138_v37, %v13671_v44  ;;  %v3371_v37 = vsel %vm121_vm1, %v10281_v3, %v13668_v11  ;;  %v13694_v3 = vld [vmem:[#allocation46_spill] sm:$0xff] }
 0x646   :  { %13685 = vst [vmem:[#allocation50_spill] sm:$0xff] %v10491_v59  ;;  %v10507_v7 = vld [vmem:[#allocation14] sm:$0xff] }
 0x647   :  { %4113 = vmatpush.msra.mxu0 %v10491_v59  ;;  %v10517_v59 = vld [vmem:[#allocation14 + $0x10] sm:$0xff]  ;;  %v13696_v11 = vld [vmem:[#allocation43_spill] sm:$0xff] }
 0x649   :  { %4114 = vmatpush.msra.mxu0 %v10507_v7 }
 0x64b   :  { %3487 = vmatmul.f32.gmra.mxu0 %v3365_v39  ;;  %3552 = vmatmul.f32.gmra.mxu1 %v3365_v39 }
 0x64c   :  { %3617 = vmatmul.f32.gmra.mxu2 %v3365_v39  ;;  %3682 = vmatmul.f32.gmra.mxu3 %v3365_v39  ;;  %v10477_v39 = vld [vmem:[#allocation14 + $0x48] sm:$0xff] }
 0x64d   :  { %13683 = vst [vmem:[#allocation45_spill] sm:$0xff] %v10477_v39  ;;  %4135 = vmatpush.msra.mxu1 %v10477_v39  ;;  %v10495_v39 = vld [vmem:[#allocation14 + $0x38] sm:$0xff]  ;;  %4403 = vmatpush.msrb.mxu0 %v10218_v49  ;;  %v3372_v49 = vsel %vm121_vm1, %v10341_v61, %v13669_v22 }
 0x64e   :  { %13687 = vst [vmem:[#allocation55_spill] sm:$0xff] %v10495_v39  ;;  %4182 = vmatpush.msra.mxu3 %v10495_v39  ;;  %v10513_v39 = vld [vmem:[#allocation14 + $0x30] sm:$0xff] }
 0x64f   :  { %4159 = vmatpush.msra.mxu2 %v10513_v39  ;;  %4404 = vmatpush.msrb.mxu0 %v10255_v53  ;;  %v13690_v53 = vld [vmem:[#allocation36_spill] sm:$0xff] }
 0x651   :  { %4160 = vmatpush.msra.mxu2 %v10517_v59  ;;  %4405 = vmatpush.msrb.mxu0 %v10288_v43  ;;  %v13697_v43 = vmov 0.0  }
 0x653   :  { %3490 = vmatmul.f32.gmra.mxu0 %v3366_v45  ;;  %3555 = vmatmul.f32.gmra.mxu1 %v3366_v45 }
 0x654   :  { %3620 = vmatmul.f32.gmra.mxu2 %v3366_v45  ;;  %3685 = vmatmul.f32.gmra.mxu3 %v3366_v45  ;;  %v10493_v45 = vld [vmem:[#allocation14 + $0x28] sm:$0xff] }
 0x655   :  { %13686 = vst [vmem:[#allocation48_spill] sm:$0xff] %v10493_v45  ;;  %4136 = vmatpush.msra.mxu1 %v10493_v45  ;;  %v10515_v45 = vld [vmem:[#allocation14 + $0x18] sm:$0xff]  ;;  %4449 = vmatpush.msrb.mxu2 %v10263_v6  ;;  %v13692_v6 = vld [vmem:[#allocation41_spill] sm:$0xff] }
 0x656   :  { %4183 = vmatpush.msra.mxu3 %v10515_v45  ;;  %4406 = vmatpush.msrb.mxu0 %v10308_v41 }
 0x657   :  { %4450 = vmatpush.msrb.mxu2 %v10296_v27 }
 0x658   :  { %4472 = vmatpush.msrb.mxu3 %v10225_v34  ;;  %4407 = vmatpush.msrb.mxu0 %v10323_v62  ;;  %v13689_v34 = vld [vmem:[#allocation37_spill] sm:$0xff] }
 0x659   :  { %4451 = vmatpush.msrb.mxu2 %v10316_v46 }
 0x65a   :  { %4473 = vmatpush.msrb.mxu3 %v10259_v28  ;;  %4408 = vmatpush.msrb.mxu0 %v10347_v16  ;;  %v13691_v28 = vld [vmem:[#allocation34_spill] sm:$0xff] }
 0x65b   :  { %3493 = vmatmul.f32.gmra.mxu0 %v3367_v8  ;;  %3558 = vmatmul.f32.gmra.mxu1 %v3367_v8 }
 0x65c   :  { %3623 = vmatmul.f32.gmra.mxu2 %v3367_v8  ;;  %3688 = vmatmul.f32.gmra.mxu3 %v3367_v8  ;;  %v10509_v8 = vld [vmem:[#allocation14 + $0x8] sm:$0xff] }
 0x65d   :  { %4137 = vmatpush.msra.mxu1 %v10509_v8  ;;  %4474 = vmatpush.msrb.mxu3 %v10292_v0  ;;  %v13700_v0 = vld [vmem:[#allocation55_spill] sm:$0xff] }
 0x65e   :  { %4452 = vmatpush.msrb.mxu2 %v10331_v33  ;;  %4409 = vmatpush.msrb.mxu0 %v10363_v48 }
 0x65f   :  { %4426 = vmatpush.msrb.mxu1 %v10220_v13  ;;  %4475 = vmatpush.msrb.mxu3 %v10312_v5  ;;  %v13688_v13 = vld [vmem:[#allocation27_spill] sm:$0xff] }
 0x660   :  { %4453 = vmatpush.msrb.mxu2 %v10355_v23  ;;  %4410 = vmatpush.msrb.mxu0 %v10379_v4 }
 0x661   :  { %4427 = vmatpush.msrb.mxu1 %v10257_v1  ;;  %4476 = vmatpush.msrb.mxu3 %v10327_v21 }
 0x662   :  { %4454 = vmatpush.msrb.mxu2 %v10371_v52  ;;  %4411 = vmatpush.msrb.mxu0 %v10395_v40  ;;  %v3437_v40 = vld [vmem:[%s12845_s7] sm:$0xf] }
 0x663   :  { %3496 = vmatmul.f32.gmra.mxu0 %v3368_v18  ;;  %3561 = vmatmul.f32.gmra.mxu1 %v3368_v18 }
 0x664   :  { %3626 = vmatmul.f32.gmra.mxu2 %v3368_v18  ;;  %3691 = vmatmul.f32.gmra.mxu3 %v3368_v18 }
 0x665   :  { %4428 = vmatpush.msrb.mxu1 %v10290_v36  ;;  %4477 = vmatpush.msrb.mxu3 %v10351_v47  ;;  %v13699_v36 = vld [vmem:[#allocation48_spill] sm:$0xff] }
 0x666   :  { %4455 = vmatpush.msrb.mxu2 %v10387_v10  ;;  %4412 = vmatpush.msrb.mxu0 %v10411_v24 }
 0x667   :  { %4429 = vmatpush.msrb.mxu1 %v10310_v56  ;;  %4478 = vmatpush.msrb.mxu3 %v10367_v30 }
 0x668   :  { %4456 = vmatpush.msrb.mxu2 %v10403_v51  ;;  %4413 = vmatpush.msrb.mxu0 %v10427_v12  ;;  %v13693_v12 = vld [vmem:[#allocation39_spill] sm:$0xff] }
 0x669   :  { %4430 = vmatpush.msrb.mxu1 %v10325_v54  ;;  %4479 = vmatpush.msrb.mxu3 %v10383_v32 }
 0x66a   :  { %4457 = vmatpush.msrb.mxu2 %v10419_v2  ;;  %4414 = vmatpush.msrb.mxu0 %v13690_v53 }
 0x66b   :  { %3499 = vmatmul.f32.gmra.mxu0 %v3369_v15  ;;  %3564 = vmatmul.f32.gmra.mxu1 %v3369_v15 }
 0x66c   :  { %3629 = vmatmul.f32.gmra.mxu2 %v3369_v15  ;;  %3694 = vmatmul.f32.gmra.mxu3 %v3369_v15 }
 0x66d   :  { %4431 = vmatpush.msrb.mxu1 %v10349_v42  ;;  %4480 = vmatpush.msrb.mxu3 %v10399_v60  ;;  %v10655_v60 = vperm.slane %v3437_v40, 1 }
 0x66e   :  { %4458 = vmatpush.msrb.mxu2 %v10435_v29  ;;  %4415 = vmatpush.msrb.mxu0 %v10459_v50 }
 0x66f   :  { %4432 = vmatpush.msrb.mxu1 %v10365_v26  ;;  %4481 = vmatpush.msrb.mxu3 %v10415_v63 }
 0x670   :  { %4459 = vmatpush.msrb.mxu2 %v10451_v35  ;;  %4416 = vmatpush.msrb.mxu0 %v10475_v14  ;;  %v13695_v35 = vld [vmem:[#allocation45_spill] sm:$0xff] }
 0x671   :  { %4433 = vmatpush.msrb.mxu1 %v10381_v25  ;;  %4482 = vmatpush.msrb.mxu3 %v13689_v34 }
 0x672   :  { %4460 = vmatpush.msrb.mxu2 %v10467_v31 }
 0x673   :  { %3502 = vmatmul.f32.gmra.mxu0 %v3370_v17  ;;  %3567 = vmatmul.f32.gmra.mxu1 %v3370_v17 }
 0x674   :  { %3632 = vmatmul.f32.gmra.mxu2 %v3370_v17  ;;  %3697 = vmatmul.f32.gmra.mxu3 %v3370_v17 }
 0x675   :  { %4434 = vmatpush.msrb.mxu1 %v10397_v55  ;;  %4483 = vmatpush.msrb.mxu3 %v13692_v6  ;;  %v10653_v55 = vperm.slane %v3437_v40, 0 }
 0x676   :  { %4461 = vmatpush.msrb.mxu2 %v10483_v19  ;;  %v13698_v19 = vld [vmem:[#allocation50_spill] sm:$0xff] }
 0x677   :  { %4435 = vmatpush.msrb.mxu1 %v10413_v57  ;;  %4484 = vmatpush.msrb.mxu3 %v13694_v3 }
 0x678   :  { %4462 = vmatpush.msrb.mxu2 %v10499_v9  ;;  %4417 = vmatpush.msrb.mxu0 %v13698_v19 }
 0x679   :  { %4436 = vmatpush.msrb.mxu1 %v13688_v13  ;;  %v10583_v29 = vpop.f32.mrf.mxu0  ;;  %v10585_v1 = vpop.f32.mrf.mxu1  ;;  %4485 = vmatpush.msrb.mxu3 %v13696_v11 }
 0x67a   :  { %4463 = vmatpush.msrb.mxu2 %v10513_v39  ;;  %4418 = vmatpush.msrb.mxu0 %v10507_v7  ;;  %v10679_v7 = vperm.slane %v3437_v40, 2 }
 0x67b   :  { %3505 = vmatmul.f32.gmra.mxu0 %v3371_v37  ;;  %3570 = vmatmul.f32.gmra.mxu1 %v3371_v37 }
 0x67c   :  { %3635 = vmatmul.f32.gmra.mxu2 %v3371_v37  ;;  %3700 = vmatmul.f32.gmra.mxu3 %v3371_v37 }
 0x67d   :  { %4437 = vmatpush.msrb.mxu1 %v13691_v28  ;;  %4486 = vmatpush.msrb.mxu3 %v13700_v0 }
 0x67e   :  { %4464 = vmatpush.msrb.mxu2 %v10517_v59 }
 0x67f   :  { %4438 = vmatpush.msrb.mxu1 %v13693_v12  ;;  %4487 = vmatpush.msrb.mxu3 %v10515_v45 }
 0x680   :  { %v10601_v31 = vpop.f32.mrf.mxu2  ;;  %v10603_v50 = vpop.f32.mrf.mxu3 }
 0x681   :  { %4439 = vmatpush.msrb.mxu1 %v13695_v35 }
 0x683   :  { %3508 = vmatmul.f32.gmra.mxu0 %v3372_v49  ;;  %3573 = vmatmul.f32.gmra.mxu1 %v3372_v49 }
 0x684   :  { %3638 = vmatmul.f32.gmra.mxu2 %v3372_v49  ;;  %3703 = vmatmul.f32.gmra.mxu3 %v3372_v49 }
 0x685   :  { %4440 = vmatpush.msrb.mxu1 %v13699_v36 }
 0x687   :  { %4441 = vmatpush.msrb.mxu1 %v10509_v8  ;;  %v10681_v8 = vperm.slane %v3437_v40, 3 }
 0x68b   :  { %4115 = vmatmul.f32.vlgmr.msra.gmra.mxu0 %v13697_v43  ;;  %4138 = vmatmul.f32.vlgmr.msra.gmra.mxu1 %v13697_v43 }
 0x68c   :  { %4161 = vmatmul.f32.vlgmr.msra.gmra.mxu2 %v13697_v43  ;;  %4184 = vmatmul.f32.vlgmr.msra.gmra.mxu3 %v13697_v43 }
 0x690   :  { %v10611_v27 = vpop.f32.mrf.mxu0  ;;  %v10613_v41 = vpop.f32.mrf.mxu1 }
 0x693   :  { %4118 = vmatmul.f32.gmra.mxu0 %v13697_v43  ;;  %4141 = vmatmul.f32.gmra.mxu1 %v13697_v43 }
 0x694   :  { %4164 = vmatmul.f32.gmra.mxu2 %v13697_v43  ;;  %4187 = vmatmul.f32.gmra.mxu3 %v13697_v43 }
 0x697   :  { %v10622_v9 = vpop.f32.mrf.mxu2  ;;  %v10624_v56 = vpop.f32.mrf.mxu3 }
 0x698   :  { %v10626_v5 = vpop.f32.mrf.mxu0  ;;  %v10628_v46 = vpop.f32.mrf.mxu1 }
 0x69f   :  { %v10630_v62 = vpop.f32.mrf.mxu2  ;;  %v10632_v54 = vpop.f32.mrf.mxu3 }
 0x6a0   :  { %v10634_v21 = vpop.f32.mrf.mxu0  ;;  %v10636_v33 = vpop.f32.mrf.mxu1 }
 0x6a7   :  { %v10638_v61 = vpop.f32.mrf.mxu2  ;;  %v10640_v22 = vpop.f32.mrf.mxu3 }
 0x6a8   :  { %v3476_v16 = vpop.f32.mrf.mxu0  ;;  %v3541_v42 = vpop.f32.mrf.mxu1 }
 0x6af   :  { %v3606_v47 = vpop.f32.mrf.mxu2  ;;  %v3671_v23 = vpop.f32.mrf.mxu3 }
 0x6b0   :  { %v10642_v38 = vpop.f32.mrf.mxu0  ;;  %v10644_v48 = vpop.f32.mrf.mxu1 }
 0x6b1   :  { %v10781_v36 = vadd.f32 %v10642_v38, %v10653_v55 }
 0x6b3   :  { %13731 = vst [vmem:[#allocation44_spill] sm:$0xff] %v10781_v36 }
 0x6b7   :  { %v10646_v26 = vpop.f32.mrf.mxu2  ;;  %v10648_v30 = vpop.f32.mrf.mxu3 }
 0x6b8   :  { %v3482_v52 = vpop.f32.mrf.mxu0  ;;  %v3547_v44 = vpop.f32.mrf.mxu1  ;;  %v10817_v38 = vadd.f32 %v10648_v30, %v10681_v8 }
 0x6b9   :  { %v10658_v63 = vadd.f32 %v3482_v52, %v10653_v55  ;;  %v10661_v2 = vadd.f32 %v3547_v44, %v10655_v60 }
 0x6ba   :  { %13737 = vst [vmem:[#allocation23_spill] sm:$0xff] %v10817_v38  ;;  %v11173_v38 = vld [vmem:[#allocation14 + $0x140] sm:$0xff] }
 0x6bb   :  { %13701 = vst [vmem:[#allocation54_spill] sm:$0xff] %v10658_v63 }
 0x6bc   :  { %13702 = vst [vmem:[#allocation52_spill] sm:$0xff] %v10661_v2 }
 0x6bf   :  { %v3612_v4 = vpop.f32.mrf.mxu2  ;;  %v3677_v25 = vpop.f32.mrf.mxu3 }
 0x6c0   :  { %v3485_v32 = vpop.f32.mrf.mxu0  ;;  %v3550_v10 = vpop.f32.mrf.mxu1  ;;  %v10684_v37 = vadd.f32 %v3612_v4, %v10679_v7  ;;  %v10687_v49 = vadd.f32 %v3677_v25, %v10681_v8 }
 0x6c1   :  { %v10696_v6 = vadd.f32 %v3485_v32, %v10653_v55  ;;  %v10699_v12 = vadd.f32 %v3550_v10, %v10655_v60 }
 0x6c2   :  { %13707 = vst [vmem:[#allocation57_spill] sm:$0xff] %v10684_v37  ;;  %v10945_v37 = vadd.f32 %v10601_v31, %v10679_v7 }
 0x6c3   :  { %13708 = vst [vmem:[#allocation58_spill] sm:$0xff] %v10687_v49 }
 0x6c4   :  { %13711 = vst [vmem:[#allocation104_spill] sm:$0xff] %v10696_v6 }
 0x6c5   :  { %13712 = vst [vmem:[#allocation105_spill] sm:$0xff] %v10699_v12 }
 0x6c6   :  { %13757 = vst [vmem:[#allocation80_spill] sm:$0xff] %v10945_v37 }
 0x6c7   :  { %v3615_v51 = vpop.f32.mrf.mxu2  ;;  %v3680_v20 = vpop.f32.mrf.mxu3 }
 0x6c8   :  { %v3488_v24 = vpop.f32.mrf.mxu0  ;;  %v3553_v57 = vpop.f32.mrf.mxu1  ;;  %v10726_v25 = vadd.f32 %v3615_v51, %v10679_v7  ;;  %v10729_v32 = vadd.f32 %v3680_v20, %v10681_v8 }
 0x6c9   :  { %v10664_v14 = vadd.f32 %v3488_v24, %v10653_v55  ;;  %v10667_v39 = vadd.f32 %v3553_v57, %v10655_v60 }
 0x6ca   :  { %13718 = vst [vmem:[#allocation108_spill] sm:$0xff] %v10726_v25 }
 0x6cb   :  { %13703 = vst [vmem:[#allocation49_spill] sm:$0xff] %v10664_v14  ;;  %v10673_v59 = vsel %vm121_vm1, %v10664_v14, %v10658_v63 }
 0x6cc   :  { %13704 = vst [vmem:[#allocation47_spill] sm:$0xff] %v10667_v39 }
 0x6cd   :  { %13705 = vst [vmem:[#allocation59_spill] sm:$0xff] %v10673_v59 }
 0x6ce   :  { %13719 = vst [vmem:[#allocation101_spill] sm:$0xff] %v10729_v32 }
 0x6cf   :  { %v3618_v15 = vpop.f32.mrf.mxu2  ;;  %v3683_v17 = vpop.f32.mrf.mxu3 }
 0x6d0   :  { %v10690_v13 = vadd.f32 %v3618_v15, %v10679_v7  ;;  %v10693_v34 = vadd.f32 %v3683_v17, %v10681_v8  ;;  %v3491_v53 = vpop.f32.mrf.mxu0  ;;  %v3556_v28 = vpop.f32.mrf.mxu1  ;;  %v10738_v15 = vadd.f32 %v3476_v16, %v10653_v55  ;;  %v10741_v17 = vadd.f32 %v3541_v42, %v10655_v60 }
 0x6d1   :  { %v10702_v3 = vadd.f32 %v3491_v53, %v10653_v55  ;;  %v10705_v35 = vadd.f32 %v3556_v28, %v10655_v60  ;;  %v10785_v28 = vadd.f32 %v10644_v48, %v10655_v60 }
 0x6d2   :  { %13709 = vst [vmem:[#allocation56_spill] sm:$0xff] %v10690_v13 }
 0x6d3   :  { %13710 = vst [vmem:[#allocation103_spill] sm:$0xff] %v10693_v34  ;;  %v10719_v0 = vsel %vm121_vm1, %v10702_v3, %v10696_v6  ;;  %v10961_v34 = vadd.f32 %v10613_v41, %v10655_v60 }
 0x6d4   :  { %13713 = vst [vmem:[#allocation106_spill] sm:$0xff] %v10702_v3  ;;  %v10921_v3 = vadd.f32 %v10585_v1, %v10655_v60  ;;  %v3468_v1 = vadd.f32 %v10611_v27, %v10653_v55 }
 0x6d5   :  { %13714 = vst [vmem:[#allocation90_spill] sm:$0xff] %v10705_v35 }
 0x6d6   :  { %13717 = vst [vmem:[#allocation107_spill] sm:$0xff] %v10719_v0 }
 0x6d7   :  { %v3621_v44 = vpop.f32.mrf.mxu2  ;;  %v3686_v4 = vpop.f32.mrf.mxu3  ;;  %13722 = vst [vmem:[#allocation40_spill] sm:$0xff] %v10738_v15 }
 0x6d8   :  { %v10732_v10 = vadd.f32 %v3621_v44, %v10679_v7  ;;  %v10735_v40 = vadd.f32 %v3686_v4, %v10681_v8  ;;  %v3494_v24 = vpop.f32.mrf.mxu0  ;;  %v3559_v57 = vpop.f32.mrf.mxu1  ;;  %13723 = vst [vmem:[#allocation111_spill] sm:$0xff] %v10741_v17 }
 0x6d9   :  { %v10744_v51 = vadd.f32 %v3494_v24, %v10653_v55  ;;  %v10747_v20 = vadd.f32 %v3559_v57, %v10655_v60  ;;  %v10768_v24 = vadd.f32 %v3606_v47, %v10679_v7  ;;  %v10771_v57 = vadd.f32 %v3671_v23, %v10681_v8  ;;  %13732 = vst [vmem:[#allocation42_spill] sm:$0xff] %v10785_v28 }
 0x6da   :  { %13720 = vst [vmem:[#allocation109_spill] sm:$0xff] %v10732_v10 }
 0x6db   :  { %13721 = vst [vmem:[#allocation110_spill] sm:$0xff] %v10735_v40  ;;  %v10761_v42 = vsel %vm121_vm1, %v10744_v51, %v10738_v15  ;;  %v11227_v15 = vld [vmem:[#allocation14 + $0xc8] sm:$0xff] }
 0x6dc   :  { %13724 = vst [vmem:[#allocation112_spill] sm:$0xff] %v10744_v51  ;;  %v11229_v51 = vld [vmem:[#allocation14 + $0xd0] sm:$0xff] }
 0x6dd   :  { %13725 = vst [vmem:[#allocation113_spill] sm:$0xff] %v10747_v20  ;;  %v11225_v20 = vld [vmem:[#allocation14 + $0xc0] sm:$0xff] }
 0x6de   :  { %13726 = vst [vmem:[#allocation114_spill] sm:$0xff] %v10761_v42 }
 0x6df   :  { %v3624_v44 = vpop.f32.mrf.mxu2  ;;  %v3689_v4 = vpop.f32.mrf.mxu3  ;;  %13727 = vst [vmem:[#allocation115_spill] sm:$0xff] %v10768_v24  ;;  %v11177_v24 = vld [vmem:[#allocation14 + $0x150] sm:$0xff] }
 0x6e0   :  { %13728 = vst [vmem:[#allocation116_spill] sm:$0xff] %v10771_v57  ;;  %v10774_v53 = vadd.f32 %v3624_v44, %v10679_v7  ;;  %v10777_v16 = vadd.f32 %v3689_v4, %v10681_v8  ;;  %v3497_v52 = vpop.f32.mrf.mxu0  ;;  %v3562_v43 = vpop.f32.mrf.mxu1  ;;  %v10813_v44 = vadd.f32 %v10646_v26, %v10679_v7  ;;  %v10831_v26 = vadd.f32 %v10628_v46, %v10655_v60  ;;  %v11213_v57 = vld [vmem:[#allocation14 + $0xf0] sm:$0xff] }
 0x6e1   :  { %v10788_v47 = vadd.f32 %v3497_v52, %v10653_v55  ;;  %v10791_v23 = vadd.f32 %v3562_v43, %v10655_v60  ;;  %v10827_v43 = vadd.f32 %v10626_v5, %v10653_v55  ;;  %v10863_v5 = vadd.f32 %v10632_v54, %v10681_v8  ;;  %13754 = vst [vmem:[#allocation76_spill] sm:$0xff] %v10921_v3 }
 0x6e2   :  { %13729 = vst [vmem:[#allocation117_spill] sm:$0xff] %v10774_v53 }
 0x6e3   :  { %13730 = vst [vmem:[#allocation93_spill] sm:$0xff] %v10777_v16  ;;  %v10805_v48 = vsel %vm121_vm1, %v10788_v47, %v10781_v36 }
 0x6e4   :  { %13733 = vst [vmem:[#allocation53_spill] sm:$0xff] %v10788_v47  ;;  %v11211_v47 = vld [vmem:[#allocation14 + $0xe8] sm:$0xff] }
 0x6e5   :  { %13734 = vst [vmem:[#allocation51_spill] sm:$0xff] %v10791_v23 }
 0x6e6   :  { %13735 = vst [vmem:[#allocation26_spill] sm:$0xff] %v10805_v48 }
 0x6e7   :  { %v3627_v52 = vpop.f32.mrf.mxu2  ;;  %v3692_v4 = vpop.f32.mrf.mxu3  ;;  %13736 = vst [vmem:[#allocation25_spill] sm:$0xff] %v10813_v44 }
 0x6e8   :  { %v10820_v18 = vadd.f32 %v3627_v52, %v10679_v7  ;;  %v10823_v48 = vadd.f32 %v3692_v4, %v10681_v8  ;;  %v3500_v42 = vpop.f32.mrf.mxu0  ;;  %v3565_v0 = vpop.f32.mrf.mxu1  ;;  %13740 = vst [vmem:[#allocation62_spill] sm:$0xff] %v10831_v26  ;;  %v10859_v52 = vadd.f32 %v10630_v62, %v10679_v7  ;;  %v10877_v62 = vadd.f32 %v10636_v33, %v10655_v60 }
 0x6e9   :  { %v10834_v59 = vadd.f32 %v3500_v42, %v10653_v55  ;;  %v10837_v30 = vadd.f32 %v3565_v0, %v10655_v60  ;;  %13744 = vst [vmem:[#allocation64_spill] sm:$0xff] %v10863_v5  ;;  %v10873_v0 = vadd.f32 %v10634_v21, %v10653_v55  ;;  %v10909_v21 = vadd.f32 %v10640_v22, %v10681_v8 }
 0x6ea   :  { %13738 = vst [vmem:[#allocation32_spill] sm:$0xff] %v10820_v18 }
 0x6eb   :  { %13739 = vst [vmem:[#allocation38_spill] sm:$0xff] %v10823_v48  ;;  %v10851_v46 = vsel %vm121_vm1, %v10834_v59, %v10827_v43  ;;  %v11175_v48 = vld [vmem:[#allocation14 + $0x148] sm:$0xff] }
 0x6ec   :  { %13741 = vst [vmem:[#allocation61_spill] sm:$0xff] %v10837_v30 }
 0x6ed   :  { %13742 = vst [vmem:[#allocation60_spill] sm:$0xff] %v10851_v46 }
 0x6ee   :  { %13743 = vst [vmem:[#allocation66_spill] sm:$0xff] %v10859_v52 }
 0x6ef   :  { %v3630_v42 = vpop.f32.mrf.mxu2  ;;  %v3695_v4 = vpop.f32.mrf.mxu3  ;;  %13747 = vst [vmem:[#allocation69_spill] sm:$0xff] %v10877_v62 }
 0x6f0   :  { %v10866_v25 = vadd.f32 %v3630_v42, %v10679_v7  ;;  %v10869_v46 = vadd.f32 %v3695_v4, %v10681_v8  ;;  %v3503_v10 = vpop.f32.mrf.mxu0  ;;  %v3568_v32 = vpop.f32.mrf.mxu1  ;;  %v10905_v42 = vadd.f32 %v10638_v61, %v10679_v7  ;;  %13751 = vst [vmem:[#allocation71_spill] sm:$0xff] %v10909_v21 }
 0x6f1   :  { %v10880_v40 = vadd.f32 %v3503_v10, %v10653_v55  ;;  %v10883_v54 = vadd.f32 %v3568_v32, %v10655_v60  ;;  %v3465_v32 = vadd.f32 %v10583_v29, %v10653_v55  ;;  %13761 = vst [vmem:[#allocation83_spill] sm:$0xff] %v10961_v34 }
 0x6f2   :  { %13745 = vst [vmem:[#allocation65_spill] sm:$0xff] %v10866_v25 }
 0x6f3   :  { %13746 = vst [vmem:[#allocation63_spill] sm:$0xff] %v10869_v46  ;;  %v10897_v33 = vsel %vm121_vm1, %v10880_v40, %v10873_v0 }
 0x6f4   :  { %13748 = vst [vmem:[#allocation68_spill] sm:$0xff] %v10883_v54 }
 0x6f5   :  { %13749 = vst [vmem:[#allocation67_spill] sm:$0xff] %v10897_v33 }
 0x6f6   :  { %13750 = vst [vmem:[#allocation73_spill] sm:$0xff] %v10905_v42 }
 0x6f7   :  { %v3633_v10 = vpop.f32.mrf.mxu2  ;;  %v3698_v4 = vpop.f32.mrf.mxu3  ;;  %13774 = vst [vmem:[#allocation96_spill] sm:$0xff] %v11213_v57 }
 0x6f8   :  { %v10912_v12 = vadd.f32 %v3633_v10, %v10679_v7  ;;  %v10915_v33 = vadd.f32 %v3698_v4, %v10681_v8  ;;  %v3506_v35 = vpop.f32.mrf.mxu0  ;;  %v3571_v6 = vpop.f32.mrf.mxu1  ;;  %v10949_v10 = vadd.f32 %v10603_v50, %v10681_v8  ;;  %13776 = vst [vmem:[#allocation100_spill] sm:$0xff] %v11225_v20 }
 0x6f9   :  { %v3507_v61 = vadd.f32 %v3506_v35, %v10653_v55  ;;  %v10925_v22 = vadd.f32 %v3571_v6, %v10655_v60  ;;  %13777 = vst [vmem:[#allocation102_spill] sm:$0xff] %v11227_v15 }
 0x6fa   :  { %13752 = vst [vmem:[#allocation72_spill] sm:$0xff] %v10912_v12 }
 0x6fb   :  { %13753 = vst [vmem:[#allocation70_spill] sm:$0xff] %v10915_v33  ;;  %v10937_v29 = vsel %vm121_vm1, %v3507_v61, %v3465_v32 }
 0x6fc   :  { %13755 = vst [vmem:[#allocation75_spill] sm:$0xff] %v10925_v22 }
 0x6fd   :  { %13756 = vst [vmem:[#allocation74_spill] sm:$0xff] %v10937_v29 }
 0x6fe   :  { %13758 = vst [vmem:[#allocation78_spill] sm:$0xff] %v10949_v10 }
 0x6ff   :  { %v3636_v6 = vpop.f32.mrf.mxu2  ;;  %v3701_v35 = vpop.f32.mrf.mxu3  ;;  %13778 = vst [vmem:[#allocation22_spill] sm:$0xff] %v11229_v51 }
 0x700   :  { %v10952_v4 = vadd.f32 %v3636_v6, %v10679_v7  ;;  %v10955_v29 = vadd.f32 %v3701_v35, %v10681_v8  ;;  %v3509_v13 = vpop.f32.mrf.mxu0  ;;  %v3574_v49 = vpop.f32.mrf.mxu1 }
 0x701   :  { %v3510_v31 = vadd.f32 %v3509_v13, %v10653_v55  ;;  %v10965_v50 = vadd.f32 %v3574_v49, %v10655_v60  ;;  %v10985_v55 = vadd.f32 %v10622_v9, %v10679_v7  ;;  %v10989_v60 = vadd.f32 %v10624_v56, %v10681_v8 }
 0x702   :  { %13759 = vst [vmem:[#allocation79_spill] sm:$0xff] %v10952_v4  ;;  %v3788_v9 = vsel %vm8051_vm2, %v10921_v3, %v10925_v22 }
 0x703   :  { %13760 = vst [vmem:[#allocation77_spill] sm:$0xff] %v10955_v29  ;;  %v10977_v27 = vsel %vm121_vm1, %v3510_v31, %v3468_v1 }
 0x704   :  { %13762 = vst [vmem:[#allocation82_spill] sm:$0xff] %v10965_v50 }
 0x705   :  { %13763 = vst [vmem:[#allocation81_spill] sm:$0xff] %v10977_v27  ;;  %v3787_v27 = vsel %vm121_vm1, %v3465_v32, %v3507_v61 }
 0x706   :  { %13764 = vst [vmem:[#allocation87_spill] sm:$0xff] %v10985_v55 }
 0x707   :  { %13765 = vst [vmem:[#allocation85_spill] sm:$0xff] %v10989_v60  ;;  %v3639_v49 = vpop.f32.mrf.mxu2  ;;  %v3704_v13 = vpop.f32.mrf.mxu3 }
 0x708   :  { %v10992_v6 = vadd.f32 %v3639_v49, %v10679_v7  ;;  %v10995_v35 = vadd.f32 %v3704_v13, %v10681_v8  ;;  %v4116_v41 = vpop.f32.mrf.mxu0  ;;  %v4139_v2 = vpop.f32.mrf.mxu1  ;;  %v3791_v49 = vsel %vm121_vm1, %v3468_v1, %v3510_v31 }
 0x709   :  { %v4191_v56 = vadd.f32 %v4116_v41, %v3787_v27  ;;  %v4192_v39 = vadd.f32 %v4139_v2, %v3788_v9  ;;  %v3790_v27 = vsel %vm8088_vm4, %v10949_v10, %v10955_v29  ;;  %v3792_v9 = vsel %vm8051_vm2, %v10961_v34, %v10965_v50 }
 0x70a   :  { %13766 = vst [vmem:[#allocation86_spill] sm:$0xff] %v10992_v6 }
 0x70b   :  { %13767 = vst [vmem:[#allocation84_spill] sm:$0xff] %v10995_v35  ;;  %v6794_v32 = vmul.f32 -1.442695, %v4191_v56  ;;  %v6796_v61 = vmul.f32 -1.442695, %v4192_v39 }
 0x70d   :  { %7132 = vpow2.f32 %v6794_v32 }
 0x70e   :  { %7134 = vpow2.f32 %v6796_v61 }
 0x70f   :  { %v4185_v2 = vpop.f32.mrf.mxu3  ;;  %v4162_v1 = vpop.f32.mrf.mxu2 }
 0x710   :  { %v4194_v41 = vadd.f32 %v4185_v2, %v3790_v27  ;;  %v4119_v13 = vpop.f32.mrf.mxu0  ;;  %v4142_v56 = vpop.f32.mrf.mxu1  ;;  %v3789_v2 = vsel %vm8084_vm3, %v10945_v37, %v10952_v4 }
 0x711   :  { %v4195_v39 = vadd.f32 %v4119_v13, %v3791_v49  ;;  %v4196_v32 = vadd.f32 %v4142_v56, %v3792_v9 }
 0x712   :  { %v6798_v61 = vmul.f32 -1.442695, %v4194_v41  ;;  %v4193_v41 = vadd.f32 %v4162_v1, %v3789_v2 }
 0x713   :  { %v7133_v7 = vpop.eup %7132  ;;  %v6795_v8 = vmul.f32 -1.442695, %v4195_v39  ;;  %v6797_v10 = vmul.f32 -1.442695, %v4196_v32 }
 0x714   :  { %v7135_v3 = vpop.eup %7134  ;;  %v4205_v22 = vadd.f32 1.0, %v7133_v7  ;;  %7136 = vpow2.f32 %v6798_v61  ;;  %v3794_v7 = vsel %vm8088_vm4, %v10989_v60, %v10995_v35 }
 0x715   :  { %v4243_v27 = vadd.f32 1.0, %v7135_v3  ;;  %7138 = vpow2.f32 %v6795_v8 }
 0x716   :  { %7140 = vrcp.f32 %v4205_v22  ;;  %v4216_v34 = vand.u32 2147483647, %v4205_v22  ;;  %vm4212_vm0 = vweird.f32 %v4205_v22 }
 0x717   :  { %7142 = vrcp.f32 %v4243_v27  ;;  %v4188_v31 = vpop.f32.mrf.mxu3  ;;  %v4254_v50 = vand.u32 2147483647, %v4243_v27  ;;  %vm4250_vm8 = vweird.f32 %v4243_v27 }
 0x718   :  { %7144 = vpow2.f32 %v6797_v10  ;;  %v4198_v8 = vadd.f32 %v4188_v31, %v3794_v7  ;;  %v4218_v31 = vand.u32 2147483648, %v4205_v22  ;;  %v4165_v7 = vpop.f32.mrf.mxu2  ;;  %vm4217_vm15 = vcmp.eq.f32.partialorder %v4216_v34, 8.507059e+37 }
 0x719   :  { %vm4255_vm12 = vcmp.eq.f32.partialorder %v4254_v50, 8.507059e+37 }
 0x71a   :  { %v7137_v49 = vpop.eup %7136  ;;  %v6799_v60 = vmul.f32 -1.442695, %v4198_v8 }
 0x71b   :  { %v7139_v13 = vpop.eup %7138  ;;  %v11029_v3 = vadd.f32 1.0, %v7137_v49  ;;  %v4256_v49 = vand.u32 2147483648, %v4243_v27 }
 0x71c   :  { %v7141_v9 = vpop.eup %7140  ;;  %v11031_v56 = vadd.f32 1.0, %v7139_v13 }
 0x71d   :  { %v7143_v10 = vpop.eup %7142  ;;  %v4208_v39 = vmul.f32 %v7141_v9, %v4205_v22  ;;  %7146 = vrcp.f32 %v11029_v3  ;;  %vm4213_vm10 = vweird.f32 %v7141_v9  ;;  %v4257_v63 = vor.u32 1.1754944e-38, %v4256_v49 }
 0x71e   :  { %v7145_v32 = vpop.eup %7144  ;;  %v4246_v61 = vmul.f32 %v7143_v10, %v4243_v27  ;;  %7148 = vtanh.f32 %v4193_v41  ;;  %vm4251_vm13 = vweird.f32 %v7143_v10  ;;  %v3793_v41 = vsel %vm8084_vm3, %v10985_v55, %v10992_v6  ;;  %vm4214_vm5 = vmor %vm4212_vm0, %vm4213_vm10 }
 0x71f   :  { %v4209_v1 = vsub.f32 1.0, %v4208_v39  ;;  %7150 = vrcp.f32 %v11031_v56  ;;  %v11035_v2 = vadd.f32 1.0, %v7145_v32  ;;  %v4197_v32 = vadd.f32 %v4165_v7, %v3793_v41  ;;  %vm4252_vm6 = vmor %vm4250_vm8, %vm4251_vm13 }
 0x720   :  { %v4247_v35 = vsub.f32 1.0, %v4246_v61  ;;  %vm4290_vm10 = vweird.f32 %v11029_v3  ;;  %v4296_v34 = vand.u32 2147483648, %v11029_v3 }
 0x721   :  { %v4210_v13 = vmul.f32 %v7141_v9, %v4209_v1  ;;  %7152 = vrcp.f32 %v11035_v2  ;;  %v4219_v1 = vor.u32 1.1754944e-38, %v4218_v31 }
 0x722   :  { %v4248_v37 = vmul.f32 %v7143_v10, %v4247_v35  ;;  %7154 = vpow2.f32 %v6799_v60 }
 0x723   :  { %v11042_v39 = vpop.eup %7146  ;;  %v4211_v8 = vadd.f32 %v7141_v9, %v4210_v13  ;;  %7156 = vtanh.f32 %v4197_v32 }
 0x724   :  { %v7149_v61 = vpop.eup %7148  ;;  %v4249_v4 = vadd.f32 %v7143_v10, %v4248_v37  ;;  %v4286_v35 = vmul.f32 %v11042_v39, %v11029_v3 }
 0x725   :  { %v7151_v29 = vpop.eup %7150  ;;  %v4215_v14 = vsel %vm4214_vm5, %v7141_v9, %v4211_v8  ;;  %v4271_v8 = vand.u32 2147483648, %v11035_v2  ;;  %vm4227_vm5 = vweird.f32 %v11031_v56 }
 0x726   :  { %v4220_v55 = vsel %vm4217_vm15, %v4219_v1, %v4215_v14  ;;  %v4253_v13 = vsel %vm4252_vm6, %v7143_v10, %v4249_v4  ;;  %v4287_v22 = vsub.f32 1.0, %v4286_v35  ;;  %v4223_v60 = vmul.f32 %v7151_v29, %v11031_v56 }
 0x727   :  { %v7153_v7 = vpop.eup %7152  ;;  %v4258_v27 = vsel %vm4255_vm12, %v4257_v63, %v4253_v13  ;;  %v4317_v41 = vmul.f32 %v7149_v61, %v4220_v55  ;;  %v4231_v14 = vand.u32 2147483647, %v11031_v56  ;;  %v4233_v4 = vand.u32 2147483648, %v11031_v56 }
 0x728   :  { %v4315_v37 = vmul.f32 0.0, %v4258_v27  ;;  %v4288_v31 = vmul.f32 %v11042_v39, %v4287_v22  ;;  %v4224_v6 = vsub.f32 1.0, %v4223_v60  ;;  %v4261_v49 = vmul.f32 %v7153_v7, %v11035_v2  ;;  %v7155_v9 = vpop.eup %7154 }
 0x729   :  { %vm4291_vm12 = vweird.f32 %v11042_v39  ;;  %vm4228_vm13 = vweird.f32 %v7151_v29  ;;  %v4284_v32 = vadd.f32 1.0, %v7155_v9  ;;  %vm4266_vm0 = vweird.f32 %v7153_v7  ;;  %v7157_v35 = vpop.eup %7156 }
 0x72a   :  { %v11054_v50 = vadd.f32 %v4317_v41, %v4315_v37  ;;  %v4262_v63 = vsub.f32 1.0, %v4261_v49  ;;  %v4225_v55 = vmul.f32 %v7151_v29, %v4224_v6  ;;  %v4289_v10 = vadd.f32 %v11042_v39, %v4288_v31  ;;  %vm11063_vm8 = vmor %vm4290_vm10, %vm4291_vm12 }
 0x72b   :  { %v4269_v1 = vand.u32 2147483647, %v11035_v2  ;;  %v4294_v6 = vand.u32 2147483647, %v11029_v3  ;;  %vm4265_vm15 = vweird.f32 %v11035_v2  ;;  %vm4229_vm6 = vmor %vm4227_vm5, %vm4228_vm13  ;;  %v4234_v60 = vor.u32 1.1754944e-38, %v4233_v4 }
 0x72c   :  { %7158 = vtanh.f32 %v11054_v50  ;;  %v4263_v61 = vmul.f32 %v7153_v7, %v4262_v63  ;;  %v4226_v22 = vadd.f32 %v7151_v29, %v4225_v55  ;;  %v4293_v41 = vsel %vm11063_vm8, %v11042_v39, %v4289_v10  ;;  %vm4267_vm12 = vmor %vm4265_vm15, %vm4266_vm0 }
 0x72d   :  { %7160 = vrcp.f32 %v4284_v32  ;;  %v4272_v37 = vor.u32 1.1754944e-38, %v4271_v8  ;;  %vm4232_vm10 = vcmp.eq.f32.partialorder %v4231_v14, 8.507059e+37  ;;  %v4297_v49 = vor.u32 1.1754944e-38, %v4296_v34 }
 0x72e   :  { %v4264_v27 = vadd.f32 %v7153_v7, %v4263_v61  ;;  %v4230_v31 = vsel %vm4229_vm6, %v7151_v29, %v4226_v22  ;;  %vm4270_vm11 = vcmp.eq.f32.partialorder %v4269_v1, 8.507059e+37  ;;  %vm4295_vm9 = vcmp.eq.f32.partialorder %v4294_v6, 8.507059e+37 }
 0x72f   :  { %v4235_v3 = vsel %vm4232_vm10, %v4234_v60, %v4230_v31  ;;  %v4298_v4 = vsel %vm4295_vm9, %v4297_v49, %v4293_v41  ;;  %v4311_v34 = vand.u32 2147483648, %v4284_v32  ;;  %v4309_v10 = vand.u32 2147483647, %v4284_v32  ;;  %v11107_v41 = vld [vmem:[#allocation14 + $0x1e8] sm:$0xff]  ;;  %v11113_v31 = vld [vmem:[#allocation14 + $0x1f8] sm:$0xff]  ;;  %v11117_v49 = vld [vmem:[#allocation14 + $0x1c0] sm:$0xff] }
 0x730   :  { %v4268_v9 = vsel %vm4267_vm12, %v7153_v7, %v4264_v27  ;;  %v4318_v63 = vmul.f32 %v7157_v35, %v4235_v3  ;;  %4730 = vmatpush.msra.mxu1 %v11107_v41  ;;  %4776 = vmatpush.msra.mxu3 %v11113_v31  ;;  %v11119_v3 = vld [vmem:[#allocation14 + $0x1c8] sm:$0xff] }
 0x731   :  { %v4273_v56 = vsel %vm4270_vm11, %v4272_v37, %v4268_v9  ;;  %vm4305_vm11 = vweird.f32 %v4284_v32  ;;  %v4312_v1 = vor.u32 1.1754944e-38, %v4311_v34  ;;  %vm4310_vm0 = vcmp.eq.f32.partialorder %v4309_v10, 8.507059e+37  ;;  %v11109_v37 = vld [vmem:[#allocation14 + $0x1f0] sm:$0xff]  ;;  %v11149_v34 = vld [vmem:[#allocation14 + $0x198] sm:$0xff]  ;;  %v11155_v10 = vld [vmem:[#allocation14 + $0x168] sm:$0xff] }
 0x732   :  { %v7159_v2 = vpop.eup %7158  ;;  %v4316_v55 = vmul.f32 0.0, %v4273_v56  ;;  %4753 = vmatpush.msra.mxu2 %v11109_v37  ;;  %v11121_v9 = vld [vmem:[#allocation14 + $0x1d0] sm:$0xff]  ;;  %4731 = vmatpush.msra.mxu1 %v11119_v3  ;;  %v11125_v56 = vld [vmem:[#allocation14 + $0x1d8] sm:$0xff] }
 0x733   :  { %v7161_v61 = vpop.eup %7160  ;;  %v11074_v44 = vmul.f32 %v7159_v2, %v4298_v4  ;;  %4777 = vmatpush.msra.mxu3 %v11125_v56  ;;  %v11131_v2 = vld [vmem:[#allocation14 + $0x1a8] sm:$0xff]  ;;  %v11137_v4 = vld [vmem:[#allocation14 + $0x1b8] sm:$0xff] }
 0x734   :  { %v11076_v13 = vadd.f32 %v4318_v63, %v4316_v55  ;;  %v4301_v39 = vmul.f32 %v7161_v61, %v4284_v32  ;;  %vm4306_vm9 = vweird.f32 %v7161_v61  ;;  %v11105_v32 = vld [vmem:[#allocation14 + $0x1e0] sm:$0xff]  ;;  %4754 = vmatpush.msra.mxu2 %v11121_v9  ;;  %v11133_v55 = vld [vmem:[#allocation14 + $0x1b0] sm:$0xff]  ;;  %4732 = vmatpush.msra.mxu1 %v11131_v2 }
 0x735   :  { %6800 = vmatmul.msk.f32.vlgmr.msrb.gmra.mxu0 %vm8500_vm14, %v11074_v44  ;;  %6802 = vmatmul.msk.f32.vlgmr.msrb.gmra.mxu1 %vm8500_vm14, %v11074_v44  ;;  %vm4307_vm13 = vmor %vm4305_vm11, %vm4306_vm9  ;;  %v11129_v63 = vld [vmem:[#allocation14 + $0x1a0] sm:$0xff] }
 0x736   :  { %13770 = vst [vmem:[#allocation95_spill] sm:$0xff] %v11076_v13  ;;  %7162 = vtanh.f32 %v11076_v13  ;;  %v4302_v7 = vsub.f32 1.0, %v4301_v39  ;;  %6804 = vmatmul.msk.f32.vlgmr.msrb.gmra.mxu2 %vm8500_vm14, %v11074_v44  ;;  %6806 = vmatmul.msk.f32.vlgmr.msrb.gmra.mxu3 %vm8500_vm14, %v11074_v44  ;;  %v11143_v39 = vld [vmem:[#allocation14 + $0x188] sm:$0xff]  ;;  %v3823_v13 = vsel %vm121_vm1, %v10873_v0, %v10880_v40  ;;  %v11259_v40 = vld [vmem:[#allocation14 + $0x80] sm:$0xff] }
 0x737   :  { %4707 = vmatpush.msra.mxu0 %v11105_v32  ;;  %4755 = vmatpush.msra.mxu2 %v11133_v55  ;;  %13782 = vst [vmem:[#allocation36_spill] sm:$0xff] %v11259_v40  ;;  %v11261_v0 = vld [vmem:[#allocation14 + $0x88] sm:$0xff] }
 0x738   :  { %v4303_v14 = vmul.f32 %v7161_v61, %v4302_v7  ;;  %4778 = vmatpush.msra.mxu3 %v11137_v4  ;;  %v11145_v7 = vld [vmem:[#allocation14 + $0x190] sm:$0xff]  ;;  %4733 = vmatpush.msra.mxu1 %v11143_v39  ;;  %13783 = vst [vmem:[#allocation34_spill] sm:$0xff] %v11261_v0 }
 0x739   :  { %4708 = vmatpush.msra.mxu0 %v11117_v49  ;;  %4756 = vmatpush.msra.mxu2 %v11145_v7 }
 0x73a   :  { %v4304_v8 = vadd.f32 %v7161_v61, %v4303_v14  ;;  %4779 = vmatpush.msra.mxu3 %v11149_v34  ;;  %v11153_v14 = vld [vmem:[#allocation14 + $0x160] sm:$0xff]  ;;  %4734 = vmatpush.msra.mxu1 %v11155_v10 }
 0x73b   :  { %4709 = vmatpush.msra.mxu0 %v11129_v63 }
 0x73c   :  { %v7163_v35 = vpop.eup %7162  ;;  %v4308_v6 = vsel %vm4307_vm13, %v7161_v61, %v4304_v8  ;;  %v11141_v61 = vld [vmem:[#allocation14 + $0x180] sm:$0xff]  ;;  %v11157_v8 = vld [vmem:[#allocation14 + $0x170] sm:$0xff]  ;;  %4735 = vmatpush.msra.mxu1 %v11175_v48 }
 0x73d   :  { %v4313_v22 = vsel %vm4310_vm0, %v4312_v1, %v4308_v6  ;;  %4710 = vmatpush.msra.mxu0 %v11141_v61  ;;  %v11161_v1 = vld [vmem:[#allocation14 + $0x178] sm:$0xff]  ;;  %4757 = vmatpush.msra.mxu2 %v11157_v8 }
 0x73e   :  { %v11091_v60 = vmul.f32 %v7163_v35, %v4313_v22  ;;  %v3819_v35 = vsel %vm121_vm1, %v10827_v43, %v10834_v59  ;;  %v3820_v22 = vsel %vm8051_vm2, %v10831_v26, %v10837_v30  ;;  %4780 = vmatpush.msra.mxu3 %v11161_v1  ;;  %v11181_v59 = vld [vmem:[#allocation14 + $0x158] sm:$0xff]  ;;  %v11185_v43 = vld [vmem:[#allocation14 + $0x120] sm:$0xff]  ;;  %v11187_v26 = vld [vmem:[#allocation14 + $0x128] sm:$0xff] }
 0x73f   :  { %4711 = vmatpush.msra.mxu0 %v11153_v14  ;;  %4758 = vmatpush.msra.mxu2 %v11177_v24  ;;  %v11189_v30 = vld [vmem:[#allocation14 + $0x130] sm:$0xff] }
 0x740   :  { %13772 = vst [vmem:[#allocation97_spill] sm:$0xff] %v11091_v60  ;;  %6801 = vmatmul.msk.f32.gmra.mxu0 %vm8525_vm7, %v11091_v60  ;;  %6803 = vmatmul.msk.f32.gmra.mxu1 %vm8525_vm7, %v11091_v60 }
 0x741   :  { %6805 = vmatmul.msk.f32.gmra.mxu2 %vm8525_vm7, %v11091_v60  ;;  %6807 = vmatmul.msk.f32.gmra.mxu3 %vm8525_vm7, %v11091_v60  ;;  %v11241_v60 = vld [vmem:[#allocation14 + $0xb0] sm:$0xff] }
 0x742   :  { %4712 = vmatpush.msra.mxu0 %v11173_v38  ;;  %4781 = vmatpush.msra.mxu3 %v11181_v59  ;;  %13780 = vst [vmem:[#allocation27_spill] sm:$0xff] %v11241_v60 }
 0x743   :  { %4736 = vmatpush.msra.mxu1 %v11187_v26  ;;  %4759 = vmatpush.msra.mxu2 %v11189_v30 }
 0x744   :  { %4713 = vmatpush.msra.mxu0 %v11185_v43 }
 0x7b2   :  { %v4420_v6 = vpop.f32.mrf.mxu0  ;;  %v4443_v18 = vpop.f32.mrf.mxu1 }
 0x7b3   :  { %v4495_v53 = vadd.f32 %v4420_v6, %v3819_v35  ;;  %v4496_v28 = vadd.f32 %v4443_v18, %v3820_v22  ;;  %v11193_v18 = vld [vmem:[#allocation14 + $0x138] sm:$0xff]  ;;  %v11197_v35 = vld [vmem:[#allocation14 + $0x100] sm:$0xff]  ;;  %v11199_v6 = vld [vmem:[#allocation14 + $0x108] sm:$0xff] }
 0x7b4   :  { %4782 = vmatpush.msra.mxu3 %v11193_v18  ;;  %v11201_v22 = vld [vmem:[#allocation14 + $0x110] sm:$0xff]  ;;  %4714 = vmatpush.msra.mxu0 %v11197_v35 }
 0x7b5   :  { %v6808_v23 = vmul.f32 -1.442695, %v4495_v53  ;;  %v6810_v36 = vmul.f32 -1.442695, %v4496_v28  ;;  %4737 = vmatpush.msra.mxu1 %v11199_v6  ;;  %v11205_v53 = vld [vmem:[#allocation14 + $0x118] sm:$0xff]  ;;  %4760 = vmatpush.msra.mxu2 %v11201_v22  ;;  %v11209_v28 = vld [vmem:[#allocation14 + $0xe0] sm:$0xff] }
 0x7b6   :  { %4783 = vmatpush.msra.mxu3 %v11205_v53  ;;  %4715 = vmatpush.msra.mxu0 %v11209_v28 }
 0x7b7   :  { %7164 = vpow2.f32 %v6808_v23  ;;  %v3822_v23 = vsel %vm8088_vm4, %v10863_v5, %v10869_v46  ;;  %4738 = vmatpush.msra.mxu1 %v11211_v47  ;;  %4761 = vmatpush.msra.mxu2 %v11213_v57  ;;  %v11233_v5 = vld [vmem:[#allocation14 + $0xd8] sm:$0xff] }
 0x7b8   :  { %7166 = vpow2.f32 %v6810_v36  ;;  %v11221_v36 = vld [vmem:[#allocation14 + $0xf8] sm:$0xff]  ;;  %4716 = vmatpush.msra.mxu0 %v11225_v20  ;;  %13779 = vst [vmem:[#allocation35_spill] sm:$0xff] %v11233_v5 }
 0x7b9   :  { %v4489_v16 = vpop.f32.mrf.mxu3  ;;  %13775 = vst [vmem:[#allocation98_spill] sm:$0xff] %v11221_v36  ;;  %4784 = vmatpush.msra.mxu3 %v11221_v36  ;;  %4739 = vmatpush.msra.mxu1 %v11227_v15 }
 0x7ba   :  { %v4498_v17 = vadd.f32 %v4489_v16, %v3822_v23  ;;  %4762 = vmatpush.msra.mxu2 %v11229_v51  ;;  %v11237_v16 = vld [vmem:[#allocation14 + $0xa0] sm:$0xff]  ;;  %v11239_v23 = vld [vmem:[#allocation14 + $0xa8] sm:$0xff] }
 0x7bb   :  { %4785 = vmatpush.msra.mxu3 %v11233_v5  ;;  %4717 = vmatpush.msra.mxu0 %v11237_v16  ;;  %v11253_v5 = vld [vmem:[#allocation14 + $0xb8] sm:$0xff] }
 0x7bc   :  { %v6812_v46 = vmul.f32 -1.442695, %v4498_v17  ;;  %v3824_v17 = vsel %vm8051_vm2, %v10877_v62, %v10883_v54  ;;  %4740 = vmatpush.msra.mxu1 %v11239_v23  ;;  %13781 = vst [vmem:[#allocation37_spill] sm:$0xff] %v11253_v5  ;;  %4763 = vmatpush.msra.mxu2 %v11241_v60  ;;  %v11263_v62 = vld [vmem:[#allocation14 + $0x90] sm:$0xff] }
 0x7bd   :  { %v7165_v27 = vpop.eup %7164  ;;  %v4423_v15 = vpop.f32.mrf.mxu0  ;;  %4786 = vmatpush.msra.mxu3 %v11253_v5  ;;  %13784 = vst [vmem:[#allocation41_spill] sm:$0xff] %v11263_v62  ;;  %4718 = vmatpush.msra.mxu0 %v11259_v40 }
 0x7be   :  { %v4446_v51 = vpop.f32.mrf.mxu1  ;;  %v7167_v20 = vpop.eup %7166  ;;  %v11255_v36 = vadd.f32 1.0, %v7165_v27  ;;  %7168 = vpow2.f32 %v6812_v46  ;;  %v4499_v57 = vadd.f32 %v4423_v15, %v3823_v13  ;;  %4741 = vmatpush.msra.mxu1 %v11261_v0  ;;  %v11269_v27 = vld [vmem:[#allocation14 + $0x98] sm:$0xff]  ;;  %4764 = vmatpush.msra.mxu2 %v11263_v62  ;;  %v11274_v15 = vld [vmem:[#allocation14 + $0x60] sm:$0xff]  ;;  %v11278_v46 = vld [vmem:[#allocation14 + $0x70] sm:$0xff] }
 0x7bf   :  { %v4500_v58 = vadd.f32 %v4446_v51, %v3824_v17  ;;  %v11265_v54 = vadd.f32 1.0, %v7167_v20  ;;  %13785 = vst [vmem:[#allocation39_spill] sm:$0xff] %v11269_v27  ;;  %4787 = vmatpush.msra.mxu3 %v11269_v27  ;;  %v11276_v51 = vld [vmem:[#allocation14 + $0x68] sm:$0xff]  ;;  %4719 = vmatpush.msra.mxu0 %v11274_v15  ;;  %v11283_v20 = vld [vmem:[#allocation14 + $0x78] sm:$0xff]  ;;  %v4466_v13 = vpop.f32.mrf.mxu2  ;;  %v11287_v27 = vld [vmem:[#allocation14 + $0x40] sm:$0xff] }
 0x7c0   :  { %7170 = vrcp.f32 %v11255_v36  ;;  %13786 = vst [vmem:[#allocation46_spill] sm:$0xff] %v11274_v15  ;;  %4742 = vmatpush.msra.mxu1 %v11276_v51  ;;  %v6809_v17 = vmul.f32 -1.442695, %v4499_v57  ;;  %4765 = vmatpush.msra.mxu2 %v11278_v46  ;;  %v11289_v62 = vld [vmem:[#allocation14 + $0x48] sm:$0xff]  ;;  %v11291_v0 = vld [vmem:[#allocation14 + $0x50] sm:$0xff]  ;;  %vm4516_vm6 = vweird.f32 %v11255_v36 }
 0x7c1   :  { %13787 = vst [vmem:[#allocation45_spill] sm:$0xff] %v11276_v51  ;;  %7172 = vrcp.f32 %v11265_v54  ;;  %v6811_v45 = vmul.f32 -1.442695, %v4500_v58  ;;  %4788 = vmatpush.msra.mxu3 %v11283_v20  ;;  %v3821_v51 = vsel %vm8084_vm3, %v10859_v52, %v10866_v25  ;;  %v3826_v58 = vsel %vm8088_vm4, %v10909_v21, %v10915_v33  ;;  %4720 = vmatpush.msra.mxu0 %v11287_v27  ;;  %v11307_v15 = vld [vmem:[#allocation14 + $0x28] sm:$0xff]  ;;  %v11313_v21 = vld [vmem:[#allocation14 + $0x30] sm:$0xff]  ;;  %v11315_v33 = vld [vmem:[#allocation14 + $0x38] sm:$0xff] }
 0x7c2   :  { %13788 = vst [vmem:[#allocation43_spill] sm:$0xff] %v11278_v46  ;;  %7174 = vpow2.f32 %v6809_v17  ;;  %4743 = vmatpush.msra.mxu1 %v11289_v62  ;;  %v11305_v46 = vld [vmem:[#allocation14 + $0x20] sm:$0xff]  ;;  %v4497_v5 = vadd.f32 %v4466_v13, %v3821_v51  ;;  %4766 = vmatpush.msra.mxu2 %v11291_v0  ;;  %v11327_v51 = vld [vmem:[#allocation14 + $0x18] sm:$0xff]  ;;  %vm4554_vm15 = vweird.f32 %v11265_v54 }
 0x7c3   :  { %13789 = vst [vmem:[#allocation50_spill] sm:$0xff] %v11283_v20  ;;  %v11303_v20 = vld [vmem:[#allocation14 + $0x58] sm:$0xff]  ;;  %7176 = vpow2.f32 %v6811_v45  ;;  %v11317_v52 = vld [vmem:[#allocation14] sm:$0xff]  ;;  %4721 = vmatpush.msra.mxu0 %v11305_v46  ;;  %v11325_v45 = vld [vmem:[#allocation14 + $0x10] sm:$0xff] }
 0x7c4   :  { %13790 = vst [vmem:[#allocation48_spill] sm:$0xff] %v11289_v62  ;;  %v7169_v40 = vpop.eup %7168  ;;  %v4492_v57 = vpop.f32.mrf.mxu3  ;;  %4789 = vmatpush.msra.mxu3 %v11303_v20  ;;  %4744 = vmatpush.msra.mxu1 %v11307_v15  ;;  %v4558_v62 = vand.u32 2147483647, %v11265_v54 }
 0x7c5   :  { %13791 = vst [vmem:[#allocation55_spill] sm:$0xff] %v11291_v0  ;;  %v11309_v60 = vadd.f32 1.0, %v7169_v40  ;;  %v4502_v17 = vadd.f32 %v4492_v57, %v3826_v58  ;;  %v11323_v40 = vld [vmem:[#allocation14 + $0x8] sm:$0xff]  ;;  %4767 = vmatpush.msra.mxu2 %v11313_v21  ;;  %4722 = vmatpush.msra.mxu0 %v11317_v52  ;;  %v4522_v0 = vand.u32 2147483648, %v11255_v36 }
 0x7c6   :  { %13792 = vst [vmem:[#allocation28_spill] sm:$0xff] %v11303_v20  ;;  %v11319_v25 = vpop.eup %7170  ;;  %4790 = vmatpush.msra.mxu3 %v11315_v33  ;;  %4745 = vmatpush.msra.mxu1 %v11323_v40  ;;  %vm4559_vm11 = vcmp.eq.f32.partialorder %v4558_v62, 8.507059e+37 }
 0x7c7   :  { %13793 = vst [vmem:[#allocation91_spill] sm:$0xff] %v11305_v46  ;;  %v11329_v13 = vpop.eup %7172  ;;  %v4512_v58 = vmul.f32 %v11319_v25, %v11255_v36  ;;  %7178 = vrcp.f32 %v11309_v60  ;;  %v6813_v46 = vmul.f32 -1.442695, %v4502_v17  ;;  %4768 = vmatpush.msra.mxu2 %v11325_v45  ;;  %5011 = vmatpush.msrb.mxu0 %v11105_v32  ;;  %vm4517_vm8 = vweird.f32 %v11319_v25 }
 0x7c8   :  { %13794 = vst [vmem:[#allocation119_spill] sm:$0xff] %v11307_v15  ;;  %v4550_v57 = vmul.f32 %v11329_v13, %v11265_v54  ;;  %v4520_v15 = vand.u32 2147483647, %v11255_v36  ;;  %7180 = vtanh.f32 %v4497_v5  ;;  %4791 = vmatpush.msra.mxu3 %v11327_v51  ;;  %v7175_v20 = vpop.eup %7174  ;;  %5034 = vmatpush.msrb.mxu1 %v11107_v41  ;;  %vm4555_vm5 = vweird.f32 %v11329_v13  ;;  %vm11374_vm10 = vmor %vm4516_vm6, %vm4517_vm8 }
 0x7c9   :  { %13795 = vst [vmem:[#allocation120_spill] sm:$0xff] %v11313_v21  ;;  %v4513_v19 = vsub.f32 1.0, %v4512_v58  ;;  %v7177_v58 = vpop.eup %7176  ;;  %v11350_v17 = vadd.f32 1.0, %v7175_v20  ;;  %7182 = vpow2.f32 %v6813_v46  ;;  %5057 = vmatpush.msrb.mxu2 %v11109_v37  ;;  %5012 = vmatpush.msrb.mxu0 %v11117_v49  ;;  %vm11388_vm12 = vmor %vm4554_vm15, %vm4555_vm5  ;;  %vm4594_vm13 = vweird.f32 %v11309_v60  ;;  %v13812_v37 = vld [vmem:[#allocation100_spill] sm:$0xff] }
 0x7ca   :  { %13796 = vst [vmem:[#allocation121_spill] sm:$0xff] %v11315_v33  ;;  %v4551_v21 = vsub.f32 1.0, %v4550_v57  ;;  %v4560_v33 = vand.u32 2147483648, %v11265_v54  ;;  %5080 = vmatpush.msrb.mxu3 %v11113_v31  ;;  %5035 = vmatpush.msrb.mxu1 %v11119_v3  ;;  %v4523_v31 = vor.u32 1.1754944e-38, %v4522_v0  ;;  %vm4521_vm9 = vcmp.eq.f32.partialorder %v4520_v15, 8.507059e+37 }
 0x7cb   :  { %13797 = vst [vmem:[#allocation122_spill] sm:$0xff] %v11327_v51  ;;  %v4514_v5 = vmul.f32 %v11319_v25, %v4513_v19  ;;  %v11356_v51 = vadd.f32 1.0, %v7177_v58  ;;  %v3825_v19 = vsel %vm8084_vm3, %v10905_v42, %v10912_v12  ;;  %7184 = vrcp.f32 %v11350_v17  ;;  %5058 = vmatpush.msrb.mxu2 %v11121_v9  ;;  %5013 = vmatpush.msrb.mxu0 %v11129_v63  ;;  %v13802_v58 = vld [vmem:[#allocation89_spill] sm:$0xff]  ;;  %v11771_v42 = vld [vmem:[#allocation14 + $0xe8] sm:$0xff] }
 0x7cc   :  { %v4552_v57 = vmul.f32 %v11329_v13, %v4551_v21  ;;  %v4469_v21 = vpop.f32.mrf.mxu2  ;;  %5081 = vmatpush.msrb.mxu3 %v11125_v56  ;;  %5036 = vmatpush.msrb.mxu1 %v11131_v2  ;;  %v4561_v36 = vor.u32 1.1754944e-38, %v4560_v33  ;;  %v13814_v56 = vld [vmem:[#allocation22_spill] sm:$0xff]  ;;  %v11773_v12 = vld [vmem:[#allocation14 + $0xf0] sm:$0xff] }
 0x7cd   :  { %v11364_v32 = vpop.eup %7178  ;;  %v4515_v41 = vadd.f32 %v11319_v25, %v4514_v5  ;;  %7186 = vrcp.f32 %v11356_v51  ;;  %5059 = vmatpush.msrb.mxu2 %v11133_v55  ;;  %v4501_v46 = vadd.f32 %v4469_v21, %v3825_v19  ;;  %5014 = vmatpush.msrb.mxu0 %v11141_v61  ;;  %v13803_v5 = vld [vmem:[#allocation118_spill] sm:$0xff] }
 0x7ce   :  { %v4553_v49 = vadd.f32 %v11329_v13, %v4552_v57  ;;  %v4590_v3 = vmul.f32 %v11364_v32, %v11309_v60  ;;  %v7181_v9 = vpop.eup %7180  ;;  %5082 = vmatpush.msrb.mxu3 %v11137_v4  ;;  %5037 = vmatpush.msrb.mxu1 %v11143_v39  ;;  %vm4595_vm0 = vweird.f32 %v11364_v32  ;;  %vm13804_vm8 = vcmp.gt.s32.totalorder %v13802_v58, %v13803_v5 }
 0x7cf   :  { %v4519_v0 = vsel %vm11374_vm10, %v11319_v25, %v4515_v41  ;;  %v7183_v33 = vpop.eup %7182  ;;  %v4327_v25 = vsel %vm8500_vm14, %v11054_v50, 0.0  ;;  %5060 = vmatpush.msrb.mxu2 %v11145_v7  ;;  %5015 = vmatpush.msrb.mxu0 %v11153_v14  ;;  %7188 = vtanh.f32 %v4501_v46  ;;  %vm11447_vm5 = vmor %vm4594_vm13, %vm4595_vm0  ;;  %v4573_v57 = vand.u32 2147483647, %v11356_v51  ;;  %v13811_v41 = vld [vmem:[#allocation98_spill] sm:$0xff] }
 0x7d0   :  { %v4524_v63 = vsel %vm4521_vm9, %v4523_v31, %v4519_v0  ;;  %v4557_v54 = vsel %vm11388_vm12, %v11329_v13, %v4553_v49  ;;  %v4591_v2 = vsub.f32 1.0, %v4590_v3  ;;  %5083 = vmatpush.msrb.mxu3 %v11149_v34  ;;  %v11408_v20 = vadd.f32 1.0, %v7183_v33  ;;  %5038 = vmatpush.msrb.mxu1 %v11155_v10  ;;  %v13813_v31 = vld [vmem:[#allocation102_spill] sm:$0xff]  ;;  %v13816_v0 = vld [vmem:[#allocation95_spill] sm:$0xff] }
 0x7d1   :  { %v4562_v62 = vsel %vm4559_vm11, %v4561_v36, %v4557_v54  ;;  %v4621_v55 = vmul.f32 %v7181_v9, %v4524_v63  ;;  %v11412_v61 = vpop.eup %7184  ;;  %5061 = vmatpush.msrb.mxu2 %v11157_v8  ;;  %5016 = vmatpush.msrb.mxu0 %v11173_v38  ;;  %v4598_v10 = vand.u32 2147483647, %v11309_v60  ;;  %v4600_v38 = vand.u32 2147483648, %v11309_v60  ;;  %v13815_v36 = vld [vmem:[#allocation35_spill] sm:$0xff] }
 0x7d2   :  { %v4619_v4 = vmul.f32 %v4562_v62, %v4327_v25  ;;  %v4592_v15 = vmul.f32 %v11364_v32, %v4591_v2  ;;  %5084 = vmatpush.msrb.mxu3 %v11161_v1  ;;  %v4527_v7 = vmul.f32 %v11412_v61, %v11350_v17  ;;  %5039 = vmatpush.msrb.mxu1 %v11175_v48  ;;  %7190 = vrcp.f32 %v11408_v20 }
 0x7d3   :  { %v11416_v50 = vpop.eup %7186  ;;  %5062 = vmatpush.msrb.mxu2 %v11177_v24  ;;  %5017 = vmatpush.msrb.mxu0 %v11185_v43  ;;  %v4535_v1 = vand.u32 2147483647, %v11350_v17  ;;  %v4537_v13 = vand.u32 2147483648, %v11350_v17  ;;  %vm4532_vm15 = vweird.f32 %v11412_v61  ;;  %vm4531_vm10 = vweird.f32 %v11350_v17 }
 0x7d4   :  { %v4623_v39 = vadd.f32 %v4621_v55, %v4619_v4  ;;  %v4593_v34 = vadd.f32 %v11364_v32, %v4592_v15  ;;  %v4565_v14 = vmul.f32 %v11416_v50, %v11356_v51  ;;  %5085 = vmatpush.msrb.mxu3 %v11181_v59  ;;  %v4528_v8 = vsub.f32 1.0, %v4527_v7  ;;  %5040 = vmatpush.msrb.mxu1 %v11187_v26  ;;  %vm4533_vm9 = vmor %vm4531_vm10, %vm4532_vm15  ;;  %v13819_v55 = vld [vmem:[#allocation27_spill] sm:$0xff]  ;;  %v13820_v4 = vld [vmem:[#allocation37_spill] sm:$0xff] }
 0x7d5   :  { %5063 = vmatpush.msrb.mxu2 %v11189_v30  ;;  %v4575_v59 = vand.u32 2147483648, %v11356_v51  ;;  %v11457_v30 = vsel %vm8500_vm14, %v11074_v44, 0.0  ;;  %5018 = vmatpush.msrb.mxu0 %v11197_v35  ;;  %vm4570_vm6 = vweird.f32 %v11416_v50  ;;  %v7189_v44 = vpop.eup %7188  ;;  %vm11469_vm14 = vcmp.eq.f32.partialorder %v4598_v10, 8.507059e+37  ;;  %v13823_v7 = vld [vmem:[#allocation92_spill] sm:$0xff]  ;;  %v13826_v10 = vld [vmem:[#allocation39_spill] sm:$0xff] }
 0x7d6   :  { %7192 = vtanh.f32 %v4623_v39  ;;  %v4566_v48 = vsub.f32 1.0, %v4565_v14  ;;  %v11439_v24 = vsel %vm13804_vm8, %v4623_v39, %v4327_v25  ;;  %5086 = vmatpush.msrb.mxu3 %v11193_v18  ;;  %v4529_v43 = vmul.f32 %v11412_v61, %v4528_v8  ;;  %13807 = vst [vmem:[#allocation89_spill] sm:$0xff] %v11457_v30  ;;  %5041 = vmatpush.msrb.mxu1 %v11199_v6  ;;  %v13825_v14 = vld [vmem:[#allocation41_spill] sm:$0xff]  ;;  %v13827_v8 = vld [vmem:[#allocation46_spill] sm:$0xff] }
 0x7d7   :  { %v4597_v60 = vsel %vm11447_vm5, %v11364_v32, %v4593_v34  ;;  %5064 = vmatpush.msrb.mxu2 %v11201_v22  ;;  %v4601_v35 = vor.u32 1.1754944e-38, %v4600_v38  ;;  %5019 = vmatpush.msrb.mxu0 %v11209_v28  ;;  %vm4569_vm12 = vweird.f32 %v11356_v51  ;;  %vm4536_vm11 = vcmp.eq.f32.partialorder %v4535_v1, 8.507059e+37  ;;  %v13810_v32 = vld [vmem:[#allocation96_spill] sm:$0xff]  ;;  %v13829_v1 = vld [vmem:[#allocation43_spill] sm:$0xff] }
 0x7d8   :  { %v4567_v18 = vmul.f32 %v11416_v50, %v4566_v48  ;;  %5087 = vmatpush.msrb.mxu3 %v11205_v53  ;;  %v4530_v6 = vadd.f32 %v11412_v61, %v4529_v43  ;;  %5042 = vmatpush.msrb.mxu1 %v11211_v47  ;;  %v11477_v19 = vpop.eup %7190  ;;  %v4538_v22 = vor.u32 1.1754944e-38, %v4537_v13  ;;  %vm4571_vm13 = vmor %vm4569_vm12, %vm4570_vm6  ;;  %v4576_v47 = vor.u32 1.1754944e-38, %v4575_v59  ;;  %v13828_v48 = vld [vmem:[#allocation45_spill] sm:$0xff]  ;;  %v13830_v13 = vld [vmem:[#allocation50_spill] sm:$0xff] }
 0x7d9   :  { %5065 = vmatpush.msrb.mxu2 %v13810_v32  ;;  %v4605_v51 = vmul.f32 %v11477_v19, %v11408_v20  ;;  %v4602_v21 = vsel %vm11469_vm14, %v4601_v35, %v4597_v60  ;;  %5020 = vmatpush.msrb.mxu0 %v13812_v37  ;;  %vm4574_vm0 = vcmp.eq.f32.partialorder %v4573_v57, 8.507059e+37  ;;  %v4328_v54 = vsel %vm8525_vm7, %v13816_v0, 0.0  ;;  %v13831_v59 = vld [vmem:[#allocation48_spill] sm:$0xff]  ;;  %v13832_v60 = vld [vmem:[#allocation55_spill] sm:$0xff] }
 0x7da   :  { %v4568_v53 = vadd.f32 %v11416_v50, %v4567_v18  ;;  %5088 = vmatpush.msrb.mxu3 %v13811_v41  ;;  %v4534_v28 = vsel %vm4533_vm9, %v11412_v61, %v4530_v6  ;;  %5043 = vmatpush.msrb.mxu1 %v13813_v31  ;;  %vm4610_vm5 = vweird.f32 %v11477_v19  ;;  %v13821_v61 = vld [vmem:[#allocation36_spill] sm:$0xff]  ;;  %v4615_v39 = vand.u32 2147483648, %v11408_v20  ;;  %v13835_v57 = vld [vmem:[#allocation119_spill] sm:$0xff]  ;;  %v13837_v6 = vld [vmem:[#allocation121_spill] sm:$0xff] }
 0x7db   :  { %v4539_v49 = vsel %vm4536_vm11, %v4538_v22, %v4534_v28  ;;  %5066 = vmatpush.msrb.mxu2 %v13814_v56  ;;  %v4606_v33 = vsub.f32 1.0, %v4605_v51  ;;  %5021 = vmatpush.msrb.mxu0 %v11237_v16  ;;  %vm13824_vm15 = vcmp.gt.s32.totalorder %v13823_v7, %v13803_v5  ;;  %vm4609_vm6 = vweird.f32 %v11408_v20  ;;  %v13833_v18 = vld [vmem:[#allocation28_spill] sm:$0xff]  ;;  %v13847_v28 = vld [vmem:[#allocation111_spill] sm:$0xff] }
 0x7dc   :  { %v7193_v17 = vpop.eup %7192  ;;  %v4572_v3 = vsel %vm4571_vm13, %v11416_v50, %v4568_v53  ;;  %5089 = vmatpush.msrb.mxu3 %v13815_v36  ;;  %v4622_v46 = vmul.f32 %v7189_v44, %v4539_v49  ;;  %5044 = vmatpush.msrb.mxu1 %v11239_v23  ;;  %v13822_v50 = vld [vmem:[#allocation34_spill] sm:$0xff]  ;;  %v4613_v38 = vand.u32 2147483647, %v11408_v20  ;;  %vm4611_vm14 = vmor %vm4609_vm6, %vm4610_vm5  ;;  %v4616_v43 = vor.u32 1.1754944e-38, %v4615_v39  ;;  %v13834_v20 = vld [vmem:[#allocation91_spill] sm:$0xff] }
 0x7dd   :  { %v4627_v9 = vmul.f32 %v7193_v17, %v4602_v21  ;;  %v4577_v2 = vsel %vm4574_vm0, %v4576_v47, %v4572_v3  ;;  %5067 = vmatpush.msrb.mxu2 %v13819_v55  ;;  %v4607_v15 = vmul.f32 %v11477_v19, %v4606_v33  ;;  %5022 = vmatpush.msrb.mxu0 %v13821_v61  ;;  %v13836_v35 = vld [vmem:[#allocation120_spill] sm:$0xff]  ;;  %v13840_v53 = vld [vmem:[#allocation122_spill] sm:$0xff]  ;;  %vm13841_vm12 = vmmov %vm13824_vm15 }
 0x7de   :  { %v4620_v25 = vmul.f32 %v4577_v2, %v4328_v54  ;;  %5090 = vmatpush.msrb.mxu3 %v13820_v4  ;;  %5045 = vmatpush.msrb.mxu1 %v13822_v50  ;;  %vm4614_vm10 = vcmp.eq.f32.partialorder %v4613_v38, 8.507059e+37  ;;  %v13846_v47 = vld [vmem:[#allocation113_spill] sm:$0xff]  ;;  %v13850_v56 = vld [vmem:[#allocation116_spill] sm:$0xff]  ;;  %v13854_v39 = vld [vmem:[#allocation51_spill] sm:$0xff] }
 0x7df   :  { %v11506_v62 = vsel %vm13804_vm8, %v4627_v9, %v11457_v30  ;;  %v4608_v23 = vadd.f32 %v11477_v19, %v4607_v15  ;;  %5068 = vmatpush.msrb.mxu2 %v13825_v14  ;;  %5023 = vmatpush.msrb.mxu0 %v13827_v8  ;;  %v3852_v5 = vsel %vm8051_vm2, %v13847_v28, %v13846_v47  ;;  %v13849_v9 = vld [vmem:[#allocation93_spill] sm:$0xff]  ;;  %v13853_v61 = vld [vmem:[#allocation44_spill] sm:$0xff]  ;;  %v13855_v14 = vld [vmem:[#allocation42_spill] sm:$0xff] }
 0x7e0   :  { %13818 = vst [vmem:[#allocation118_spill] sm:$0xff] %v11506_v62  ;;  %4723 = vmatmul.f32.vlgmr.msra.gmra.mxu0 %v11506_v62  ;;  %4746 = vmatmul.f32.vlgmr.msra.gmra.mxu1 %v11506_v62  ;;  %v4624_v16 = vadd.f32 %v4622_v46, %v4620_v25  ;;  %v3854_v0 = vsel %vm8088_vm4, %v13850_v56, %v13849_v9  ;;  %v11799_v56 = vld [vmem:[#allocation14 + $0xa8] sm:$0xff]  ;;  %v11801_v9 = vld [vmem:[#allocation14 + $0xb0] sm:$0xff]  ;;  %v11849_v51 = vld [vmem:[#allocation14 + $0x40] sm:$0xff] }
 0x7e1   :  { %4769 = vmatmul.f32.vlgmr.msra.gmra.mxu2 %v11506_v62  ;;  %4792 = vmatmul.f32.vlgmr.msra.gmra.mxu3 %v11506_v62  ;;  %v4612_v26 = vsel %vm4611_vm14, %v11477_v19, %v4608_v23  ;;  %v13852_v23 = vld [vmem:[#allocation53_spill] sm:$0xff]  ;;  %13880 = vst [vmem:[#allocation94_spill] sm:$0xff] %v11799_v56  ;;  %v11813_v28 = vld [vmem:[#allocation14 + $0x88] sm:$0xff] }
 0x7e2   :  { %7194 = vtanh.f32 %v4624_v16  ;;  %v11523_v34 = vsel %vm13824_vm15, %v4624_v16, %v4328_v54  ;;  %5091 = vmatpush.msrb.mxu3 %v13826_v10  ;;  %5046 = vmatpush.msrb.mxu1 %v13828_v48  ;;  %v4617_v29 = vsel %vm4614_vm10, %v4616_v43, %v4612_v26  ;;  %v3855_v50 = vsel %vm121_vm1, %v13853_v61, %v13852_v23  ;;  %v13856_v48 = vld [vmem:[#allocation117_spill] sm:$0xff] }
 0x7e3   :  { %5069 = vmatpush.msrb.mxu2 %v13829_v1  ;;  %5024 = vmatpush.msrb.mxu0 %v11287_v27  ;;  %v13838_v27 = vld [vmem:[#allocation97_spill] sm:$0xff]  ;;  %v3856_v10 = vsel %vm8051_vm2, %v13855_v14, %v13854_v39  ;;  %v13857_v1 = vld [vmem:[#allocation115_spill] sm:$0xff]  ;;  %13881 = vst [vmem:[#allocation27_spill] sm:$0xff] %v11801_v9 }
 0x7e4   :  { %5092 = vmatpush.msrb.mxu3 %v13830_v13  ;;  %5047 = vmatpush.msrb.mxu1 %v13831_v59  ;;  %v11547_v22 = vsel %vm8525_vm7, %v13838_v27, 0.0  ;;  %v3853_v13 = vsel %vm8084_vm3, %v13857_v1, %v13856_v48  ;;  %v11797_v48 = vld [vmem:[#allocation14 + $0xa0] sm:$0xff]  ;;  %13884 = vst [vmem:[#allocation34_spill] sm:$0xff] %v11813_v28  ;;  %v11815_v47 = vld [vmem:[#allocation14 + $0x90] sm:$0xff] }
 0x7e5   :  { %5070 = vmatpush.msrb.mxu2 %v13832_v60  ;;  %5025 = vmatpush.msrb.mxu0 %v13834_v20  ;;  %13839 = vst [vmem:[#allocation96_spill] sm:$0xff] %v11547_v22 }
 0x7e6   :  { %5093 = vmatpush.msrb.mxu3 %v13833_v18  ;;  %5048 = vmatpush.msrb.mxu1 %v13835_v57  ;;  %13879 = vst [vmem:[#allocation95_spill] sm:$0xff] %v11797_v48 }
 0x7e7   :  { %5071 = vmatpush.msrb.mxu2 %v13836_v35  ;;  %5026 = vmatpush.msrb.mxu0 %v11317_v52  ;;  %v13843_v52 = vld [vmem:[#allocation112_spill] sm:$0xff]  ;;  %13885 = vst [vmem:[#allocation41_spill] sm:$0xff] %v11815_v47 }
 0x7e8   :  { %v7195_v44 = vpop.eup %7194  ;;  %5094 = vmatpush.msrb.mxu3 %v13837_v6  ;;  %5049 = vmatpush.msrb.mxu1 %v11323_v40  ;;  %v13844_v40 = vld [vmem:[#allocation40_spill] sm:$0xff]  ;;  %v13858_v6 = vld [vmem:[#allocation38_spill] sm:$0xff]  ;;  %13897 = vst [vmem:[#allocation48_spill] sm:$0xff] %v11849_v51 }
 0x7e9   :  { %v4628_v19 = vmul.f32 %v7195_v44, %v4617_v29  ;;  %5072 = vmatpush.msrb.mxu2 %v11325_v45  ;;  %v3851_v45 = vsel %vm121_vm1, %v13844_v40, %v13843_v52 }
 0x7ea   :  { %5095 = vmatpush.msrb.mxu3 %v13840_v53 }
 0x7eb   :  { %v11555_v32 = vsel %vm13841_vm12, %v4628_v19, %v11547_v22  ;;  %v13859_v19 = vld [vmem:[#allocation23_spill] sm:$0xff]  ;;  %v11759_v22 = vld [vmem:[#allocation14 + $0x108] sm:$0xff] }
 0x7ec   :  { %13842 = vst [vmem:[#allocation98_spill] sm:$0xff] %v11555_v32  ;;  %4726 = vmatmul.f32.gmra.mxu0 %v11555_v32  ;;  %4749 = vmatmul.f32.gmra.mxu1 %v11555_v32  ;;  %v3858_v27 = vsel %vm8088_vm4, %v13859_v19, %v13858_v6  ;;  %v11783_v19 = vld [vmem:[#allocation14 + $0xc8] sm:$0xff]  ;;  %v11785_v6 = vld [vmem:[#allocation14 + $0xd0] sm:$0xff] }
 0x7ed   :  { %4772 = vmatmul.f32.gmra.mxu2 %v11555_v32  ;;  %4795 = vmatmul.f32.gmra.mxu3 %v11555_v32  ;;  %13877 = vst [vmem:[#allocation22_spill] sm:$0xff] %v11785_v6 }
 0x85d   :  { %v4724_v17 = vpop.f32.mrf.mxu0  ;;  %v4747_v21 = vpop.f32.mrf.mxu1 }
 0x85e   :  { %v4799_v37 = vadd.f32 %v4724_v17, %v3851_v45  ;;  %v4800_v31 = vadd.f32 %v4747_v21, %v3852_v5 }
 0x860   :  { %v6814_v49 = vmul.f32 -1.442695, %v4799_v37  ;;  %v6816_v3 = vmul.f32 -1.442695, %v4800_v31 }
 0x862   :  { %7196 = vpow2.f32 %v6814_v49 }
 0x863   :  { %7198 = vpow2.f32 %v6816_v3 }
 0x864   :  { %v4793_v63 = vpop.f32.mrf.mxu3  ;;  %v4770_v16 = vpop.f32.mrf.mxu2 }
 0x865   :  { %v4802_v54 = vadd.f32 %v4793_v63, %v3854_v0  ;;  %v4801_v59 = vadd.f32 %v4770_v16, %v3853_v13 }
 0x867   :  { %v6818_v2 = vmul.f32 -1.442695, %v4802_v54 }
 0x868   :  { %v7197_v46 = vpop.eup %7196 }
 0x869   :  { %v7199_v33 = vpop.eup %7198  ;;  %v4813_v25 = vadd.f32 1.0, %v7197_v46  ;;  %7200 = vpow2.f32 %v6818_v2  ;;  %v4727_v4 = vpop.f32.mrf.mxu0 }
 0x86a   :  { %v4851_v55 = vadd.f32 1.0, %v7199_v33  ;;  %v4750_v15 = vpop.f32.mrf.mxu1  ;;  %v4803_v38 = vadd.f32 %v4727_v4, %v3855_v50 }
 0x86b   :  { %7202 = vrcp.f32 %v4813_v25  ;;  %v4804_v8 = vadd.f32 %v4750_v15, %v3856_v10  ;;  %v4824_v17 = vand.u32 2147483647, %v4813_v25  ;;  %v4826_v5 = vand.u32 2147483648, %v4813_v25 }
 0x86c   :  { %7204 = vrcp.f32 %v4851_v55  ;;  %v6815_v43 = vmul.f32 -1.442695, %v4803_v38  ;;  %v4864_v45 = vand.u32 2147483648, %v4851_v55  ;;  %v4862_v37 = vand.u32 2147483647, %v4851_v55 }
 0x86d   :  { %v6817_v18 = vmul.f32 -1.442695, %v4804_v8  ;;  %vm4820_vm11 = vweird.f32 %v4813_v25  ;;  %vm4858_vm13 = vweird.f32 %v4851_v55  ;;  %vm4825_vm8 = vcmp.eq.f32.partialorder %v4824_v17, 8.507059e+37 }
 0x86e   :  { %7206 = vpow2.f32 %v6815_v43  ;;  %v4827_v46 = vor.u32 1.1754944e-38, %v4826_v5  ;;  %v4865_v16 = vor.u32 1.1754944e-38, %v4864_v45  ;;  %vm4863_vm15 = vcmp.eq.f32.partialorder %v4862_v37, 8.507059e+37  ;;  %v13864_v37 = vld [vmem:[#allocation99_spill] sm:$0xff] }
 0x86f   :  { %v7201_v26 = vpop.eup %7200  ;;  %vm13865_vm12 = vcmp.gt.s32.totalorder %v13802_v58, %v13864_v37 }
 0x870   :  { %v11585_v60 = vadd.f32 1.0, %v7201_v26  ;;  %v4796_v57 = vpop.f32.mrf.mxu3  ;;  %v4773_v26 = vpop.f32.mrf.mxu2 }
 0x871   :  { %v7203_v20 = vpop.eup %7202  ;;  %v4806_v52 = vadd.f32 %v4796_v57, %v3858_v27 }
 0x872   :  { %v7205_v44 = vpop.eup %7204  ;;  %v4816_v29 = vmul.f32 %v7203_v20, %v4813_v25  ;;  %7208 = vrcp.f32 %v11585_v60  ;;  %vm4821_vm7 = vweird.f32 %v7203_v20  ;;  %vm4898_vm14 = vweird.f32 %v11585_v60 }
 0x873   :  { %v4854_v35 = vmul.f32 %v7205_v44, %v4851_v55  ;;  %7210 = vtanh.f32 %v4801_v59  ;;  %v6819_v31 = vmul.f32 -1.442695, %v4806_v52  ;;  %vm4859_vm9 = vweird.f32 %v7205_v44  ;;  %vm4822_vm0 = vmor %vm4820_vm11, %vm4821_vm7 }
 0x874   :  { %v4817_v53 = vsub.f32 1.0, %v4816_v29  ;;  %7212 = vpow2.f32 %v6817_v18  ;;  %v7207_v49 = vpop.eup %7206  ;;  %vm4860_vm5 = vmor %vm4858_vm13, %vm4859_vm9  ;;  %v13860_v18 = vld [vmem:[#allocation32_spill] sm:$0xff] }
 0x875   :  { %v4855_v40 = vsub.f32 1.0, %v4854_v35  ;;  %v11592_v54 = vadd.f32 1.0, %v7207_v49  ;;  %7214 = vpow2.f32 %v6819_v31 }
 0x876   :  { %v4818_v21 = vmul.f32 %v7203_v20, %v4817_v53  ;;  %v4904_v53 = vand.u32 2147483648, %v11585_v60 }
 0x877   :  { %v4856_v3 = vmul.f32 %v7205_v44, %v4855_v40  ;;  %7216 = vrcp.f32 %v11592_v54  ;;  %v4902_v40 = vand.u32 2147483647, %v11585_v60  ;;  %vm4835_vm11 = vweird.f32 %v11592_v54 }
 0x878   :  { %v7209_v0 = vpop.eup %7208  ;;  %v4819_v63 = vadd.f32 %v7203_v20, %v4818_v21  ;;  %v4841_v21 = vand.u32 2147483648, %v11592_v54 }
 0x879   :  { %v7211_v2 = vpop.eup %7210  ;;  %v4857_v33 = vadd.f32 %v7205_v44, %v4856_v3  ;;  %v4894_v4 = vmul.f32 %v7209_v0, %v11585_v60  ;;  %vm4899_vm6 = vweird.f32 %v7209_v0  ;;  %v4905_v3 = vor.u32 1.1754944e-38, %v4904_v53 }
 0x87a   :  { %v7213_v15 = vpop.eup %7212  ;;  %v4823_v23 = vsel %vm4822_vm0, %v7203_v20, %v4819_v63  ;;  %v13861_v20 = vld [vmem:[#allocation25_spill] sm:$0xff]  ;;  %vm11611_vm10 = vmor %vm4898_vm14, %vm4899_vm6  ;;  %vm4903_vm9 = vcmp.eq.f32.partialorder %v4902_v40, 8.507059e+37 }
 0x87b   :  { %v4828_v25 = vsel %vm4825_vm8, %v4827_v46, %v4823_v23  ;;  %v4861_v55 = vsel %vm4860_vm5, %v7205_v44, %v4857_v33  ;;  %v4895_v61 = vsub.f32 1.0, %v4894_v4  ;;  %v11596_v50 = vadd.f32 1.0, %v7213_v15  ;;  %v7215_v59 = vpop.eup %7214 }
 0x87c   :  { %v4866_v10 = vsel %vm4863_vm15, %v4865_v16, %v4861_v55  ;;  %v4925_v38 = vmul.f32 %v7211_v2, %v4828_v25  ;;  %v3857_v57 = vsel %vm8084_vm3, %v13861_v20, %v13860_v18  ;;  %v11604_v29 = vadd.f32 1.0, %v7215_v59  ;;  %vm13866_vm15 = vmmov %vm13865_vm12  ;;  %v11781_v18 = vld [vmem:[#allocation14 + $0xc0] sm:$0xff] }
 0x87d   :  { %v4923_v8 = vmul.f32 %v4866_v10, %v11439_v24  ;;  %v4896_v13 = vmul.f32 %v7209_v0, %v4895_v61  ;;  %7218 = vrcp.f32 %v11596_v50  ;;  %v7217_v44 = vpop.eup %7216  ;;  %v4805_v27 = vadd.f32 %v4773_v26, %v3857_v57 }
 0x87e   :  { %v4831_v52 = vmul.f32 %v7217_v44, %v11592_v54  ;;  %vm4836_vm7 = vweird.f32 %v7217_v44  ;;  %v4839_v2 = vand.u32 2147483647, %v11592_v54  ;;  %v4879_v4 = vand.u32 2147483648, %v11596_v50 }
 0x87f   :  { %v4927_v43 = vadd.f32 %v4925_v38, %v4923_v8  ;;  %v4897_v35 = vadd.f32 %v7209_v0, %v4896_v13  ;;  %v4842_v15 = vor.u32 1.1754944e-38, %v4841_v21  ;;  %vm4837_vm0 = vmor %vm4835_vm11, %vm4836_vm7  ;;  %v4877_v25 = vand.u32 2147483647, %v11596_v50 }
 0x880   :  { %v4832_v5 = vsub.f32 1.0, %v4831_v52  ;;  %vm4840_vm8 = vcmp.eq.f32.partialorder %v4839_v2, 8.507059e+37  ;;  %vm4873_vm5 = vweird.f32 %v11596_v50  ;;  %v4880_v26 = vor.u32 1.1754944e-38, %v4879_v4  ;;  %v11673_v2 = vld [vmem:[#allocation14 + $0x1c0] sm:$0xff]  ;;  %v11681_v4 = vld [vmem:[#allocation14 + $0x1d8] sm:$0xff] }
 0x881   :  { %7220 = vtanh.f32 %v4927_v43  ;;  %v11620_v31 = vsel %vm13865_vm12, %v4927_v43, %v11439_v24  ;;  %v4901_v49 = vsel %vm11611_vm10, %v7209_v0, %v4897_v35  ;;  %vm4878_vm14 = vcmp.eq.f32.partialorder %v4877_v25, 8.507059e+37  ;;  %v11699_v25 = vld [vmem:[#allocation14 + $0x188] sm:$0xff] }
 0x882   :  { %7222 = vrcp.f32 %v11604_v29  ;;  %v4833_v63 = vmul.f32 %v7217_v44, %v4832_v5  ;;  %v4906_v16 = vsel %vm4903_vm9, %v4905_v3, %v4901_v49  ;;  %v4919_v52 = vand.u32 2147483648, %v11604_v29 }
 0x883   :  { %v7219_v45 = vpop.eup %7218  ;;  %7224 = vtanh.f32 %v4805_v27  ;;  %vm13867_vm12 = vcmp.gt.s32.totalorder %v13823_v7, %v13864_v37  ;;  %vm4913_vm7 = vweird.f32 %v11604_v29  ;;  %v11669_v37 = vld [vmem:[#allocation14 + $0x1f8] sm:$0xff]  ;;  %v13890_v7 = vld [vmem:[#allocation104_spill] sm:$0xff] }
 0x884   :  { %v4869_v60 = vmul.f32 %v7219_v45, %v11596_v50  ;;  %v4834_v24 = vadd.f32 %v7217_v44, %v4833_v63  ;;  %vm4874_vm13 = vweird.f32 %v7219_v45  ;;  %v4920_v5 = vor.u32 1.1754944e-38, %v4919_v52  ;;  %v11665_v63 = vld [vmem:[#allocation14 + $0x1f0] sm:$0xff]  ;;  %5384 = vmatpush.msra.mxu3 %v11669_v37  ;;  %v11725_v52 = vld [vmem:[#allocation14 + $0x178] sm:$0xff] }
 0x885   :  { %vm4875_vm6 = vmor %vm4873_vm5, %vm4874_vm13  ;;  %5361 = vmatpush.msra.mxu2 %v11665_v63 }
 0x886   :  { %v4870_v46 = vsub.f32 1.0, %v4869_v60  ;;  %v4838_v61 = vsel %vm4837_vm0, %v7217_v44, %v4834_v24  ;;  %vm13869_vm13 = vmmov %vm13867_vm12  ;;  %5385 = vmatpush.msra.mxu3 %v11681_v4  ;;  %v11685_v24 = vld [vmem:[#allocation14 + $0x1a0] sm:$0xff] }
 0x887   :  { %v7221_v33 = vpop.eup %7220  ;;  %v4843_v54 = vsel %vm4840_vm8, %v4842_v15, %v4838_v61  ;;  %v11687_v15 = vld [vmem:[#allocation14 + $0x1a8] sm:$0xff]  ;;  %v13871_v61 = vld [vmem:[#allocation49_spill] sm:$0xff] }
 0x888   :  { %v7223_v23 = vpop.eup %7222  ;;  %v4871_v0 = vmul.f32 %v7219_v45, %v4870_v46  ;;  %v4931_v55 = vmul.f32 %v7221_v33, %v4906_v16  ;;  %v11675_v46 = vld [vmem:[#allocation14 + $0x1c8] sm:$0xff]  ;;  %v11677_v33 = vld [vmem:[#allocation14 + $0x1d0] sm:$0xff] }
 0x889   :  { %v4909_v10 = vmul.f32 %v7223_v23, %v11604_v29  ;;  %v7225_v38 = vpop.eup %7224  ;;  %vm4914_vm10 = vweird.f32 %v7223_v23  ;;  %5362 = vmatpush.msra.mxu2 %v11677_v33  ;;  %v11689_v16 = vld [vmem:[#allocation14 + $0x1b0] sm:$0xff] }
 0x88a   :  { %v4872_v8 = vadd.f32 %v7219_v45, %v4871_v0  ;;  %v11635_v13 = vsel %vm13866_vm15, %v4931_v55, %v11506_v62  ;;  %v4926_v59 = vmul.f32 %v7225_v38, %v4843_v54  ;;  %vm4915_vm9 = vmor %vm4913_vm7, %vm4914_vm10  ;;  %v11697_v0 = vld [vmem:[#allocation14 + $0x180] sm:$0xff]  ;;  %v11701_v55 = vld [vmem:[#allocation14 + $0x190] sm:$0xff] }
 0x88b   :  { %v4910_v43 = vsub.f32 1.0, %v4909_v10  ;;  %5027 = vmatmul.f32.vlgmr.msrb.gmra.mxu0 %v11635_v13  ;;  %5050 = vmatmul.f32.vlgmr.msrb.gmra.mxu1 %v11635_v13  ;;  %v13872_v10 = vld [vmem:[#allocation54_spill] sm:$0xff]  ;;  %v11769_v62 = vld [vmem:[#allocation14 + $0xe0] sm:$0xff] }
 0x88c   :  { %v4876_v57 = vsel %vm4875_vm6, %v7219_v45, %v4872_v8  ;;  %5073 = vmatmul.f32.vlgmr.msrb.gmra.mxu2 %v11635_v13  ;;  %5096 = vmatmul.f32.vlgmr.msrb.gmra.mxu3 %v11635_v13  ;;  %v4917_v45 = vand.u32 2147483647, %v11604_v29  ;;  %v11663_v29 = vld [vmem:[#allocation14 + $0x1e8] sm:$0xff]  ;;  %v3883_v38 = vsel %vm121_vm1, %v13872_v10, %v13871_v61  ;;  %v13873_v8 = vld [vmem:[#allocation47_spill] sm:$0xff] }
 0x88d   :  { %v4881_v50 = vsel %vm4878_vm14, %v4880_v26, %v4876_v57  ;;  %v4911_v44 = vmul.f32 %v7223_v23, %v4910_v43  ;;  %5338 = vmatpush.msra.mxu1 %v11663_v29  ;;  %5363 = vmatpush.msra.mxu2 %v11689_v16  ;;  %v13874_v26 = vld [vmem:[#allocation52_spill] sm:$0xff]  ;;  %v11713_v57 = vld [vmem:[#allocation14 + $0x198] sm:$0xff]  ;;  %v11741_v61 = vld [vmem:[#allocation14 + $0x120] sm:$0xff] }
 0x88e   :  { %v4924_v35 = vmul.f32 %v4881_v50, %v11523_v34  ;;  %vm4918_vm11 = vcmp.eq.f32.partialorder %v4917_v45, 8.507059e+37  ;;  %v11743_v10 = vld [vmem:[#allocation14 + $0x128] sm:$0xff] }
 0x88f   :  { %v4912_v53 = vadd.f32 %v7223_v23, %v4911_v44  ;;  %5339 = vmatpush.msra.mxu1 %v11675_v46  ;;  %5364 = vmatpush.msra.mxu2 %v11701_v55 }
 0x890   :  { %v4928_v27 = vadd.f32 %v4926_v59, %v4924_v35  ;;  %v3884_v59 = vsel %vm8051_vm2, %v13874_v26, %v13873_v8  ;;  %v11717_v35 = vld [vmem:[#allocation14 + $0x160] sm:$0xff]  ;;  %v13888_v26 = vld [vmem:[#allocation57_spill] sm:$0xff] }
 0x891   :  { %v4916_v17 = vsel %vm4915_vm9, %v7223_v23, %v4912_v53  ;;  %5340 = vmatpush.msra.mxu1 %v11687_v15  ;;  %v11693_v23 = vld [vmem:[#allocation14 + $0x1b8] sm:$0xff]  ;;  %v11721_v53 = vld [vmem:[#allocation14 + $0x170] sm:$0xff] }
 0x892   :  { %7226 = vtanh.f32 %v4928_v27  ;;  %v11647_v40 = vsel %vm13867_vm12, %v4928_v27, %v11523_v34  ;;  %v4921_v49 = vsel %vm4918_vm11, %v4920_v5, %v4916_v17  ;;  %v11661_v34 = vld [vmem:[#allocation14 + $0x1e0] sm:$0xff]  ;;  %5386 = vmatpush.msra.mxu3 %v11693_v23  ;;  %v11719_v27 = vld [vmem:[#allocation14 + $0x168] sm:$0xff]  ;;  %5365 = vmatpush.msra.mxu2 %v11721_v53 }
 0x893   :  { %13868 = vst [vmem:[#allocation100_spill] sm:$0xff] %v11647_v40  ;;  %5315 = vmatpush.msra.mxu0 %v11661_v34  ;;  %5341 = vmatpush.msra.mxu1 %v11699_v25  ;;  %v11729_v5 = vld [vmem:[#allocation14 + $0x140] sm:$0xff] }
 0x894   :  { %5387 = vmatpush.msra.mxu3 %v11713_v57 }
 0x895   :  { %5316 = vmatpush.msra.mxu0 %v11673_v2  ;;  %5342 = vmatpush.msra.mxu1 %v11719_v27 }
 0x896   :  { %5388 = vmatpush.msra.mxu3 %v11725_v52 }
 0x897   :  { %5317 = vmatpush.msra.mxu0 %v11685_v24 }
 0x898   :  { %v7227_v21 = vpop.eup %7226 }
 0x899   :  { %v4932_v60 = vmul.f32 %v7227_v21, %v4921_v49  ;;  %5318 = vmatpush.msra.mxu0 %v11697_v0  ;;  %v11731_v21 = vld [vmem:[#allocation14 + $0x148] sm:$0xff]  ;;  %v11735_v49 = vld [vmem:[#allocation14 + $0x150] sm:$0xff] }
 0x89a   :  { %5343 = vmatpush.msra.mxu1 %v11731_v21  ;;  %5366 = vmatpush.msra.mxu2 %v11735_v49 }
 0x89b   :  { %v11655_v3 = vsel %vm13869_vm13, %v4932_v60, %v11555_v32  ;;  %5319 = vmatpush.msra.mxu0 %v11717_v35  ;;  %v11737_v60 = vld [vmem:[#allocation14 + $0x158] sm:$0xff] }
 0x89c   :  { %13870 = vst [vmem:[#allocation102_spill] sm:$0xff] %v11655_v3  ;;  %5030 = vmatmul.f32.gmra.mxu0 %v11655_v3  ;;  %5053 = vmatmul.f32.gmra.mxu1 %v11655_v3  ;;  %v11765_v32 = vld [vmem:[#allocation14 + $0x118] sm:$0xff] }
 0x89d   :  { %5076 = vmatmul.f32.gmra.mxu2 %v11655_v3  ;;  %5099 = vmatmul.f32.gmra.mxu3 %v11655_v3  ;;  %v13889_v3 = vld [vmem:[#allocation106_spill] sm:$0xff] }
 0x89e   :  { %5320 = vmatpush.msra.mxu0 %v11729_v5  ;;  %5389 = vmatpush.msra.mxu3 %v11737_v60  ;;  %v3887_v40 = vsel %vm121_vm1, %v13890_v7, %v13889_v3 }
 0x89f   :  { %5344 = vmatpush.msra.mxu1 %v11743_v10 }
 0x8a0   :  { %5321 = vmatpush.msra.mxu0 %v11741_v61 }
 0x8a1   :  { %5345 = vmatpush.msra.mxu1 %v11759_v22 }
 0x8a3   :  { %5346 = vmatpush.msra.mxu1 %v11771_v42 }
 0x8a5   :  { %5347 = vmatpush.msra.mxu1 %v11783_v19 }
 0x8a7   :  { %5348 = vmatpush.msra.mxu1 %v11799_v56  ;;  %v13892_v56 = vld [vmem:[#allocation105_spill] sm:$0xff] }
 0x8a9   :  { %5349 = vmatpush.msra.mxu1 %v11813_v28  ;;  %v11835_v28 = vld [vmem:[#allocation14 + $0x60] sm:$0xff] }
 0x8aa   :  { %13893 = vst [vmem:[#allocation46_spill] sm:$0xff] %v11835_v28 }
 0x908   :  { %v5028_v54 = vpop.f32.mrf.mxu0  ;;  %v5051_v43 = vpop.f32.mrf.mxu1 }
 0x909   :  { %v5103_v50 = vadd.f32 %v5028_v54, %v3883_v38  ;;  %v5104_v44 = vadd.f32 %v5051_v43, %v3884_v59  ;;  %v11745_v38 = vld [vmem:[#allocation14 + $0x130] sm:$0xff]  ;;  %v11749_v54 = vld [vmem:[#allocation14 + $0x138] sm:$0xff]  ;;  %v13875_v59 = vld [vmem:[#allocation103_spill] sm:$0xff] }
 0x90a   :  { %v13876_v43 = vld [vmem:[#allocation58_spill] sm:$0xff]  ;;  %5367 = vmatpush.msra.mxu2 %v11745_v38  ;;  %5390 = vmatpush.msra.mxu3 %v11749_v54 }
 0x90b   :  { %v6820_v45 = vmul.f32 -1.442695, %v5103_v50  ;;  %v6822_v17 = vmul.f32 -1.442695, %v5104_v44  ;;  %v3886_v50 = vsel %vm8088_vm4, %v13876_v43, %v13875_v59  ;;  %v11819_v43 = vld [vmem:[#allocation14 + $0x98] sm:$0xff]  ;;  %v13887_v59 = vld [vmem:[#allocation56_spill] sm:$0xff] }
 0x90c   :  { %5391 = vmatpush.msra.mxu3 %v11765_v32  ;;  %13886 = vst [vmem:[#allocation39_spill] sm:$0xff] %v11819_v43  ;;  %v3885_v8 = vsel %vm8084_vm3, %v13888_v26, %v13887_v59  ;;  %v11839_v26 = vld [vmem:[#allocation14 + $0x70] sm:$0xff] }
 0x90d   :  { %7228 = vpow2.f32 %v6820_v45  ;;  %v11757_v45 = vld [vmem:[#allocation14 + $0x100] sm:$0xff]  ;;  %13895 = vst [vmem:[#allocation43_spill] sm:$0xff] %v11839_v26 }
 0x90e   :  { %7230 = vpow2.f32 %v6822_v17  ;;  %v11761_v17 = vld [vmem:[#allocation14 + $0x110] sm:$0xff]  ;;  %5322 = vmatpush.msra.mxu0 %v11757_v45 }
 0x90f   :  { %v5097_v44 = vpop.f32.mrf.mxu3  ;;  %5368 = vmatpush.msra.mxu2 %v11761_v17 }
 0x910   :  { %v5106_v30 = vadd.f32 %v5097_v44, %v3886_v50  ;;  %5323 = vmatpush.msra.mxu0 %v11769_v62  ;;  %v11777_v50 = vld [vmem:[#allocation14 + $0xf8] sm:$0xff] }
 0x911   :  { %5369 = vmatpush.msra.mxu2 %v11773_v12  ;;  %5392 = vmatpush.msra.mxu3 %v11777_v50 }
 0x912   :  { %v6824_v20 = vmul.f32 -1.442695, %v5106_v30  ;;  %5324 = vmatpush.msra.mxu0 %v11781_v18  ;;  %v11791_v30 = vld [vmem:[#allocation14 + $0xd8] sm:$0xff] }
 0x913   :  { %v7229_v44 = vpop.eup %7228  ;;  %13878 = vst [vmem:[#allocation35_spill] sm:$0xff] %v11791_v30  ;;  %5370 = vmatpush.msra.mxu2 %v11785_v6  ;;  %5393 = vmatpush.msra.mxu3 %v11791_v30  ;;  %v11837_v30 = vld [vmem:[#allocation14 + $0x68] sm:$0xff] }
 0x914   :  { %v7231_v14 = vpop.eup %7230  ;;  %v11787_v39 = vadd.f32 1.0, %v7229_v44  ;;  %7232 = vpow2.f32 %v6824_v20  ;;  %5325 = vmatpush.msra.mxu0 %v11797_v48  ;;  %v11806_v20 = vld [vmem:[#allocation14 + $0xb8] sm:$0xff]  ;;  %v11811_v44 = vld [vmem:[#allocation14 + $0x80] sm:$0xff]  ;;  %13894 = vst [vmem:[#allocation45_spill] sm:$0xff] %v11837_v30  ;;  %5350 = vmatpush.msra.mxu1 %v11837_v30  ;;  %v13905_v30 = vld [vmem:[#allocation101_spill] sm:$0xff] }
 0x915   :  { %v11793_v1 = vadd.f32 1.0, %v7231_v14  ;;  %13882 = vst [vmem:[#allocation37_spill] sm:$0xff] %v11806_v20  ;;  %v5074_v14 = vpop.f32.mrf.mxu2  ;;  %5371 = vmatpush.msra.mxu2 %v11801_v9  ;;  %5394 = vmatpush.msra.mxu3 %v11806_v20  ;;  %v13891_v9 = vld [vmem:[#allocation90_spill] sm:$0xff] }
 0x916   :  { %7234 = vrcp.f32 %v11787_v39  ;;  %13883 = vst [vmem:[#allocation36_spill] sm:$0xff] %v11811_v44  ;;  %5326 = vmatpush.msra.mxu0 %v11811_v44  ;;  %v3888_v44 = vsel %vm8051_vm2, %v13892_v56, %v13891_v9  ;;  %v5105_v41 = vadd.f32 %v5074_v14, %v3885_v8  ;;  %v11843_v56 = vld [vmem:[#allocation14 + $0x78] sm:$0xff]  ;;  %vm5124_vm15 = vweird.f32 %v11787_v39 }
 0x917   :  { %7236 = vrcp.f32 %v11793_v1  ;;  %5372 = vmatpush.msra.mxu2 %v11815_v47  ;;  %5395 = vmatpush.msra.mxu3 %v11819_v43  ;;  %13896 = vst [vmem:[#allocation50_spill] sm:$0xff] %v11843_v56  ;;  %v11851_v43 = vld [vmem:[#allocation14 + $0x48] sm:$0xff]  ;;  %v11853_v47 = vld [vmem:[#allocation14 + $0x50] sm:$0xff]  ;;  %v5168_v6 = vand.u32 2147483648, %v11793_v1  ;;  %v5166_v36 = vand.u32 2147483647, %v11793_v1  ;;  %vm5162_vm5 = vweird.f32 %v11793_v1 }
 0x918   :  { %5327 = vmatpush.msra.mxu0 %v11835_v28  ;;  %13898 = vst [vmem:[#allocation55_spill] sm:$0xff] %v11851_v43  ;;  %5351 = vmatpush.msra.mxu1 %v11851_v43 }
 0x919   :  { %v5031_v20 = vpop.f32.mrf.mxu0  ;;  %v5054_v48 = vpop.f32.mrf.mxu1  ;;  %5373 = vmatpush.msra.mxu2 %v11839_v26  ;;  %5396 = vmatpush.msra.mxu3 %v11843_v56  ;;  %13899 = vst [vmem:[#allocation28_spill] sm:$0xff] %v11853_v47  ;;  %v11880_v56 = vld [vmem:[#allocation14] sm:$0xff]  ;;  %v13904_v26 = vld [vmem:[#allocation110_spill] sm:$0xff]  ;;  %vm5167_vm12 = vcmp.eq.f32.partialorder %v5166_v36, 8.507059e+37 }
 0x91a   :  { %v7233_v59 = vpop.eup %7232  ;;  %v5107_v7 = vadd.f32 %v5031_v20, %v3887_v40  ;;  %v5108_v3 = vadd.f32 %v5054_v48, %v3888_v44  ;;  %5328 = vmatpush.msra.mxu0 %v11849_v51  ;;  %v11868_v44 = vld [vmem:[#allocation14 + $0x20] sm:$0xff]  ;;  %v11878_v51 = vld [vmem:[#allocation14 + $0x38] sm:$0xff]  ;;  %v3890_v28 = vsel %vm8088_vm4, %v13905_v30, %v13904_v26 }
 0x91b   :  { %v11845_v9 = vadd.f32 1.0, %v7233_v59  ;;  %v11859_v59 = vld [vmem:[#allocation14 + $0x58] sm:$0xff]  ;;  %5374 = vmatpush.msra.mxu2 %v11853_v47  ;;  %13901 = vst [vmem:[#allocation119_spill] sm:$0xff] %v11868_v44 }
 0x91c   :  { %v11855_v40 = vpop.eup %7234  ;;  %v6821_v48 = vmul.f32 -1.442695, %v5107_v7  ;;  %v6823_v8 = vmul.f32 -1.442695, %v5108_v3  ;;  %13900 = vst [vmem:[#allocation91_spill] sm:$0xff] %v11859_v59  ;;  %5397 = vmatpush.msra.mxu3 %v11859_v59  ;;  %v11870_v7 = vld [vmem:[#allocation14 + $0x28] sm:$0xff]  ;;  %5329 = vmatpush.msra.mxu0 %v11868_v44 }
 0x91d   :  { %v11861_v20 = vpop.eup %7236  ;;  %v5120_v14 = vmul.f32 %v11855_v40, %v11787_v39  ;;  %7238 = vrcp.f32 %v11845_v9  ;;  %13902 = vst [vmem:[#allocation120_spill] sm:$0xff] %v11870_v7  ;;  %v11872_v3 = vld [vmem:[#allocation14 + $0x30] sm:$0xff]  ;;  %5352 = vmatpush.msra.mxu1 %v11870_v7  ;;  %v5128_v59 = vand.u32 2147483647, %v11787_v39  ;;  %v11897_v30 = vld [vmem:[#allocation14 + $0x18] sm:$0xff]  ;;  %vm5125_vm0 = vweird.f32 %v11855_v40 }
 0x91e   :  { %v5158_v43 = vmul.f32 %v11861_v20, %v11793_v1  ;;  %7240 = vtanh.f32 %v5105_v41  ;;  %13903 = vst [vmem:[#allocation121_spill] sm:$0xff] %v11878_v51  ;;  %5375 = vmatpush.msra.mxu2 %v11872_v3  ;;  %5398 = vmatpush.msra.mxu3 %v11878_v51  ;;  %v11889_v41 = vld [vmem:[#allocation14 + $0x8] sm:$0xff]  ;;  %v11891_v7 = vld [vmem:[#allocation14 + $0x10] sm:$0xff]  ;;  %vm5163_vm8 = vweird.f32 %v11861_v20  ;;  %vm11917_vm6 = vmor %vm5124_vm15, %vm5125_vm0  ;;  %vm5202_vm9 = vweird.f32 %v11845_v9 }
 0x91f   :  { %v5121_v47 = vsub.f32 1.0, %v5120_v14  ;;  %7242 = vpow2.f32 %v6821_v48  ;;  %v5130_v14 = vand.u32 2147483648, %v11787_v39  ;;  %5330 = vmatpush.msra.mxu0 %v11880_v56  ;;  %5353 = vmatpush.msra.mxu1 %v11889_v41  ;;  %vm5129_vm14 = vcmp.eq.f32.partialorder %v5128_v59, 8.507059e+37  ;;  %vm5164_vm10 = vmor %vm5162_vm5, %vm5163_vm8 }
 0x920   :  { %v5159_v44 = vsub.f32 1.0, %v5158_v43  ;;  %7244 = vpow2.f32 %v6823_v8  ;;  %v5100_v48 = vpop.f32.mrf.mxu3  ;;  %5376 = vmatpush.msra.mxu2 %v11891_v7  ;;  %5399 = vmatpush.msra.mxu3 %v11897_v30  ;;  %v5169_v39 = vor.u32 1.1754944e-38, %v5168_v6 }
 0x921   :  { %v5122_v26 = vmul.f32 %v11855_v40, %v5121_v47  ;;  %v5110_v51 = vadd.f32 %v5100_v48, %v3890_v28  ;;  %5619 = vmatpush.msrb.mxu0 %v11661_v34  ;;  %5642 = vmatpush.msrb.mxu1 %v11663_v29  ;;  %v5131_v29 = vor.u32 1.1754944e-38, %v5130_v14 }
 0x922   :  { %v5160_v43 = vmul.f32 %v11861_v20, %v5159_v44  ;;  %5665 = vmatpush.msrb.mxu2 %v11665_v63  ;;  %5688 = vmatpush.msrb.mxu3 %v11669_v37 }
 0x923   :  { %v11908_v8 = vpop.eup %7238  ;;  %v5123_v47 = vadd.f32 %v11855_v40, %v5122_v26  ;;  %v6825_v28 = vmul.f32 -1.442695, %v5110_v51  ;;  %5620 = vmatpush.msrb.mxu0 %v11673_v2  ;;  %5643 = vmatpush.msrb.mxu1 %v11675_v46 }
 0x924   :  { %v7241_v44 = vpop.eup %7240  ;;  %v5161_v48 = vadd.f32 %v11861_v20, %v5160_v43  ;;  %v5198_v26 = vmul.f32 %v11908_v8, %v11845_v9  ;;  %5666 = vmatpush.msrb.mxu2 %v11677_v33  ;;  %5689 = vmatpush.msrb.mxu3 %v11681_v4  ;;  %vm5203_vm7 = vweird.f32 %v11908_v8 }
 0x925   :  { %v7243_v51 = vpop.eup %7242  ;;  %v5127_v63 = vsel %vm11917_vm6, %v11855_v40, %v5123_v47  ;;  %7246 = vpow2.f32 %v6825_v28  ;;  %5621 = vmatpush.msrb.mxu0 %v11685_v24  ;;  %5644 = vmatpush.msrb.mxu1 %v11687_v15  ;;  %v5077_v24 = vpop.f32.mrf.mxu2  ;;  %vm11979_vm13 = vmor %vm5202_vm9, %vm5203_vm7  ;;  %v13916_v28 = vld [vmem:[#allocation35_spill] sm:$0xff] }
 0x926   :  { %v7245_v37 = vpop.eup %7244  ;;  %v5132_v2 = vsel %vm5129_vm14, %v5131_v29, %v5127_v63  ;;  %v5165_v46 = vsel %vm5164_vm10, %v11861_v20, %v5161_v48  ;;  %v5199_v59 = vsub.f32 1.0, %v5198_v26  ;;  %v11936_v14 = vadd.f32 1.0, %v7243_v51  ;;  %5667 = vmatpush.msrb.mxu2 %v11689_v16  ;;  %5690 = vmatpush.msrb.mxu3 %v11693_v23  ;;  %v13917_v63 = vld [vmem:[#allocation95_spill] sm:$0xff] }
 0x927   :  { %v5170_v1 = vsel %vm5167_vm12, %v5169_v39, %v5165_v46  ;;  %v5229_v6 = vmul.f32 %v7241_v44, %v5132_v2  ;;  %v11940_v40 = vadd.f32 1.0, %v7245_v37  ;;  %5622 = vmatpush.msrb.mxu0 %v11697_v0  ;;  %5645 = vmatpush.msrb.mxu1 %v11699_v25  ;;  %v5208_v23 = vand.u32 2147483648, %v11845_v9  ;;  %v13908_v0 = vld [vmem:[#allocation109_spill] sm:$0xff]  ;;  %v13909_v25 = vld [vmem:[#allocation108_spill] sm:$0xff]  ;;  %v13918_v37 = vld [vmem:[#allocation94_spill] sm:$0xff] }
 0x928   :  { %v5227_v36 = vmul.f32 %v5170_v1, %v11620_v31  ;;  %v5200_v33 = vmul.f32 %v11908_v8, %v5199_v59  ;;  %7248 = vrcp.f32 %v11936_v14  ;;  %5668 = vmatpush.msrb.mxu2 %v11701_v55  ;;  %5691 = vmatpush.msrb.mxu3 %v11713_v57  ;;  %v3889_v55 = vsel %vm8084_vm3, %v13909_v25, %v13908_v0  ;;  %v13919_v59 = vld [vmem:[#allocation27_spill] sm:$0xff]  ;;  %v13921_v1 = vld [vmem:[#allocation100_spill] sm:$0xff] }
 0x929   :  { %7250 = vrcp.f32 %v11940_v40  ;;  %5623 = vmatpush.msrb.mxu0 %v11717_v35  ;;  %5646 = vmatpush.msrb.mxu1 %v11719_v27  ;;  %v5206_v57 = vand.u32 2147483647, %v11845_v9  ;;  %v5109_v35 = vadd.f32 %v5077_v24, %v3889_v55  ;;  %vm5139_vm15 = vweird.f32 %v11936_v14  ;;  %v13925_v24 = vld [vmem:[#allocation39_spill] sm:$0xff] }
 0x92a   :  { %v5231_v4 = vadd.f32 %v5229_v6, %v5227_v36  ;;  %v5201_v16 = vadd.f32 %v11908_v8, %v5200_v33  ;;  %5669 = vmatpush.msrb.mxu2 %v11721_v53  ;;  %5692 = vmatpush.msrb.mxu3 %v11725_v52  ;;  %v13910_v53 = vld [vmem:[#allocation24_spill] sm:$0xff]  ;;  %vm5177_vm14 = vweird.f32 %v11940_v40  ;;  %v13923_v33 = vld [vmem:[#allocation34_spill] sm:$0xff] }
 0x92b   :  { %v7247_v15 = vpop.eup %7246  ;;  %5624 = vmatpush.msrb.mxu0 %v11729_v5  ;;  %5647 = vmatpush.msrb.mxu1 %v11731_v21  ;;  %vm13911_vm11 = vcmp.gt.s32.totalorder %v13802_v58, %v13910_v53  ;;  %vm5207_vm0 = vcmp.eq.f32.partialorder %v5206_v57, 8.507059e+37  ;;  %v13922_v36 = vld [vmem:[#allocation36_spill] sm:$0xff]  ;;  %v13928_v57 = vld [vmem:[#allocation43_spill] sm:$0xff] }
 0x92c   :  { %7252 = vtanh.f32 %v5231_v4  ;;  %v11967_v27 = vadd.f32 1.0, %v7247_v15  ;;  %v11973_v52 = vsel %vm13911_vm11, %v5231_v4, %v11620_v31  ;;  %5670 = vmatpush.msrb.mxu2 %v11735_v49  ;;  %5693 = vmatpush.msrb.mxu3 %v11737_v60  ;;  %v5205_v31 = vsel %vm11979_vm13, %v11908_v8, %v5201_v16  ;;  %vm13914_vm6 = vmmov %vm13911_vm11  ;;  %v13924_v4 = vld [vmem:[#allocation41_spill] sm:$0xff]  ;;  %v13926_v16 = vld [vmem:[#allocation46_spill] sm:$0xff] }
 0x92d   :  { %5625 = vmatpush.msrb.mxu0 %v11741_v61  ;;  %5648 = vmatpush.msrb.mxu1 %v11743_v10  ;;  %v5209_v49 = vor.u32 1.1754944e-38, %v5208_v23  ;;  %v13927_v23 = vld [vmem:[#allocation45_spill] sm:$0xff]  ;;  %v13930_v5 = vld [vmem:[#allocation92_spill] sm:$0xff] }
 0x92e   :  { %v7249_v20 = vpop.eup %7248  ;;  %7254 = vrcp.f32 %v11967_v27  ;;  %5671 = vmatpush.msrb.mxu2 %v11745_v38  ;;  %5694 = vmatpush.msrb.mxu3 %v11749_v54  ;;  %v5183_v38 = vand.u32 2147483648, %v11940_v40  ;;  %v5145_v54 = vand.u32 2147483648, %v11936_v14  ;;  %vm13931_vm13 = vcmp.gt.s32.totalorder %v13930_v5, %v13910_v53 }
 0x92f   :  { %v7251_v9 = vpop.eup %7250  ;;  %v5135_v21 = vmul.f32 %v7249_v20, %v11936_v14  ;;  %5626 = vmatpush.msrb.mxu0 %v11757_v45  ;;  %5649 = vmatpush.msrb.mxu1 %v11759_v22  ;;  %7256 = vtanh.f32 %v5109_v35  ;;  %v5210_v8 = vsel %vm5207_vm0, %v5209_v49, %v5205_v31  ;;  %vm5140_vm8 = vweird.f32 %v7249_v20  ;;  %v13929_v35 = vld [vmem:[#allocation50_spill] sm:$0xff]  ;;  %v13932_v31 = vld [vmem:[#allocation48_spill] sm:$0xff] }
 0x930   :  { %v5173_v60 = vmul.f32 %v7251_v9, %v11940_v40  ;;  %5672 = vmatpush.msrb.mxu2 %v11761_v17  ;;  %5695 = vmatpush.msrb.mxu3 %v11765_v32  ;;  %v5143_v22 = vand.u32 2147483647, %v11936_v14  ;;  %vm5178_vm5 = vweird.f32 %v7251_v9  ;;  %v5181_v17 = vand.u32 2147483647, %v11940_v40  ;;  %vm5141_vm10 = vmor %vm5139_vm15, %vm5140_vm8  ;;  %v13920_v14 = vld [vmem:[#allocation37_spill] sm:$0xff] }
 0x931   :  { %v5136_v61 = vsub.f32 1.0, %v5135_v21  ;;  %5627 = vmatpush.msrb.mxu0 %v11769_v62  ;;  %5650 = vmatpush.msrb.mxu1 %v11771_v42  ;;  %vm5179_vm12 = vmor %vm5177_vm14, %vm5178_vm5  ;;  %v5184_v29 = vor.u32 1.1754944e-38, %v5183_v38  ;;  %v13933_v21 = vld [vmem:[#allocation55_spill] sm:$0xff]  ;;  %vm5217_vm0 = vweird.f32 %v11967_v27  ;;  %v5221_v49 = vand.u32 2147483647, %v11967_v27 }
 0x932   :  { %v7253_v10 = vpop.eup %7252  ;;  %v5174_v43 = vsub.f32 1.0, %v5173_v60  ;;  %5673 = vmatpush.msrb.mxu2 %v11773_v12  ;;  %5696 = vmatpush.msrb.mxu3 %v11777_v50  ;;  %v13915_v50 = vld [vmem:[#allocation22_spill] sm:$0xff]  ;;  %vm5144_vm7 = vcmp.eq.f32.partialorder %v5143_v22, 8.507059e+37  ;;  %vm5182_vm9 = vcmp.eq.f32.partialorder %v5181_v17, 8.507059e+37  ;;  %v13934_v60 = vld [vmem:[#allocation28_spill] sm:$0xff]  ;;  %vm13940_vm15 = vmmov %vm13931_vm13 }
 0x933   :  { %v5137_v45 = vmul.f32 %v7249_v20, %v5136_v61  ;;  %v5235_v47 = vmul.f32 %v7253_v10, %v5210_v8  ;;  %5628 = vmatpush.msrb.mxu0 %v11781_v18  ;;  %5651 = vmatpush.msrb.mxu1 %v11783_v19  ;;  %v5146_v19 = vor.u32 1.1754944e-38, %v5145_v54  ;;  %v13935_v61 = vld [vmem:[#allocation91_spill] sm:$0xff]  ;;  %v13938_v54 = vld [vmem:[#allocation121_spill] sm:$0xff]  ;;  %vm5222_vm5 = vcmp.eq.f32.partialorder %v5221_v49, 8.507059e+37 }
 0x934   :  { %v5175_v32 = vmul.f32 %v7251_v9, %v5174_v43  ;;  %v12007_v62 = vpop.eup %7254  ;;  %5674 = vmatpush.msrb.mxu2 %v13915_v50  ;;  %5697 = vmatpush.msrb.mxu3 %v13916_v28  ;;  %v13936_v10 = vld [vmem:[#allocation119_spill] sm:$0xff]  ;;  %v13937_v43 = vld [vmem:[#allocation120_spill] sm:$0xff] }
 0x935   :  { %v5138_v42 = vadd.f32 %v7249_v20, %v5137_v45  ;;  %v12014_v12 = vsel %vm13914_vm6, %v5235_v47, %v11635_v13  ;;  %v5213_v44 = vmul.f32 %v12007_v62, %v11967_v27  ;;  %v7257_v34 = vpop.eup %7256  ;;  %5629 = vmatpush.msrb.mxu0 %v13917_v63  ;;  %5652 = vmatpush.msrb.mxu1 %v13918_v37  ;;  %vm5218_vm11 = vweird.f32 %v12007_v62  ;;  %v13939_v47 = vld [vmem:[#allocation102_spill] sm:$0xff]  ;;  %v13943_v17 = vld [vmem:[#allocation47_spill] sm:$0xff] }
 0x936   :  { %v5176_v18 = vadd.f32 %v7251_v9, %v5175_v32  ;;  %5331 = vmatmul.f32.vlgmr.msra.gmra.mxu0 %v12014_v12  ;;  %5354 = vmatmul.f32.vlgmr.msra.gmra.mxu1 %v12014_v12  ;;  %vm5219_vm8 = vmor %vm5217_vm0, %vm5218_vm11  ;;  %vm6564_vm6 = vcmask 1040384  }
 0x937   :  { %v5142_v48 = vsel %vm5141_vm10, %v7249_v20, %v5138_v42  ;;  %5377 = vmatmul.f32.vlgmr.msra.gmra.mxu2 %v12014_v12  ;;  %5400 = vmatmul.f32.vlgmr.msra.gmra.mxu3 %v12014_v12  ;;  %v5214_v39 = vsub.f32 1.0, %v5213_v44  ;;  %v5223_v20 = vand.u32 2147483648, %v11967_v27 }
 0x938   :  { %v5147_v26 = vsel %vm5144_vm7, %v5146_v19, %v5142_v48  ;;  %v5180_v51 = vsel %vm5179_vm12, %v7251_v9, %v5176_v18  ;;  %5675 = vmatpush.msrb.mxu2 %v13919_v59  ;;  %5698 = vmatpush.msrb.mxu3 %v13920_v14  ;;  %v6489_v19 = vld [vmem:[%s12847_s9] sm:$0x1] }
 0x939   :  { %v5185_v2 = vsel %vm5182_vm9, %v5184_v29, %v5180_v51  ;;  %v5230_v46 = vmul.f32 %v7257_v34, %v5147_v26  ;;  %v5215_v40 = vmul.f32 %v12007_v62, %v5214_v39  ;;  %5630 = vmatpush.msrb.mxu0 %v13922_v36  ;;  %5653 = vmatpush.msrb.mxu1 %v13923_v33  ;;  %v5224_v8 = vor.u32 1.1754944e-38, %v5223_v20  ;;  %v13947_v29 = vld [vmem:[#allocation103_spill] sm:$0xff]  ;;  %v13948_v48 = vld [vmem:[#allocation58_spill] sm:$0xff]  ;;  %v13951_v36 = vld [vmem:[#allocation57_spill] sm:$0xff] }
 0x93a   :  { %v5228_v6 = vmul.f32 %v5185_v2, %v13921_v1  ;;  %5676 = vmatpush.msrb.mxu2 %v13924_v4  ;;  %5699 = vmatpush.msrb.mxu3 %v13925_v24  ;;  %v6565_v18 = vsel %vm6564_vm6, %v6489_v19, 0.0  ;;  %v13949_v26 = vsel %vm8088_vm4, %v13947_v29, %v13948_v48 }
 0x93b   :  { %5631 = vmatpush.msrb.mxu0 %v13926_v16  ;;  %5654 = vmatpush.msrb.mxu1 %v13927_v23  ;;  %v5216_v55 = vadd.f32 %v12007_v62, %v5215_v40  ;;  %v13950_v40 = vld [vmem:[#allocation56_spill] sm:$0xff]  ;;  %v13954_v23 = vld [vmem:[#allocation90_spill] sm:$0xff] }
 0x93c   :  { %v5232_v15 = vadd.f32 %v5230_v46, %v5228_v6  ;;  %5677 = vmatpush.msrb.mxu2 %v13928_v57  ;;  %5700 = vmatpush.msrb.mxu3 %v13929_v35  ;;  %v13952_v33 = vsel %vm8084_vm3, %v13950_v40, %v13951_v36 }
 0x93d   :  { %5632 = vmatpush.msrb.mxu0 %v13932_v31  ;;  %5655 = vmatpush.msrb.mxu1 %v13933_v21  ;;  %v5220_v38 = vsel %vm5219_vm8, %v12007_v62, %v5216_v55  ;;  %v13944_v62 = vld [vmem:[#allocation52_spill] sm:$0xff]  ;;  %v13955_v55 = vld [vmem:[#allocation105_spill] sm:$0xff] }
 0x93e   :  { %7258 = vtanh.f32 %v5232_v15  ;;  %v12048_v9 = vsel %vm13931_vm13, %v5232_v15, %v13921_v1  ;;  %5678 = vmatpush.msrb.mxu2 %v13934_v60  ;;  %5701 = vmatpush.msrb.mxu3 %v13935_v61  ;;  %v5225_v45 = vsel %vm5222_vm5, %v5224_v8, %v5220_v38  ;;  %v13945_v42 = vsel %vm8051_vm2, %v13943_v17, %v13944_v62  ;;  %v13953_v15 = vld [vmem:[#allocation107_spill] sm:$0xff] }
 0x93f   :  { %5633 = vmatpush.msrb.mxu0 %v13936_v10  ;;  %5656 = vmatpush.msrb.mxu1 %v13937_v43  ;;  %v13956_v57 = vsel %vm8051_vm2, %v13954_v23, %v13955_v55  ;;  %v13960_v23 = vld [vmem:[#allocation33_spill] sm:$0xff] }
 0x940   :  { %5679 = vmatpush.msrb.mxu2 %v11872_v3  ;;  %5702 = vmatpush.msrb.mxu3 %v13938_v54 }
 0x941   :  { %5634 = vmatpush.msrb.mxu0 %v11880_v56  ;;  %5657 = vmatpush.msrb.mxu1 %v11889_v41 }
 0x942   :  { %5680 = vmatpush.msrb.mxu2 %v11891_v7  ;;  %5703 = vmatpush.msrb.mxu3 %v11897_v30  ;;  %v13941_v30 = vld [vmem:[#allocation59_spill] sm:$0xff] }
 0x943   :  { %6566 = vadd.xlane.f32.xlu1 %v6565_v18 }
 0x944   :  { %v7259_v27 = vpop.eup %7258 }
 0x945   :  { %v5236_v22 = vmul.f32 %v7259_v27, %v5225_v45 }
 0x947   :  { %v12069_v3 = vsel %vm13940_vm15, %v5236_v22, %v13939_v47  ;;  %vm13961_vm15 = vcmp.gt.s32.totalorder %v13802_v58, %v13960_v23  ;;  %v12347_v47 = vld [vmem:[#allocation14 + $0x90] sm:$0xff] }
 0x948   :  { %5334 = vmatmul.f32.gmra.mxu0 %v12069_v3  ;;  %5357 = vmatmul.f32.gmra.mxu1 %v12069_v3  ;;  %13991 = vst [vmem:[#allocation94_spill] sm:$0xff] %v12347_v47 }
 0x949   :  { %5380 = vmatmul.f32.gmra.mxu2 %v12069_v3  ;;  %5403 = vmatmul.f32.gmra.mxu3 %v12069_v3 }
 0x9b3   :  { %v5332_v56 = vpop.f32.mrf.mxu0  ;;  %v5355_v7 = vpop.f32.mrf.mxu1 }
 0x9b4   :  { %v5407_v41 = vadd.f32 %v5332_v56, %v13941_v30  ;;  %v5408_v53 = vadd.f32 %v5355_v7, %v13945_v42  ;;  %v13957_v7 = vld [vmem:[#allocation110_spill] sm:$0xff]  ;;  %v13958_v30 = vld [vmem:[#allocation101_spill] sm:$0xff] }
 0x9b6   :  { %v6826_v50 = vmul.f32 -1.442695, %v5407_v41  ;;  %v6828_v28 = vmul.f32 -1.442695, %v5408_v53  ;;  %v13959_v41 = vsel %vm8088_vm4, %v13957_v7, %v13958_v30  ;;  %v6875_v53 = vld [vmem:[#allocation5] ss:$0 sm:$0xff] }
 0x9b7   :  { %6545 = vperm.xlu1 %6873, %v6875_v53  }
 0x9b8   :  { %7260 = vpow2.f32 %v6826_v50 }
 0x9b9   :  { %7262 = vpow2.f32 %v6828_v28 }
 0x9ba   :  { %v5401_v44 = vpop.f32.mrf.mxu3  ;;  %v5378_v59 = vpop.f32.mrf.mxu2 }
 0x9bb   :  { %v5410_v51 = vadd.f32 %v5401_v44, %v13949_v26  ;;  %v5409_v4 = vadd.f32 %v5378_v59, %v13952_v33 }
 0x9bd   :  { %v6830_v39 = vmul.f32 -1.442695, %v5410_v51 }
 0x9be   :  { %v7261_v63 = vpop.eup %7260 }
 0x9bf   :  { %v7263_v37 = vpop.eup %7262  ;;  %v5421_v2 = vadd.f32 1.0, %v7261_v63  ;;  %7264 = vpow2.f32 %v6830_v39 }
 0x9c0   :  { %v5459_v46 = vadd.f32 1.0, %v7263_v37 }
 0x9c1   :  { %7266 = vrcp.f32 %v5421_v2  ;;  %v5432_v54 = vand.u32 2147483647, %v5421_v2  ;;  %v5434_v8 = vand.u32 2147483648, %v5421_v2  ;;  %vm5428_vm12 = vweird.f32 %v5421_v2 }
 0x9c2   :  { %7268 = vrcp.f32 %v5459_v46  ;;  %v5472_v38 = vand.u32 2147483648, %v5459_v46  ;;  %v5470_v45 = vand.u32 2147483647, %v5459_v46  ;;  %vm5466_vm7 = vweird.f32 %v5459_v46 }
 0x9c3   :  { %v5435_v50 = vor.u32 1.1754944e-38, %v5434_v8  ;;  %vm5433_vm13 = vcmp.eq.f32.partialorder %v5432_v54, 8.507059e+37 }
 0x9c4   :  { %v5473_v44 = vor.u32 1.1754944e-38, %v5472_v38  ;;  %vm5471_vm0 = vcmp.eq.f32.partialorder %v5470_v45, 8.507059e+37  ;;  %v12134_v38 = vld [vmem:[%s12847_s9] ss:$0 sm:$0xff] }
 0x9c5   :  { %v7265_v14 = vpop.eup %7264  ;;  %v5335_v1 = vpop.f32.mrf.mxu0  ;;  %13963 = vst [vmem:[#allocation97_spill] sm:$0xff] %v12134_v38 }
 0x9c6   :  { %v5358_v6 = vpop.f32.mrf.mxu1  ;;  %v12094_v24 = vadd.f32 1.0, %v7265_v14  ;;  %v5411_v16 = vadd.f32 %v5335_v1, %v13953_v15 }
 0x9c7   :  { %v5412_v35 = vadd.f32 %v5358_v6, %v13956_v57  ;;  %v7267_v20 = vpop.eup %7266 }
 0x9c8   :  { %v7269_v31 = vpop.eup %7268  ;;  %v5424_v21 = vmul.f32 %v7267_v20, %v5421_v2  ;;  %7270 = vrcp.f32 %v12094_v24  ;;  %v6827_v61 = vmul.f32 -1.442695, %v5411_v16  ;;  %vm5429_vm14 = vweird.f32 %v7267_v20 }
 0x9c9   :  { %v5462_v49 = vmul.f32 %v7269_v31, %v5459_v46  ;;  %7272 = vtanh.f32 %v5409_v4  ;;  %v6829_v10 = vmul.f32 -1.442695, %v5412_v35  ;;  %vm5467_vm10 = vweird.f32 %v7269_v31  ;;  %vm5430_vm9 = vmor %vm5428_vm12, %vm5429_vm14 }
 0x9ca   :  { %v5425_v60 = vsub.f32 1.0, %v5424_v21  ;;  %7274 = vpow2.f32 %v6827_v61  ;;  %vm5468_vm11 = vmor %vm5466_vm7, %vm5467_vm10  ;;  %v5512_v33 = vand.u32 2147483648, %v12094_v24  ;;  %vm5506_vm5 = vweird.f32 %v12094_v24 }
 0x9cb   :  { %v5463_v43 = vsub.f32 1.0, %v5462_v49  ;;  %7276 = vpow2.f32 %v6829_v10  ;;  %v5510_v15 = vand.u32 2147483647, %v12094_v24  ;;  %v13962_v21 = vsel %vm8084_vm3, %v13908_v0, %v13909_v25  ;;  %vm13964_vm12 = vmmov %vm13961_vm15 }
 0x9cc   :  { %v5426_v27 = vmul.f32 %v7267_v20, %v5425_v60  ;;  %v5404_v22 = vpop.f32.mrf.mxu3  ;;  %v5381_v16 = vpop.f32.mrf.mxu2 }
 0x9cd   :  { %v5464_v56 = vmul.f32 %v7269_v31, %v5463_v43  ;;  %v5414_v17 = vadd.f32 %v5404_v22, %v13959_v41  ;;  %v5413_v49 = vadd.f32 %v5381_v16, %v13962_v21  ;;  %vm5511_vm14 = vcmp.eq.f32.partialorder %v5510_v15, 8.507059e+37  ;;  %v13965_v41 = vld [vmem:[#allocation20_spill] sm:$0xff]  ;;  %v12196_v21 = vld [vmem:[#allocation14 + $0x1f0] sm:$0xff] }
 0x9ce   :  { %v7271_v62 = vpop.eup %7270  ;;  %v5427_v42 = vadd.f32 %v7267_v20, %v5426_v27  ;;  %5969 = vmatpush.msra.mxu2 %v12196_v21 }
 0x9cf   :  { %v5465_v28 = vadd.f32 %v7269_v31, %v5464_v56  ;;  %v5502_v19 = vmul.f32 %v7271_v62, %v12094_v24  ;;  %v7273_v18 = vpop.eup %7272  ;;  %v6831_v48 = vmul.f32 -1.442695, %v5414_v17  ;;  %vm5507_vm8 = vweird.f32 %v7271_v62 }
 0x9d0   :  { %v5431_v29 = vsel %vm5430_vm9, %v7267_v20, %v5427_v42  ;;  %v7275_v63 = vpop.eup %7274  ;;  %vm5508_vm6 = vmor %vm5506_vm5, %vm5507_vm8 }
 0x9d1   :  { %v5436_v26 = vsel %vm5433_vm13, %v5435_v50, %v5431_v29  ;;  %v5469_v51 = vsel %vm5468_vm11, %v7269_v31, %v5465_v28  ;;  %v5503_v39 = vsub.f32 1.0, %v5502_v19  ;;  %7278 = vpow2.f32 %v6831_v48  ;;  %v7277_v46 = vpop.eup %7276 }
 0x9d2   :  { %v5474_v37 = vsel %vm5471_vm0, %v5473_v44, %v5469_v51  ;;  %v5533_v2 = vmul.f32 %v7273_v18, %v5436_v26  ;;  %v5422_v1 = vadd.f32 1.0, %v7275_v63  ;;  %v12110_v6 = vadd.f32 1.0, %v7277_v46 }
 0x9d3   :  { %v5531_v59 = vmul.f32 %v5474_v37, %v11973_v52  ;;  %v5504_v14 = vmul.f32 %v7271_v62, %v5503_v39  ;;  %v5513_v31 = vor.u32 1.1754944e-38, %v5512_v33 }
 0x9d4   :  { %7280 = vrcp.f32 %v5422_v1  ;;  %v5487_v0 = vand.u32 2147483648, %v12110_v6  ;;  %v5449_v25 = vand.u32 2147483648, %v5422_v1  ;;  %v5447_v45 = vand.u32 2147483647, %v5422_v1 }
 0x9d5   :  { %v5535_v40 = vadd.f32 %v5533_v2, %v5531_v59  ;;  %v5505_v36 = vadd.f32 %v7271_v62, %v5504_v14  ;;  %7282 = vrcp.f32 %v12110_v6  ;;  %v5485_v30 = vand.u32 2147483647, %v12110_v6 }
 0x9d6   :  { %vm5443_vm9 = vweird.f32 %v5422_v1  ;;  %vm5481_vm11 = vweird.f32 %v12110_v6  ;;  %v5450_v50 = vor.u32 1.1754944e-38, %v5449_v25  ;;  %v5488_v19 = vor.u32 1.1754944e-38, %v5487_v0  ;;  %v13972_v0 = vld [vmem:[#allocation111_spill] sm:$0xff] }
 0x9d7   :  { %7284 = vtanh.f32 %v5535_v40  ;;  %v7279_v4 = vpop.eup %7278  ;;  %v12120_v55 = vsel %vm13961_vm15, %v5535_v40, %v11973_v52  ;;  %v5509_v35 = vsel %vm5508_vm6, %v7271_v62, %v5505_v36  ;;  %vm5448_vm8 = vcmp.eq.f32.partialorder %v5447_v45, 8.507059e+37  ;;  %v12222_v45 = vld [vmem:[#allocation14 + $0x1a0] sm:$0xff] }
 0x9d8   :  { %v12122_v57 = vadd.f32 1.0, %v7279_v4  ;;  %v5514_v10 = vsel %vm5511_vm14, %v5513_v31, %v5509_v35  ;;  %vm5486_vm5 = vcmp.eq.f32.partialorder %v5485_v30, 8.507059e+37  ;;  %vm13966_vm6 = vcmp.gt.s32.totalorder %v13930_v5, %v13960_v23  ;;  %v12194_v31 = vld [vmem:[#allocation14 + $0x1e8] sm:$0xff]  ;;  %v12230_v30 = vld [vmem:[#allocation14 + $0x1b8] sm:$0xff]  ;;  %v13992_v5 = vld [vmem:[#allocation117_spill] sm:$0xff] }
 0x9d9   :  { %5946 = vmatpush.msra.mxu1 %v12194_v31 }
 0x9da   :  { %v7281_v20 = vpop.eup %7280  ;;  %7286 = vrcp.f32 %v12122_v57  ;;  %vm5521_vm14 = vweird.f32 %v12122_v57  ;;  %v5525_v40 = vand.u32 2147483647, %v12122_v57 }
 0x9db   :  { %v7283_v24 = vpop.eup %7282  ;;  %v5439_v60 = vmul.f32 %v7281_v20, %v5422_v1  ;;  %7288 = vtanh.f32 %v5413_v49  ;;  %vm5444_vm10 = vweird.f32 %v7281_v20  ;;  %v5527_v1 = vand.u32 2147483648, %v12122_v57  ;;  %v12200_v49 = vld [vmem:[#allocation14 + $0x1f8] sm:$0xff] }
 0x9dc   :  { %v5477_v52 = vmul.f32 %v7283_v24, %v12110_v6  ;;  %vm5482_vm7 = vweird.f32 %v7283_v24  ;;  %vm5445_vm13 = vmor %vm5443_vm9, %vm5444_vm10  ;;  %5992 = vmatpush.msra.mxu3 %v12200_v49 }
 0x9dd   :  { %v7285_v61 = vpop.eup %7284  ;;  %v5440_v43 = vsub.f32 1.0, %v5439_v60  ;;  %vm5483_vm0 = vmor %vm5481_vm11, %vm5482_vm7  ;;  %v5528_v36 = vor.u32 1.1754944e-38, %v5527_v1  ;;  %v12208_v60 = vld [vmem:[#allocation14 + $0x1d0] sm:$0xff]  ;;  %v12277_v1 = vld [vmem:[#allocation14 + $0x128] sm:$0xff] }
 0x9de   :  { %v5539_v54 = vmul.f32 %v7285_v61, %v5514_v10  ;;  %v5478_v8 = vsub.f32 1.0, %v5477_v52  ;;  %vm13968_vm7 = vmmov %vm13966_vm6  ;;  %v12212_v10 = vld [vmem:[#allocation14 + $0x1d8] sm:$0xff]  ;;  %5970 = vmatpush.msra.mxu2 %v12208_v60 }
 0x9df   :  { %v5441_v27 = vmul.f32 %v7281_v20, %v5440_v43  ;;  %v13970_v43 = vld [vmem:[#allocation114_spill] sm:$0xff]  ;;  %5993 = vmatpush.msra.mxu3 %v12212_v10 }
 0x9e0   :  { %v12141_v22 = vsel %vm13964_vm12, %v5539_v54, %v12014_v12  ;;  %v7287_v56 = vpop.eup %7286  ;;  %v5479_v7 = vmul.f32 %v7283_v24, %v5478_v8  ;;  %vm5526_vm12 = vcmp.eq.f32.partialorder %v5525_v40, 8.507059e+37  ;;  %v13971_v8 = vld [vmem:[#allocation113_spill] sm:$0xff] }
 0x9e1   :  { %5635 = vmatmul.f32.vlgmr.msrb.gmra.mxu0 %v12141_v22  ;;  %5658 = vmatmul.f32.vlgmr.msrb.gmra.mxu1 %v12141_v22  ;;  %v6479_v17 = vsel %vm121_vm1, %v12014_v12, %v12141_v22  ;;  %v5442_v62 = vadd.f32 %v7281_v20, %v5441_v27  ;;  %v5517_v42 = vmul.f32 %v7287_v56, %v12122_v57  ;;  %v7289_v29 = vpop.eup %7288  ;;  %vm5522_vm15 = vweird.f32 %v7287_v56  ;;  %v12279_v40 = vld [vmem:[#allocation14 + $0x130] sm:$0xff] }
 0x9e2   :  { %5681 = vmatmul.f32.vlgmr.msrb.gmra.mxu2 %v12141_v22  ;;  %5704 = vmatmul.f32.vlgmr.msrb.gmra.mxu3 %v12141_v22  ;;  %v6499_v53 = vmul.f32 %v12134_v38, %v6479_v17  ;;  %v5480_v28 = vadd.f32 %v7283_v24, %v5479_v7  ;;  %v6481_v2 = vsel %vm121_vm1, %v12141_v22, %v12014_v12  ;;  %vm5523_vm10 = vmor %vm5521_vm14, %vm5522_vm15  ;;  %v12226_v7 = vld [vmem:[#allocation14 + $0x1b0] sm:$0xff] }
 0x9e3   :  { %v5446_v18 = vsel %vm5445_vm13, %v7281_v20, %v5442_v62  ;;  %v5518_v44 = vsub.f32 1.0, %v5517_v42  ;;  %v6501_v14 = vmul.f32 %v12134_v38, %v6481_v2  ;;  %v12192_v20 = vld [vmem:[#allocation14 + $0x1e0] sm:$0xff]  ;;  %v13973_v25 = vsel %vm8051_vm2, %v13971_v8, %v13972_v0  ;;  %5971 = vmatpush.msra.mxu2 %v12226_v7  ;;  %5994 = vmatpush.msra.mxu3 %v12230_v30  ;;  %v12312_v8 = vld [vmem:[#allocation14 + $0xf8] sm:$0xff] }
 0x9e4   :  { %6521 = vadd.xlane.f32.xlu2 %v6499_v53  ;;  %v5451_v48 = vsel %vm5448_vm8, %v5450_v50, %v5446_v18  ;;  %v5484_v26 = vsel %vm5483_vm0, %v7283_v24, %v5480_v28  ;;  %5923 = vmatpush.msra.mxu0 %v12192_v20  ;;  %v12206_v24 = vld [vmem:[#allocation14 + $0x1c8] sm:$0xff]  ;;  %v12234_v42 = vld [vmem:[#allocation14 + $0x180] sm:$0xff]  ;;  %v12240_v50 = vld [vmem:[#allocation14 + $0x190] sm:$0xff]  ;;  %13980 = vst [vmem:[#allocation99_spill] sm:$0xff] %v12312_v8 }
 0x9e5   :  { %v5489_v51 = vsel %vm5486_vm5, %v5488_v19, %v5484_v26  ;;  %v5534_v39 = vmul.f32 %v7289_v29, %v5451_v48  ;;  %v5519_v63 = vmul.f32 %v7287_v56, %v5518_v44  ;;  %5947 = vmatpush.msra.mxu1 %v12206_v24  ;;  %v12236_v53 = vld [vmem:[#allocation14 + $0x188] sm:$0xff]  ;;  %v12242_v28 = vld [vmem:[#allocation14 + $0x198] sm:$0xff]  ;;  %5972 = vmatpush.msra.mxu2 %v12240_v50  ;;  %v12246_v19 = vld [vmem:[#allocation14 + $0x160] sm:$0xff] }
 0x9e6   :  { %v5532_v37 = vmul.f32 %v5489_v51, %v12048_v9  ;;  %5995 = vmatpush.msra.mxu3 %v12242_v28  ;;  %v12248_v18 = vld [vmem:[#allocation14 + $0x168] sm:$0xff]  ;;  %v12250_v44 = vld [vmem:[#allocation14 + $0x170] sm:$0xff]  ;;  %v12254_v29 = vld [vmem:[#allocation14 + $0x178] sm:$0xff] }
 0x9e7   :  { %v5520_v59 = vadd.f32 %v7287_v56, %v5519_v63  ;;  %5973 = vmatpush.msra.mxu2 %v12250_v44  ;;  %v12258_v26 = vld [vmem:[#allocation14 + $0x140] sm:$0xff]  ;;  %v12260_v51 = vld [vmem:[#allocation14 + $0x148] sm:$0xff]  ;;  %v13974_v63 = vld [vmem:[#allocation93_spill] sm:$0xff] }
 0x9e8   :  { %v5536_v46 = vadd.f32 %v5534_v39, %v5532_v37  ;;  %5996 = vmatpush.msra.mxu3 %v12254_v29  ;;  %v12262_v39 = vld [vmem:[#allocation14 + $0x150] sm:$0xff]  ;;  %v13975_v37 = vld [vmem:[#allocation116_spill] sm:$0xff]  ;;  %v12317_v0 = vld [vmem:[#allocation14 + $0xc0] sm:$0xff] }
 0x9e9   :  { %v5524_v12 = vsel %vm5523_vm10, %v7287_v56, %v5520_v59  ;;  %v12224_v56 = vld [vmem:[#allocation14 + $0x1a8] sm:$0xff]  ;;  %v13976_v2 = vsel %vm8088_vm4, %v13974_v63, %v13975_v37  ;;  %v12271_v59 = vld [vmem:[#allocation14 + $0x158] sm:$0xff]  ;;  %5974 = vmatpush.msra.mxu2 %v12262_v39  ;;  %13981 = vst [vmem:[#allocation49_spill] sm:$0xff] %v12317_v0  ;;  %v12333_v37 = vld [vmem:[#allocation14 + $0xb0] sm:$0xff] }
 0x9ea   :  { %7290 = vtanh.f32 %v5536_v46  ;;  %v12168_v6 = vsel %vm13966_vm6, %v5536_v46, %v12048_v9  ;;  %v5529_v4 = vsel %vm5526_vm12, %v5528_v36, %v5524_v12  ;;  %5948 = vmatpush.msra.mxu1 %v12224_v56  ;;  %5997 = vmatpush.msra.mxu3 %v12271_v59  ;;  %v12283_v36 = vld [vmem:[#allocation14 + $0x138] sm:$0xff]  ;;  %v12331_v63 = vld [vmem:[#allocation14 + $0xa8] sm:$0xff]  ;;  %13987 = vst [vmem:[#allocation24_spill] sm:$0xff] %v12333_v37 }
 0x9eb   :  { %13967 = vst [vmem:[#allocation122_spill] sm:$0xff] %v12168_v6  ;;  %5975 = vmatpush.msra.mxu2 %v12279_v40  ;;  %v13993_v6 = vld [vmem:[#allocation115_spill] sm:$0xff] }
 0x9ec   :  { %6525 = vadd.xlane.f32.xlu2 %v6501_v14  ;;  %5949 = vmatpush.msra.mxu1 %v12236_v53  ;;  %v12275_v14 = vld [vmem:[#allocation14 + $0x120] sm:$0xff]  ;;  %13986 = vst [vmem:[#allocation108_spill] sm:$0xff] %v12331_v63 }
 0x9ed   :  { %5998 = vmatpush.msra.mxu3 %v12283_v36 }
 0x9ee   :  { %5950 = vmatpush.msra.mxu1 %v12248_v18 }
 0x9f0   :  { %v7291_v33 = vpop.eup %7290  ;;  %5951 = vmatpush.msra.mxu1 %v12260_v51 }
 0x9f1   :  { %v5540_v15 = vmul.f32 %v7291_v33, %v5529_v4  ;;  %v12287_v4 = vld [vmem:[#allocation14 + $0x100] sm:$0xff] }
 0x9f2   :  { %5952 = vmatpush.msra.mxu1 %v12277_v1 }
 0x9f3   :  { %v12176_v16 = vsel %vm13968_vm7, %v5540_v15, %v12069_v3  ;;  %v12289_v15 = vld [vmem:[#allocation14 + $0x108] sm:$0xff] }
 0x9f4   :  { %13969 = vst [vmem:[#allocation112_spill] sm:$0xff] %v12176_v16  ;;  %5638 = vmatmul.f32.gmra.mxu0 %v12176_v16  ;;  %5661 = vmatmul.f32.gmra.mxu1 %v12176_v16  ;;  %v6480_v9 = vsel %vm121_vm1, %v12069_v3, %v12176_v16  ;;  %v6482_v23 = vsel %vm121_vm1, %v12176_v16, %v12069_v3  ;;  %v12204_v3 = vld [vmem:[#allocation14 + $0x1c0] sm:$0xff] }
 0x9f5   :  { %5684 = vmatmul.f32.gmra.mxu2 %v12176_v16  ;;  %5707 = vmatmul.f32.gmra.mxu3 %v12176_v16  ;;  %v6500_v57 = vmul.f32 %v12134_v38, %v6480_v9  ;;  %v6502_v35 = vmul.f32 %v12134_v38, %v6482_v23  ;;  %v12291_v9 = vld [vmem:[#allocation14 + $0x110] sm:$0xff] }
 0x9f6   :  { %5924 = vmatpush.msra.mxu0 %v12204_v3  ;;  %5953 = vmatpush.msra.mxu1 %v12289_v15 }
 0x9f7   :  { %6523 = vadd.xlane.f32.xlu2 %v6500_v57  ;;  %5976 = vmatpush.msra.mxu2 %v12291_v9 }
 0x9f8   :  { %5925 = vmatpush.msra.mxu0 %v12222_v45 }
 0x9fa   :  { %5926 = vmatpush.msra.mxu0 %v12234_v42 }
 0x9fc   :  { %5927 = vmatpush.msra.mxu0 %v12246_v19 }
 0x9fe   :  { %5928 = vmatpush.msra.mxu0 %v12258_v26 }
 0x9ff   :  { %6527 = vadd.xlane.f32.xlu2 %v6502_v35  ;;  %v12297_v35 = vld [vmem:[#allocation14 + $0x118] sm:$0xff] }
 0xa00   :  { %5929 = vmatpush.msra.mxu0 %v12275_v14  ;;  %5999 = vmatpush.msra.mxu3 %v12297_v35 }
 0xa02   :  { %5930 = vmatpush.msra.mxu0 %v12287_v4  ;;  %6000 = vmatpush.msra.mxu3 %v12312_v8  ;;  %v14001_v8 = vld [vmem:[#allocation42_spill] sm:$0xff] }
 0xa5e   :  { %v5636_v61 = vpop.f32.mrf.mxu0  ;;  %v5659_v52 = vpop.f32.mrf.mxu1 }
 0xa5f   :  { %v5711_v54 = vadd.f32 %v5636_v61, %v13970_v43  ;;  %v5712_v27 = vadd.f32 %v5659_v52, %v13973_v25  ;;  %v12303_v52 = vld [vmem:[#allocation14 + $0xe0] sm:$0xff]  ;;  %v12305_v43 = vld [vmem:[#allocation14 + $0xe8] sm:$0xff] }
 0xa60   :  { %13977 = vst [vmem:[#allocation40_spill] sm:$0xff] %v12303_v52  ;;  %5931 = vmatpush.msra.mxu0 %v12303_v52  ;;  %5954 = vmatpush.msra.mxu1 %v12305_v43  ;;  %v12319_v25 = vld [vmem:[#allocation14 + $0xc8] sm:$0xff] }
 0xa61   :  { %v6832_v17 = vmul.f32 -1.442695, %v5711_v54  ;;  %v6834_v62 = vmul.f32 -1.442695, %v5712_v27  ;;  %13978 = vst [vmem:[#allocation53_spill] sm:$0xff] %v12305_v43  ;;  %v12307_v54 = vld [vmem:[#allocation14 + $0xf0] sm:$0xff] }
 0xa62   :  { %13979 = vst [vmem:[#allocation44_spill] sm:$0xff] %v12307_v54  ;;  %5977 = vmatpush.msra.mxu2 %v12307_v54  ;;  %v12321_v27 = vld [vmem:[#allocation14 + $0xd0] sm:$0xff]  ;;  %5932 = vmatpush.msra.mxu0 %v12317_v0  ;;  %v14000_v0 = vld [vmem:[#allocation51_spill] sm:$0xff] }
 0xa63   :  { %7292 = vpow2.f32 %v6832_v17  ;;  %13982 = vst [vmem:[#allocation54_spill] sm:$0xff] %v12319_v25  ;;  %5955 = vmatpush.msra.mxu1 %v12319_v25  ;;  %v12325_v17 = vld [vmem:[#allocation14 + $0xd8] sm:$0xff]  ;;  %v14002_v54 = vsel %vm8051_vm2, %v14000_v0, %v14001_v8  ;;  %v12396_v8 = vld [vmem:[#allocation14 + $0x50] sm:$0xff] }
 0xa64   :  { %7294 = vpow2.f32 %v6834_v62  ;;  %13983 = vst [vmem:[#allocation106_spill] sm:$0xff] %v12321_v27  ;;  %5978 = vmatpush.msra.mxu2 %v12321_v27  ;;  %6001 = vmatpush.msra.mxu3 %v12325_v17  ;;  %v13999_v25 = vld [vmem:[#allocation26_spill] sm:$0xff] }
 0xa65   :  { %v5705_v48 = vpop.f32.mrf.mxu3  ;;  %13984 = vst [vmem:[#allocation104_spill] sm:$0xff] %v12325_v17  ;;  %v5682_v62 = vpop.f32.mrf.mxu2  ;;  %5956 = vmatpush.msra.mxu1 %v12331_v63  ;;  %v13994_v63 = vsel %vm8084_vm3, %v13992_v5, %v13993_v6  ;;  %v12367_v5 = vld [vmem:[#allocation14 + $0x60] sm:$0xff]  ;;  %v12369_v6 = vld [vmem:[#allocation14 + $0x68] sm:$0xff] }
 0xa66   :  { %v5714_v46 = vadd.f32 %v5705_v48, %v13976_v2  ;;  %v12329_v48 = vld [vmem:[#allocation14 + $0xa0] sm:$0xff]  ;;  %5979 = vmatpush.msra.mxu2 %v12333_v37  ;;  %13996 = vst [vmem:[#allocation37_spill] sm:$0xff] %v12367_v5 }
 0xa67   :  { %13985 = vst [vmem:[#allocation109_spill] sm:$0xff] %v12329_v48  ;;  %5933 = vmatpush.msra.mxu0 %v12329_v48  ;;  %v5713_v48 = vadd.f32 %v5682_v62, %v13994_v63  ;;  %v12371_v62 = vld [vmem:[#allocation14 + $0x70] sm:$0xff] }
 0xa68   :  { %v6836_v12 = vmul.f32 -1.442695, %v5714_v46  ;;  %v12337_v46 = vld [vmem:[#allocation14 + $0xb8] sm:$0xff]  ;;  %5980 = vmatpush.msra.mxu2 %v12347_v47  ;;  %13997 = vst [vmem:[#allocation100_spill] sm:$0xff] %v12369_v6 }
 0xa69   :  { %v7293_v33 = vpop.eup %7292  ;;  %13988 = vst [vmem:[#allocation22_spill] sm:$0xff] %v12337_v46  ;;  %6002 = vmatpush.msra.mxu3 %v12337_v46  ;;  %v12358_v46 = vld [vmem:[#allocation14 + $0x98] sm:$0xff] }
 0xa6a   :  { %v7295_v57 = vpop.eup %7294  ;;  %v12293_v23 = vadd.f32 1.0, %v7293_v33  ;;  %7296 = vpow2.f32 %v6836_v12  ;;  %v12343_v33 = vld [vmem:[#allocation14 + $0x80] sm:$0xff]  ;;  %13995 = vst [vmem:[#allocation27_spill] sm:$0xff] %v12358_v46  ;;  %5981 = vmatpush.msra.mxu2 %v12371_v62 }
 0xa6b   :  { %v12299_v61 = vadd.f32 1.0, %v7295_v57  ;;  %13989 = vst [vmem:[#allocation35_spill] sm:$0xff] %v12343_v33  ;;  %v12345_v57 = vld [vmem:[#allocation14 + $0x88] sm:$0xff]  ;;  %5934 = vmatpush.msra.mxu0 %v12343_v33  ;;  %6003 = vmatpush.msra.mxu3 %v12358_v46 }
 0xa6c   :  { %7298 = vrcp.f32 %v12293_v23  ;;  %13990 = vst [vmem:[#allocation95_spill] sm:$0xff] %v12345_v57  ;;  %5957 = vmatpush.msra.mxu1 %v12345_v57  ;;  %v12377_v57 = vld [vmem:[#allocation14 + $0x78] sm:$0xff]  ;;  %v5736_v47 = vand.u32 2147483647, %v12293_v23  ;;  %v5738_v38 = vand.u32 2147483648, %v12293_v23  ;;  %5982 = vmatpush.msra.mxu2 %v12396_v8  ;;  %vm5732_vm0 = vweird.f32 %v12293_v23 }
 0xa6d   :  { %7300 = vrcp.f32 %v12299_v61  ;;  %5935 = vmatpush.msra.mxu0 %v12367_v5  ;;  %13998 = vst [vmem:[#allocation36_spill] sm:$0xff] %v12377_v57  ;;  %6004 = vmatpush.msra.mxu3 %v12377_v57  ;;  %v12388_v5 = vld [vmem:[#allocation14 + $0x40] sm:$0xff]  ;;  %v5774_v32 = vand.u32 2147483647, %v12299_v61  ;;  %vm5770_vm13 = vweird.f32 %v12299_v61 }
 0xa6e   :  { %5958 = vmatpush.msra.mxu1 %v12369_v6  ;;  %14003 = vst [vmem:[#allocation34_spill] sm:$0xff] %v12388_v5  ;;  %v12390_v6 = vld [vmem:[#allocation14 + $0x48] sm:$0xff]  ;;  %vm5737_vm15 = vcmp.eq.f32.partialorder %v5736_v47, 8.507059e+37 }
 0xa6f   :  { %14004 = vst [vmem:[#allocation41_spill] sm:$0xff] %v12390_v6  ;;  %5936 = vmatpush.msra.mxu0 %v12388_v5  ;;  %vm5775_vm6 = vcmp.eq.f32.partialorder %v5774_v32, 8.507059e+37 }
 0xa70   :  { %v7297_v2 = vpop.eup %7296  ;;  %5959 = vmatpush.msra.mxu1 %v12390_v6  ;;  %14005 = vst [vmem:[#allocation39_spill] sm:$0xff] %v12396_v8  ;;  %v12428_v8 = vld [vmem:[#allocation14 + $0x10] sm:$0xff] }
 0xa71   :  { %v12339_v12 = vadd.f32 1.0, %v7297_v2  ;;  %v5639_v2 = vpop.f32.mrf.mxu0  ;;  %v5662_v17 = vpop.f32.mrf.mxu1 }
 0xa72   :  { %v12349_v16 = vpop.eup %7298  ;;  %v5715_v46 = vadd.f32 %v5639_v2, %v13999_v25  ;;  %v5716_v43 = vadd.f32 %v5662_v17, %v14002_v54  ;;  %v12398_v54 = vld [vmem:[#allocation14 + $0x58] sm:$0xff]  ;;  %v12404_v2 = vld [vmem:[#allocation14 + $0x20] sm:$0xff] }
 0xa73   :  { %v12360_v37 = vpop.eup %7300  ;;  %v5728_v27 = vmul.f32 %v12349_v16, %v12293_v23  ;;  %7302 = vrcp.f32 %v12339_v12  ;;  %14006 = vst [vmem:[#allocation46_spill] sm:$0xff] %v12398_v54  ;;  %vm5733_vm9 = vweird.f32 %v12349_v16  ;;  %6005 = vmatpush.msra.mxu3 %v12398_v54  ;;  %5937 = vmatpush.msra.mxu0 %v12404_v2  ;;  %vm5810_vm10 = vweird.f32 %v12339_v12 }
 0xa74   :  { %v5766_v63 = vmul.f32 %v12360_v37, %v12299_v61  ;;  %7304 = vtanh.f32 %v5713_v48  ;;  %v6833_v25 = vmul.f32 -1.442695, %v5715_v46  ;;  %v6835_v17 = vmul.f32 -1.442695, %v5716_v43  ;;  %14007 = vst [vmem:[#allocation45_spill] sm:$0xff] %v12404_v2  ;;  %v12406_v48 = vld [vmem:[#allocation14 + $0x28] sm:$0xff]  ;;  %vm12432_vm8 = vmor %vm5732_vm0, %vm5733_vm9 }
 0xa75   :  { %v5729_v33 = vsub.f32 1.0, %v5728_v27  ;;  %v5776_v27 = vand.u32 2147483648, %v12299_v61  ;;  %14008 = vst [vmem:[#allocation43_spill] sm:$0xff] %v12406_v48  ;;  %vm5771_vm11 = vweird.f32 %v12360_v37  ;;  %5960 = vmatpush.msra.mxu1 %v12406_v48  ;;  %v12413_v46 = vld [vmem:[#allocation14 + $0x30] sm:$0xff]  ;;  %v12415_v43 = vld [vmem:[#allocation14 + $0x38] sm:$0xff]  ;;  %v12424_v2 = vld [vmem:[#allocation14] sm:$0xff] }
 0xa76   :  { %v5767_v52 = vsub.f32 1.0, %v5766_v63  ;;  %14009 = vst [vmem:[#allocation50_spill] sm:$0xff] %v12413_v46  ;;  %7306 = vpow2.f32 %v6833_v25  ;;  %5983 = vmatpush.msra.mxu2 %v12413_v46  ;;  %6006 = vmatpush.msra.mxu3 %v12415_v43  ;;  %v12426_v48 = vld [vmem:[#allocation14 + $0x8] sm:$0xff]  ;;  %vm5772_vm5 = vmor %vm5770_vm13, %vm5771_vm11 }
 0xa77   :  { %v5730_v0 = vmul.f32 %v12349_v16, %v5729_v33  ;;  %14010 = vst [vmem:[#allocation48_spill] sm:$0xff] %v12415_v43  ;;  %7308 = vpow2.f32 %v6835_v17  ;;  %5938 = vmatpush.msra.mxu0 %v12424_v2  ;;  %5961 = vmatpush.msra.mxu1 %v12426_v48  ;;  %v12441_v43 = vld [vmem:[#allocation14 + $0x18] sm:$0xff]  ;;  %v5777_v46 = vor.u32 1.1754944e-38, %v5776_v27 }
 0xa78   :  { %v5768_v63 = vmul.f32 %v12360_v37, %v5767_v52  ;;  %v5708_v52 = vpop.f32.mrf.mxu3  ;;  %14011 = vst [vmem:[#allocation55_spill] sm:$0xff] %v12424_v2  ;;  %v14015_v17 = vld [vmem:[#allocation38_spill] sm:$0xff]  ;;  %5984 = vmatpush.msra.mxu2 %v12428_v8  ;;  %6007 = vmatpush.msra.mxu3 %v12441_v43 }
 0xa79   :  { %v12417_v33 = vpop.eup %7302  ;;  %v5731_v54 = vadd.f32 %v12349_v16, %v5730_v0  ;;  %14012 = vst [vmem:[#allocation28_spill] sm:$0xff] %v12426_v48  ;;  %v5739_v0 = vor.u32 1.1754944e-38, %v5738_v38  ;;  %6227 = vmatpush.msrb.mxu0 %v12192_v20  ;;  %6250 = vmatpush.msrb.mxu1 %v12194_v31 }
 0xa7a   :  { %v5769_v23 = vadd.f32 %v12360_v37, %v5768_v63  ;;  %v5806_v25 = vmul.f32 %v12417_v33, %v12339_v12  ;;  %v14016_v63 = vld [vmem:[#allocation23_spill] sm:$0xff]  ;;  %v7305_v48 = vpop.eup %7304  ;;  %6273 = vmatpush.msrb.mxu2 %v12196_v21  ;;  %6296 = vmatpush.msrb.mxu3 %v12200_v49  ;;  %vm5811_vm14 = vweird.f32 %v12417_v33 }
 0xa7b   :  { %v5735_v38 = vsel %vm12432_vm8, %v12349_v16, %v5731_v54  ;;  %v14017_v2 = vsel %vm8088_vm4, %v14015_v17, %v14016_v63  ;;  %6228 = vmatpush.msrb.mxu0 %v12204_v3  ;;  %6251 = vmatpush.msrb.mxu1 %v12206_v24  ;;  %v5816_v3 = vand.u32 2147483648, %v12339_v12  ;;  %v5814_v24 = vand.u32 2147483647, %v12339_v12  ;;  %vm12486_vm12 = vmor %vm5810_vm10, %vm5811_vm14 }
 0xa7c   :  { %v5718_v5 = vadd.f32 %v5708_v52, %v14017_v2  ;;  %v5740_v57 = vsel %vm5737_vm15, %v5739_v0, %v5735_v38  ;;  %v5773_v61 = vsel %vm5772_vm5, %v12360_v37, %v5769_v23  ;;  %v5807_v27 = vsub.f32 1.0, %v5806_v25  ;;  %v7307_v32 = vpop.eup %7306  ;;  %6274 = vmatpush.msrb.mxu2 %v12208_v60  ;;  %6297 = vmatpush.msrb.mxu3 %v12212_v10  ;;  %v14029_v0 = vld [vmem:[#allocation44_spill] sm:$0xff]  ;;  %v14030_v25 = vld [vmem:[#allocation99_spill] sm:$0xff]  ;;  %v14031_v38 = vld [vmem:[#allocation49_spill] sm:$0xff] }
 0xa7d   :  { %v5778_v47 = vsel %vm5775_vm6, %v5777_v46, %v5773_v61  ;;  %v5837_v16 = vmul.f32 %v7305_v48, %v5740_v57  ;;  %v7309_v20 = vpop.eup %7308  ;;  %v12468_v37 = vadd.f32 1.0, %v7307_v32  ;;  %6229 = vmatpush.msrb.mxu0 %v12222_v45  ;;  %6252 = vmatpush.msrb.mxu1 %v12224_v56  ;;  %v14020_v56 = vld [vmem:[#allocation30_spill] sm:$0xff]  ;;  %vm5815_vm9 = vcmp.eq.f32.partialorder %v5814_v24, 8.507059e+37  ;;  %v14028_v48 = vld [vmem:[#allocation53_spill] sm:$0xff] }
 0xa7e   :  { %v6837_v6 = vmul.f32 -1.442695, %v5718_v5  ;;  %v5835_v54 = vmul.f32 %v5778_v47, %v12120_v55  ;;  %v5808_v2 = vmul.f32 %v12417_v33, %v5807_v27  ;;  %v12474_v49 = vadd.f32 1.0, %v7309_v20  ;;  %6275 = vmatpush.msrb.mxu2 %v12226_v7  ;;  %6298 = vmatpush.msrb.mxu3 %v12230_v30  ;;  %v14027_v5 = vld [vmem:[#allocation40_spill] sm:$0xff]  ;;  %v14032_v27 = vld [vmem:[#allocation54_spill] sm:$0xff] }
 0xa7f   :  { %6230 = vmatpush.msrb.mxu0 %v12234_v42  ;;  %6253 = vmatpush.msrb.mxu1 %v12236_v53  ;;  %vm14021_vm7 = vcmp.gt.s32.totalorder %v13802_v58, %v14020_v56  ;;  %v5817_v30 = vor.u32 1.1754944e-38, %v5816_v3  ;;  %v5685_v42 = vpop.f32.mrf.mxu2  ;;  %v5751_v57 = vand.u32 2147483647, %v12468_v37  ;;  %vm5747_vm8 = vweird.f32 %v12468_v37  ;;  %v14033_v47 = vld [vmem:[#allocation106_spill] sm:$0xff] }
 0xa80   :  { %7310 = vpow2.f32 %v6837_v6  ;;  %v5839_v31 = vadd.f32 %v5837_v16, %v5835_v54  ;;  %v5809_v21 = vadd.f32 %v12417_v33, %v5808_v2  ;;  %6276 = vmatpush.msrb.mxu2 %v12240_v50  ;;  %6299 = vmatpush.msrb.mxu3 %v12242_v28  ;;  %vm14025_vm11 = vmmov %vm14021_vm7  ;;  %vm5785_vm5 = vweird.f32 %v12474_v49  ;;  %v14034_v54 = vld [vmem:[#allocation104_spill] sm:$0xff]  ;;  %v14035_v2 = vld [vmem:[#allocation109_spill] sm:$0xff] }
 0xa81   :  { %6231 = vmatpush.msrb.mxu0 %v12246_v19  ;;  %6254 = vmatpush.msrb.mxu1 %v12248_v18  ;;  %v14022_v19 = vld [vmem:[#allocation32_spill] sm:$0xff]  ;;  %v14023_v18 = vld [vmem:[#allocation25_spill] sm:$0xff]  ;;  %vm5752_vm14 = vcmp.eq.f32.partialorder %v5751_v57, 8.507059e+37  ;;  %v14038_v60 = vld [vmem:[#allocation22_spill] sm:$0xff] }
 0xa82   :  { %7312 = vtanh.f32 %v5839_v31  ;;  %v5813_v45 = vsel %vm12486_vm12, %v12417_v33, %v5809_v21  ;;  %v12500_v7 = vsel %vm14021_vm7, %v5839_v31, %v12120_v55  ;;  %6277 = vmatpush.msrb.mxu2 %v12250_v44  ;;  %6300 = vmatpush.msrb.mxu3 %v12254_v29  ;;  %v14024_v44 = vsel %vm8084_vm3, %v14022_v19, %v14023_v18  ;;  %v14037_v21 = vld [vmem:[#allocation24_spill] sm:$0xff] }
 0xa83   :  { %7314 = vrcp.f32 %v12468_v37  ;;  %6232 = vmatpush.msrb.mxu0 %v12258_v26  ;;  %6255 = vmatpush.msrb.mxu1 %v12260_v51  ;;  %v5818_v55 = vsel %vm5815_vm9, %v5817_v30, %v5813_v45  ;;  %v5717_v29 = vadd.f32 %v5685_v42, %v14024_v44  ;;  %v5789_v33 = vand.u32 2147483647, %v12474_v49  ;;  %v14040_v45 = vld [vmem:[#allocation122_spill] sm:$0xff]  ;;  %v14041_v42 = vld [vmem:[#allocation95_spill] sm:$0xff]  ;;  %v14045_v18 = vld [vmem:[#allocation100_spill] sm:$0xff] }
 0xa84   :  { %7316 = vrcp.f32 %v12474_v49  ;;  %6278 = vmatpush.msrb.mxu2 %v12262_v39  ;;  %6301 = vmatpush.msrb.mxu3 %v12271_v59  ;;  %v14056_v57 = vld [vmem:[#allocation48_spill] sm:$0xff] }
 0xa85   :  { %6233 = vmatpush.msrb.mxu0 %v12275_v14  ;;  %6256 = vmatpush.msrb.mxu1 %v12277_v1  ;;  %vm5790_vm10 = vcmp.eq.f32.partialorder %v5789_v33, 8.507059e+37 }
 0xa86   :  { %v7311_v10 = vpop.eup %7310  ;;  %6279 = vmatpush.msrb.mxu2 %v12279_v40  ;;  %6302 = vmatpush.msrb.mxu3 %v12283_v36 }
 0xa87   :  { %v12504_v53 = vadd.f32 1.0, %v7311_v10  ;;  %6234 = vmatpush.msrb.mxu0 %v12287_v4  ;;  %6257 = vmatpush.msrb.mxu1 %v12289_v15  ;;  %v5753_v4 = vand.u32 2147483648, %v12468_v37  ;;  %v14039_v10 = vld [vmem:[#allocation35_spill] sm:$0xff] }
 0xa88   :  { %v7313_v50 = vpop.eup %7312  ;;  %6280 = vmatpush.msrb.mxu2 %v12291_v9  ;;  %6303 = vmatpush.msrb.mxu3 %v12297_v35  ;;  %v5791_v35 = vand.u32 2147483648, %v12474_v49 }
 0xa89   :  { %7318 = vrcp.f32 %v12504_v53  ;;  %v7315_v28 = vpop.eup %7314  ;;  %v5843_v26 = vmul.f32 %v7313_v50, %v5818_v55  ;;  %6235 = vmatpush.msrb.mxu0 %v14027_v5  ;;  %6258 = vmatpush.msrb.mxu1 %v14028_v48  ;;  %v5754_v17 = vor.u32 1.1754944e-38, %v5753_v4  ;;  %v14042_v50 = vld [vmem:[#allocation94_spill] sm:$0xff]  ;;  %v14043_v55 = vld [vmem:[#allocation27_spill] sm:$0xff]  ;;  %vm5825_vm9 = vweird.f32 %v12504_v53  ;;  %v14053_v4 = vld [vmem:[#allocation45_spill] sm:$0xff] }
 0xa8a   :  { %v7317_v51 = vpop.eup %7316  ;;  %v5743_v39 = vmul.f32 %v7315_v28, %v12468_v37  ;;  %7320 = vtanh.f32 %v5717_v29  ;;  %vm5748_vm13 = vweird.f32 %v7315_v28  ;;  %6281 = vmatpush.msrb.mxu2 %v14029_v0  ;;  %6304 = vmatpush.msrb.mxu3 %v14030_v25  ;;  %v5792_v16 = vor.u32 1.1754944e-38, %v5791_v35  ;;  %v14036_v37 = vld [vmem:[#allocation108_spill] sm:$0xff]  ;;  %v14055_v35 = vld [vmem:[#allocation50_spill] sm:$0xff]  ;;  %v14057_v5 = vld [vmem:[#allocation55_spill] sm:$0xff] }
 0xa8b   :  { %v5781_v59 = vmul.f32 %v7317_v51, %v12474_v49  ;;  %v12528_v14 = vsel %vm14025_vm11, %v5843_v26, %v12141_v22  ;;  %v14026_v22 = vld [vmem:[#allocation97_spill] sm:$0xff]  ;;  %vm5786_vm0 = vweird.f32 %v7317_v51  ;;  %6236 = vmatpush.msrb.mxu0 %v14031_v38  ;;  %vm5749_vm15 = vmor %vm5747_vm8, %vm5748_vm13  ;;  %6259 = vmatpush.msrb.mxu1 %v14032_v27  ;;  %v14046_v29 = vld [vmem:[#allocation36_spill] sm:$0xff] }
 0xa8c   :  { %v5744_v1 = vsub.f32 1.0, %v5743_v39  ;;  %5939 = vmatmul.f32.vlgmr.msra.gmra.mxu0 %v12528_v14  ;;  %5962 = vmatmul.f32.vlgmr.msra.gmra.mxu1 %v12528_v14  ;;  %v6473_v40 = vsel %vm121_vm1, %v11635_v13, %v12528_v14  ;;  %vm5787_vm6 = vmor %vm5785_vm5, %vm5786_vm0  ;;  %v14047_v26 = vld [vmem:[#allocation34_spill] sm:$0xff]  ;;  %v14048_v39 = vld [vmem:[#allocation92_spill] sm:$0xff] }
 0xa8d   :  { %v5782_v36 = vsub.f32 1.0, %v5781_v59  ;;  %5985 = vmatmul.f32.vlgmr.msra.gmra.mxu2 %v12528_v14  ;;  %6008 = vmatmul.f32.vlgmr.msra.gmra.mxu3 %v12528_v14  ;;  %v6497_v15 = vmul.f32 %v14026_v22, %v6473_v40  ;;  %vm14049_vm7 = vcmp.gt.s32.totalorder %v14048_v39, %v14020_v56  ;;  %v5829_v40 = vand.u32 2147483647, %v12504_v53  ;;  %v14059_v0 = vld [vmem:[#allocation112_spill] sm:$0xff]  ;;  %v14065_v27 = vld [vmem:[#allocation62_spill] sm:$0xff] }
 0xa8e   :  { %v5745_v12 = vmul.f32 %v7315_v28, %v5744_v1  ;;  %6282 = vmatpush.msrb.mxu2 %v14033_v47  ;;  %6305 = vmatpush.msrb.mxu3 %v14034_v54  ;;  %v14050_v1 = vld [vmem:[#allocation41_spill] sm:$0xff]  ;;  %vm14060_vm0 = vmmov %vm14049_vm7  ;;  %v14062_v38 = vld [vmem:[#allocation60_spill] sm:$0xff] }
 0xa8f   :  { %v12542_v9 = vpop.eup %7318  ;;  %v5783_v46 = vmul.f32 %v7317_v51, %v5782_v36  ;;  %6517 = vadd.xlane.f32.xlu1 %v6497_v15  ;;  %6237 = vmatpush.msrb.mxu0 %v14035_v2  ;;  %v14052_v36 = vld [vmem:[#allocation46_spill] sm:$0xff]  ;;  %v14054_v15 = vld [vmem:[#allocation43_spill] sm:$0xff]  ;;  %vm5830_vm13 = vcmp.eq.f32.partialorder %v5829_v40, 8.507059e+37 }
 0xa90   :  { %v5821_v52 = vmul.f32 %v12542_v9, %v12504_v53  ;;  %v5746_v23 = vadd.f32 %v7315_v28, %v5745_v12  ;;  %v7321_v32 = vpop.eup %7320  ;;  %6260 = vmatpush.msrb.mxu1 %v14036_v37  ;;  %6283 = vmatpush.msrb.mxu2 %v14037_v21  ;;  %vm5826_vm12 = vweird.f32 %v12542_v9 }
 0xa91   :  { %v5784_v63 = vadd.f32 %v7317_v51, %v5783_v46  ;;  %6306 = vmatpush.msrb.mxu3 %v14038_v60  ;;  %6238 = vmatpush.msrb.mxu0 %v14039_v10  ;;  %vm5827_vm11 = vmor %vm5825_vm9, %vm5826_vm12  ;;  %v14058_v46 = vld [vmem:[#allocation28_spill] sm:$0xff] }
 0xa92   :  { %v5822_v61 = vsub.f32 1.0, %v5821_v52  ;;  %v5750_v6 = vsel %vm5749_vm15, %v7315_v28, %v5746_v23  ;;  %6261 = vmatpush.msrb.mxu1 %v14041_v42  ;;  %6284 = vmatpush.msrb.mxu2 %v14042_v50  ;;  %v14044_v28 = vld [vmem:[#allocation37_spill] sm:$0xff]  ;;  %v14061_v23 = vld [vmem:[#allocation102_spill] sm:$0xff] }
 0xa93   :  { %v5755_v20 = vsel %vm5752_vm14, %v5754_v17, %v5750_v6  ;;  %v5788_v31 = vsel %vm5787_vm6, %v7317_v51, %v5784_v63  ;;  %6307 = vmatpush.msrb.mxu3 %v14043_v55  ;;  %6239 = vmatpush.msrb.mxu0 %v14044_v28  ;;  %v5831_v51 = vand.u32 2147483648, %v12504_v53 }
 0xa94   :  { %v5793_v49 = vsel %vm5790_vm10, %v5792_v16, %v5788_v31  ;;  %v5838_v3 = vmul.f32 %v7321_v32, %v5755_v20  ;;  %v5823_v24 = vmul.f32 %v12542_v9, %v5822_v61  ;;  %6262 = vmatpush.msrb.mxu1 %v14045_v18  ;;  %6285 = vmatpush.msrb.mxu2 %v12371_v62  ;;  %v14051_v62 = vld [vmem:[#allocation39_spill] sm:$0xff]  ;;  %v14064_v61 = vld [vmem:[#allocation61_spill] sm:$0xff] }
 0xa95   :  { %v5836_v30 = vmul.f32 %v5793_v49, %v14040_v45  ;;  %6308 = vmatpush.msrb.mxu3 %v14046_v29  ;;  %6240 = vmatpush.msrb.mxu0 %v14047_v26  ;;  %v5832_v48 = vor.u32 1.1754944e-38, %v5831_v51  ;;  %v14066_v47 = vsel %vm8051_vm2, %v14064_v61, %v14065_v27  ;;  %v14067_v32 = vld [vmem:[#allocation63_spill] sm:$0xff] }
 0xa96   :  { %v5824_v44 = vadd.f32 %v12542_v9, %v5823_v24  ;;  %6263 = vmatpush.msrb.mxu1 %v14050_v1  ;;  %6286 = vmatpush.msrb.mxu2 %v14051_v62 }
 0xa97   :  { %v5840_v19 = vadd.f32 %v5838_v3, %v5836_v30  ;;  %6309 = vmatpush.msrb.mxu3 %v14052_v36  ;;  %6241 = vmatpush.msrb.mxu0 %v14053_v4  ;;  %v14071_v30 = vld [vmem:[#allocation66_spill] sm:$0xff]  ;;  %v14073_v36 = vld [vmem:[#allocation67_spill] sm:$0xff] }
 0xa98   :  { %6264 = vmatpush.msrb.mxu1 %v14054_v15  ;;  %6287 = vmatpush.msrb.mxu2 %v14055_v35  ;;  %v5828_v12 = vsel %vm5827_vm11, %v12542_v9, %v5824_v44  ;;  %v14074_v15 = vld [vmem:[#allocation68_spill] sm:$0xff]  ;;  %v14075_v35 = vld [vmem:[#allocation69_spill] sm:$0xff] }
 0xa99   :  { %7322 = vtanh.f32 %v5840_v19  ;;  %v12583_v59 = vsel %vm14049_vm7, %v5840_v19, %v14040_v45  ;;  %6310 = vmatpush.msrb.mxu3 %v14056_v57  ;;  %6242 = vmatpush.msrb.mxu0 %v14057_v5  ;;  %v5833_v33 = vsel %vm5830_vm13, %v5832_v48, %v5828_v12  ;;  %v14070_v45 = vld [vmem:[#allocation65_spill] sm:$0xff]  ;;  %v14076_v12 = vsel %vm8051_vm2, %v14074_v15, %v14075_v35 }
 0xa9a   :  { %6265 = vmatpush.msrb.mxu1 %v14058_v46  ;;  %6288 = vmatpush.msrb.mxu2 %v12428_v8  ;;  %v14072_v42 = vsel %vm8084_vm3, %v14070_v45, %v14071_v30 }
 0xa9b   :  { %6311 = vmatpush.msrb.mxu3 %v12441_v43 }
 0xa9f   :  { %v7323_v53 = vpop.eup %7322 }
 0xaa0   :  { %v5844_v52 = vmul.f32 %v7323_v53, %v5833_v33 }
 0xaa2   :  { %v12603_v9 = vsel %vm14060_vm0, %v5844_v52, %v14059_v0 }
 0xaa3   :  { %5942 = vmatmul.f32.gmra.mxu0 %v12603_v9  ;;  %5965 = vmatmul.f32.gmra.mxu1 %v12603_v9  ;;  %v6474_v8 = vsel %vm121_vm1, %v14061_v23, %v12603_v9 }
 0xaa4   :  { %5988 = vmatmul.f32.gmra.mxu2 %v12603_v9  ;;  %6011 = vmatmul.f32.gmra.mxu3 %v12603_v9  ;;  %v6498_v43 = vmul.f32 %v14026_v22, %v6474_v8  ;;  %v14068_v22 = vld [vmem:[#allocation64_spill] sm:$0xff] }
 0xaa5   :  { %v14069_v20 = vsel %vm8088_vm4, %v14067_v32, %v14068_v22  ;;  %v14077_v32 = vld [vmem:[#allocation70_spill] sm:$0xff]  ;;  %v14078_v22 = vld [vmem:[#allocation71_spill] sm:$0xff] }
 0xaa6   :  { %6519 = vadd.xlane.f32.xlu2 %v6498_v43 }
 0xb09   :  { %v5940_v25 = vpop.f32.mrf.mxu0  ;;  %v5963_v56 = vpop.f32.mrf.mxu1 }
 0xb0a   :  { %v6015_v17 = vadd.f32 %v5940_v25, %v14062_v38  ;;  %v6016_v16 = vadd.f32 %v5963_v56, %v14066_v47 }
 0xb0c   :  { %v6838_v6 = vmul.f32 -1.442695, %v6015_v17  ;;  %v6840_v54 = vmul.f32 -1.442695, %v6016_v16 }
 0xb0e   :  { %7324 = vpow2.f32 %v6838_v6 }
 0xb0f   :  { %7326 = vpow2.f32 %v6840_v54 }
 0xb10   :  { %v6009_v2 = vpop.f32.mrf.mxu3  ;;  %v5986_v60 = vpop.f32.mrf.mxu2 }
 0xb11   :  { %v6018_v31 = vadd.f32 %v6009_v2, %v14069_v20  ;;  %v6017_v50 = vadd.f32 %v5986_v60, %v14072_v42  ;;  %v14079_v20 = vsel %vm8088_vm4, %v14077_v32, %v14078_v22  ;;  %v6484_v22 = vsel %vm121_vm1, %v12603_v9, %v14061_v23 }
 0xb13   :  { %v6842_v37 = vmul.f32 -1.442695, %v6018_v31 }
 0xb14   :  { %v7325_v21 = vpop.eup %7324 }
 0xb15   :  { %v7327_v49 = vpop.eup %7326  ;;  %v6029_v3 = vadd.f32 1.0, %v7325_v21  ;;  %7328 = vpow2.f32 %v6842_v37 }
 0xb16   :  { %v6067_v24 = vadd.f32 1.0, %v7327_v49 }
 0xb17   :  { %7330 = vrcp.f32 %v6029_v3  ;;  %v6040_v26 = vand.u32 2147483647, %v6029_v3  ;;  %v6042_v40 = vand.u32 2147483648, %v6029_v3  ;;  %vm6036_vm6 = vweird.f32 %v6029_v3 }
 0xb18   :  { %7332 = vrcp.f32 %v6067_v24  ;;  %v6080_v5 = vand.u32 2147483648, %v6067_v24  ;;  %v6078_v46 = vand.u32 2147483647, %v6067_v24  ;;  %vm6074_vm15 = vweird.f32 %v6067_v24 }
 0xb19   :  { %v6043_v43 = vor.u32 1.1754944e-38, %v6042_v40  ;;  %vm6041_vm12 = vcmp.eq.f32.partialorder %v6040_v26, 8.507059e+37 }
 0xb1a   :  { %v6081_v17 = vor.u32 1.1754944e-38, %v6080_v5  ;;  %vm6079_vm7 = vcmp.eq.f32.partialorder %v6078_v46, 8.507059e+37 }
 0xb1b   :  { %v7329_v10 = vpop.eup %7328 }
 0xb1c   :  { %v12630_v55 = vadd.f32 1.0, %v7329_v10 }
 0xb1d   :  { %v7331_v28 = vpop.eup %7330 }
 0xb1e   :  { %v7333_v19 = vpop.eup %7332  ;;  %v6032_v18 = vmul.f32 %v7331_v28, %v6029_v3  ;;  %7334 = vrcp.f32 %v12630_v55  ;;  %vm6037_vm8 = vweird.f32 %v7331_v28  ;;  %v6120_v30 = vand.u32 2147483648, %v12630_v55 }
 0xb1f   :  { %v6070_v44 = vmul.f32 %v7333_v19, %v6067_v24  ;;  %7336 = vtanh.f32 %v6017_v50  ;;  %vm6075_vm5 = vweird.f32 %v7333_v19  ;;  %vm6038_vm14 = vmor %vm6036_vm6, %vm6037_vm8  ;;  %v14080_v50 = vld [vmem:[#allocation31_spill] sm:$0xff]  ;;  %vm6114_vm13 = vweird.f32 %v12630_v55 }
 0xb20   :  { %v6033_v29 = vsub.f32 1.0, %v6032_v18  ;;  %v5943_v51 = vpop.f32.mrf.mxu0  ;;  %v5966_v1 = vpop.f32.mrf.mxu1  ;;  %vm6076_vm10 = vmor %vm6074_vm15, %vm6075_vm5  ;;  %vm14081_vm11 = vcmp.gt.s32.totalorder %v13802_v58, %v14080_v50 }
 0xb21   :  { %v6071_v62 = vsub.f32 1.0, %v6070_v44  ;;  %v6019_v4 = vadd.f32 %v5943_v51, %v14073_v36  ;;  %v6020_v57 = vadd.f32 %v5966_v1, %v14076_v12  ;;  %v14082_v1 = vld [vmem:[#allocation72_spill] sm:$0xff]  ;;  %vm14085_vm5 = vmmov %vm14081_vm11 }
 0xb22   :  { %v6034_v48 = vmul.f32 %v7331_v28, %v6033_v29  ;;  %v6121_v29 = vor.u32 1.1754944e-38, %v6120_v30 }
 0xb23   :  { %v6072_v53 = vmul.f32 %v7333_v19, %v6071_v62  ;;  %v6839_v33 = vmul.f32 -1.442695, %v6019_v4  ;;  %v6841_v52 = vmul.f32 -1.442695, %v6020_v57  ;;  %v14083_v62 = vld [vmem:[#allocation73_spill] sm:$0xff] }
 0xb24   :  { %v7335_v0 = vpop.eup %7334  ;;  %v6035_v8 = vadd.f32 %v7331_v28, %v6034_v48  ;;  %v14084_v40 = vsel %vm8084_vm3, %v14082_v1, %v14083_v62 }
 0xb25   :  { %v6073_v25 = vadd.f32 %v7333_v19, %v6072_v53  ;;  %v6110_v56 = vmul.f32 %v7335_v0, %v12630_v55  ;;  %7338 = vpow2.f32 %v6839_v33  ;;  %v7337_v38 = vpop.eup %7336  ;;  %vm6115_vm9 = vweird.f32 %v7335_v0 }
 0xb26   :  { %v6039_v61 = vsel %vm6038_vm14, %v7331_v28, %v6035_v8  ;;  %7340 = vpow2.f32 %v6841_v52  ;;  %vm6116_vm0 = vmor %vm6114_vm13, %vm6115_vm9  ;;  %v14086_v52 = vld [vmem:[#allocation118_spill] sm:$0xff] }
 0xb27   :  { %v6044_v27 = vsel %vm6041_vm12, %v6043_v43, %v6039_v61  ;;  %v6077_v47 = vsel %vm6076_vm10, %v7333_v19, %v6073_v25  ;;  %v6111_v16 = vsub.f32 1.0, %v6110_v56  ;;  %v6012_v6 = vpop.f32.mrf.mxu3  ;;  %v6118_v19 = vand.u32 2147483647, %v12630_v55  ;;  %v5989_v44 = vpop.f32.mrf.mxu2  ;;  %v12680_v25 = vld [vmem:[%s12847_s9] ss:$0 sm:$0xff] }
 0xb28   :  { %v6082_v54 = vsel %vm6079_vm7, %v6081_v17, %v6077_v47  ;;  %v6141_v2 = vmul.f32 %v7337_v38, %v6044_v27  ;;  %v6022_v31 = vadd.f32 %v6012_v6, %v14079_v20 }
 0xb29   :  { %v6139_v37 = vmul.f32 %v6082_v54, %v12500_v7  ;;  %v6112_v21 = vmul.f32 %v7335_v0, %v6111_v16  ;;  %vm6119_vm8 = vcmp.eq.f32.partialorder %v6118_v19, 8.507059e+37 }
 0xb2a   :  { %v6843_v49 = vmul.f32 -1.442695, %v6022_v31 }
 0xb2b   :  { %v7339_v3 = vpop.eup %7338  ;;  %v6143_v24 = vadd.f32 %v6141_v2, %v6139_v37  ;;  %v6113_v10 = vadd.f32 %v7335_v0, %v6112_v21 }
 0xb2c   :  { %v7341_v60 = vpop.eup %7340  ;;  %v6030_v45 = vadd.f32 1.0, %v7339_v3  ;;  %7342 = vpow2.f32 %v6843_v49 }
 0xb2d   :  { %7344 = vtanh.f32 %v6143_v24  ;;  %v6068_v42 = vadd.f32 1.0, %v7341_v60  ;;  %v12651_v28 = vsel %vm14081_vm11, %v6143_v24, %v12500_v7  ;;  %v6117_v18 = vsel %vm6116_vm0, %v7335_v0, %v6113_v10 }
 0xb2e   :  { %7346 = vrcp.f32 %v6030_v45  ;;  %v6021_v7 = vadd.f32 %v5989_v44, %v14084_v40  ;;  %v6122_v4 = vsel %vm6119_vm8, %v6121_v29, %v6117_v18  ;;  %v6055_v53 = vand.u32 2147483647, %v6030_v45 }
 0xb2f   :  { %7348 = vrcp.f32 %v6068_v42  ;;  %v6057_v33 = vand.u32 2147483648, %v6030_v45  ;;  %v6095_v8 = vand.u32 2147483648, %v6068_v42  ;;  %v6093_v17 = vand.u32 2147483647, %v6068_v42 }
 0xb30   :  { %vm6051_vm14 = vweird.f32 %v6030_v45  ;;  %vm6089_vm10 = vweird.f32 %v6068_v42  ;;  %vm6056_vm9 = vcmp.eq.f32.partialorder %v6055_v53, 8.507059e+37  ;;  %v6504_v60 = vmul.f32 %v12680_v25, %v6484_v22 }
 0xb31   :  { %v6058_v47 = vor.u32 1.1754944e-38, %v6057_v33  ;;  %v6096_v2 = vor.u32 1.1754944e-38, %v6095_v8  ;;  %vm6094_vm11 = vcmp.eq.f32.partialorder %v6093_v17, 8.507059e+37  ;;  %vm14087_vm0 = vcmp.gt.s32.totalorder %v14048_v39, %v14080_v50 }
 0xb32   :  { %v7343_v26 = vpop.eup %7342 }
 0xb33   :  { %v7345_v51 = vpop.eup %7344  ;;  %v12660_v36 = vadd.f32 1.0, %v7343_v26 }
 0xb34   :  { %v7347_v15 = vpop.eup %7346  ;;  %v6147_v55 = vmul.f32 %v7345_v51, %v6122_v4 }
 0xb35   :  { %v7349_v35 = vpop.eup %7348  ;;  %v6047_v12 = vmul.f32 %v7347_v15, %v6030_v45  ;;  %7350 = vrcp.f32 %v12660_v36  ;;  %vm6052_vm15 = vweird.f32 %v7347_v15  ;;  %v6135_v30 = vand.u32 2147483648, %v12660_v36 }
 0xb36   :  { %v6085_v57 = vmul.f32 %v7349_v35, %v6068_v42  ;;  %7352 = vtanh.f32 %v6021_v7  ;;  %v12667_v48 = vsel %vm14085_vm5, %v6147_v55, %v12528_v14  ;;  %vm6090_vm6 = vweird.f32 %v7349_v35  ;;  %vm6053_vm12 = vmor %vm6051_vm14, %vm6052_vm15 }
 0xb37   :  { %v6048_v5 = vsub.f32 1.0, %v6047_v12  ;;  %6243 = vmatmul.f32.vlgmr.msrb.gmra.mxu0 %v12667_v48  ;;  %6266 = vmatmul.f32.vlgmr.msrb.gmra.mxu1 %v12667_v48  ;;  %v6467_v0 = vsel %vm121_vm1, %v14086_v52, %v12667_v48  ;;  %vm6091_vm7 = vmor %vm6089_vm10, %vm6090_vm6  ;;  %vm6129_vm8 = vweird.f32 %v12660_v36  ;;  %v6133_v42 = vand.u32 2147483647, %v12660_v36  ;;  %v14092_v12 = vld [vmem:[#allocation76_spill] sm:$0xff] }
 0xb38   :  { %v6086_v46 = vsub.f32 1.0, %v6085_v57  ;;  %6289 = vmatmul.f32.vlgmr.msrb.gmra.mxu2 %v12667_v48  ;;  %6312 = vmatmul.f32.vlgmr.msrb.gmra.mxu3 %v12667_v48  ;;  %v6495_v56 = vmul.f32 %v12680_v25, %v6467_v0  ;;  %v6136_v18 = vor.u32 1.1754944e-38, %v6135_v30  ;;  %vm14088_vm6 = vmmov %vm14087_vm0  ;;  %v6485_v40 = vsel %vm121_vm1, %v12667_v48, %v14086_v52  ;;  %v14094_v52 = vld [vmem:[#allocation77_spill] sm:$0xff]  ;;  %v14095_v0 = vld [vmem:[#allocation78_spill] sm:$0xff] }
 0xb39   :  { %v6049_v43 = vmul.f32 %v7347_v15, %v6048_v5  ;;  %vm6134_vm15 = vcmp.eq.f32.partialorder %v6133_v42, 8.507059e+37  ;;  %v6505_v7 = vmul.f32 %v12680_v25, %v6485_v40  ;;  %v14096_v8 = vsel %vm8088_vm4, %v14094_v52, %v14095_v0  ;;  %v14102_v30 = vld [vmem:[#allocation83_spill] sm:$0xff]  ;;  %v14104_v52 = vld [vmem:[#allocation84_spill] sm:$0xff]  ;;  %v14105_v0 = vld [vmem:[#allocation85_spill] sm:$0xff] }
 0xb3a   :  { %v6087_v38 = vmul.f32 %v7349_v35, %v6086_v46  ;;  %6513 = vadd.xlane.f32.xlu2 %v6495_v56 }
 0xb3b   :  { %v7351_v61 = vpop.eup %7350  ;;  %v6050_v27 = vadd.f32 %v7347_v15, %v6049_v43 }
 0xb3c   :  { %v6088_v16 = vadd.f32 %v7349_v35, %v6087_v38  ;;  %v6125_v6 = vmul.f32 %v7351_v61, %v12660_v36  ;;  %v7353_v54 = vpop.eup %7352  ;;  %vm6130_vm13 = vweird.f32 %v7351_v61 }
 0xb3d   :  { %v6054_v32 = vsel %vm6053_vm12, %v7347_v15, %v6050_v27  ;;  %vm6131_vm5 = vmor %vm6129_vm8, %vm6130_vm13  ;;  %v14090_v15 = vld [vmem:[#allocation74_spill] sm:$0xff] }
 0xb3e   :  { %v6059_v20 = vsel %vm6056_vm9, %v6058_v47, %v6054_v32  ;;  %v6092_v31 = vsel %vm6091_vm7, %v7349_v35, %v6088_v16  ;;  %v6126_v37 = vsub.f32 1.0, %v6125_v6  ;;  %v14091_v35 = vld [vmem:[#allocation75_spill] sm:$0xff] }
 0xb3f   :  { %v6097_v21 = vsel %vm6094_vm11, %v6096_v2, %v6092_v31  ;;  %v6142_v49 = vmul.f32 %v7353_v54, %v6059_v20  ;;  %v14093_v57 = vsel %vm8051_vm2, %v14091_v35, %v14092_v12  ;;  %v14097_v6 = vld [vmem:[#allocation79_spill] sm:$0xff]  ;;  %v14098_v54 = vld [vmem:[#allocation80_spill] sm:$0xff] }
 0xb40   :  { %v6140_v3 = vmul.f32 %v6097_v21, %v12583_v59  ;;  %v6127_v24 = vmul.f32 %v7351_v61, %v6126_v37  ;;  %v14099_v2 = vsel %vm8084_vm3, %v14097_v6, %v14098_v54 }
 0xb42   :  { %v6144_v10 = vadd.f32 %v6142_v49, %v6140_v3  ;;  %v6128_v45 = vadd.f32 %v7351_v61, %v6127_v24  ;;  %6531 = vadd.xlane.f32.xlu2 %v6504_v60  ;;  %v14100_v60 = vld [vmem:[#allocation81_spill] sm:$0xff] }
 0xb44   :  { %7354 = vtanh.f32 %v6144_v10  ;;  %v12695_v23 = vsel %vm14087_vm0, %v6144_v10, %v12583_v59  ;;  %v6132_v19 = vsel %vm6131_vm5, %v7351_v61, %v6128_v45  ;;  %v14089_v59 = vld [vmem:[#allocation98_spill] sm:$0xff] }
 0xb45   :  { %v6137_v29 = vsel %vm6134_vm15, %v6136_v18, %v6132_v19  ;;  %v14101_v45 = vld [vmem:[#allocation82_spill] sm:$0xff] }
 0xb46   :  { %v14103_v42 = vsel %vm8051_vm2, %v14101_v45, %v14102_v30 }
 0xb4a   :  { %v7355_v44 = vpop.eup %7354 }
 0xb4b   :  { %v6148_v26 = vmul.f32 %v7355_v44, %v6137_v29 }
 0xb4d   :  { %v12703_v51 = vsel %vm14088_vm6, %v6148_v26, %v12603_v9 }
 0xb4e   :  { %6246 = vmatmul.f32.gmra.mxu0 %v12703_v51  ;;  %6269 = vmatmul.f32.gmra.mxu1 %v12703_v51  ;;  %v6468_v1 = vsel %vm121_vm1, %v14089_v59, %v12703_v51  ;;  %v6486_v62 = vsel %vm121_vm1, %v12703_v51, %v14089_v59 }
 0xb4f   :  { %6292 = vmatmul.f32.gmra.mxu2 %v12703_v51  ;;  %6315 = vmatmul.f32.gmra.mxu3 %v12703_v51  ;;  %v6496_v9 = vmul.f32 %v12680_v25, %v6468_v1  ;;  %v6506_v50 = vmul.f32 %v12680_v25, %v6486_v62 }
 0xb51   :  { %6515 = vadd.xlane.f32.xlu0 %v6496_v9  ;;  %6535 = vadd.xlane.f32.xlu2 %v6506_v50 }
 0xb59   :  { %6533 = vadd.xlane.f32.xlu0 %v6505_v7 }
 0xbb4   :  { %v6244_v36 = vpop.f32.mrf.mxu0  ;;  %v6267_v4 = vpop.f32.mrf.mxu1 }
 0xbb5   :  { %v6319_v55 = vadd.f32 %v6244_v36, %v14090_v15  ;;  %v6320_v5 = vadd.f32 %v6267_v4, %v14093_v57 }
 0xbb7   :  { %v6844_v46 = vmul.f32 -1.442695, %v6319_v55  ;;  %v6846_v53 = vmul.f32 -1.442695, %v6320_v5 }
 0xbb9   :  { %7356 = vpow2.f32 %v6844_v46 }
 0xbba   :  { %7358 = vpow2.f32 %v6846_v53 }
 0xbbb   :  { %v6313_v33 = vpop.f32.mrf.mxu3  ;;  %v6290_v47 = vpop.f32.mrf.mxu2 }
 0xbbc   :  { %v6322_v43 = vadd.f32 %v6313_v33, %v14096_v8  ;;  %v6321_v32 = vadd.f32 %v6290_v47, %v14099_v2  ;;  %v14106_v8 = vsel %vm8088_vm4, %v14104_v52, %v14105_v0  ;;  %v6483_v0 = vsel %vm121_vm1, %v12528_v14, %v11635_v13 }
 0xbbe   :  { %v6848_v56 = vmul.f32 -1.442695, %v6322_v43 }
 0xbbf   :  { %v7357_v38 = vpop.eup %7356 }
 0xbc0   :  { %v7359_v17 = vpop.eup %7358  ;;  %v6333_v61 = vadd.f32 1.0, %v7357_v38  ;;  %7360 = vpow2.f32 %v6848_v56 }
 0xbc1   :  { %v6371_v27 = vadd.f32 1.0, %v7359_v17 }
 0xbc2   :  { %7362 = vrcp.f32 %v6333_v61  ;;  %v6344_v29 = vand.u32 2147483647, %v6333_v61  ;;  %v6346_v26 = vand.u32 2147483648, %v6333_v61  ;;  %vm6340_vm7 = vweird.f32 %v6333_v61 }
 0xbc3   :  { %7364 = vrcp.f32 %v6371_v27  ;;  %v6384_v44 = vand.u32 2147483648, %v6371_v27  ;;  %v6382_v50 = vand.u32 2147483647, %v6371_v27  ;;  %vm6378_vm12 = vweird.f32 %v6371_v27 }
 0xbc4   :  { %v6347_v63 = vor.u32 1.1754944e-38, %v6346_v26  ;;  %vm6345_vm11 = vcmp.eq.f32.partialorder %v6344_v29, 8.507059e+37  ;;  %v14110_v29 = vld [vmem:[#allocation88_spill] sm:$0xff] }
 0xbc5   :  { %v6385_v55 = vor.u32 1.1754944e-38, %v6384_v44  ;;  %vm6383_vm13 = vcmp.eq.f32.partialorder %v6382_v50, 8.507059e+37  ;;  %v6541_v44 = vld [vmem:[#allocation5] sm:$0x1] }
 0xbc6   :  { %v7361_v16 = vpop.eup %7360 }
 0xbc7   :  { %v12740_v22 = vadd.f32 1.0, %v7361_v16 }
 0xbc8   :  { %v7363_v20 = vpop.eup %7362 }
 0xbc9   :  { %v7365_v31 = vpop.eup %7364  ;;  %v6336_v37 = vmul.f32 %v7363_v20, %v6333_v61  ;;  %7366 = vrcp.f32 %v12740_v22  ;;  %vm6341_vm14 = vweird.f32 %v7363_v20  ;;  %v6424_v34 = vand.u32 2147483648, %v12740_v22 }
 0xbca   :  { %v6374_v21 = vmul.f32 %v7365_v31, %v6371_v27  ;;  %7368 = vtanh.f32 %v6321_v32  ;;  %vm6379_vm10 = vweird.f32 %v7365_v31  ;;  %vm6342_vm9 = vmor %vm6340_vm7, %vm6341_vm14  ;;  %vm6418_vm4 = vweird.f32 %v12740_v22 }
 0xbcb   :  { %v6247_v49 = vpop.f32.mrf.mxu0  ;;  %v6270_v3 = vpop.f32.mrf.mxu1  ;;  %v6337_v24 = vsub.f32 1.0, %v6336_v37  ;;  %vm6380_vm2 = vmor %vm6378_vm12, %vm6379_vm10  ;;  %v14107_v37 = vld [vmem:[#allocation86_spill] sm:$0xff] }
 0xbcc   :  { %v6323_v10 = vadd.f32 %v6247_v49, %v14100_v60  ;;  %v6324_v19 = vadd.f32 %v6270_v3, %v14103_v42  ;;  %v6375_v18 = vsub.f32 1.0, %v6374_v21  ;;  %v14108_v21 = vld [vmem:[#allocation87_spill] sm:$0xff] }
 0xbcd   :  { %v6338_v59 = vmul.f32 %v7363_v20, %v6337_v24  ;;  %v14109_v49 = vsel %vm8084_vm3, %v14107_v37, %v14108_v21  ;;  %vm14111_vm3 = vcmp.gt.s32.totalorder %v13802_v58, %v14110_v29 }
 0xbce   :  { %v6845_v1 = vmul.f32 -1.442695, %v6323_v10  ;;  %v6847_v62 = vmul.f32 -1.442695, %v6324_v19  ;;  %v6376_v9 = vmul.f32 %v7365_v31, %v6375_v18 }
 0xbcf   :  { %v7367_v40 = vpop.eup %7366  ;;  %v6339_v7 = vadd.f32 %v7363_v20, %v6338_v59 }
 0xbd0   :  { %7370 = vpow2.f32 %v6845_v1  ;;  %v6377_v36 = vadd.f32 %v7365_v31, %v6376_v9  ;;  %v6414_v4 = vmul.f32 %v7367_v40, %v12740_v22  ;;  %v7369_v15 = vpop.eup %7368  ;;  %vm6419_vm0 = vweird.f32 %v7367_v40 }
 0xbd1   :  { %7372 = vpow2.f32 %v6847_v62  ;;  %v6343_v35 = vsel %vm6342_vm9, %v7363_v20, %v6339_v7  ;;  %vm6420_vm8 = vmor %vm6418_vm4, %vm6419_vm0  ;;  %v6425_v20 = vor.u32 1.1754944e-38, %v6424_v34  ;;  %v14112_v62 = vld [vmem:[#allocation89_spill] sm:$0xff] }
 0xbd2   :  { %v6316_v12 = vpop.f32.mrf.mxu3  ;;  %v6348_v57 = vsel %vm6345_vm11, %v6347_v63, %v6343_v35  ;;  %v6381_v5 = vsel %vm6380_vm2, %v7365_v31, %v6377_v36  ;;  %v6415_v46 = vsub.f32 1.0, %v6414_v4  ;;  %v6293_v2 = vpop.f32.mrf.mxu2 }
 0xbd3   :  { %v6386_v53 = vsel %vm6383_vm13, %v6385_v55, %v6381_v5  ;;  %v6445_v33 = vmul.f32 %v7369_v15, %v6348_v57  ;;  %v6326_v43 = vadd.f32 %v6316_v12, %v14106_v8  ;;  %v6325_v3 = vadd.f32 %v6293_v2, %v14109_v49 }
 0xbd4   :  { %v6443_v56 = vmul.f32 %v6386_v53, %v12651_v28  ;;  %v6416_v38 = vmul.f32 %v7367_v40, %v6415_v46  ;;  %v6422_v28 = vand.u32 2147483647, %v12740_v22  ;;  %v6567_v22 = vpop.xlane.xlu1 %6566 }
 0xbd5   :  { %v6849_v61 = vmul.f32 -1.442695, %v6326_v43  ;;  %v6568_v19 = vmul.f32 12.0, %v6567_v22 }
 0xbd6   :  { %v7371_v17 = vpop.eup %7370  ;;  %v6447_v47 = vadd.f32 %v6445_v33, %v6443_v56  ;;  %v6417_v54 = vadd.f32 %v7367_v40, %v6416_v38  ;;  %vm6423_vm5 = vcmp.eq.f32.partialorder %v6422_v28, 8.507059e+37 }
 0xbd7   :  { %v7373_v27 = vpop.eup %7372  ;;  %v12756_v16 = vadd.f32 1.0, %v7371_v17  ;;  %7374 = vpow2.f32 %v6849_v61  ;;  %v6569_v4 = vadd.f32 %v6568_v19, %v6541_v44 }
 0xbd8   :  { %v12758_v6 = vadd.f32 1.0, %v7373_v27  ;;  %7376 = vtanh.f32 %v6447_v47  ;;  %v6421_v32 = vsel %vm6420_vm8, %v7367_v40, %v6417_v54  ;;  %v6503_v47 = vmul.f32 %v12680_v25, %v6483_v0 }
 0xbd9   :  { %7378 = vrcp.f32 %v12756_v16  ;;  %v6426_v10 = vsel %vm6423_vm5, %v6425_v20, %v6421_v32  ;;  %v6359_v1 = vand.u32 2147483647, %v12756_v16  ;;  %v6361_v7 = vand.u32 2147483648, %v12756_v16  ;;  %6851 = vpush %v6569_v4  ;;  %v14114_v20 = vld [vmem:[#allocation96_spill] sm:$0xff] }
 0xbda   :  { %7380 = vrcp.f32 %v12758_v6  ;;  %v6399_v58 = vand.u32 2147483648, %v12758_v6  ;;  %v6397_v55 = vand.u32 2147483647, %v12758_v6  ;;  %vm6355_vm14 = vweird.f32 %v12756_v16 }
 0xbdb   :  { %vm6393_vm10 = vweird.f32 %v12758_v6  ;;  %v6362_v5 = vor.u32 1.1754944e-38, %v6361_v7  ;;  %vm6360_vm9 = vcmp.eq.f32.partialorder %v6359_v1, 8.507059e+37  ;;  %vm14113_vm8 = vcmp.gt.s32.totalorder %v14048_v39, %v14110_v29 }
 0xbdc   :  { %v6400_v33 = vor.u32 1.1754944e-38, %v6399_v58  ;;  %vm6398_vm2 = vcmp.eq.f32.partialorder %v6397_v55, 8.507059e+37  ;;  %vm6618_vm5 = vcmask 1041409  }
 0xbdd   :  { %v7375_v31 = vpop.eup %7374 }
 0xbde   :  { %v7377_v24 = vpop.eup %7376  ;;  %v12770_v60 = vadd.f32 1.0, %v7375_v31 }
 0xbdf   :  { %v7379_v45 = vpop.eup %7378  ;;  %v6451_v30 = vmul.f32 %v7377_v24, %v6426_v10 }
 0xbe0   :  { %v7381_v42 = vpop.eup %7380  ;;  %v6351_v18 = vmul.f32 %v7379_v45, %v12756_v16  ;;  %7382 = vrcp.f32 %v12770_v60  ;;  %vm6356_vm15 = vweird.f32 %v7379_v45  ;;  %v6439_v54 = vand.u32 2147483648, %v12770_v60 }
 0xbe1   :  { %v6389_v11 = vmul.f32 %v7381_v42, %v12758_v6  ;;  %7384 = vtanh.f32 %v6325_v3  ;;  %v6453_v26 = vsel %vm14111_vm3, %v6451_v30, %v12667_v48  ;;  %vm6394_vm6 = vweird.f32 %v7381_v42  ;;  %vm6357_vm12 = vmor %vm6355_vm14, %vm6356_vm15  ;;  %v6522_v3 = vpop.xlane.xlu2 %6521 }
 0xbe2   :  { %v6352_v59 = vsub.f32 1.0, %v6351_v18  ;;  %v6461_v9 = vsel %vm121_vm1, %v14112_v62, %v6453_v26  ;;  %v6487_v50 = vsel %vm121_vm1, %v6453_v26, %v14112_v62  ;;  %vm6395_vm7 = vmor %vm6393_vm10, %vm6394_vm6  ;;  %vm6433_vm13 = vweird.f32 %v12770_v60 }
 0xbe3   :  { %v6390_v40 = vsub.f32 1.0, %v6389_v11  ;;  %v6493_v63 = vmul.f32 %v12680_v25, %v6461_v9  ;;  %v6507_v36 = vmul.f32 %v12680_v25, %v6487_v50  ;;  %v6437_v13 = vand.u32 2147483647, %v12770_v60 }
 0xbe4   :  { %v6353_v48 = vmul.f32 %v7379_v45, %v6352_v59  ;;  %v6440_v34 = vor.u32 1.1754944e-38, %v6439_v54  ;;  %v6593_v26 = vadd.s32 4294967288, %v13965_v41  ;;  %vm6620_vm3 = vcmask 1042434  }
 0xbe5   :  { %v6391_v15 = vmul.f32 %v7381_v42, %v6390_v40  ;;  %6509 = vadd.xlane.f32.xlu1 %v6493_v63  ;;  %6537 = vadd.xlane.f32.xlu0 %v6507_v36  ;;  %vm6438_vm4 = vcmp.eq.f32.partialorder %v6437_v13, 8.507059e+37  ;;  %vm6622_vm15 = vcmask 1043459   ;;  %vm6624_vm6 = vcmask 1044484  }
 0xbe6   :  { %v7383_v35 = vpop.eup %7382  ;;  %v6354_v12 = vadd.f32 %v7379_v45, %v6353_v48  ;;  %vm6626_vm14 = vcmask 1045509   ;;  %vm6628_vm10 = vcmask 1046534  }
 0xbe7   :  { %v7385_v57 = vpop.eup %7384  ;;  %v6392_v46 = vadd.f32 %v7381_v42, %v6391_v15  ;;  %v6429_v53 = vmul.f32 %v7383_v35, %v12770_v60  ;;  %vm6434_vm11 = vweird.f32 %v7383_v35 }
 0xbe8   :  { %v6358_v52 = vsel %vm6357_vm12, %v7379_v45, %v6354_v12  ;;  %vm6435_vm0 = vmor %vm6433_vm13, %vm6434_vm11  ;;  %vm6630_vm12 = vcmask 1047559   ;;  %vm6653_vm13 = vcmask 130048  }
 0xbe9   :  { %v6363_v8 = vsel %vm6360_vm9, %v6362_v5, %v6358_v52  ;;  %v6396_v43 = vsel %vm6395_vm7, %v7381_v42, %v6392_v46  ;;  %v6430_v56 = vsub.f32 1.0, %v6429_v53  ;;  %v6526_v24 = vpop.xlane.xlu2 %6525  ;;  %v6516_v42 = vpop.xlane.xlu0 %6515 }
 0xbea   :  { %v6401_v38 = vsel %vm6398_vm2, %v6400_v33, %v6396_v43  ;;  %v6446_v17 = vmul.f32 %v7385_v57, %v6363_v8 }
 0xbeb   :  { %v6444_v61 = vmul.f32 %v6401_v38, %v12695_v23  ;;  %v6431_v27 = vmul.f32 %v7383_v35, %v6430_v56 }
 0xbed   :  { %v6448_v16 = vadd.f32 %v6446_v17, %v6444_v61  ;;  %6529 = vadd.xlane.f32.xlu1 %v6503_v47  ;;  %v6432_v6 = vadd.f32 %v7383_v35, %v6431_v27 }
 0xbef   :  { %7386 = vtanh.f32 %v6448_v16  ;;  %v6436_v14 = vsel %vm6435_vm0, %v7383_v35, %v6432_v6 }
 0xbf0   :  { %v6441_v23 = vsel %vm6438_vm4, %v6440_v34, %v6436_v14 }
 0xbf1   :  { %v6524_v60 = vpop.xlane.xlu2 %6523  ;;  %v6534_v11 = vpop.xlane.xlu0 %6533 }
 0xbf5   :  { %v7387_v28 = vpop.eup %7386 }
 0xbf6   :  { %v6452_v2 = vmul.f32 %v7387_v28, %v6441_v23 }
 0xbf8   :  { %v6454_v32 = vsel %vm14113_vm8, %v6452_v2, %v12703_v51  ;;  %v6546_v51 = vpop.permute.xlu1 %6545  ;;  %v6570_v2 = vld [vmem:[%s12840_s2] sm:$0xff]  ;;  %s7563_s2 = smov [#allocation15]  }
 0xbf9   :  { %v6462_v31 = vsel %vm121_vm1, %v14114_v20, %v6454_v32  ;;  %v6488_v21 = vsel %vm121_vm1, %v6454_v32, %v14114_v20  ;;  %v6528_v10 = vpop.xlane.xlu2 %6527  ;;  %v6554_v44 = vadd.f32 %v6546_v51, %v6522_v3  ;;  %v6556_v29 = vadd.f32 %v6546_v51, %v6526_v24  ;;  %s6660_s14 = sshll.u32 %s7563_s2, 4  ;;  %s6661_s14 = int_to_ptr.vmem [resolvable:$true] %s6660_s14 }
 0xbfa   :  { %v6494_v37 = vmul.f32 %v12680_v25, %v6462_v31  ;;  %v6508_v49 = vmul.f32 %v12680_v25, %v6488_v21  ;;  %v6551_v59 = vadd.f32 %v6546_v51, %v6516_v42  ;;  %v6555_v25 = vadd.f32 %v6546_v51, %v6524_v60 }
 0xbfb   :  { %v6557_v1 = vadd.f32 %v6546_v51, %v6528_v10  ;;  %v6603_v7 = vperm.slane %v6554_v44, %v13965_v41  ;;  %vm6595_vm1 = vcmask 130112   ;;  %v6606_v58 = vperm.slane %v6556_v29, %v13965_v41 }
 0xbfc   :  { %6511 = vadd.xlane.f32.xlu2 %v6494_v37  ;;  %v6598_v48 = vperm.slane %v6551_v59, %v6593_v26  ;;  %v6604_v55 = vperm.slane %v6555_v25, %v6593_v26  ;;  %v6560_v0 = vadd.f32 %v6546_v51, %v6534_v11  ;;  %vm6571_vm7 = vcmp.gt.f32.partialorder %v6570_v2, 0.0 }
 0xbfd   :  { %v6607_v35 = vperm.slane %v6557_v1, %v6593_v26 }
 0xbfe   :  { %v6605_v17 = vsel %vm6595_vm1, %v6604_v55, %v6603_v7  ;;  %v6612_v14 = vperm.slane %v6560_v0, %v13965_v41 }
 0xbff   :  { %v6608_v54 = vsel %vm6595_vm1, %v6607_v35, %v6606_v58 }
 0xc00   :  { %v6518_v22 = vpop.xlane.xlu1 %6517 }
 0xc01   :  { %v6520_v39 = vpop.xlane.xlu2 %6519  ;;  %v6552_v63 = vadd.f32 %v6546_v51, %v6518_v22 }
 0xc02   :  { %v6553_v62 = vadd.f32 %v6546_v51, %v6520_v39 }
 0xc03   :  { %v6600_v33 = vperm.slane %v6552_v63, %v13965_v41 }
 0xc04   :  { %6539 = vadd.xlane.f32.xlu2 %v6508_v49  ;;  %v6601_v12 = vperm.slane %v6553_v62, %v6593_v26 }
 0xc06   :  { %v6602_v61 = vsel %vm6595_vm1, %v6601_v12, %v6600_v33 }
 0xc09   :  { %v6514_v45 = vpop.xlane.xlu2 %6513 }
 0xc0a   :  { %v6550_v9 = vadd.f32 %v6546_v51, %v6514_v45  ;;  %s6852_s13 = spop %6851 }
 0xc0b   :  { %v6574_v60 = vstv %s6852_s13 }
 0xc0c   :  { %v6597_v57 = vperm.slane %v6550_v9, %v13965_v41 }
 0xc0e   :  { %v6599_v43 = vsel %vm6595_vm1, %v6598_v48, %v6597_v57 }
 0xc11   :  { %v6532_v30 = vpop.xlane.xlu2 %6531 }
 0xc12   :  { %v6559_v5 = vadd.f32 %v6546_v51, %v6532_v30 }
 0xc14   :  { %v6610_v47 = vperm.slane %v6559_v5, %v6593_v26 }
 0xc19   :  { %v6536_v18 = vpop.xlane.xlu2 %6535 }
 0xc1a   :  { %v6561_v52 = vadd.f32 %v6546_v51, %v6536_v18 }
 0xc1c   :  { %v6613_v13 = vperm.slane %v6561_v52, %v6593_v26 }
 0xc1e   :  { %v6614_v49 = vsel %vm6595_vm1, %v6613_v13, %v6612_v14 }
 0xc58   :  { %v6510_v19 = vpop.xlane.xlu1 %6509  ;;  %v6538_v8 = vpop.xlane.xlu0 %6537 }
 0xc59   :  { %v6548_v40 = vadd.f32 %v6546_v51, %v6510_v19  ;;  %v6562_v16 = vadd.f32 %v6546_v51, %v6538_v8 }
 0xc5b   :  { %v6592_v46 = vperm.slane %v6548_v40, %v13965_v41  ;;  %v6615_v37 = vperm.slane %v6562_v16, %v13965_v41 }
 0xc60   :  { %v6530_v50 = vpop.xlane.xlu1 %6529 }
 0xc61   :  { %v6558_v4 = vadd.f32 %v6546_v51, %v6530_v50 }
 0xc63   :  { %v6609_v56 = vperm.slane %v6558_v4, %v13965_v41 }
 0xc65   :  { %v6611_v23 = vsel %vm6595_vm1, %v6610_v47, %v6609_v56 }
 0xc6f   :  { %v6512_v36 = vpop.xlane.xlu2 %6511 }
 0xc70   :  { %v6549_v15 = vadd.f32 %v6546_v51, %v6512_v36 }
 0xc72   :  { %v6594_v53 = vperm.slane %v6549_v15, %v6593_v26 }
 0xc74   :  { %v6596_v38 = vsel %vm6595_vm1, %v6594_v53, %v6592_v46 }
 0xc75   :  { %v6619_v27 = vsel %vm6618_vm5, %v6599_v43, %v6596_v38 }
 0xc76   :  { %v6621_v6 = vsel %vm6620_vm3, %v6602_v61, %v6619_v27 }
 0xc77   :  { %v6623_v34 = vsel %vm6622_vm15, %v6605_v17, %v6621_v6  ;;  %v6540_v28 = vpop.xlane.xlu2 %6539 }
 0xc78   :  { %v6625_v32 = vsel %vm6624_vm6, %v6608_v54, %v6623_v34  ;;  %v6563_v20 = vadd.f32 %v6546_v51, %v6540_v28 }
 0xc79   :  { %v6627_v31 = vsel %vm6626_vm14, %v6611_v23, %v6625_v32 }
 0xc7a   :  { %v6616_v21 = vperm.slane %v6563_v20, %v6593_v26  ;;  %v6629_v3 = vsel %vm6628_vm10, %v6614_v49, %v6627_v31 }
 0xc7c   :  { %v6617_v24 = vsel %vm6595_vm1, %v6616_v21, %v6615_v37 }
 0xc7d   :  { %v6631_v10 = vsel %vm6630_vm12, %v6617_v24, %v6629_v3 }
 0xc7e   :  { %v6633_v39 = vsel %vm6571_vm7, %v6631_v10, %v6574_v60 }
 0xc7f   :  { %v6850_v45 = vmul.f32 -1.442695, %v6633_v39 }
 0xc81   :  { %7388 = vpow2.f32 %v6850_v45 }
 0xc87   :  { %v7389_v22 = vpop.eup %7388 }
 0xc88   :  { %v6637_v51 = vadd.f32 1.0, %v7389_v22 }
 0xc8a   :  { %7390 = vrcp.f32 %v6637_v51  ;;  %v6649_v41 = vand.u32 2147483648, %v6637_v51  ;;  %v6647_v44 = vand.u32 2147483647, %v6637_v51  ;;  %vm6643_vm2 = vweird.f32 %v6637_v51 }
 0xc8c   :  { %v6650_v29 = vor.u32 1.1754944e-38, %v6649_v41  ;;  %vm6648_vm0 = vcmp.eq.f32.partialorder %v6647_v44, 8.507059e+37 }
 0xc90   :  { %v7391_v30 = vpop.eup %7390 }
 0xc91   :  { %v6639_v42 = vmul.f32 %v7391_v30, %v6637_v51  ;;  %vm6644_vm9 = vweird.f32 %v7391_v30 }
 0xc92   :  { %vm6645_vm11 = vmor %vm6643_vm2, %vm6644_vm9 }
 0xc93   :  { %v6640_v19 = vsub.f32 1.0, %v6639_v42 }
 0xc95   :  { %v6641_v18 = vmul.f32 %v7391_v30, %v6640_v19 }
 0xc97   :  { %v6642_v11 = vadd.f32 %v7391_v30, %v6641_v18 }
 0xc99   :  { %v6646_v26 = vsel %vm6645_vm11, %v7391_v30, %v6642_v11 }
 0xc9a   :  { %v6651_v59 = vsel %vm6648_vm0, %v6650_v29, %v6646_v26 }
 0xc9b   :  { %6654 = vst.msk [vmem:[#allocation15] sm:$0xff] %vm6653_vm13, %v6651_v59 }
 0xc9c   :  { %6665 = dma.vmem_to_hbm [thread:$0]  %s6661_s14, 128, %s6663_s17, [#allocation8]  }
 0xc9d   :  { %7543 = dma.done.wait [#allocation8], 128  }
 0xc9e   :  { %7544 = vsyncadd [#allocation8], 4294967168 }
 0xc9f   :  { %6670 = vsyncpa [#allocation7], 1 }
 0xca0   :  { %6671 = vsyncpa [#allocation10], 1 }
 0xca1   :  { %6672 = vsyncpa [#allocation13], 1 }
 0xca2   :  { %6673 = vsyncpa [#allocation8], 1 }

</bundles_post_ra>
